<compile_context>
chip_gen: v7x
topology: tpu7x:2x2x1
jax: 0.10.0
libtpu: 0.0.40
codegen_flags: <defaults>
</compile_context>

<pallas_src>
import math
import jax
import jax.numpy as jnp
from jax.experimental import pallas as pl
from jax.experimental.pallas import tpu as pltpu

MB = 128            # minibatch size, fixed by synthetic_gradient_layer_o (in_features=128)
IN_FEATURES = 28 * 28


def _sigmoid(v):
    # 1 / (1 + exp(-v)) with the reciprocal on the EUP (otherwise-idle slot).
    return pl.reciprocal(1.0 + jnp.exp(-v), approx=True)


def dynamic_routing_kernel(
    x_ref, tgt_ref, sl_ref,
    w0_ref, b0_ref,          # fc0                              [784, H] bf16, [1, H] f32
    wA_ref, bA_ref,          # fused [select_path|fc1|fc2|fc3]  [H, 3+3*h2] bf16, [1, 3+3*h2] f32
    wB_ref, bB_ref,          # block-diag [fc11|fc22|fc33]      [3*h2, 3*h3] bf16, [1, 3*h3] f32
    wsg_ref, bsg_ref,        # synthetic_gradient_layer (row)   [1, 3] f32, [1, 1] f32
    wsgo_ref, bsgo_ref,      # synthetic_gradient_layer_o       [128, 1] f32, [1, 1] f32
    wout_ref, bout_ref,      # fc_out                           [h3, O] bf16, [1, O] f32
    out_ref, loss_ref,       # logits [K*128, O] f32, losses [K, 2] f32 (col0=CE, col1=syn MSE)
):
    rows = x_ref.shape[0]
    K = sl_ref.shape[0]                 # number of 128-row minibatches in this block

    # ---- fc0 + relu (bf16 operands, f32 accumulate); cast x in-kernel ---------------
    h = jnp.maximum(
        jnp.dot(x_ref[...].astype(jnp.bfloat16), w0_ref[...],
                preferred_element_type=jnp.float32) + b0_ref[...], 0.0)       # [rows, H]

    # ---- fused [select_path | fc1 | fc2 | fc3] : one MXU call ------------------------
    pre = jnp.dot(h.astype(jnp.bfloat16), wA_ref[...],
                  preferred_element_type=jnp.float32) + bA_ref[...]           # [rows, 3+3*h2]
    sel_logits = pre[:, 0:3]                                                  # [rows, 3]
    t_all = jnp.maximum(pre[:, 3:], 0.0)                                      # [rows, 3*h2]

    # ---- routing mask from raw logits (softmax is monotone; first-max wins on ties) --
    smax = jnp.max(sel_logits, axis=1, keepdims=True)                         # [rows, 1]
    is0 = sel_logits[:, 0:1] == smax
    is1 = jnp.logical_and(sel_logits[:, 1:2] == smax, jnp.logical_not(is0))

    # ---- softmax(dim=1) for the synthetic-gradient path ------------------------------
    sel_exp = jnp.exp(sel_logits - smax)
    selector = sel_exp * pl.reciprocal(
        jnp.sum(sel_exp, axis=1, keepdims=True), approx=True)                 # [rows, 3]

    # ---- synthetic gradient path (K=3 and K=128 reductions on VPU/XLU, no MXU) -------
    syn1 = _sigmoid(
        jnp.sum(selector * wsg_ref[...], axis=1, keepdims=True) + bsg_ref[...])  # [rows, 1]
    syn1_g = syn1.reshape(K, MB, 1)                                           # per-minibatch
    syn2_pre = jnp.sum(syn1_g * wsgo_ref[...], axis=1) + bsgo_ref[...]        # [K, 1]
    syn2 = _sigmoid(syn2_pre)                                                 # [K, 1]
    diff = syn2 - sl_ref[...]
    syn_loss = diff * diff                                                    # MSE (1 elem/mb)

    # ---- fused block-diagonal [fc11 | fc22 | fc33] : one MXU call --------------------
    y_all = jnp.maximum(
        jnp.dot(t_all.astype(jnp.bfloat16), wB_ref[...],
                preferred_element_type=jnp.float32) + bB_ref[...], 0.0)       # [rows, 3*h3]
    h3 = y_all.shape[1] // 3

    routed = jnp.where(
        is0, y_all[:, 0:h3],
        jnp.where(is1, y_all[:, h3:2 * h3], y_all[:, 2 * h3:3 * h3]))         # [rows, h3]

    # ---- fc_out + relu ----------------------------------------------------------------
    logits = jnp.maximum(
        jnp.dot(routed.astype(jnp.bfloat16), wout_ref[...],
                preferred_element_type=jnp.float32) + bout_ref[...], 0.0)     # [rows, O]
    out_ref[...] = logits

    # ---- CrossEntropyLoss (mean over each 128-row minibatch) via one-hot from iota ----
    nclass = logits.shape[1]
    lmax = jnp.max(logits, axis=1, keepdims=True)
    lse = lmax + jnp.log(jnp.sum(jnp.exp(logits - lmax), axis=1, keepdims=True))
    classes = jax.lax.broadcasted_iota(jnp.int32, (rows, nclass), 1)
    onehot = (classes == tgt_ref[...]).astype(jnp.float32)
    picked = jnp.sum(onehot * logits, axis=1, keepdims=True)
    ce_rows = (lse - picked).reshape(K, MB, 1)                                # per-minibatch
    ce = jnp.sum(ce_rows, axis=1) * (1.0 / MB)                                # [K, 1]

    loss_ref[...] = jnp.concatenate([ce, syn_loss], axis=1)                   # [K, 2]


def _init_linear(key, fan_in, fan_out):
    """Deterministic PyTorch-Linear-style init; weight returned as [in, out]."""
    kw, kb = jax.random.split(key)
    bound = 1.0 / math.sqrt(fan_in)
    w = jax.random.uniform(kw, (fan_in, fan_out), jnp.float32, -bound, bound)
    b = jax.random.uniform(kb, (1, fan_out), jnp.float32, -bound, bound)
    return w, b


def make_params(key, input_size, hidden_size, output_size):
    h2 = hidden_size // 2
    h3 = hidden_size // 4
    keys = jax.random.split(key, 11)
    p = {}
    p["fc0"] = _init_linear(keys[0], input_size, hidden_size)
    p["select_path"] = _init_linear(keys[1], hidden_size, 3)
    p["syn"] = _init_linear(keys[2], 3, 1)
    p["syn_o"] = _init_linear(keys[3], MB, 1)      # in_features=128 -> minibatch must be 128
    p["fc1"] = _init_linear(keys[4], hidden_size, h2)
    p["fc11"] = _init_linear(keys[5], h2, h3)
    p["fc2"] = _init_linear(keys[6], hidden_size, h2)
    p["fc22"] = _init_linear(keys[7], h2, h3)
    p["fc3"] = _init_linear(keys[8], hidden_size, h2)
    p["fc33"] = _init_linear(keys[9], h2, h3)
    p["fc_out"] = _init_linear(keys[10], h3, output_size)
    return p


def pack_params(p, hidden_size):
    """Fuse the skinny Linear layers and cast matmul weights to bf16 (biases stay f32)."""
    h2 = hidden_size // 2
    h3 = hidden_size // 4
    w0, b0 = p["fc0"]
    wsel, bsel = p["select_path"]
    w1, b1 = p["fc1"]
    w11, b11 = p["fc11"]
    w2, b2 = p["fc2"]
    w22, b22 = p["fc22"]
    w3, b3 = p["fc3"]
    w33, b33 = p["fc33"]
    wsg, bsg = p["syn"]
    wsgo, bsgo = p["syn_o"]
    wout, bout = p["fc_out"]

    # [select_path | fc1 | fc2 | fc3] along the output-lane axis.
    wA = jnp.concatenate([wsel, w1, w2, w3], axis=1)         # [H, 3 + 3*h2]
    bA = jnp.concatenate([bsel, b1, b2, b3], axis=1)         # [1, 3 + 3*h2]

    # Block-diagonal [fc11 | fc22 | fc33].
    wB = jnp.zeros((3 * h2, 3 * h3), jnp.float32)
    wB = wB.at[0:h2, 0:h3].set(w11)
    wB = wB.at[h2:2 * h2, h3:2 * h3].set(w22)
    wB = wB.at[2 * h2:3 * h2, 2 * h3:3 * h3].set(w33)
    bB = jnp.concatenate([b11, b22, b33], axis=1)            # [1, 3*h3]

    return dict(
        w0=w0.astype(jnp.bfloat16), b0=b0,
        wA=wA.astype(jnp.bfloat16), bA=bA,
        wB=wB.astype(jnp.bfloat16), bB=bB,
        wsg=wsg.reshape(1, 3), bsg=bsg,                      # Linear(3->1) as a row vector
        wsgo=wsgo, bsgo=bsgo,                                # [128, 1], [1, 1]
        wout=wout.astype(jnp.bfloat16), bout=bout,
    )


def _choose_mb_per_step(n_mb, cap):
    """Largest divisor of n_mb <= cap that still leaves >= 2 grid steps (when possible)."""
    best = 1
    for k in range(1, min(n_mb, cap) + 1):
        if n_mb % k != 0:
            continue
        if n_mb >= 2 and (n_mb // k) < 2:
            continue
        best = k
    return best


def net_forward(x, target, selector_loss, packed, output_size, mb_per_step=None):
    """Runs the Net forward on stacked minibatches of 128 samples each.

    Returns (logits [total, O] f32, ce_loss [n_mb] f32, synthetic_loss [n_mb] f32).
    """
    x2 = x.reshape(-1, IN_FEATURES)        # no dtype cast here: x streams as-is (f32)
    total = x2.shape[0]
    assert total % MB == 0, "batch must be a multiple of 128 (synthetic_gradient_layer_o)"
    n_mb = total // MB

    # Number of 128-row minibatches processed per grid step.  Cap 16 keeps the block
    # comfortably inside v7x's 64 MiB VMEM; on v5e/v6e (128 MiB) a cap of 48-64 is fine.
    if mb_per_step is None:
        mb_per_step = _choose_mb_per_step(n_mb, cap=16)
    K = mb_per_step
    assert n_mb % K == 0
    n_steps = n_mb // K
    rows = K * MB

    x3 = x2.reshape(n_steps, rows, IN_FEATURES)
    tgt = target.reshape(n_steps, rows, 1).astype(jnp.int32)
    sl = jnp.asarray(selector_loss, jnp.float32).reshape(n_steps, K, 1)

    weights = (
        packed["w0"], packed["b0"],
        packed["wA"], packed["bA"],
        packed["wB"], packed["bB"],
        packed["wsg"], packed["bsg"],
        packed["wsgo"], packed["bsgo"],
        packed["wout"], packed["bout"],
    )

    def stream(tail):
        # Streams one stacked block per grid step (leading dim squeezed away).
        return pl.BlockSpec((None,) + tail, lambda n: (n, 0, 0))

    def resident(arr):
        # Constant block index -> the weight stays resident in VMEM across grid steps.
        return pl.BlockSpec(arr.shape, lambda n: (0, 0))

    in_specs = [
        stream((rows, IN_FEATURES)),     # x (f32, cast to bf16 inside the kernel)
        stream((rows, 1)),               # target
        stream((K, 1)),                  # selector_loss (one per minibatch)
    ] + [resident(w) for w in weights]

    out_specs = (
        stream((rows, output_size)),     # logits
        stream((K, 2)),                  # merged losses: col0 = CE, col1 = synthetic MSE
    )
    out_shape = (
        jax.ShapeDtypeStruct((n_steps, rows, output_size), jnp.float32),
        jax.ShapeDtypeStruct((n_steps, K, 2), jnp.float32),
    )

    # Explicit VMEM budget: double-buffered streamed blocks + resident weights + headroom.
    stream_bytes = (rows * IN_FEATURES * 4 + rows * 4 + K * 4            # inputs
                    + rows * output_size * 4 + K * 2 * 4)                # outputs
    weight_bytes = sum(int(w.size) * w.dtype.itemsize for w in weights)
    vmem_limit = min(100 * 1024 * 1024,
                     max(32 * 1024 * 1024, 2 * stream_bytes + weight_bytes + (8 << 20)))

    logits, losses = pl.pallas_call(
        dynamic_routing_kernel,
        out_shape=out_shape,
        grid=(n_steps,),
        in_specs=in_specs,
        out_specs=out_specs,
        compiler_params=pltpu.CompilerParams(
            dimension_semantics=("parallel",),    # shards grid steps across v7x's 2 TCs
            vmem_limit_bytes=int(vmem_limit)),
    )(x3, tgt, sl, *weights)

    ce_loss = losses[:, :, 0].reshape(n_mb)
    syn_loss = losses[:, :, 1].reshape(n_mb)
    return logits.reshape(total, output_size), ce_loss, syn_loss


if __name__ == "__main__":
    N_MINIBATCH = 4          # total minibatches; each minibatch is 128 samples
    INPUT_SIZE = IN_FEATURES
    HIDDEN_SIZE = 32
    OUTPUT_SIZE = 10

    key = jax.random.PRNGKey(0)
    k_x, k_t, k_sl, k_p = jax.random.split(key, 4)

    x = jax.random.normal(k_x, (N_MINIBATCH * MB, 1, 28, 28), dtype=jnp.float32)
    target = jax.random.randint(k_t, (N_MINIBATCH * MB,), 0, OUTPUT_SIZE, dtype=jnp.int32)
    selector_loss = jax.random.uniform(k_sl, (N_MINIBATCH,), dtype=jnp.float32)

    params = make_params(k_p, INPUT_SIZE, HIDDEN_SIZE, OUTPUT_SIZE)
    packed = pack_params(params, HIDDEN_SIZE)

    logits, ce_loss, syn_loss = net_forward(x, target, selector_loss, packed, OUTPUT_SIZE)
    jax.block_until_ready((logits, ce_loss, syn_loss))

    assert logits.shape == (N_MINIBATCH * MB, OUTPUT_SIZE)
    assert ce_loss.shape == (N_MINIBATCH,) and syn_loss.shape == (N_MINIBATCH,)
    assert bool(jnp.all(jnp.isfinite(logits)))
    assert bool(jnp.all(jnp.isfinite(ce_loss))) and bool(jnp.all(jnp.isfinite(syn_loss)))
    print("KERNEL_OK")
</pallas_src>

<mosaic_0001>
module attributes {stable_mosaic.version = 11 : i64} {
  func.func @dynamic_routing_kernel(%arg0: i32, %arg1: memref<1x256x784xf32, #tpu.memory_space<vmem>>, %arg2: memref<1x256x1xi32, #tpu.memory_space<vmem>>, %arg3: memref<1x2x1xf32, #tpu.memory_space<vmem>>, %arg4: memref<784x32xbf16, #tpu.memory_space<vmem>>, %arg5: memref<1x32xf32, #tpu.memory_space<vmem>>, %arg6: memref<32x51xbf16, #tpu.memory_space<vmem>>, %arg7: memref<1x51xf32, #tpu.memory_space<vmem>>, %arg8: memref<48x24xbf16, #tpu.memory_space<vmem>>, %arg9: memref<1x24xf32, #tpu.memory_space<vmem>>, %arg10: memref<1x3xf32, #tpu.memory_space<vmem>>, %arg11: memref<1x1xf32, #tpu.memory_space<vmem>>, %arg12: memref<128x1xf32, #tpu.memory_space<vmem>>, %arg13: memref<1x1xf32, #tpu.memory_space<vmem>>, %arg14: memref<8x10xbf16, #tpu.memory_space<vmem>>, %arg15: memref<1x10xf32, #tpu.memory_space<vmem>>, %arg16: memref<1x256x10xf32, #tpu.memory_space<vmem>>, %arg17: memref<1x2x2xf32, #tpu.memory_space<vmem>>) attributes {dimension_semantics = [#tpu.dimension_semantics<parallel>], iteration_bounds = array<i64: 2>, scalar_prefetch = 0 : i64, scratch_operands = 0 : i64, tpu.core_type = #tpu.core_type<tc>, window_params = [{transform_indices = @transform_0, window_bounds = array<i64: 1, 256, 784>}, {transform_indices = @transform_1, window_bounds = array<i64: 1, 256, 1>}, {transform_indices = @transform_2, window_bounds = array<i64: 1, 2, 1>}, {pipeline_mode = #tpu.pipeline_mode<synchronous>, transform_indices = @transform_3, window_bounds = array<i64: 784, 32>}, {pipeline_mode = #tpu.pipeline_mode<synchronous>, transform_indices = @transform_4, window_bounds = array<i64: 1, 32>}, {pipeline_mode = #tpu.pipeline_mode<synchronous>, transform_indices = @transform_5, window_bounds = array<i64: 32, 51>}, {pipeline_mode = #tpu.pipeline_mode<synchronous>, transform_indices = @transform_6, window_bounds = array<i64: 1, 51>}, {pipeline_mode = #tpu.pipeline_mode<synchronous>, transform_indices = @transform_7, window_bounds = array<i64: 48, 24>}, {pipeline_mode = #tpu.pipeline_mode<synchronous>, transform_indices = @transform_8, window_bounds = array<i64: 1, 24>}, {pipeline_mode = #tpu.pipeline_mode<synchronous>, transform_indices = @transform_9, window_bounds = array<i64: 1, 3>}, {pipeline_mode = #tpu.pipeline_mode<synchronous>, transform_indices = @transform_10, window_bounds = array<i64: 1, 1>}, {pipeline_mode = #tpu.pipeline_mode<synchronous>, transform_indices = @transform_11, window_bounds = array<i64: 128, 1>}, {pipeline_mode = #tpu.pipeline_mode<synchronous>, transform_indices = @transform_12, window_bounds = array<i64: 1, 1>}, {pipeline_mode = #tpu.pipeline_mode<synchronous>, transform_indices = @transform_13, window_bounds = array<i64: 8, 10>}, {pipeline_mode = #tpu.pipeline_mode<synchronous>, transform_indices = @transform_14, window_bounds = array<i64: 1, 10>}, {transform_indices = @transform_15, window_bounds = array<i64: 1, 256, 10>}, {transform_indices = @transform_16, window_bounds = array<i64: 1, 2, 2>}]} {
    %c0 = arith.constant 0 : index
    %c0_0 = arith.constant 0 : index
    %c0_1 = arith.constant 0 : index
    %0 = vector.load %arg1[%c0, %c0_0, %c0_1] : memref<1x256x784xf32, #tpu.memory_space<vmem>>, vector<1x256x784xf32>
    %1 = vector.shape_cast %0 : vector<1x256x784xf32> to vector<256x784xf32>
    %2 = arith.truncf %1 : vector<256x784xf32> to vector<256x784xbf16>
    %c0_2 = arith.constant 0 : index
    %c0_3 = arith.constant 0 : index
    %3 = vector.load %arg4[%c0_2, %c0_3] : memref<784x32xbf16, #tpu.memory_space<vmem>>, vector<784x32xbf16>
    %cst = arith.constant dense<0.000000e+00> : vector<256x32xf32>
    %4 = tpu.matmul %2, %3, %cst {dimension_numbers = #tpu.dot_dimension_numbers<[1], [0], [0], [1], [0, 0, 1, 1], [], []>} : vector<256x784xbf16>, vector<784x32xbf16>, vector<256x32xf32> -> vector<256x32xf32>
    %c0_4 = arith.constant 0 : index
    %c0_5 = arith.constant 0 : index
    %5 = vector.load %arg5[%c0_4, %c0_5] : memref<1x32xf32, #tpu.memory_space<vmem>>, vector<1x32xf32>
    %6 = vector.broadcast %5 : vector<1x32xf32> to vector<256x32xf32>
    %7 = arith.addf %4, %6 : vector<256x32xf32>
    %cst_6 = arith.constant 0.000000e+00 : f32
    %8 = vector.broadcast %cst_6 : f32 to vector<256x32xf32>
    %9 = arith.maximumf %7, %8 : vector<256x32xf32>
    %10 = arith.truncf %9 : vector<256x32xf32> to vector<256x32xbf16>
    %c0_7 = arith.constant 0 : index
    %c0_8 = arith.constant 0 : index
    %11 = vector.load %arg6[%c0_7, %c0_8] : memref<32x51xbf16, #tpu.memory_space<vmem>>, vector<32x51xbf16>
    %cst_9 = arith.constant dense<0.000000e+00> : vector<256x51xf32>
    %12 = tpu.matmul %10, %11, %cst_9 {dimension_numbers = #tpu.dot_dimension_numbers<[1], [0], [0], [1], [0, 0, 1, 1], [], []>} : vector<256x32xbf16>, vector<32x51xbf16>, vector<256x51xf32> -> vector<256x51xf32>
    %c0_10 = arith.constant 0 : index
    %c0_11 = arith.constant 0 : index
    %13 = vector.load %arg7[%c0_10, %c0_11] : memref<1x51xf32, #tpu.memory_space<vmem>>, vector<1x51xf32>
    %14 = vector.broadcast %13 : vector<1x51xf32> to vector<256x51xf32>
    %15 = arith.addf %12, %14 : vector<256x51xf32>
    %16 = vector.extract_strided_slice %15 {offsets = [0, 0], sizes = [256, 3], strides = [1, 1]} : vector<256x51xf32> to vector<256x3xf32>
    %17 = vector.extract_strided_slice %15 {offsets = [0, 3], sizes = [256, 48], strides = [1, 1]} : vector<256x51xf32> to vector<256x48xf32>
    %cst_12 = arith.constant 0.000000e+00 : f32
    %18 = vector.broadcast %cst_12 : f32 to vector<256x48xf32>
    %19 = arith.maximumf %17, %18 : vector<256x48xf32>
    %cst_13 = arith.constant dense<0xFF800000> : vector<256xf32>
    %20 = vector.multi_reduction <maximumf>, %16, %cst_13 [1] : vector<256x3xf32> to vector<256xf32>
    %21 = vector.shape_cast %20 : vector<256xf32> to vector<256x1xf32>
    %22 = vector.extract_strided_slice %16 {offsets = [0, 0], sizes = [256, 1], strides = [1, 1]} : vector<256x3xf32> to vector<256x1xf32>
    %23 = arith.cmpf oeq, %22, %21 : vector<256x1xf32>
    %24 = vector.extract_strided_slice %16 {offsets = [0, 1], sizes = [256, 1], strides = [1, 1]} : vector<256x3xf32> to vector<256x1xf32>
    %25 = arith.cmpf oeq, %24, %21 : vector<256x1xf32>
    %cst_14 = arith.constant dense<true> : vector<256x1xi1>
    %26 = arith.xori %23, %cst_14 : vector<256x1xi1>
    %27 = arith.andi %25, %26 : vector<256x1xi1>
    %28 = vector.broadcast %21 : vector<256x1xf32> to vector<256x3xf32>
    %29 = arith.subf %16, %28 : vector<256x3xf32>
    %30 = math.exp %29 : vector<256x3xf32>
    %cst_15 = arith.constant dense<0.000000e+00> : vector<256xf32>
    %31 = vector.multi_reduction <add>, %30, %cst_15 [1] : vector<256x3xf32> to vector<256xf32>
    %32 = vector.shape_cast %31 : vector<256xf32> to vector<256x1xf32>
    %33 = tpu.reciprocal %32 {approx = true} : vector<256x1xf32> -> vector<256x1xf32>
    %34 = vector.broadcast %33 : vector<256x1xf32> to vector<256x3xf32>
    %35 = arith.mulf %30, %34 : vector<256x3xf32>
    %c0_16 = arith.constant 0 : index
    %c0_17 = arith.constant 0 : index
    %36 = vector.load %arg10[%c0_16, %c0_17] : memref<1x3xf32, #tpu.memory_space<vmem>>, vector<1x3xf32>
    %37 = vector.broadcast %36 : vector<1x3xf32> to vector<256x3xf32>
    %38 = arith.mulf %35, %37 : vector<256x3xf32>
    %cst_18 = arith.constant dense<0.000000e+00> : vector<256xf32>
    %39 = vector.multi_reduction <add>, %38, %cst_18 [1] : vector<256x3xf32> to vector<256xf32>
    %40 = vector.shape_cast %39 : vector<256xf32> to vector<256x1xf32>
    %c0_19 = arith.constant 0 : index
    %c0_20 = arith.constant 0 : index
    %41 = vector.load %arg11[%c0_19, %c0_20] : memref<1x1xf32, #tpu.memory_space<vmem>>, vector<1x1xf32>
    %42 = vector.broadcast %41 : vector<1x1xf32> to vector<256x1xf32>
    %43 = arith.addf %40, %42 : vector<256x1xf32>
    %cst_21 = arith.constant 0.000000e+00 : f32
    %44 = vector.broadcast %cst_21 : f32 to vector<256x1xf32>
    %45 = arith.subf %44, %43 : vector<256x1xf32>
    %46 = math.exp %45 : vector<256x1xf32>
    %cst_22 = arith.constant 1.000000e+00 : f32
    %47 = vector.broadcast %cst_22 : f32 to vector<256x1xf32>
    %48 = arith.addf %47, %46 : vector<256x1xf32>
    %49 = tpu.reciprocal %48 {approx = true} : vector<256x1xf32> -> vector<256x1xf32>
    %50 = vector.shape_cast %49 : vector<256x1xf32> to vector<2x128x1xf32>
    %c0_23 = arith.constant 0 : index
    %c0_24 = arith.constant 0 : index
    %51 = vector.load %arg12[%c0_23, %c0_24] : memref<128x1xf32, #tpu.memory_space<vmem>>, vector<128x1xf32>
    %52 = vector.shape_cast %51 : vector<128x1xf32> to vector<1x128x1xf32>
    %53 = vector.broadcast %52 : vector<1x128x1xf32> to vector<2x128x1xf32>
    %54 = arith.mulf %50, %53 : vector<2x128x1xf32>
    %cst_25 = arith.constant dense<0.000000e+00> : vector<2x1xf32>
    %55 = vector.multi_reduction <add>, %54, %cst_25 [1] : vector<2x128x1xf32> to vector<2x1xf32>
    %c0_26 = arith.constant 0 : index
    %c0_27 = arith.constant 0 : index
    %56 = vector.load %arg13[%c0_26, %c0_27] : memref<1x1xf32, #tpu.memory_space<vmem>>, vector<1x1xf32>
    %57 = vector.broadcast %56 : vector<1x1xf32> to vector<2x1xf32>
    %58 = arith.addf %55, %57 : vector<2x1xf32>
    %cst_28 = arith.constant 0.000000e+00 : f32
    %59 = vector.broadcast %cst_28 : f32 to vector<2x1xf32>
    %60 = arith.subf %59, %58 : vector<2x1xf32>
    %61 = math.exp %60 : vector<2x1xf32>
    %cst_29 = arith.constant 1.000000e+00 : f32
    %62 = vector.broadcast %cst_29 : f32 to vector<2x1xf32>
    %63 = arith.addf %62, %61 : vector<2x1xf32>
    %64 = tpu.reciprocal %63 {approx = true} : vector<2x1xf32> -> vector<2x1xf32>
    %c0_30 = arith.constant 0 : index
    %c0_31 = arith.constant 0 : index
    %c0_32 = arith.constant 0 : index
    %65 = vector.load %arg3[%c0_30, %c0_31, %c0_32] : memref<1x2x1xf32, #tpu.memory_space<vmem>>, vector<1x2x1xf32>
    %66 = vector.shape_cast %65 : vector<1x2x1xf32> to vector<2x1xf32>
    %67 = arith.subf %64, %66 : vector<2x1xf32>
    %68 = arith.mulf %67, %67 : vector<2x1xf32>
    %69 = arith.truncf %19 : vector<256x48xf32> to vector<256x48xbf16>
    %c0_33 = arith.constant 0 : index
    %c0_34 = arith.constant 0 : index
    %70 = vector.load %arg8[%c0_33, %c0_34] : memref<48x24xbf16, #tpu.memory_space<vmem>>, vector<48x24xbf16>
    %cst_35 = arith.constant dense<0.000000e+00> : vector<256x24xf32>
    %71 = tpu.matmul %69, %70, %cst_35 {dimension_numbers = #tpu.dot_dimension_numbers<[1], [0], [0], [1], [0, 0, 1, 1], [], []>} : vector<256x48xbf16>, vector<48x24xbf16>, vector<256x24xf32> -> vector<256x24xf32>
    %c0_36 = arith.constant 0 : index
    %c0_37 = arith.constant 0 : index
    %72 = vector.load %arg9[%c0_36, %c0_37] : memref<1x24xf32, #tpu.memory_space<vmem>>, vector<1x24xf32>
    %73 = vector.broadcast %72 : vector<1x24xf32> to vector<256x24xf32>
    %74 = arith.addf %71, %73 : vector<256x24xf32>
    %cst_38 = arith.constant 0.000000e+00 : f32
    %75 = vector.broadcast %cst_38 : f32 to vector<256x24xf32>
    %76 = arith.maximumf %74, %75 : vector<256x24xf32>
    %77 = vector.extract_strided_slice %76 {offsets = [0, 0], sizes = [256, 8], strides = [1, 1]} : vector<256x24xf32> to vector<256x8xf32>
    %78 = vector.extract_strided_slice %76 {offsets = [0, 8], sizes = [256, 8], strides = [1, 1]} : vector<256x24xf32> to vector<256x8xf32>
    %79 = vector.extract_strided_slice %76 {offsets = [0, 16], sizes = [256, 8], strides = [1, 1]} : vector<256x24xf32> to vector<256x8xf32>
    %80 = vector.shape_cast %27 : vector<256x1xi1> to vector<256x1xi1>
    %81 = vector.broadcast %80 : vector<256x1xi1> to vector<256x8xi1>
    %82 = arith.select %81, %78, %79 : vector<256x8xi1>, vector<256x8xf32>
    %83 = vector.shape_cast %23 : vector<256x1xi1> to vector<256x1xi1>
    %84 = vector.broadcast %83 : vector<256x1xi1> to vector<256x8xi1>
    %85 = arith.select %84, %77, %82 : vector<256x8xi1>, vector<256x8xf32>
    %86 = arith.truncf %85 : vector<256x8xf32> to vector<256x8xbf16>
    %c0_39 = arith.constant 0 : index
    %c0_40 = arith.constant 0 : index
    %87 = vector.load %arg14[%c0_39, %c0_40] : memref<8x10xbf16, #tpu.memory_space<vmem>>, vector<8x10xbf16>
    %cst_41 = arith.constant dense<0.000000e+00> : vector<256x10xf32>
    %88 = tpu.matmul %86, %87, %cst_41 {dimension_numbers = #tpu.dot_dimension_numbers<[1], [0], [0], [1], [0, 0, 1, 1], [], []>} : vector<256x8xbf16>, vector<8x10xbf16>, vector<256x10xf32> -> vector<256x10xf32>
    %c0_42 = arith.constant 0 : index
    %c0_43 = arith.constant 0 : index
    %89 = vector.load %arg15[%c0_42, %c0_43] : memref<1x10xf32, #tpu.memory_space<vmem>>, vector<1x10xf32>
    %90 = vector.broadcast %89 : vector<1x10xf32> to vector<256x10xf32>
    %91 = arith.addf %88, %90 : vector<256x10xf32>
    %cst_44 = arith.constant 0.000000e+00 : f32
    %92 = vector.broadcast %cst_44 : f32 to vector<256x10xf32>
    %93 = arith.maximumf %91, %92 : vector<256x10xf32>
    %c0_45 = arith.constant 0 : index
    %c0_46 = arith.constant 0 : index
    %c0_47 = arith.constant 0 : index
    %94 = vector.load %arg16[%c0_45, %c0_46, %c0_47] : memref<1x256x10xf32, #tpu.memory_space<vmem>>, vector<1x256x10xf32>
    %95 = vector.shape_cast %94 : vector<1x256x10xf32> to vector<256x10xf32>
    %96 = vector.shape_cast %93 : vector<256x10xf32> to vector<1x256x10xf32>
    tpu.vector_store %arg16[%c0_45, %c0_46, %c0_47], %96 {strides = array<i32>} : memref<1x256x10xf32, #tpu.memory_space<vmem>>, vector<1x256x10xf32>,
    %cst_48 = arith.constant dense<0xFF800000> : vector<256xf32>
    %97 = vector.multi_reduction <maximumf>, %93, %cst_48 [1] : vector<256x10xf32> to vector<256xf32>
    %98 = vector.shape_cast %97 : vector<256xf32> to vector<256x1xf32>
    %99 = vector.broadcast %98 : vector<256x1xf32> to vector<256x10xf32>
    %100 = arith.subf %93, %99 : vector<256x10xf32>
    %101 = math.exp %100 : vector<256x10xf32>
    %cst_49 = arith.constant dense<0.000000e+00> : vector<256xf32>
    %102 = vector.multi_reduction <add>, %101, %cst_49 [1] : vector<256x10xf32> to vector<256xf32>
    %103 = vector.shape_cast %102 : vector<256xf32> to vector<256x1xf32>
    %104 = math.log %103 : vector<256x1xf32>
    %105 = arith.addf %98, %104 : vector<256x1xf32>
    %106 = tpu.iota {dimensions = array<i32: 1>} : vector<256x10xi32>
    %c0_50 = arith.constant 0 : index
    %c0_51 = arith.constant 0 : index
    %c0_52 = arith.constant 0 : index
    %107 = vector.load %arg2[%c0_50, %c0_51, %c0_52] : memref<1x256x1xi32, #tpu.memory_space<vmem>>, vector<1x256x1xi32>
    %108 = vector.shape_cast %107 : vector<1x256x1xi32> to vector<256x1xi32>
    %109 = vector.broadcast %108 : vector<256x1xi32> to vector<256x10xi32>
    %110 = arith.cmpi eq, %106, %109 : vector<256x10xi32>
    %111 = arith.extui %110 : vector<256x10xi1> to vector<256x10xi32>
    %112 = arith.sitofp %111 : vector<256x10xi32> to vector<256x10xf32>
    %113 = arith.mulf %112, %93 : vector<256x10xf32>
    %cst_53 = arith.constant dense<0.000000e+00> : vector<256xf32>
    %114 = vector.multi_reduction <add>, %113, %cst_53 [1] : vector<256x10xf32> to vector<256xf32>
    %115 = vector.shape_cast %114 : vector<256xf32> to vector<256x1xf32>
    %116 = arith.subf %105, %115 : vector<256x1xf32>
    %117 = vector.shape_cast %116 : vector<256x1xf32> to vector<2x128x1xf32>
    %cst_54 = arith.constant dense<0.000000e+00> : vector<2x1xf32>
    %118 = vector.multi_reduction <add>, %117, %cst_54 [1] : vector<2x128x1xf32> to vector<2x1xf32>
    %cst_55 = arith.constant 7.812500e-03 : f32
    %119 = vector.broadcast %cst_55 : f32 to vector<2x1xf32>
    %120 = arith.mulf %118, %119 : vector<2x1xf32>
    %121 = tpu.concatenate %120, %68 in 1 : vector<2x1xf32>, vector<2x1xf32> -> vector<2x2xf32>
    %c0_56 = arith.constant 0 : index
    %c0_57 = arith.constant 0 : index
    %c0_58 = arith.constant 0 : index
    %122 = vector.load %arg17[%c0_56, %c0_57, %c0_58] : memref<1x2x2xf32, #tpu.memory_space<vmem>>, vector<1x2x2xf32>
    %123 = vector.shape_cast %122 : vector<1x2x2xf32> to vector<2x2xf32>
    %124 = vector.shape_cast %121 : vector<2x2xf32> to vector<1x2x2xf32>
    tpu.vector_store %arg17[%c0_56, %c0_57, %c0_58], %124 {strides = array<i32>} : memref<1x2x2xf32, #tpu.memory_space<vmem>>, vector<1x2x2xf32>,
    return
  }
  func.func @transform_0(%arg0: i32) -> (i32, i32, i32) {
    %c0_i32 = arith.constant 0 : i32
    %c0_i32_0 = arith.constant 0 : i32
    %c0_i32_1 = arith.constant 0 : i32
    return %arg0, %c0_i32, %c0_i32_0 : i32, i32, i32
  }
  func.func @transform_1(%arg0: i32) -> (i32, i32, i32) {
    %c0_i32 = arith.constant 0 : i32
    %c0_i32_0 = arith.constant 0 : i32
    %c0_i32_1 = arith.constant 0 : i32
    return %arg0, %c0_i32, %c0_i32_0 : i32, i32, i32
  }
  func.func @transform_2(%arg0: i32) -> (i32, i32, i32) {
    %c0_i32 = arith.constant 0 : i32
    %c0_i32_0 = arith.constant 0 : i32
    %c0_i32_1 = arith.constant 0 : i32
    return %arg0, %c0_i32, %c0_i32_0 : i32, i32, i32
  }
  func.func @transform_3(%arg0: i32) -> (i32, i32) {
    %c0_i32 = arith.constant 0 : i32
    %c0_i32_0 = arith.constant 0 : i32
    %c0_i32_1 = arith.constant 0 : i32
    return %c0_i32, %c0_i32_0 : i32, i32
  }
  func.func @transform_4(%arg0: i32) -> (i32, i32) {
    %c0_i32 = arith.constant 0 : i32
    %c0_i32_0 = arith.constant 0 : i32
    %c0_i32_1 = arith.constant 0 : i32
    return %c0_i32, %c0_i32_0 : i32, i32
  }
  func.func @transform_5(%arg0: i32) -> (i32, i32) {
    %c0_i32 = arith.constant 0 : i32
    %c0_i32_0 = arith.constant 0 : i32
    %c0_i32_1 = arith.constant 0 : i32
    return %c0_i32, %c0_i32_0 : i32, i32
  }
  func.func @transform_6(%arg0: i32) -> (i32, i32) {
    %c0_i32 = arith.constant 0 : i32
    %c0_i32_0 = arith.constant 0 : i32
    %c0_i32_1 = arith.constant 0 : i32
    return %c0_i32, %c0_i32_0 : i32, i32
  }
  func.func @transform_7(%arg0: i32) -> (i32, i32) {
    %c0_i32 = arith.constant 0 : i32
    %c0_i32_0 = arith.constant 0 : i32
    %c0_i32_1 = arith.constant 0 : i32
    return %c0_i32, %c0_i32_0 : i32, i32
  }
  func.func @transform_8(%arg0: i32) -> (i32, i32) {
    %c0_i32 = arith.constant 0 : i32
    %c0_i32_0 = arith.constant 0 : i32
    %c0_i32_1 = arith.constant 0 : i32
    return %c0_i32, %c0_i32_0 : i32, i32
  }
  func.func @transform_9(%arg0: i32) -> (i32, i32) {
    %c0_i32 = arith.constant 0 : i32
    %c0_i32_0 = arith.constant 0 : i32
    %c0_i32_1 = arith.constant 0 : i32
    return %c0_i32, %c0_i32_0 : i32, i32
  }
  func.func @transform_10(%arg0: i32) -> (i32, i32) {
    %c0_i32 = arith.constant 0 : i32
    %c0_i32_0 = arith.constant 0 : i32
    %c0_i32_1 = arith.constant 0 : i32
    return %c0_i32, %c0_i32_0 : i32, i32
  }
  func.func @transform_11(%arg0: i32) -> (i32, i32) {
    %c0_i32 = arith.constant 0 : i32
    %c0_i32_0 = arith.constant 0 : i32
    %c0_i32_1 = arith.constant 0 : i32
    return %c0_i32, %c0_i32_0 : i32, i32
  }
  func.func @transform_12(%arg0: i32) -> (i32, i32) {
    %c0_i32 = arith.constant 0 : i32
    %c0_i32_0 = arith.constant 0 : i32
    %c0_i32_1 = arith.constant 0 : i32
    return %c0_i32, %c0_i32_0 : i32, i32
  }
  func.func @transform_13(%arg0: i32) -> (i32, i32) {
    %c0_i32 = arith.constant 0 : i32
    %c0_i32_0 = arith.constant 0 : i32
    %c0_i32_1 = arith.constant 0 : i32
    return %c0_i32, %c0_i32_0 : i32, i32
  }
  func.func @transform_14(%arg0: i32) -> (i32, i32) {
    %c0_i32 = arith.constant 0 : i32
    %c0_i32_0 = arith.constant 0 : i32
    %c0_i32_1 = arith.constant 0 : i32
    return %c0_i32, %c0_i32_0 : i32, i32
  }
  func.func @transform_15(%arg0: i32) -> (i32, i32, i32) {
    %c0_i32 = arith.constant 0 : i32
    %c0_i32_0 = arith.constant 0 : i32
    %c0_i32_1 = arith.constant 0 : i32
    return %arg0, %c0_i32, %c0_i32_0 : i32, i32, i32
  }
  func.func @transform_16(%arg0: i32) -> (i32, i32, i32) {
    %c0_i32 = arith.constant 0 : i32
    %c0_i32_0 = arith.constant 0 : i32
    %c0_i32_1 = arith.constant 0 : i32
    return %arg0, %c0_i32, %c0_i32_0 : i32, i32, i32
  }
}

</mosaic_0001>

<bundles_post_ra>
// kernel: tpu_custom_call.1
= control target key start
LH: loop header
LB: loop body
LE: loop exit
PB: predicated region body
PF: predicated region fallthrough
CT: control target
= control target key end

     0   :  { %s10787_s0 = inlined_call_operand.vmem [shape: f32[2,256,784], index: 0, kind: input, shape index: {}]   ;;  %s10788_s1 = inlined_call_operand.vmem [shape: s32[2,256,1], index: 1, kind: input, shape index: {}]   ;;  %s10789_s2 = inlined_call_operand.vmem [shape: f32[2,2,1], index: 2, kind: input, shape index: {}]   ;;  %s10790_s3 = inlined_call_operand.vmem [shape: bf16[784,32], index: 3, kind: input, shape index: {}]   ;;  %s10791_s4 = inlined_call_operand.vmem [shape: f32[1,32], index: 4, kind: input, shape index: {}]   ;;  %s10792_s5 = inlined_call_operand.vmem [shape: bf16[32,51], index: 5, kind: input, shape index: {}]   ;;  %s10793_s6 = inlined_call_operand.vmem [shape: f32[1,51], index: 6, kind: input, shape index: {}]   ;;  %s10794_s7 = inlined_call_operand.vmem [shape: bf16[48,24], index: 7, kind: input, shape index: {}]   ;;  %s10795_s8 = inlined_call_operand.vmem [shape: f32[1,24], index: 8, kind: input, shape index: {}]   ;;  %s10796_s9 = inlined_call_operand.vmem [shape: f32[1,3], index: 9, kind: input, shape index: {}]   ;;  %s10797_s10 = inlined_call_operand.<no memory space> [shape: f32[1,1], index: 10, kind: input, shape index: {}]   ;;  %s10798_s11 = inlined_call_operand.vmem [shape: f32[128,1], index: 11, kind: input, shape index: {}]   ;;  %s10799_s13 = inlined_call_operand.vmem [shape: bf16[8,10], index: 13, kind: input, shape index: {}]   ;;  %s10800_s14 = inlined_call_operand.vmem [shape: f32[1,10], index: 14, kind: input, shape index: {}]   ;;  %s10801_s15 = inlined_call_operand.vmem [shape: f32[2,256,10], index: 15, kind: output, shape index: {0}]   ;;  %s10802_s16 = inlined_call_operand.hbm [shape: f32[2,2,2], index: 16, kind: output, shape index: {1}]   ;;  %s10803_s12 = inlined_call_operand.<no memory space> [shape: f32[1,1], index: 12, kind: input, shape index: {}]  }
   0x1   :  { %10949 = sst [smem:[#allocation116_spill]] %s10787_s0  ;;  %v22_v0 = vstv %s10797_s10  ;;  %v24_v1 = vstv %s10803_s12 }
   0x2   :  { %23 = vst [vmem:[#allocation2] sm:$0x1] %v22_v0  ;;  %25 = vst [vmem:[#allocation3] sm:$0x1] %v24_v1 }
   0x3   :  { %26 = vsyncpa [#allocation5], 0 }
   0x4   :  { %28 = vsyncpa [#allocation5 + $0x1], 0  ;;  %s7165_s25 = smov 0   ;;  %s7167_s26 = smov 0  }
   0x5   :  { %s7169_s27 = smov 0   ;;  %s7171_s28 = smov 0  }
   0x6 LB: > { %10950 = sst [smem:[#allocation7_spill]] %s7052_s25  ;;  %s7186_s10 = sadd.s32 4294967295, %s7064_s28   ;;  %s7064_s28 = sphi %s7171_s28, %s11356_s28   ;;  %s7060_s27 = sphi %s7169_s27, %s11358_s27   ;;  %s7056_s26 = sphi %s7167_s26, %s11360_s26   ;;  %s7052_s25 = sphi %s7165_s25, %s11359_s25  }
   0x7   : > { %10951 = sst [smem:[#allocation8_spill]] %s7060_s27  ;;  %s5617_s12 = sadd.s32 4294967294, %s7064_s28  }
   0x8   : > { %s7190_s29 = sadd.s32 1, %s7064_s28   ;;  %s397_s30 = sadd.s32 1, %s7060_s27 }
   0x9   : > { %10952 = sst [smem:[#allocation9_spill]] %s7190_s29  ;;  %s394_s0 = ssub.s32 %s7064_s28, %s7190_s29 }
   0xa   : > { %p407_p0 = scmp.ne.s32.totalorder %s7060_s27, %s7056_s26  ;;  %p395_p1 = scmp.eq.s32.totalorder %s394_s0, 0 }
   0xb   : > { %p408_p2 = scmp.eq.s32.totalorder %s7186_s10, 1  ;;  %p413_p3 = scmp.ne.s32.totalorder %s7056_s26, %s7052_s25 }
   0xc   : > { %p414_p4 = scmp.eq.s32.totalorder %s5617_s12, 1  ;;  %p5620_p7 = scmp.ge.s32.totalorder %s7064_s28, 1 }
   0xd   : > { %s7201_s17 = scalar_select %p395_p1, %s7060_s27, %s397_s30  }
   0xe   : > { %p7203_p5 = por %p408_p2, %p407_p0  ;;  %p7207_p6 = por %p414_p4, %p413_p3 }
   0xf   : > { %10953 = sst [smem:[#allocation10_spill]] %s7201_s17  ;;  %p491_p8 = scmp.lt.s32.totalorder %s7064_s28, 3 }
  0x10   : > { %s10955_s19 = scalar_select %p7207_p6, 1, 0 }
  0x11   : > { %p492_p9 = pnand %p5620_p7, %p491_p8 }
  0x12   : > { %10956 = sst [smem:[#allocation11_spill]] %s10955_s19 }
  0x13   : > { %495 = sbr.rel (%p492_p9) target bundleno = 2974 (0xb9e), region = 80 }
  0x1a   : > { %v6554_v2 = vld [vmem:[%s10790_s3 + $0x40] sm:$0xff]   ;;  %v6558_v6 = vld [vmem:[%s10790_s3 + $0x48] sm:$0xff]   ;;  %v6562_v10 = vld [vmem:[%s10790_s3 + $0x50] sm:$0xff]   ;;  %p555_p10 = scmp.lt.s32.totalorder %s7186_s10, 1  ;;  %s10957_s25 = sld [smem:[#allocation116_spill]]  ;;  %vm1310_vm0 = vcmask 130048  }
  0x1b   : > { %v6555_v3 = vld [vmem:[%s10790_s3] sm:$0xff]   ;;  %5791 = vmatprep.subr.bf16.mxu0 %v6554_v2  ;;  %v6559_v7 = vld [vmem:[%s10790_s3 + $0x8] sm:$0xff]   ;;  %v6563_v11 = vld [vmem:[%s10790_s3 + $0x10] sm:$0xff]   ;;  %vm2074_vm1 = vcmask 261120   ;;  %vm2316_vm2 = vcmask 23552   ;;  %s7067_s17 = smov 125  }
  0x1c   : > { %v6556_v4 = vld [vmem:[%s10790_s3 + $0xc0] sm:$0xff]   ;;  %5792 = vmatpush3.bf16.msra.mxu0 %v6555_v3  ;;  %v6560_v8 = vld [vmem:[%s10790_s3 + $0xc8] sm:$0xff]   ;;  %v6564_v12 = vld [vmem:[%s10790_s3 + $0xd0] sm:$0xff]   ;;  %s7278_s22 = scalar_select %p555_p10, %s7186_s10, 1  ;;  %vm3473_vm3 = vcmask 392192   ;;  %vm7068_vm5 = vmmov 1  }
  0x1d   : > { %v6557_v5 = vld [vmem:[%s10790_s3 + $0x80] sm:$0xff]   ;;  %5903 = vmatprep.subr.bf16.mxu1 %v6556_v4  ;;  %5793 = vmatprep.subr.bf16.mxu0 %v6558_v6  ;;  %v6561_v9 = vld [vmem:[%s10790_s3 + $0x88] sm:$0xff]   ;;  %v6565_v13 = vld [vmem:[%s10790_s3 + $0x90] sm:$0xff]   ;;  %s7069_s20 = smov 1   ;;  %s7071_s30 = smov 120  }
  0x1e   : > { %5904 = vmatpush3.bf16.msra.mxu1 %v6557_v5  ;;  %v6566_v14 = vld [vmem:[%s10790_s3 + $0x58] sm:$0xff]   ;;  %v6570_v18 = vld [vmem:[%s10790_s3 + $0x60] sm:$0xff]   ;;  %v6574_v22 = vld [vmem:[%s10790_s3 + $0x68] sm:$0xff]   ;;  %s6341_s21 = smul.u32 1792, %s7278_s22  ;;  %s5789_s23 = sshll.u32 %s7278_s22, 8 }
  0x1f   : > { %5905 = vmatprep.subr.bf16.mxu1 %v6560_v8  ;;  %v6567_v15 = vld [vmem:[%s10790_s3 + $0x18] sm:$0xff]   ;;  %v6571_v19 = vld [vmem:[%s10790_s3 + $0x20] sm:$0xff]   ;;  %v6575_v23 = vld [vmem:[%s10790_s3 + $0x28] sm:$0xff]   ;;  %s9618_s12 = scalar_lea.vmem %s10788_s1, %s5789_s23  ;;  %s9876_s0 = scalar_lea.vmem %s10801_s15, %s5789_s23 }
  0x20   : > { %5794 = vmatpush3.bf16.msra.mxu0 %v6559_v7  ;;  %v6568_v16 = vld [vmem:[%s10790_s3 + $0xd8] sm:$0xff]   ;;  %v6572_v20 = vld [vmem:[%s10790_s3 + $0xe0] sm:$0xff]   ;;  %v6576_v24 = vld [vmem:[%s10790_s3 + $0xe8] sm:$0xff]   ;;  %s7308_s29 = scalar_lea.vmem %s10957_s25, %s6341_s21  ;;  %s5786_s24 = sshll.u32 %s7186_s10, 5 }
  0x21   : > { %5795 = vmatprep.subr.bf16.mxu0 %v6562_v10  ;;  %v6569_v17 = vld [vmem:[%s10790_s3 + $0x98] sm:$0xff]   ;;  %v6573_v21 = vld [vmem:[%s10790_s3 + $0xa0] sm:$0xff]   ;;  %v6577_v25 = vld [vmem:[%s10790_s3 + $0xa8] sm:$0xff]   ;;  %s10744_s19 = scalar_lea.hbm %s10802_s16, %s5786_s24 }
  0x22   : > { %5906 = vmatpush3.bf16.msra.mxu1 %v6561_v9  ;;  %v6578_v26 = vld [vmem:[%s10790_s3 + $0x70] sm:$0xff]   ;;  %v6582_v30 = vld [vmem:[%s10790_s3 + $0x78] sm:$0xff]   ;;  %v576_v33 = vld [vmem:[%s7308_s29 + $0x8] sm:$0xff] }
  0x23   : > { %5907 = vmatprep.subr.bf16.mxu1 %v6564_v12  ;;  %v6579_v27 = vld [vmem:[%s10790_s3 + $0x30] sm:$0xff]   ;;  %v6583_v31 = vld [vmem:[%s10790_s3 + $0x38] sm:$0xff]   ;;  %v583_v34 = vld [vmem:[%s7308_s29 + $0x40] sm:$0xff] }
  0x24   : > { %5796 = vmatpush3.bf16.msra.mxu0 %v6563_v11  ;;  %v6580_v28 = vld [vmem:[%s10790_s3 + $0xf0] sm:$0xff]   ;;  %v6584_v32 = vld [vmem:[%s10790_s3 + $0xf8] sm:$0xff]   ;;  %v800_v35 = vpack.c.bf16 %v583_v34, %v576_v33  ;;  %v575_v37 = vld [vmem:[%s7308_s29] sm:$0xff] }
  0x25   : > { %5797 = vmatprep.subr.bf16.mxu0 %v6566_v14  ;;  %v6581_v29 = vld [vmem:[%s10790_s3 + $0xb0] sm:$0xff]   ;;  %v6585_v36 = vld [vmem:[%s10790_s3 + $0xb8] sm:$0xff]   ;;  %v6586_v40 = vld [vmem:[%s10790_s3 + $0x140] sm:$0xff]  }
  0x26   : > { %5908 = vmatpush3.bf16.msra.mxu1 %v6565_v13  ;;  %v582_v38 = vld [vmem:[%s7308_s29 + $0x38] sm:$0xff]  ;;  %1391 = vmatprep.mubr.bf16.mxu0 %v800_v35  ;;  %v585_v42 = vld [vmem:[%s7308_s29 + $0x50] sm:$0xff]  ;;  %v6587_v44 = vld [vmem:[%s10790_s3 + $0x100] sm:$0xff]  }
  0x27   : > { %5909 = vmatprep.subr.bf16.mxu1 %v6568_v16  ;;  %v799_v39 = vpack.c.bf16 %v582_v38, %v575_v37  ;;  %v578_v41 = vld [vmem:[%s7308_s29 + $0x18] sm:$0xff]  ;;  %v577_v45 = vld [vmem:[%s7308_s29 + $0x10] sm:$0xff]  ;;  %v584_v46 = vld [vmem:[%s7308_s29 + $0x48] sm:$0xff] }
  0x28   : > { %5798 = vmatpush3.bf16.msra.mxu0 %v6567_v15  ;;  %v802_v43 = vpack.c.bf16 %v585_v42, %v578_v41  ;;  %v590_v47 = vld [vmem:[%s7308_s29 + $0x78] sm:$0xff]  ;;  %v801_v48 = vpack.c.bf16 %v584_v46, %v577_v45  ;;  %v597_v49 = vld [vmem:[%s7308_s29 + $0xb0] sm:$0xff]  ;;  %v596_v51 = vld [vmem:[%s7308_s29 + $0xa8] sm:$0xff] }
  0x29   : > { %5799 = vmatprep.subr.bf16.mxu0 %v6570_v18  ;;  %v589_v50 = vld [vmem:[%s7308_s29 + $0x70] sm:$0xff]  ;;  %v807_v52 = vpack.c.bf16 %v597_v49, %v590_v47  ;;  %v592_v53 = vld [vmem:[%s7308_s29 + $0x88] sm:$0xff]  ;;  %v599_v54 = vld [vmem:[%s7308_s29 + $0xc0] sm:$0xff] }
  0x2a   : > { %5910 = vmatpush3.bf16.msra.mxu1 %v6569_v17  ;;  %1552 = vmatprep.mubr.bf16.mxu1 %v802_v43  ;;  %v591_v55 = vld [vmem:[%s7308_s29 + $0x80] sm:$0xff]  ;;  %v809_v56 = vpack.c.bf16 %v599_v54, %v592_v53  ;;  %v598_v57 = vld [vmem:[%s7308_s29 + $0xb8] sm:$0xff]  ;;  %v806_v58 = vpack.c.bf16 %v596_v51, %v589_v50  ;;  %v604_v60 = vld [vmem:[%s7308_s29 + $0xe8] sm:$0xff] }
  0x2b   : > { %5911 = vmatprep.subr.bf16.mxu1 %v6572_v20  ;;  %v6588_v59 = vld [vmem:[%s10790_s3 + $0x180] sm:$0xff]   ;;  %v6589_v63 = vld [vmem:[%s10790_s3 + $0x148] sm:$0xff]   ;;  %v606_v0 = vld [vmem:[%s7308_s29 + $0xf8] sm:$0xff]  ;;  %v808_v1 = vpack.c.bf16 %v598_v57, %v591_v55 }
  0x2c   : > { %5800 = vmatpush3.bf16.msra.mxu0 %v6571_v19  ;;  %v611_v61 = vld [vmem:[%s7308_s29 + $0x120] sm:$0xff]  ;;  %v613_v2 = vld [vmem:[%s7308_s29 + $0x130] sm:$0xff]  ;;  %v6590_v4 = vld [vmem:[%s10790_s3 + $0x108] sm:$0xff]  }
  0x2d   : > { %5801 = vmatprep.subr.bf16.mxu0 %v6574_v22  ;;  %v814_v62 = vpack.c.bf16 %v611_v61, %v604_v60  ;;  %v816_v3 = vpack.c.bf16 %v613_v2, %v606_v0  ;;  %v603_v5 = vld [vmem:[%s7308_s29 + $0xe0] sm:$0xff]  ;;  %v610_v6 = vld [vmem:[%s7308_s29 + $0x118] sm:$0xff]  ;;  %v625_v8 = vld [vmem:[%s7308_s29 + $0x190] sm:$0xff] }
  0x2e   : > { %5912 = vmatpush3.bf16.msra.mxu1 %v6573_v21  ;;  %v618_v7 = vld [vmem:[%s7308_s29 + $0x158] sm:$0xff]  ;;  %v605_v9 = vld [vmem:[%s7308_s29 + $0xf0] sm:$0xff]  ;;  %v813_v10 = vpack.c.bf16 %v610_v6, %v603_v5  ;;  %v612_v11 = vld [vmem:[%s7308_s29 + $0x128] sm:$0xff] }
  0x2f   : > { %5913 = vmatprep.subr.bf16.mxu1 %v6576_v24  ;;  %v620_v12 = vld [vmem:[%s7308_s29 + $0x168] sm:$0xff]  ;;  %v627_v13 = vld [vmem:[%s7308_s29 + $0x1a0] sm:$0xff]  ;;  %v821_v14 = vpack.c.bf16 %v625_v8, %v618_v7  ;;  %v6591_v15 = vld [vmem:[%s10790_s3 + $0x150] sm:$0xff]   ;;  %v815_v16 = vpack.c.bf16 %v612_v11, %v605_v9 }
  0x30   : > { %5802 = vmatpush3.bf16.msra.mxu0 %v6575_v23  ;;  %v6592_v17 = vld [vmem:[%s10790_s3 + $0x110] sm:$0xff]   ;;  %v823_v18 = vpack.c.bf16 %v627_v13, %v620_v12  ;;  %v624_v20 = vld [vmem:[%s7308_s29 + $0x188] sm:$0xff]  ;;  %v639_v22 = vld [vmem:[%s7308_s29 + $0x200] sm:$0xff] }
  0x31   : > { %5803 = vmatprep.subr.bf16.mxu0 %v6578_v26  ;;  %v617_v19 = vld [vmem:[%s7308_s29 + $0x150] sm:$0xff]  ;;  %v632_v21 = vld [vmem:[%s7308_s29 + $0x1c8] sm:$0xff]  ;;  %v619_v23 = vld [vmem:[%s7308_s29 + $0x160] sm:$0xff] }
  0x32   : > { %5914 = vmatpush3.bf16.msra.mxu1 %v6577_v25  ;;  %v820_v24 = vpack.c.bf16 %v624_v20, %v617_v19  ;;  %v626_v25 = vld [vmem:[%s7308_s29 + $0x198] sm:$0xff]  ;;  %v828_v26 = vpack.c.bf16 %v639_v22, %v632_v21  ;;  %v631_v33 = vld [vmem:[%s7308_s29 + $0x1c0] sm:$0xff]  ;;  %v633_v37 = vld [vmem:[%s7308_s29 + $0x1d0] sm:$0xff] }
  0x33   : > { %5915 = vmatprep.subr.bf16.mxu1 %v6580_v28  ;;  %v641_v28 = vld [vmem:[%s7308_s29 + $0x210] sm:$0xff]  ;;  %v638_v34 = vld [vmem:[%s7308_s29 + $0x1f8] sm:$0xff]  ;;  %v640_v38 = vld [vmem:[%s7308_s29 + $0x208] sm:$0xff] }
  0x34   : > { %5804 = vmatpush3.bf16.msra.mxu0 %v6579_v27  ;;  %v634_v27 = vld [vmem:[%s7308_s29 + $0x1d8] sm:$0xff]  ;;  %v6595_v41 = vld [vmem:[%s10790_s3 + $0x160] sm:$0xff]   ;;  %v829_v45 = vpack.c.bf16 %v640_v38, %v633_v37  ;;  %v645_v47 = vld [vmem:[%s7308_s29 + $0x230] sm:$0xff] }
  0x35   : > { %5805 = vmatprep.subr.bf16.mxu0 %v6582_v30  ;;  %v6594_v30 = vld [vmem:[%s10790_s3 + $0x118] sm:$0xff]   ;;  %v655_v43 = vld [vmem:[%s7308_s29 + $0x280] sm:$0xff]  ;;  %v660_v50 = vld [vmem:[%s7308_s29 + $0x2a8] sm:$0xff] }
  0x36   : > { %5916 = vmatpush3.bf16.msra.mxu1 %v6581_v29  ;;  %v6593_v29 = vld [vmem:[%s10790_s3 + $0x158] sm:$0xff]   ;;  %v647_v49 = vld [vmem:[%s7308_s29 + $0x240] sm:$0xff]  ;;  %v669_v57 = vld [vmem:[%s7308_s29 + $0x2f0] sm:$0xff] }
  0x37   : > { %5917 = vmatprep.subr.bf16.mxu1 %v6584_v32  ;;  %v830_v32 = vpack.c.bf16 %v641_v28, %v634_v27  ;;  %v646_v35 = vld [vmem:[%s7308_s29 + $0x238] sm:$0xff]  ;;  %v667_v51 = vld [vmem:[%s7308_s29 + $0x2e0] sm:$0xff]  ;;  %v681_v0 = vld [vmem:[%s7308_s29 + $0x350] sm:$0xff] }
  0x38   : > { %5806 = vmatpush3.bf16.msra.mxu0 %v6583_v31  ;;  %v822_v31 = vpack.c.bf16 %v626_v25, %v619_v23  ;;  %v654_v54 = vld [vmem:[%s7308_s29 + $0x278] sm:$0xff]  ;;  %v659_v61 = vld [vmem:[%s7308_s29 + $0x2a0] sm:$0xff]  ;;  %v668_v2 = vld [vmem:[%s7308_s29 + $0x2e8] sm:$0xff] }
  0x39   : > { %6015 = vmatprep.subr.bf16.mxu0 %v6586_v40  ;;  %v648_v40 = vld [vmem:[%s7308_s29 + $0x248] sm:$0xff]  ;;  %v662_v55 = vld [vmem:[%s7308_s29 + $0x2b8] sm:$0xff]  ;;  %v6600_v5 = vld [vmem:[%s10790_s3 + $0x130] sm:$0xff]  }
  0x3a   : > { %5918 = vmatpush3.bf16.msra.mxu1 %v6585_v36  ;;  %v653_v36 = vld [vmem:[%s7308_s29 + $0x270] sm:$0xff]  ;;  %v837_v46 = vpack.c.bf16 %v655_v43, %v648_v40  ;;  %v844_v60 = vpack.c.bf16 %v669_v57, %v662_v55  ;;  %v676_v7 = vld [vmem:[%s7308_s29 + $0x328] sm:$0xff]  ;;  %v683_v8 = vld [vmem:[%s7308_s29 + $0x360] sm:$0xff] }
  0x3b   : > { %1392 = vmatmul.mubr.bf16.vlgmr.msra.gmra.mrb[0].mxu0 %v799_v39  ;;  %6198 = vmatprep.subr.bf16.mxu1 %v6588_v59  ;;  %v827_v39 = vpack.c.bf16 %v638_v34, %v631_v33  ;;  %v835_v42 = vpack.c.bf16 %v653_v36, %v646_v35  ;;  %v851_v11 = vpack.c.bf16 %v683_v8, %v676_v7  ;;  %v680_v12 = vld [vmem:[%s7308_s29 + $0x348] sm:$0xff]  ;;  %v6602_v19 = vld [vmem:[%s10790_s3 + $0x138] sm:$0xff]   ;;  %v697_v22 = vld [vmem:[%s7308_s29 + $0x3d0] sm:$0xff] }
  0x3c   : > { %6016 = vmatpush3.bf16.msra.mxu0 %v6587_v44  ;;  %1399 = vmatprep.mubr.bf16.mxu0 %v807_v52  ;;  %v6596_v44 = vld [vmem:[%s10790_s3 + $0x120] sm:$0xff]   ;;  %v6597_v52 = vld [vmem:[%s10790_s3 + $0x168] sm:$0xff]   ;;  %v690_v21 = vld [vmem:[%s7308_s29 + $0x398] sm:$0xff] }
  0x3d   : > { %1553 = vmatmul.mubr.bf16.vlgmr.msra.gmra.mrb[0].mxu1 %v801_v48  ;;  %6017 = vmatprep.subr.bf16.mxu0 %v6589_v63  ;;  %v652_v48 = vld [vmem:[%s7308_s29 + $0x268] sm:$0xff]  ;;  %v674_v63 = vld [vmem:[%s7308_s29 + $0x318] sm:$0xff]  ;;  %v687_v25 = vld [vmem:[%s7308_s29 + $0x380] sm:$0xff] }
  0x3e   : > { %1560 = vmatprep.mubr.bf16.mxu1 %v809_v56  ;;  %6199 = vmatpush3.bf16.msra.mxu1 %v6588_v59  ;;  %v834_v53 = vpack.c.bf16 %v652_v48, %v645_v47  ;;  %v842_v56 = vpack.c.bf16 %v667_v51, %v660_v50  ;;  %v836_v59 = vpack.c.bf16 %v654_v54, %v647_v49  ;;  %v688_v13 = vld [vmem:[%s7308_s29 + $0x388] sm:$0xff]  ;;  %v702_v27 = vld [vmem:[%s7308_s29 + $0x3f8] sm:$0xff]  ;;  %v709_v28 = vld [vmem:[%s7308_s29 + $0x430] sm:$0xff] }
  0x3f   : > { %v849_v6 = vpack.c.bf16 %v681_v0, %v674_v63  ;;  %v704_v33 = vld [vmem:[%s7308_s29 + $0x408] sm:$0xff]  ;;  %v711_v34 = vld [vmem:[%s7308_s29 + $0x440] sm:$0xff]  ;;  %v701_v37 = vld [vmem:[%s7308_s29 + $0x3f0] sm:$0xff] }
  0x40   : > { %6018 = vmatpush3.bf16.msra.mxu0 %v6590_v4  ;;  %v865_v36 = vpack.c.bf16 %v711_v34, %v704_v33  ;;  %v708_v38 = vld [vmem:[%s7308_s29 + $0x428] sm:$0xff]  ;;  %v723_v40 = vld [vmem:[%s7308_s29 + $0x4a0] sm:$0xff]  ;;  %v710_v43 = vld [vmem:[%s7308_s29 + $0x438] sm:$0xff] }
  0x41   : > { %6019 = vmatprep.subr.bf16.mxu0 %v6591_v15  ;;  %v6601_v15 = vld [vmem:[%s10790_s3 + $0x178] sm:$0xff]   ;;  %v715_v49 = vld [vmem:[%s7308_s29 + $0x460] sm:$0xff]  ;;  %v724_v55 = vld [vmem:[%s7308_s29 + $0x4a8] sm:$0xff] }
  0x42   : > { %v722_v50 = vld [vmem:[%s7308_s29 + $0x498] sm:$0xff]  ;;  %v739_v57 = vld [vmem:[%s7308_s29 + $0x520] sm:$0xff]  ;;  %v744_v63 = vld [vmem:[%s7308_s29 + $0x548] sm:$0xff] }
  0x43   : > { %1400 = vmatmul.mubr.bf16.gmra.mrb[4].mxu0 %v806_v58  ;;  %v6598_v58 = vld [vmem:[%s10790_s3 + $0x128] sm:$0xff]   ;;  %v730_v51 = vld [vmem:[%s7308_s29 + $0x4d8] sm:$0xff]  ;;  %v869_v54 = vpack.c.bf16 %v722_v50, %v715_v49  ;;  %v751_v0 = vld [vmem:[%s7308_s29 + $0x580] sm:$0xff] }
  0x44   : > { %1407 = vmatprep.mubr.bf16.mxu0 %v814_v62  ;;  %6020 = vmatpush3.bf16.msra.mxu0 %v6592_v17  ;;  %v666_v62 = vld [vmem:[%s7308_s29 + $0x2d8] sm:$0xff]  ;;  %v675_v17 = vld [vmem:[%s7308_s29 + $0x320] sm:$0xff] }
  0x45   : > { %1561 = vmatmul.mubr.bf16.gmra.mrb[4].mxu1 %v808_v1  ;;  %6021 = vmatprep.subr.bf16.mxu0 %v6593_v29  ;;  %v661_v1 = vld [vmem:[%s7308_s29 + $0x2b0] sm:$0xff]  ;;  %v841_v4 = vpack.c.bf16 %v666_v62, %v659_v61  ;;  %v736_v62 = vld [vmem:[%s7308_s29 + $0x508] sm:$0xff]  ;;  %v771_v33 = vld [vmem:[%s7308_s29 + $0x620] sm:$0xff] }
  0x46   : > { %1568 = vmatprep.mubr.bf16.mxu1 %v816_v3  ;;  %v6599_v3 = vld [vmem:[%s10790_s3 + $0x170] sm:$0xff]   ;;  %v843_v9 = vpack.c.bf16 %v668_v2, %v661_v1  ;;  %v731_v2 = vld [vmem:[%s7308_s29 + $0x4e0] sm:$0xff]  ;;  %v778_v34 = vld [vmem:[%s7308_s29 + $0x658] sm:$0xff] }
  0x47   : > { %v729_v61 = vld [vmem:[%s7308_s29 + $0x4d0] sm:$0xff]  ;;  %v787_v50 = vld [vmem:[%s7308_s29 + $0x6a0] sm:$0xff] }
  0x48   : > { %6022 = vmatpush3.bf16.msra.mxu0 %v6594_v30  ;;  %v689_v30 = vld [vmem:[%s7308_s29 + $0x390] sm:$0xff]  ;;  %v876_v1 = vpack.c.bf16 %v736_v62, %v729_v61  ;;  %v595_v62 = vld [vmem:[%s7308_s29 + $0xa0] sm:$0xff] }
  0x49   : > { %6023 = vmatprep.subr.bf16.mxu0 %v6595_v41  ;;  %v862_v41 = vpack.c.bf16 %v708_v38, %v701_v37  ;;  %v897_v37 = vpack.c.bf16 %v778_v34, %v771_v33  ;;  %v773_v38 = vld [vmem:[%s7308_s29 + $0x630] sm:$0xff]  ;;  %v679_v34 = vld [vmem:[%s7308_s29 + $0x340] sm:$0xff] }
  0x4b   : > { %1408 = vmatmul.mubr.bf16.gmra.mrb[8].mxu0 %v813_v10  ;;  %v673_v10 = vld [vmem:[%s7308_s29 + $0x310] sm:$0xff] }
  0x4c   : > { %1415 = vmatprep.mubr.bf16.mxu0 %v821_v14  ;;  %6024 = vmatpush3.bf16.msra.mxu0 %v6596_v44  ;;  %v695_v14 = vld [vmem:[%s7308_s29 + $0x3c0] sm:$0xff] }
  0x4d   : > { %1569 = vmatmul.mubr.bf16.gmra.mrb[8].mxu1 %v815_v16  ;;  %6025 = vmatprep.subr.bf16.mxu0 %v6597_v52  ;;  %v848_v16 = vpack.c.bf16 %v680_v12, %v673_v10  ;;  %v856_v20 = vpack.c.bf16 %v695_v14, %v688_v13  ;;  %v737_v52 = vld [vmem:[%s7308_s29 + $0x510] sm:$0xff]  ;;  %v750_v10 = vld [vmem:[%s7308_s29 + $0x578] sm:$0xff] }
  0x4e   : > { %1576 = vmatprep.mubr.bf16.mxu1 %v823_v18  ;;  %v682_v18 = vld [vmem:[%s7308_s29 + $0x358] sm:$0xff]  ;;  %v765_v12 = vld [vmem:[%s7308_s29 + $0x5f0] sm:$0xff] }
  0x4f   : > { %v850_v23 = vpack.c.bf16 %v682_v18, %v675_v17  ;;  %v745_v14 = vld [vmem:[%s7308_s29 + $0x550] sm:$0xff]  ;;  %v760_v17 = vld [vmem:[%s7308_s29 + $0x5c8] sm:$0xff]  ;;  %v767_v18 = vld [vmem:[%s7308_s29 + $0x600] sm:$0xff] }
  0x50   : > { %6026 = vmatpush3.bf16.msra.mxu0 %v6598_v58  ;;  %v877_v58 = vpack.c.bf16 %v737_v52, %v730_v51  ;;  %v794_v51 = vld [vmem:[%s7308_s29 + $0x6d8] sm:$0xff] }
  0x51   : > { %6027 = vmatprep.subr.bf16.mxu0 %v6599_v3  ;;  %v738_v3 = vld [vmem:[%s7308_s29 + $0x518] sm:$0xff] }
  0x52   : > { %v878_v7 = vpack.c.bf16 %v738_v3, %v731_v2  ;;  %v616_v2 = vld [vmem:[%s7308_s29 + $0x148] sm:$0xff] }
  0x53   : > { %1416 = vmatmul.mubr.bf16.gmra.mrb[12].mxu0 %v820_v24  ;;  %v858_v24 = vpack.c.bf16 %v697_v22, %v690_v21  ;;  %v757_v21 = vld [vmem:[%s7308_s29 + $0x5b0] sm:$0xff]  ;;  %v764_v22 = vld [vmem:[%s7308_s29 + $0x5e8] sm:$0xff] }
  0x54   : > { %1423 = vmatprep.mubr.bf16.mxu0 %v828_v26  ;;  %6028 = vmatpush3.bf16.msra.mxu0 %v6600_v5  ;;  %v694_v26 = vld [vmem:[%s7308_s29 + $0x3b8] sm:$0xff] }
  0x55   : > { %1577 = vmatmul.mubr.bf16.gmra.mrb[12].mxu1 %v822_v31  ;;  %6029 = vmatprep.subr.bf16.mxu0 %v6601_v15  ;;  %v855_v29 = vpack.c.bf16 %v694_v26, %v687_v25  ;;  %v696_v31 = vld [vmem:[%s7308_s29 + $0x3c8] sm:$0xff]  ;;  %v746_v5 = vld [vmem:[%s7308_s29 + $0x558] sm:$0xff]  ;;  %v890_v25 = vpack.c.bf16 %v764_v22, %v757_v21  ;;  %v759_v26 = vld [vmem:[%s7308_s29 + $0x5c0] sm:$0xff] }
  0x56   : > { %1584 = vmatprep.mubr.bf16.mxu1 %v830_v32  ;;  %v863_v32 = vpack.c.bf16 %v709_v28, %v702_v27  ;;  %v857_v35 = vpack.c.bf16 %v696_v31, %v689_v30  ;;  %v752_v15 = vld [vmem:[%s7308_s29 + $0x588] sm:$0xff]  ;;  %v766_v27 = vld [vmem:[%s7308_s29 + $0x5f8] sm:$0xff]  ;;  %v781_v30 = vld [vmem:[%s7308_s29 + $0x670] sm:$0xff] }
  0x57   : > { %v892_v31 = vpack.c.bf16 %v766_v27, %v759_v26  ;;  %v651_v22 = vld [vmem:[%s7308_s29 + $0x260] sm:$0xff]  ;;  %v672_v26 = vld [vmem:[%s7308_s29 + $0x308] sm:$0xff] }
  0x58   : > { %6030 = vmatpush3.bf16.msra.mxu0 %v6602_v19  ;;  %v885_v19 = vpack.c.bf16 %v752_v15, %v745_v14  ;;  %v644_v14 = vld [vmem:[%s7308_s29 + $0x228] sm:$0xff] }
  0x5b   : > { %1424 = vmatmul.mubr.bf16.gmra.mrb[16].mxu0 %v827_v39  ;;  %v716_v39 = vld [vmem:[%s7308_s29 + $0x468] sm:$0xff] }
  0x5c   : > { %1431 = vmatprep.mubr.bf16.mxu0 %v835_v42  ;;  %v703_v42 = vld [vmem:[%s7308_s29 + $0x400] sm:$0xff]  ;;  %v870_v44 = vpack.c.bf16 %v723_v40, %v716_v39  ;;  %v780_v39 = vld [vmem:[%s7308_s29 + $0x668] sm:$0xff] }
  0x5d   : > { %1585 = vmatmul.mubr.bf16.gmra.mrb[16].mxu1 %v829_v45  ;;  %v718_v45 = vld [vmem:[%s7308_s29 + $0x478] sm:$0xff]  ;;  %v864_v47 = vpack.c.bf16 %v710_v43, %v703_v42  ;;  %v795_v42 = vld [vmem:[%s7308_s29 + $0x6e0] sm:$0xff]  ;;  %v899_v43 = vpack.c.bf16 %v780_v39, %v773_v38  ;;  %v700_v38 = vld [vmem:[%s7308_s29 + $0x3e8] sm:$0xff] }
  0x5e   : > { %1592 = vmatprep.mubr.bf16.mxu1 %v837_v46  ;;  %v725_v46 = vld [vmem:[%s7308_s29 + $0x4b0] sm:$0xff] }
  0x5f   : > { %v872_v48 = vpack.c.bf16 %v725_v46, %v718_v45  ;;  %v785_v45 = vld [vmem:[%s7308_s29 + $0x690] sm:$0xff]  ;;  %v792_v46 = vld [vmem:[%s7308_s29 + $0x6c8] sm:$0xff] }
  0x60   : > { %v904_v49 = vpack.c.bf16 %v792_v46, %v785_v45  ;;  %v707_v46 = vld [vmem:[%s7308_s29 + $0x420] sm:$0xff] }
  0x63   : > { %1432 = vmatmul.mubr.bf16.gmra.mrb[20].mxu0 %v834_v53  ;;  %v717_v53 = vld [vmem:[%s7308_s29 + $0x470] sm:$0xff] }
  0x64   : > { %1439 = vmatprep.mubr.bf16.mxu0 %v842_v56  ;;  %v732_v56 = vld [vmem:[%s7308_s29 + $0x4e8] sm:$0xff] }
  0x65   : > { %1593 = vmatmul.mubr.bf16.gmra.mrb[20].mxu1 %v836_v59  ;;  %v871_v59 = vpack.c.bf16 %v724_v55, %v717_v53  ;;  %v581_v53 = vld [vmem:[%s7308_s29 + $0x30] sm:$0xff]  ;;  %v906_v55 = vpack.c.bf16 %v794_v51, %v787_v50  ;;  %v728_v50 = vld [vmem:[%s7308_s29 + $0x4c8] sm:$0xff] }
  0x66   : > { %1600 = vmatprep.mubr.bf16.mxu1 %v844_v60  ;;  %v879_v60 = vpack.c.bf16 %v739_v57, %v732_v56  ;;  %v579_v57 = vld [vmem:[%s7308_s29 + $0x20] sm:$0xff] }
  0x6b   : > { %1440 = vmatmul.mubr.bf16.gmra.mrb[24].mxu0 %v841_v4  ;;  %v884_v4 = vpack.c.bf16 %v751_v0, %v744_v63  ;;  %v602_v63 = vld [vmem:[%s7308_s29 + $0xd8] sm:$0xff] }
  0x6c   : > { %1447 = vmatprep.mubr.bf16.mxu0 %v849_v6  ;;  %v753_v6 = vld [vmem:[%s7308_s29 + $0x590] sm:$0xff]  ;;  %v812_v3 = vpack.c.bf16 %v602_v63, %v595_v62  ;;  %v756_v62 = vld [vmem:[%s7308_s29 + $0x5a8] sm:$0xff] }
  0x6d   : > { %1601 = vmatmul.mubr.bf16.gmra.mrb[24].mxu1 %v843_v9  ;;  %v886_v8 = vpack.c.bf16 %v753_v6, %v746_v5  ;;  %v743_v9 = vld [vmem:[%s7308_s29 + $0x540] sm:$0xff]  ;;  %v593_v5 = vld [vmem:[%s7308_s29 + $0x90] sm:$0xff]  ;;  %v600_v6 = vld [vmem:[%s7308_s29 + $0xc8] sm:$0xff] }
  0x6e   : > { %1608 = vmatprep.mubr.bf16.mxu1 %v851_v11  ;;  %v758_v11 = vld [vmem:[%s7308_s29 + $0x5b8] sm:$0xff]  ;;  %v883_v13 = vpack.c.bf16 %v750_v10, %v743_v9  ;;  %v810_v9 = vpack.c.bf16 %v600_v6, %v593_v5  ;;  %v623_v10 = vld [vmem:[%s7308_s29 + $0x180] sm:$0xff] }
  0x6f   : > { %v763_v6 = vld [vmem:[%s7308_s29 + $0x5e0] sm:$0xff] }
  0x73   : > { %1448 = vmatmul.mubr.bf16.gmra.mrb[28].mxu0 %v848_v16  ;;  %v891_v16 = vpack.c.bf16 %v765_v12, %v758_v11  ;;  %v630_v11 = vld [vmem:[%s7308_s29 + $0x1b8] sm:$0xff] }
  0x74   : > { %1455 = vmatprep.mubr.bf16.mxu0 %v856_v20  ;;  %v893_v20 = vpack.c.bf16 %v767_v18, %v760_v17  ;;  %v826_v15 = vpack.c.bf16 %v630_v11, %v623_v10  ;;  %v607_v17 = vld [vmem:[%s7308_s29 + $0x100] sm:$0xff]  ;;  %v614_v18 = vld [vmem:[%s7308_s29 + $0x138] sm:$0xff]  ;;  %v777_v10 = vld [vmem:[%s7308_s29 + $0x650] sm:$0xff] }
  0x75   : > { %1609 = vmatmul.mubr.bf16.gmra.mrb[28].mxu1 %v850_v23  ;;  %v772_v23 = vld [vmem:[%s7308_s29 + $0x628] sm:$0xff]  ;;  %v817_v21 = vpack.c.bf16 %v614_v18, %v607_v17  ;;  %v699_v17 = vld [vmem:[%s7308_s29 + $0x3e0] sm:$0xff] }
  0x76   : > { %1616 = vmatprep.mubr.bf16.mxu1 %v858_v24  ;;  %v779_v24 = vld [vmem:[%s7308_s29 + $0x660] sm:$0xff]  ;;  %v784_v11 = vld [vmem:[%s7308_s29 + $0x688] sm:$0xff] }
  0x77   : > { %v898_v28 = vpack.c.bf16 %v779_v24, %v772_v23  ;;  %v658_v23 = vld [vmem:[%s7308_s29 + $0x298] sm:$0xff] }
  0x78   : > { %v840_v27 = vpack.c.bf16 %v658_v23, %v651_v22  ;;  %v691_v23 = vld [vmem:[%s7308_s29 + $0x3a0] sm:$0xff] }
  0x7b   : > { %1456 = vmatmul.mubr.bf16.gmra.mrb[32].mxu0 %v855_v29  ;;  %v774_v29 = vld [vmem:[%s7308_s29 + $0x638] sm:$0xff] }
  0x7c   : > { %1463 = vmatprep.mubr.bf16.mxu0 %v863_v32  ;;  %v900_v32 = vpack.c.bf16 %v781_v30, %v774_v29  ;;  %v621_v29 = vld [vmem:[%s7308_s29 + $0x170] sm:$0xff]  ;;  %v628_v30 = vld [vmem:[%s7308_s29 + $0x1a8] sm:$0xff] }
  0x7d   : > { %1617 = vmatmul.mubr.bf16.gmra.mrb[32].mxu1 %v857_v35  ;;  %v786_v35 = vld [vmem:[%s7308_s29 + $0x698] sm:$0xff]  ;;  %v824_v33 = vpack.c.bf16 %v628_v30, %v621_v29  ;;  %v705_v29 = vld [vmem:[%s7308_s29 + $0x410] sm:$0xff]  ;;  %v712_v30 = vld [vmem:[%s7308_s29 + $0x448] sm:$0xff] }
  0x7e   : > { %1624 = vmatprep.mubr.bf16.mxu1 %v865_v36  ;;  %v793_v36 = vld [vmem:[%s7308_s29 + $0x6d0] sm:$0xff] }
  0x7f   : > { %v905_v40 = vpack.c.bf16 %v793_v36, %v786_v35  ;;  %v686_v35 = vld [vmem:[%s7308_s29 + $0x378] sm:$0xff] }
  0x80   : > { %v854_v39 = vpack.c.bf16 %v686_v35, %v679_v34  ;;  %v719_v35 = vld [vmem:[%s7308_s29 + $0x480] sm:$0xff] }
  0x83   : > { %1464 = vmatmul.mubr.bf16.gmra.mrb[36].mxu0 %v862_v41  ;;  %v788_v41 = vld [vmem:[%s7308_s29 + $0x6a8] sm:$0xff] }
  0x84   : > { %1471 = vmatprep.mubr.bf16.mxu0 %v870_v44  ;;  %v907_v44 = vpack.c.bf16 %v795_v42, %v788_v41  ;;  %v635_v41 = vld [vmem:[%s7308_s29 + $0x1e0] sm:$0xff]  ;;  %v642_v42 = vld [vmem:[%s7308_s29 + $0x218] sm:$0xff] }
  0x85   : > { %1625 = vmatmul.mubr.bf16.gmra.mrb[36].mxu1 %v864_v47  ;;  %v580_v47 = vld [vmem:[%s7308_s29 + $0x28] sm:$0xff]  ;;  %v831_v45 = vpack.c.bf16 %v642_v42, %v635_v41  ;;  %v733_v42 = vld [vmem:[%s7308_s29 + $0x4f0] sm:$0xff] }
  0x86   : > { %1632 = vmatprep.mubr.bf16.mxu1 %v872_v48  ;;  %v587_v48 = vld [vmem:[%s7308_s29 + $0x60] sm:$0xff] }
  0x87   : > { %v804_v52 = vpack.c.bf16 %v587_v48, %v580_v47  ;;  %v714_v47 = vld [vmem:[%s7308_s29 + $0x458] sm:$0xff] }
  0x88   : > { %v868_v51 = vpack.c.bf16 %v714_v47, %v707_v46  ;;  %v7605_v47 = vld [vmem:[%s10791_s4] ss:$0 sm:$0xff] }
  0x8b   : > { %1472 = vmatmul.mubr.bf16.gmra.mrb[40].mxu0 %v869_v54  ;;  %v588_v54 = vld [vmem:[%s7308_s29 + $0x68] sm:$0xff] }
  0x8c   : > { %1479 = vmatprep.mubr.bf16.mxu0 %v877_v58  ;;  %v805_v56 = vpack.c.bf16 %v588_v54, %v581_v53  ;;  %v586_v58 = vld [vmem:[%s7308_s29 + $0x58] sm:$0xff]  ;;  %v649_v53 = vld [vmem:[%s7308_s29 + $0x250] sm:$0xff]  ;;  %v656_v54 = vld [vmem:[%s7308_s29 + $0x288] sm:$0xff] }
  0x8d   : > { %1633 = vmatmul.mubr.bf16.gmra.mrb[40].mxu1 %v871_v59  ;;  %v594_v59 = vld [vmem:[%s7308_s29 + $0x98] sm:$0xff]  ;;  %v803_v61 = vpack.c.bf16 %v586_v58, %v579_v57  ;;  %v838_v57 = vpack.c.bf16 %v656_v54, %v649_v53  ;;  %v735_v58 = vld [vmem:[%s7308_s29 + $0x500] sm:$0xff] }
  0x8e   : > { %1640 = vmatprep.mubr.bf16.mxu1 %v879_v60  ;;  %v601_v60 = vld [vmem:[%s7308_s29 + $0xd0] sm:$0xff] }
  0x8f   : > { %v811_v0 = vpack.c.bf16 %v601_v60, %v594_v59  ;;  %v742_v59 = vld [vmem:[%s7308_s29 + $0x538] sm:$0xff] }
  0x90   : > { %v882_v63 = vpack.c.bf16 %v742_v59, %v735_v58 }
  0x93   : > { %1480 = vmatmul.mubr.bf16.gmra.mrb[44].mxu0 %v876_v1  ;;  %v609_v1 = vld [vmem:[%s7308_s29 + $0x110] sm:$0xff] }
  0x94   : > { %1487 = vmatprep.mubr.bf16.mxu0 %v884_v4  ;;  %v819_v4 = vpack.c.bf16 %v616_v2, %v609_v1  ;;  %v663_v1 = vld [vmem:[%s7308_s29 + $0x2c0] sm:$0xff]  ;;  %v670_v2 = vld [vmem:[%s7308_s29 + $0x2f8] sm:$0xff] }
  0x95   : > { %1641 = vmatmul.mubr.bf16.gmra.mrb[44].mxu1 %v878_v7  ;;  %v608_v7 = vld [vmem:[%s7308_s29 + $0x108] sm:$0xff]  ;;  %v845_v5 = vpack.c.bf16 %v670_v2, %v663_v1  ;;  %v762_v2 = vld [vmem:[%s7308_s29 + $0x5d8] sm:$0xff] }
  0x96   : > { %1648 = vmatprep.mubr.bf16.mxu1 %v886_v8  ;;  %v615_v8 = vld [vmem:[%s7308_s29 + $0x140] sm:$0xff] }
  0x97   : > { %v818_v12 = vpack.c.bf16 %v615_v8, %v608_v7  ;;  %v770_v7 = vld [vmem:[%s7308_s29 + $0x618] sm:$0xff]  ;;  %v6603_v8 = vld [vmem:[%s10792_s5] sm:$0xff]  }
  0x98   : > { %6232 = vmatprep.subr.bf16.mxu1 %v6603_v8 }
  0x9b   : > { %1488 = vmatmul.mubr.bf16.gmra.mrb[48].mxu0 %v883_v13  ;;  %v637_v13 = vld [vmem:[%s7308_s29 + $0x1f0] sm:$0xff] }
  0x9c   : > { %1495 = vmatprep.mubr.bf16.mxu0 %v891_v16  ;;  %v833_v16 = vpack.c.bf16 %v644_v14, %v637_v13  ;;  %v903_v13 = vpack.c.bf16 %v784_v11, %v777_v10  ;;  %v677_v14 = vld [vmem:[%s7308_s29 + $0x330] sm:$0xff] }
  0x9d   : > { %1649 = vmatmul.mubr.bf16.gmra.mrb[48].mxu1 %v885_v19  ;;  %v622_v19 = vld [vmem:[%s7308_s29 + $0x178] sm:$0xff] }
  0x9e   : > { %1656 = vmatprep.mubr.bf16.mxu1 %v893_v20  ;;  %v629_v20 = vld [vmem:[%s7308_s29 + $0x1b0] sm:$0xff] }
  0x9f   : > { %v825_v24 = vpack.c.bf16 %v629_v20, %v622_v19  ;;  %v791_v19 = vld [vmem:[%s7308_s29 + $0x6c0] sm:$0xff]  ;;  %v798_v20 = vld [vmem:[%s7308_s29 + $0x6f8] sm:$0xff] }
  0xa0   : > { %v910_v22 = vpack.c.bf16 %v798_v20, %v791_v19  ;;  %v761_v20 = vld [vmem:[%s7308_s29 + $0x5d0] sm:$0xff] }
  0xa3   : > { %1496 = vmatmul.mubr.bf16.gmra.mrb[52].mxu0 %v890_v25  ;;  %v665_v25 = vld [vmem:[%s7308_s29 + $0x2d0] sm:$0xff] }
  0xa4   : > { %1503 = vmatprep.mubr.bf16.mxu0 %v898_v28  ;;  %v847_v28 = vpack.c.bf16 %v672_v26, %v665_v25  ;;  %v706_v25 = vld [vmem:[%s7308_s29 + $0x418] sm:$0xff]  ;;  %v713_v26 = vld [vmem:[%s7308_s29 + $0x450] sm:$0xff] }
  0xa5   : > { %1657 = vmatmul.mubr.bf16.gmra.mrb[52].mxu1 %v892_v31  ;;  %v636_v31 = vld [vmem:[%s7308_s29 + $0x1e8] sm:$0xff] }
  0xa6   : > { %1664 = vmatprep.mubr.bf16.mxu1 %v900_v32  ;;  %v643_v32 = vld [vmem:[%s7308_s29 + $0x220] sm:$0xff] }
  0xa7   : > { %v832_v36 = vpack.c.bf16 %v643_v32, %v636_v31  ;;  %v720_v31 = vld [vmem:[%s7308_s29 + $0x488] sm:$0xff]  ;;  %v727_v32 = vld [vmem:[%s7308_s29 + $0x4c0] sm:$0xff] }
  0xa8   : > { %v874_v34 = vpack.c.bf16 %v727_v32, %v720_v31 }
  0xab   : > { %1504 = vmatmul.mubr.bf16.gmra.mrb[56].mxu0 %v897_v37  ;;  %v693_v37 = vld [vmem:[%s7308_s29 + $0x3b0] sm:$0xff] }
  0xac   : > { %1511 = vmatprep.mubr.bf16.mxu0 %v905_v40  ;;  %v861_v40 = vpack.c.bf16 %v700_v38, %v693_v37  ;;  %v734_v37 = vld [vmem:[%s7308_s29 + $0x4f8] sm:$0xff]  ;;  %v741_v38 = vld [vmem:[%s7308_s29 + $0x530] sm:$0xff] }
  0xad   : > { %1665 = vmatmul.mubr.bf16.gmra.mrb[56].mxu1 %v899_v43  ;;  %v650_v43 = vld [vmem:[%s7308_s29 + $0x258] sm:$0xff]  ;;  %v881_v41 = vpack.c.bf16 %v741_v38, %v734_v37 }
  0xae   : > { %1672 = vmatprep.mubr.bf16.mxu1 %v907_v44  ;;  %v657_v44 = vld [vmem:[%s7308_s29 + $0x290] sm:$0xff] }
  0xaf   : > { %v839_v48 = vpack.c.bf16 %v657_v44, %v650_v43  ;;  %v740_v43 = vld [vmem:[%s7308_s29 + $0x528] sm:$0xff] }
  0xb0   : > { %v748_v44 = vld [vmem:[%s7308_s29 + $0x568] sm:$0xff] }
  0xb3   : > { %1512 = vmatmul.mubr.bf16.gmra.mrb[60].mxu0 %v904_v49  ;;  %v721_v49 = vld [vmem:[%s7308_s29 + $0x490] sm:$0xff] }
  0xb4   : > { %1713 = vmatprep.mubr.bf16.mxu0 %v804_v52  ;;  %v875_v52 = vpack.c.bf16 %v728_v50, %v721_v49  ;;  %v880_v49 = vpack.c.bf16 %v740_v43, %v733_v42  ;;  %v775_v42 = vld [vmem:[%s7308_s29 + $0x640] sm:$0xff]  ;;  %v782_v43 = vld [vmem:[%s7308_s29 + $0x678] sm:$0xff] }
  0xb5   : > { %1673 = vmatmul.mubr.bf16.gmra.mrb[60].mxu1 %v906_v55  ;;  %v664_v55 = vld [vmem:[%s7308_s29 + $0x2c8] sm:$0xff] }
  0xb6   : > { %6200 = vmatprep.mubr.msk.bf16.mxu1 %vm1310_vm0, %v805_v56  ;;  %v671_v56 = vld [vmem:[%s7308_s29 + $0x300] sm:$0xff] }
  0xb7   : > { %v846_v60 = vpack.c.bf16 %v671_v56, %v664_v55 }
  0xbb   : > { %1714 = vmatmul.mubr.bf16.vlgmr.msra.gmra.mrb[64].mxu0 %v803_v61  ;;  %v749_v61 = vld [vmem:[%s7308_s29 + $0x570] sm:$0xff] }
  0xbc   : > { %1721 = vmatprep.mubr.bf16.mxu0 %v811_v0  ;;  %v889_v0 = vpack.c.bf16 %v756_v62, %v749_v61  ;;  %v747_v62 = vld [vmem:[%s7308_s29 + $0x560] sm:$0xff] }
  0xbd   : > { %6201 = vmatmul.mubr.msk.bf16.vlgmr.msra.gmra.mrb[64].mxu1 %vm1310_vm0, %v812_v3  ;;  %v678_v3 = vld [vmem:[%s7308_s29 + $0x338] sm:$0xff] }
  0xbe   : > { %6204 = vmatprep.mubr.msk.bf16.mxu1 %vm1310_vm0, %v819_v4  ;;  %v685_v4 = vld [vmem:[%s7308_s29 + $0x370] sm:$0xff]  ;;  %6233 = vmatpush3.bf16.msra.mxu1 %v6603_v8 }
  0xc3   : > { %1722 = vmatmul.mubr.bf16.gmra.mrb[68].mxu0 %v810_v9  ;;  %v853_v9 = vpack.c.bf16 %v685_v4, %v678_v3  ;;  %v769_v3 = vld [vmem:[%s7308_s29 + $0x610] sm:$0xff] }
  0xc4   : > { %1729 = vmatprep.mubr.bf16.mxu0 %v818_v12  ;;  %v896_v12 = vpack.c.bf16 %v770_v7, %v763_v6  ;;  %v895_v10 = vpack.c.bf16 %v769_v3, %v762_v2  ;;  %v789_v2 = vld [vmem:[%s7308_s29 + $0x6b0] sm:$0xff]  ;;  %v796_v3 = vld [vmem:[%s7308_s29 + $0x6e8] sm:$0xff] }
  0xc5   : > { %6205 = vmatmul.mubr.msk.bf16.gmra.mrb[68].mxu1 %vm1310_vm0, %v826_v15  ;;  %v684_v15 = vld [vmem:[%s7308_s29 + $0x368] sm:$0xff] }
  0xc6   : > { %6208 = vmatprep.mubr.msk.bf16.mxu1 %vm1310_vm0, %v833_v16  ;;  %v692_v16 = vld [vmem:[%s7308_s29 + $0x3a8] sm:$0xff]  ;;  %v852_v18 = vpack.c.bf16 %v684_v15, %v677_v14 }
  0xcb   : > { %1730 = vmatmul.mubr.bf16.gmra.mrb[72].mxu0 %v817_v21  ;;  %v860_v21 = vpack.c.bf16 %v699_v17, %v692_v16 }
  0xcc   : > { %1737 = vmatprep.mubr.bf16.mxu0 %v825_v24  ;;  %v698_v24 = vld [vmem:[%s7308_s29 + $0x3d8] sm:$0xff] }
  0xcd   : > { %6209 = vmatmul.mubr.msk.bf16.gmra.mrb[72].mxu1 %vm1310_vm0, %v840_v27  ;;  %v859_v27 = vpack.c.bf16 %v698_v24, %v691_v23  ;;  %v776_v24 = vld [vmem:[%s7308_s29 + $0x648] sm:$0xff] }
  0xce   : > { %6212 = vmatprep.mubr.msk.bf16.mxu1 %vm1310_vm0, %v847_v28  ;;  %v867_v28 = vpack.c.bf16 %v713_v26, %v706_v25  ;;  %v783_v25 = vld [vmem:[%s7308_s29 + $0x680] sm:$0xff] }
  0xcf   : > { %v902_v32 = vpack.c.bf16 %v783_v25, %v776_v24 }
  0xd3   : > { %1738 = vmatmul.mubr.bf16.gmra.mrb[76].mxu0 %v824_v33  ;;  %v866_v33 = vpack.c.bf16 %v712_v30, %v705_v29 }
  0xd4   : > { %1745 = vmatprep.mubr.bf16.mxu0 %v832_v36  ;;  %v726_v36 = vld [vmem:[%s7308_s29 + $0x4b8] sm:$0xff] }
  0xd5   : > { %6213 = vmatmul.mubr.msk.bf16.gmra.mrb[76].mxu1 %vm1310_vm0, %v854_v39  ;;  %v873_v39 = vpack.c.bf16 %v726_v36, %v719_v35 }
  0xd6   : > { %6216 = vmatprep.mubr.msk.bf16.mxu1 %vm1310_vm0, %v861_v40  ;;  %v6604_v40 = vld [vmem:[%s10792_s5 + $0x8] sm:$0xff]  }
  0xd7   : > { %6234 = vmatprep.subr.bf16.mxu1 %v6604_v40 }
  0xd8   : > { %6235 = vmatpush3.bf16.msra.mxu1 %v6604_v40 }
  0xdb   : > { %1746 = vmatmul.mubr.bf16.gmra.mrb[80].mxu0 %v831_v45  ;;  %v755_v45 = vld [vmem:[%s7308_s29 + $0x5a0] sm:$0xff] }
  0xdc   : > { %1753 = vmatprep.mubr.bf16.mxu0 %v839_v48 }
  0xdd   : > { %6217 = vmatmul.mubr.msk.bf16.gmra.mrb[80].mxu1 %vm1310_vm0, %v868_v51 }
  0xde   : > { %6220 = vmatprep.mubr.msk.bf16.mxu1 %vm1310_vm0, %v875_v52  ;;  %v888_v52 = vpack.c.bf16 %v755_v45, %v748_v44 }
  0xe3   : > { %1754 = vmatmul.mubr.bf16.gmra.mrb[84].mxu0 %v838_v57 }
  0xe4   : > { %1761 = vmatprep.mubr.bf16.mxu0 %v846_v60 }
  0xe5   : > { %6221 = vmatmul.mubr.msk.bf16.gmra.mrb[84].mxu1 %vm1310_vm0, %v882_v63  ;;  %v754_v63 = vld [vmem:[%s7308_s29 + $0x598] sm:$0xff] }
  0xe6   : > { %6224 = vmatprep.mubr.msk.bf16.mxu1 %vm1310_vm0, %v889_v0  ;;  %v887_v7 = vpack.c.bf16 %v754_v63, %v747_v62 }
  0xeb   : > { %1762 = vmatmul.mubr.bf16.gmra.mrb[88].mxu0 %v845_v5 }
  0xec   : > { %1769 = vmatprep.mubr.bf16.mxu0 %v853_v9 }
  0xed   : > { %6225 = vmatmul.mubr.msk.bf16.gmra.mrb[88].mxu1 %vm1310_vm0, %v896_v12 }
  0xee   : > { %6228 = vmatprep.mubr.msk.bf16.mxu1 %vm1310_vm0, %v903_v13 }
  0xf3   : > { %1770 = vmatmul.mubr.bf16.gmra.mrb[92].mxu0 %v852_v18 }
  0xf4   : > { %1777 = vmatprep.mubr.bf16.mxu0 %v860_v21  ;;  %v768_v21 = vld [vmem:[%s7308_s29 + $0x608] sm:$0xff] }
  0xf5   : > { %6229 = vmatmul.mubr.msk.bf16.gmra.mrb[92].mxu1 %vm1310_vm0, %v910_v22  ;;  %v894_v29 = vpack.c.bf16 %v768_v21, %v761_v20 }
  0xfb   : > { %1778 = vmatmul.mubr.bf16.gmra.mrb[96].mxu0 %v859_v27 }
  0xfc   : > { %1785 = vmatprep.mubr.bf16.mxu0 %v867_v28 }
 0x103   : > { %1786 = vmatmul.mubr.bf16.gmra.mrb[100].mxu0 %v866_v33 }
 0x104   : > { %1793 = vmatprep.mubr.bf16.mxu0 %v874_v34 }
 0x10b   : > { %1794 = vmatmul.mubr.bf16.gmra.mrb[104].mxu0 %v873_v39 }
 0x10c   : > { %1801 = vmatprep.mubr.bf16.mxu0 %v881_v41 }
 0x10e   : > { %v5807_v46 = vpop.f32.mrb[0].mxu0 }
 0x10f   : > { %v5808_v48 = vpop.f32.mrb[1].mxu0 }
 0x110   : > { %v5809_v50 = vadd.f32 %v5808_v48, %v5807_v46  ;;  %v5810_v51 = vpop.f32.mrb[2].mxu0  ;;  %v5919_v53 = vpop.f32.mrb[0].mxu1  ;;  %v790_v46 = vld [vmem:[%s7308_s29 + $0x6b8] sm:$0xff]  ;;  %v797_v48 = vld [vmem:[%s7308_s29 + $0x6f0] sm:$0xff] }
 0x111   : > { %v5811_v54 = vpop.f32.mrb[3].mxu0  ;;  %v5920_v57 = vpop.f32.mrb[1].mxu1 }
 0x112   : > { %v1394_v55 = vadd.f32 %v5809_v50, %v7605_v47  ;;  %v5812_v56 = vadd.f32 %v5811_v54, %v5810_v51  ;;  %v5921_v58 = vadd.f32 %v5920_v57, %v5919_v53  ;;  %v5922_v59 = vpop.f32.mrb[2].mxu1 }
 0x113   : > { %1802 = vmatmul.mubr.bf16.gmra.mrb[108].mxu0 %v880_v49  ;;  %v5923_v61 = vpop.f32.mrb[3].mxu1 }
 0x114   : > { %v1397_v60 = vadd.f32 %v5812_v56, %v7605_v47  ;;  %1809 = vmatprep.mubr.bf16.mxu0 %v888_v52  ;;  %v7611_v0 = vadd.f32 %v5921_v58, %v1394_v55  ;;  %v5924_v1 = vadd.f32 %v5923_v61, %v5922_v59  ;;  %v901_v52 = vpack.c.bf16 %v782_v43, %v775_v42 }
 0x115   : > { %v909_v55 = vpack.c.bf16 %v797_v48, %v790_v46 }
 0x116   : > { %v5813_v4 = vpop.f32.mrb[4].mxu0  ;;  %v7615_v5 = vadd.f32 %v5924_v1, %v1397_v60 }
 0x117   : > { %v5814_v6 = vpop.f32.mrb[5].mxu0 }
 0x118   : > { %v5815_v8 = vadd.f32 %v5814_v6, %v5813_v4  ;;  %v5816_v9 = vpop.f32.mrb[6].mxu0  ;;  %v5925_v11 = vpop.f32.mrb[4].mxu1 }
 0x119   : > { %v5817_v12 = vpop.f32.mrb[7].mxu0  ;;  %v5926_v15 = vpop.f32.mrb[5].mxu1 }
 0x11a   : > { %v1402_v13 = vadd.f32 %v5815_v8, %v7605_v47  ;;  %v5818_v14 = vadd.f32 %v5817_v12, %v5816_v9  ;;  %v5927_v16 = vadd.f32 %v5926_v15, %v5925_v11  ;;  %v5928_v17 = vpop.f32.mrb[6].mxu1 }
 0x11b   : > { %1810 = vmatmul.mubr.bf16.gmra.mrb[112].mxu0 %v887_v7  ;;  %v5929_v19 = vpop.f32.mrb[7].mxu1 }
 0x11c   : > { %v1405_v18 = vadd.f32 %v5818_v14, %v7605_v47  ;;  %1817 = vmatprep.mubr.bf16.mxu0 %v895_v10  ;;  %v7621_v22 = vadd.f32 %v5927_v16, %v1402_v13  ;;  %v5930_v23 = vadd.f32 %v5929_v19, %v5928_v17  ;;  %v908_v10 = vpack.c.bf16 %v796_v3, %v789_v2 }
 0x11e   : > { %v5819_v26 = vpop.f32.mrb[8].mxu0  ;;  %v7625_v27 = vadd.f32 %v5930_v23, %v1405_v18 }
 0x11f   : > { %v5820_v28 = vpop.f32.mrb[9].mxu0 }
 0x120   : > { %v5821_v30 = vadd.f32 %v5820_v28, %v5819_v26  ;;  %v5822_v31 = vpop.f32.mrb[10].mxu0  ;;  %v5931_v33 = vpop.f32.mrb[8].mxu1 }
 0x121   : > { %v5823_v34 = vpop.f32.mrb[11].mxu0  ;;  %v5932_v37 = vpop.f32.mrb[9].mxu1 }
 0x122   : > { %v1410_v35 = vadd.f32 %v5821_v30, %v7605_v47  ;;  %v5824_v36 = vadd.f32 %v5823_v34, %v5822_v31  ;;  %v5933_v38 = vadd.f32 %v5932_v37, %v5931_v33  ;;  %v5934_v39 = vpop.f32.mrb[10].mxu1 }
 0x123   : > { %1818 = vmatmul.mubr.bf16.gmra.mrb[116].mxu0 %v894_v29  ;;  %v5935_v41 = vpop.f32.mrb[11].mxu1 }
 0x124   : > { %v1413_v40 = vadd.f32 %v5824_v36, %v7605_v47  ;;  %1825 = vmatprep.mubr.bf16.mxu0 %v902_v32  ;;  %v7631_v44 = vadd.f32 %v5933_v38, %v1410_v35  ;;  %v5936_v45 = vadd.f32 %v5935_v41, %v5934_v39 }
 0x126   : > { %v5825_v49 = vpop.f32.mrb[12].mxu0  ;;  %v7635_v50 = vadd.f32 %v5936_v45, %v1413_v40 }
 0x127   : > { %v5826_v51 = vpop.f32.mrb[13].mxu0 }
 0x128   : > { %v5827_v53 = vadd.f32 %v5826_v51, %v5825_v49  ;;  %v5828_v54 = vpop.f32.mrb[14].mxu0  ;;  %v5937_v56 = vpop.f32.mrb[12].mxu1 }
 0x129   : > { %v5829_v57 = vpop.f32.mrb[15].mxu0  ;;  %v5938_v60 = vpop.f32.mrb[13].mxu1 }
 0x12a   : > { %v1418_v58 = vadd.f32 %v5827_v53, %v7605_v47  ;;  %v5830_v59 = vadd.f32 %v5829_v57, %v5828_v54  ;;  %v5939_v61 = vadd.f32 %v5938_v60, %v5937_v56  ;;  %v5940_v62 = vpop.f32.mrb[14].mxu1 }
 0x12b   : > { %1826 = vmatmul.mubr.bf16.gmra.mrb[120].mxu0 %v901_v52  ;;  %v5941_v1 = vpop.f32.mrb[15].mxu1 }
 0x12c   : > { %v1421_v63 = vadd.f32 %v5830_v59, %v7605_v47  ;;  %1833 = vmatprep.mubr.bf16.mxu0 %v909_v55  ;;  %v7641_v4 = vadd.f32 %v5939_v61, %v1418_v58  ;;  %v5942_v6 = vadd.f32 %v5941_v1, %v5940_v62 }
 0x12e   : > { %v5831_v7 = vpop.f32.mrb[16].mxu0  ;;  %v7643_v8 = vadd.f32 %v5942_v6, %v1421_v63 }
 0x12f   : > { %v5832_v9 = vpop.f32.mrb[17].mxu0 }
 0x130   : > { %v5833_v11 = vadd.f32 %v5832_v9, %v5831_v7  ;;  %v5834_v12 = vpop.f32.mrb[18].mxu0  ;;  %v5943_v13 = vpop.f32.mrb[16].mxu1 }
 0x131   : > { %v5835_v14 = vpop.f32.mrb[19].mxu0  ;;  %v5944_v17 = vpop.f32.mrb[17].mxu1 }
 0x132   : > { %v1426_v15 = vadd.f32 %v5833_v11, %v7605_v47  ;;  %v5836_v16 = vadd.f32 %v5835_v14, %v5834_v12  ;;  %v5945_v18 = vadd.f32 %v5944_v17, %v5943_v13  ;;  %v5946_v19 = vpop.f32.mrb[18].mxu1 }
 0x133   : > { %1834 = vmatmul.mubr.bf16.gmra.mrb[124].mxu0 %v908_v10  ;;  %v5947_v21 = vpop.f32.mrb[19].mxu1 }
 0x134   : > { %v1429_v20 = vadd.f32 %v5836_v16, %v7605_v47  ;;  %v7647_v23 = vadd.f32 %v5945_v18, %v1426_v15  ;;  %v5948_v24 = vadd.f32 %v5947_v21, %v5946_v19 }
 0x136   : > { %v5837_v25 = vpop.f32.mrb[20].mxu0  ;;  %v7649_v26 = vadd.f32 %v5948_v24, %v1429_v20 }
 0x137   : > { %v5838_v28 = vpop.f32.mrb[21].mxu0 }
 0x138   : > { %v5839_v29 = vadd.f32 %v5838_v28, %v5837_v25  ;;  %v5840_v30 = vpop.f32.mrb[22].mxu0  ;;  %v5949_v31 = vpop.f32.mrb[20].mxu1 }
 0x139   : > { %v5841_v32 = vpop.f32.mrb[23].mxu0  ;;  %v5950_v35 = vpop.f32.mrb[21].mxu1 }
 0x13a   : > { %v1434_v33 = vadd.f32 %v5839_v29, %v7605_v47  ;;  %v5842_v34 = vadd.f32 %v5841_v32, %v5840_v30  ;;  %v5951_v36 = vadd.f32 %v5950_v35, %v5949_v31  ;;  %v5952_v37 = vpop.f32.mrb[22].mxu1 }
 0x13b   : > { %v5953_v39 = vpop.f32.mrb[23].mxu1 }
 0x13c   : > { %v1437_v38 = vadd.f32 %v5842_v34, %v7605_v47  ;;  %v7653_v40 = vadd.f32 %v5951_v36, %v1434_v33  ;;  %v5954_v41 = vadd.f32 %v5953_v39, %v5952_v37 }
 0x13e   : > { %v5843_v42 = vpop.f32.mrb[24].mxu0  ;;  %v7655_v43 = vadd.f32 %v5954_v41, %v1437_v38 }
 0x13f   : > { %v5844_v45 = vpop.f32.mrb[25].mxu0 }
 0x140   : > { %v5845_v46 = vadd.f32 %v5844_v45, %v5843_v42  ;;  %v5846_v48 = vpop.f32.mrb[26].mxu0  ;;  %v5955_v49 = vpop.f32.mrb[24].mxu1 }
 0x141   : > { %v5847_v51 = vpop.f32.mrb[27].mxu0  ;;  %v5956_v54 = vpop.f32.mrb[25].mxu1 }
 0x142   : > { %v1442_v52 = vadd.f32 %v5845_v46, %v7605_v47  ;;  %v5848_v53 = vadd.f32 %v5847_v51, %v5846_v48  ;;  %v5957_v55 = vadd.f32 %v5956_v54, %v5955_v49  ;;  %v5958_v56 = vpop.f32.mrb[26].mxu1 }
 0x143   : > { %v5959_v58 = vpop.f32.mrb[27].mxu1 }
 0x144   : > { %v1445_v57 = vadd.f32 %v5848_v53, %v7605_v47  ;;  %v7659_v59 = vadd.f32 %v5957_v55, %v1442_v52  ;;  %v5960_v60 = vadd.f32 %v5959_v58, %v5958_v56 }
 0x146   : > { %v5849_v61 = vpop.f32.mrb[28].mxu0  ;;  %v7661_v62 = vadd.f32 %v5960_v60, %v1445_v57 }
 0x147   : > { %v5850_v63 = vpop.f32.mrb[29].mxu0 }
 0x148   : > { %v5851_v1 = vadd.f32 %v5850_v63, %v5849_v61  ;;  %v5852_v2 = vpop.f32.mrb[30].mxu0  ;;  %v5961_v3 = vpop.f32.mrb[28].mxu1 }
 0x149   : > { %v5853_v6 = vpop.f32.mrb[31].mxu0  ;;  %v5962_v10 = vpop.f32.mrb[29].mxu1 }
 0x14a   : > { %v1450_v7 = vadd.f32 %v5851_v1, %v7605_v47  ;;  %v5854_v9 = vadd.f32 %v5853_v6, %v5852_v2  ;;  %v5963_v11 = vadd.f32 %v5962_v10, %v5961_v3  ;;  %v5964_v12 = vpop.f32.mrb[30].mxu1 }
 0x14b   : > { %v5965_v14 = vpop.f32.mrb[31].mxu1 }
 0x14c   : > { %v1453_v13 = vadd.f32 %v5854_v9, %v7605_v47  ;;  %v7665_v15 = vadd.f32 %v5963_v11, %v1450_v7  ;;  %v5966_v16 = vadd.f32 %v5965_v14, %v5964_v12 }
 0x14e   : > { %v5855_v17 = vpop.f32.mrb[32].mxu0  ;;  %v7667_v18 = vadd.f32 %v5966_v16, %v1453_v13 }
 0x14f   : > { %v5856_v19 = vpop.f32.mrb[33].mxu0 }
 0x150   : > { %v5857_v20 = vadd.f32 %v5856_v19, %v5855_v17  ;;  %v5858_v21 = vpop.f32.mrb[34].mxu0  ;;  %v5967_v24 = vpop.f32.mrb[32].mxu1 }
 0x151   : > { %v5859_v25 = vpop.f32.mrb[35].mxu0  ;;  %v5968_v30 = vpop.f32.mrb[33].mxu1 }
 0x152   : > { %v1458_v28 = vadd.f32 %v5857_v20, %v7605_v47  ;;  %v5860_v29 = vadd.f32 %v5859_v25, %v5858_v21  ;;  %v5969_v31 = vadd.f32 %v5968_v30, %v5967_v24  ;;  %v5970_v32 = vpop.f32.mrb[34].mxu1 }
 0x153   : > { %v5971_v34 = vpop.f32.mrb[35].mxu1 }
 0x154   : > { %v1461_v33 = vadd.f32 %v5860_v29, %v7605_v47  ;;  %v7671_v35 = vadd.f32 %v5969_v31, %v1458_v28  ;;  %v5972_v36 = vadd.f32 %v5971_v34, %v5970_v32 }
 0x156   : > { %v5861_v37 = vpop.f32.mrb[36].mxu0  ;;  %v7673_v38 = vadd.f32 %v5972_v36, %v1461_v33 }
 0x157   : > { %v5862_v39 = vpop.f32.mrb[37].mxu0 }
 0x158   : > { %v5863_v41 = vadd.f32 %v5862_v39, %v5861_v37  ;;  %v5864_v42 = vpop.f32.mrb[38].mxu0  ;;  %v5973_v45 = vpop.f32.mrb[36].mxu1 }
 0x159   : > { %v5865_v46 = vpop.f32.mrb[39].mxu0  ;;  %v5974_v51 = vpop.f32.mrb[37].mxu1 }
 0x15a   : > { %v1466_v48 = vadd.f32 %v5863_v41, %v7605_v47  ;;  %v5866_v49 = vadd.f32 %v5865_v46, %v5864_v42  ;;  %v5975_v52 = vadd.f32 %v5974_v51, %v5973_v45  ;;  %v5976_v53 = vpop.f32.mrb[38].mxu1 }
 0x15b   : > { %v5977_v55 = vpop.f32.mrb[39].mxu1 }
 0x15c   : > { %v1469_v54 = vadd.f32 %v5866_v49, %v7605_v47  ;;  %v7677_v56 = vadd.f32 %v5975_v52, %v1466_v48  ;;  %v5978_v57 = vadd.f32 %v5977_v55, %v5976_v53 }
 0x15e   : > { %v5867_v58 = vpop.f32.mrb[40].mxu0  ;;  %v7679_v60 = vadd.f32 %v5978_v57, %v1469_v54 }
 0x15f   : > { %v5868_v61 = vpop.f32.mrb[41].mxu0 }
 0x160   : > { %v5869_v63 = vadd.f32 %v5868_v61, %v5867_v58  ;;  %v5870_v1 = vpop.f32.mrb[42].mxu0  ;;  %v5979_v2 = vpop.f32.mrb[40].mxu1 }
 0x161   : > { %v5871_v3 = vpop.f32.mrb[43].mxu0  ;;  %v5980_v9 = vpop.f32.mrb[41].mxu1 }
 0x162   : > { %v1474_v6 = vadd.f32 %v5869_v63, %v7605_v47  ;;  %v5872_v7 = vadd.f32 %v5871_v3, %v5870_v1  ;;  %v5981_v10 = vadd.f32 %v5980_v9, %v5979_v2  ;;  %v5982_v11 = vpop.f32.mrb[42].mxu1 }
 0x163   : > { %v5983_v13 = vpop.f32.mrb[43].mxu1 }
 0x164   : > { %v1477_v12 = vadd.f32 %v5872_v7, %v7605_v47  ;;  %v7683_v14 = vadd.f32 %v5981_v10, %v1474_v6  ;;  %v5984_v16 = vadd.f32 %v5983_v13, %v5982_v11 }
 0x166   : > { %v5873_v17 = vpop.f32.mrb[44].mxu0  ;;  %v7685_v19 = vadd.f32 %v5984_v16, %v1477_v12 }
 0x167   : > { %v5874_v20 = vpop.f32.mrb[45].mxu0 }
 0x168   : > { %v5875_v21 = vadd.f32 %v5874_v20, %v5873_v17  ;;  %v5876_v24 = vpop.f32.mrb[46].mxu0  ;;  %v5985_v25 = vpop.f32.mrb[44].mxu1 }
 0x169   : > { %v5877_v28 = vpop.f32.mrb[47].mxu0  ;;  %v5986_v31 = vpop.f32.mrb[45].mxu1 }
 0x16a   : > { %v1482_v29 = vadd.f32 %v5875_v21, %v7605_v47  ;;  %v5878_v30 = vadd.f32 %v5877_v28, %v5876_v24  ;;  %v5987_v32 = vadd.f32 %v5986_v31, %v5985_v25  ;;  %v5988_v33 = vpop.f32.mrb[46].mxu1 }
 0x16b   : > { %v5989_v36 = vpop.f32.mrb[47].mxu1 }
 0x16c   : > { %v1485_v34 = vadd.f32 %v5878_v30, %v7605_v47  ;;  %v7689_v37 = vadd.f32 %v5987_v32, %v1482_v29  ;;  %v5990_v39 = vadd.f32 %v5989_v36, %v5988_v33 }
 0x16e   : > { %v5879_v41 = vpop.f32.mrb[48].mxu0  ;;  %v7691_v42 = vadd.f32 %v5990_v39, %v1485_v34 }
 0x16f   : > { %v5880_v45 = vpop.f32.mrb[49].mxu0 }
 0x170   : > { %v5881_v46 = vadd.f32 %v5880_v45, %v5879_v41  ;;  %v5882_v48 = vpop.f32.mrb[50].mxu0  ;;  %v5991_v49 = vpop.f32.mrb[48].mxu1 }
 0x171   : > { %v5883_v51 = vpop.f32.mrb[51].mxu0  ;;  %v5992_v54 = vpop.f32.mrb[49].mxu1 }
 0x172   : > { %v1490_v52 = vadd.f32 %v5881_v46, %v7605_v47  ;;  %v5884_v53 = vadd.f32 %v5883_v51, %v5882_v48  ;;  %v5993_v55 = vadd.f32 %v5992_v54, %v5991_v49  ;;  %v5994_v57 = vpop.f32.mrb[50].mxu1 }
 0x173   : > { %v5995_v61 = vpop.f32.mrb[51].mxu1 }
 0x174   : > { %v1493_v58 = vadd.f32 %v5884_v53, %v7605_v47  ;;  %v7695_v63 = vadd.f32 %v5993_v55, %v1490_v52  ;;  %v5996_v1 = vadd.f32 %v5995_v61, %v5994_v57 }
 0x176   : > { %v5885_v2 = vpop.f32.mrb[52].mxu0  ;;  %v7697_v3 = vadd.f32 %v5996_v1, %v1493_v58 }
 0x177   : > { %v5886_v6 = vpop.f32.mrb[53].mxu0 }
 0x178   : > { %v5887_v7 = vadd.f32 %v5886_v6, %v5885_v2  ;;  %v5888_v9 = vpop.f32.mrb[54].mxu0  ;;  %v5997_v10 = vpop.f32.mrb[52].mxu1 }
 0x179   : > { %v5889_v11 = vpop.f32.mrb[55].mxu0  ;;  %v5998_v16 = vpop.f32.mrb[53].mxu1 }
 0x17a   : > { %v1498_v12 = vadd.f32 %v5887_v7, %v7605_v47  ;;  %v5890_v13 = vadd.f32 %v5889_v11, %v5888_v9  ;;  %v5999_v17 = vadd.f32 %v5998_v16, %v5997_v10  ;;  %v6000_v20 = vpop.f32.mrb[54].mxu1 }
 0x17b   : > { %v6001_v24 = vpop.f32.mrb[55].mxu1 }
 0x17c   : > { %v1501_v21 = vadd.f32 %v5890_v13, %v7605_v47  ;;  %v7701_v25 = vadd.f32 %v5999_v17, %v1498_v12  ;;  %v6002_v28 = vadd.f32 %v6001_v24, %v6000_v20 }
 0x17e   : > { %v5891_v29 = vpop.f32.mrb[56].mxu0  ;;  %v7703_v30 = vadd.f32 %v6002_v28, %v1501_v21 }
 0x17f   : > { %v5892_v31 = vpop.f32.mrb[57].mxu0 }
 0x180   : > { %v5893_v32 = vadd.f32 %v5892_v31, %v5891_v29  ;;  %v5894_v33 = vpop.f32.mrb[58].mxu0  ;;  %v6003_v34 = vpop.f32.mrb[56].mxu1 }
 0x181   : > { %v5895_v36 = vpop.f32.mrb[59].mxu0  ;;  %v6004_v45 = vpop.f32.mrb[57].mxu1 }
 0x182   : > { %v1506_v39 = vadd.f32 %v5893_v32, %v7605_v47  ;;  %v5896_v41 = vadd.f32 %v5895_v36, %v5894_v33  ;;  %v6005_v46 = vadd.f32 %v6004_v45, %v6003_v34  ;;  %v6006_v48 = vpop.f32.mrb[58].mxu1 }
 0x183   : > { %v6007_v51 = vpop.f32.mrb[59].mxu1 }
 0x184   : > { %v1509_v49 = vadd.f32 %v5896_v41, %v7605_v47  ;;  %v7707_v52 = vadd.f32 %v6005_v46, %v1506_v39  ;;  %v6008_v53 = vadd.f32 %v6007_v51, %v6006_v48 }
 0x186   : > { %v5897_v54 = vpop.f32.mrb[60].mxu0  ;;  %v7709_v55 = vadd.f32 %v6008_v53, %v1509_v49 }
 0x187   : > { %v5898_v57 = vpop.f32.mrb[61].mxu0 }
 0x188   : > { %v5899_v58 = vadd.f32 %v5898_v57, %v5897_v54  ;;  %v5900_v61 = vpop.f32.mrb[62].mxu0  ;;  %v6009_v1 = vpop.f32.mrb[60].mxu1 }
 0x189   : > { %v5901_v2 = vpop.f32.mrb[63].mxu0  ;;  %v6010_v9 = vpop.f32.mrb[61].mxu1 }
 0x18a   : > { %v1514_v6 = vadd.f32 %v5899_v58, %v7605_v47  ;;  %v5902_v7 = vadd.f32 %v5901_v2, %v5900_v61  ;;  %v6011_v10 = vadd.f32 %v6010_v9, %v6009_v1  ;;  %v6012_v11 = vpop.f32.mrb[62].mxu1 }
 0x18b   : > { %v6013_v13 = vpop.f32.mrb[63].mxu1 }
 0x18c   : > { %v1517_v12 = vadd.f32 %v5902_v7, %v7605_v47  ;;  %v7713_v16 = vadd.f32 %v6011_v10, %v1514_v6  ;;  %v6014_v17 = vadd.f32 %v6013_v13, %v6012_v11 }
 0x18e   : > { %v6031_v20 = vpop.f32.mrb[64].mxu0  ;;  %v7715_v21 = vadd.f32 %v6014_v17, %v1517_v12 }
 0x18f   : > { %v6032_v24 = vpop.f32.mrb[65].mxu0 }
 0x190   : > { %v6033_v28 = vadd.f32 %v6032_v24, %v6031_v20  ;;  %v6034_v29 = vpop.f32.mrb[66].mxu0  ;;  %v6202_v32 = vpop.f32.mrb[64].mxu1 }
 0x191   : > { %v6035_v31 = vpop.f32.mrb[67].mxu0  ;;  %v1876_v36 = vpop.f32.mrb[65].mxu1 }
 0x192   : > { %v6036_v33 = vadd.f32 %v6035_v31, %v6034_v29  ;;  %v1716_v34 = vadd.f32 %v6033_v28, %v7611_v0  ;;  %v6203_v39 = vpop.f32.mrb[66].mxu1 }
 0x193   : > { %v1879_v45 = vpop.f32.mrb[67].mxu1 }
 0x194   : > { %v1877_v41 = vadd.f32 %v1876_v36, %v1716_v34  ;;  %v1719_v47 = vadd.f32 %v6036_v33, %v7615_v5 }
 0x196   : > { %v1880_v46 = vadd.f32 %v1879_v45, %v1719_v47  ;;  %v6037_v48 = vpop.f32.mrb[68].mxu0  ;;  %v2003_v51 = vmax.f32 %v1877_v41, 0.0 }
 0x197   : > { %v6038_v49 = vpop.f32.mrb[69].mxu0 }
 0x198   : > { %v2004_v53 = vmax.f32 %v1880_v46, 0.0  ;;  %v6039_v54 = vadd.f32 %v6038_v49, %v6037_v48  ;;  %v6040_v57 = vpop.f32.mrb[70].mxu0  ;;  %v6206_v61 = vpop.f32.mrb[68].mxu1 }
 0x199   : > { %v6041_v58 = vpop.f32.mrb[71].mxu0  ;;  %v1892_v6 = vpop.f32.mrb[69].mxu1 }
 0x19a   : > { %v2035_v1 = vpack.c.bf16 %v2004_v53, %v2003_v51  ;;  %v1724_v2 = vadd.f32 %v6039_v54, %v7621_v22  ;;  %v6042_v0 = vadd.f32 %v6041_v58, %v6040_v57  ;;  %v6207_v7 = vpop.f32.mrb[70].mxu1 }
 0x19b   : > { %v1895_v10 = vpop.f32.mrb[71].mxu1 }
 0x19c   : > { %v1885_v9 = vadd.f32 %v6202_v32, %v1724_v2  ;;  %v1727_v5 = vadd.f32 %v6042_v0, %v7625_v27  ;;  %6236 = vmatprep.mubr.msk.bf16.mxu1 %vm2074_vm1, %v2035_v1 }
 0x19e   : > { %v1888_v11 = vadd.f32 %v6203_v39, %v1727_v5  ;;  %v6043_v12 = vpop.f32.mrb[72].mxu0  ;;  %v2005_v17 = vmax.f32 %v1885_v9, 0.0 }
 0x19f   : > { %v6044_v13 = vpop.f32.mrb[73].mxu0 }
 0x1a0   : > { %v2006_v20 = vmax.f32 %v1888_v11, 0.0  ;;  %v6045_v24 = vadd.f32 %v6044_v13, %v6043_v12  ;;  %v6046_v28 = vpop.f32.mrb[74].mxu0  ;;  %v6210_v31 = vpop.f32.mrb[72].mxu1 }
 0x1a1   : > { %v6047_v29 = vpop.f32.mrb[75].mxu0  ;;  %v1908_v36 = vpop.f32.mrb[73].mxu1 }
 0x1a2   : > { %v2036_v33 = vpack.c.bf16 %v2006_v20, %v2005_v17  ;;  %v6048_v22 = vadd.f32 %v6047_v29, %v6046_v28  ;;  %v1732_v34 = vadd.f32 %v6045_v24, %v7631_v44  ;;  %v6211_v32 = vpop.f32.mrb[74].mxu1 }
 0x1a3   : > { %v1911_v39 = vpop.f32.mrb[75].mxu1 }
 0x1a4   : > { %v1893_v41 = vadd.f32 %v1892_v6, %v1732_v34  ;;  %6237 = vmatmul.mubr.msk.bf16.vlgmr.msra.gmra.mrb[96].mxu1 %vm2074_vm1, %v2036_v33  ;;  %v1735_v27 = vadd.f32 %v6048_v22, %v7635_v50 }
 0x1a6   : > { %v1896_v47 = vadd.f32 %v1895_v10, %v1735_v27  ;;  %v6049_v45 = vpop.f32.mrb[76].mxu0  ;;  %v2007_v48 = vmax.f32 %v1893_v41, 0.0 }
 0x1a7   : > { %v6050_v46 = vpop.f32.mrb[77].mxu0 }
 0x1a8   : > { %v2008_v49 = vmax.f32 %v1896_v47, 0.0  ;;  %v6051_v51 = vadd.f32 %v6050_v46, %v6049_v45  ;;  %v6052_v53 = vpop.f32.mrb[78].mxu0  ;;  %v7725_v57 = vpop.f32.mrb[76].mxu1 }
 0x1a9   : > { %v6053_v54 = vpop.f32.mrb[79].mxu0  ;;  %v1924_v2 = vpop.f32.mrb[77].mxu1 }
 0x1aa   : > { %v2037_v58 = vpack.c.bf16 %v2008_v49, %v2007_v48  ;;  %v1740_v44 = vadd.f32 %v6051_v51, %v7641_v4  ;;  %v6054_v1 = vadd.f32 %v6053_v54, %v6052_v53  ;;  %v7728_v0 = vpop.f32.mrb[78].mxu1 }
 0x1ab   : > { %v1927_v9 = vpop.f32.mrb[79].mxu1 }
 0x1ac   : > { %v1901_v6 = vadd.f32 %v6206_v61, %v1740_v44  ;;  %v1743_v50 = vadd.f32 %v6054_v1, %v7643_v8  ;;  %6240 = vmatprep.mubr.msk.bf16.mxu1 %vm2074_vm1, %v2037_v58 }
 0x1ae   : > { %v1904_v5 = vadd.f32 %v6207_v7, %v1743_v50  ;;  %v6055_v10 = vpop.f32.mrb[80].mxu0  ;;  %v2009_v12 = vmax.f32 %v1901_v6, 0.0 }
 0x1af   : > { %v6056_v11 = vpop.f32.mrb[81].mxu0 }
 0x1b0   : > { %v2010_v13 = vmax.f32 %v1904_v5, 0.0  ;;  %v6057_v17 = vadd.f32 %v6056_v11, %v6055_v10  ;;  %v6058_v20 = vpop.f32.mrb[82].mxu0  ;;  %v7732_v28 = vpop.f32.mrb[80].mxu1 }
 0x1b1   : > { %v6059_v24 = vpop.f32.mrb[83].mxu0  ;;  %v7735_v61 = vpop.f32.mrb[81].mxu1 }
 0x1b2   : > { %v2038_v4 = vpack.c.bf16 %v2010_v13, %v2009_v12  ;;  %v6060_v29 = vadd.f32 %v6059_v24, %v6058_v20  ;;  %v1748_v33 = vadd.f32 %v6057_v17, %v7647_v23  ;;  %v7737_v8 = vpop.f32.mrb[82].mxu1 }
 0x1b3   : > { %v7741_v34 = vpop.f32.mrb[83].mxu1 }
 0x1b4   : > { %v1909_v22 = vadd.f32 %v1908_v36, %v1748_v33  ;;  %6241 = vmatmul.mubr.msk.bf16.gmra.mrb[100].mxu1 %vm2074_vm1, %v2038_v4  ;;  %v1751_v7 = vadd.f32 %v6060_v29, %v7649_v26 }
 0x1b6   : > { %v1912_v41 = vadd.f32 %v1911_v39, %v1751_v7  ;;  %v6061_v27 = vpop.f32.mrb[84].mxu0  ;;  %v2011_v45 = vmax.f32 %v1909_v22, 0.0 }
 0x1b7   : > { %v6062_v47 = vpop.f32.mrb[85].mxu0 }
 0x1b8   : > { %v2012_v46 = vmax.f32 %v1912_v41, 0.0  ;;  %v6063_v48 = vadd.f32 %v6062_v47, %v6061_v27  ;;  %v6064_v49 = vpop.f32.mrb[86].mxu0  ;;  %v7743_v23 = vpop.f32.mrb[84].mxu1 }
 0x1b9   : > { %v6065_v51 = vpop.f32.mrb[87].mxu0  ;;  %v7746_v58 = vpop.f32.mrb[85].mxu1 }
 0x1ba   : > { %v2039_v53 = vpack.c.bf16 %v2012_v46, %v2011_v45  ;;  %v1756_v54 = vadd.f32 %v6063_v48, %v7653_v40  ;;  %v6066_v36 = vadd.f32 %v6065_v51, %v6064_v49  ;;  %v7748_v44 = vpop.f32.mrb[86].mxu1 }
 0x1bb   : > { %v7752_v1 = vpop.f32.mrb[87].mxu1 }
 0x1bc   : > { %v1917_v26 = vadd.f32 %v6210_v31, %v1756_v54  ;;  %v1759_v39 = vadd.f32 %v6066_v36, %v7655_v43  ;;  %6244 = vmatprep.mubr.msk.bf16.mxu1 %vm2074_vm1, %v2039_v53 }
 0x1be   : > { %v1920_v6 = vadd.f32 %v6211_v32, %v1759_v39  ;;  %v6067_v50 = vpop.f32.mrb[88].mxu0  ;;  %v2013_v10 = vmax.f32 %v1917_v26, 0.0 }
 0x1bf   : > { %v6068_v5 = vpop.f32.mrb[89].mxu0 }
 0x1c0   : > { %v2014_v11 = vmax.f32 %v1920_v6, 0.0  ;;  %v6069_v12 = vadd.f32 %v6068_v5, %v6067_v50  ;;  %v6070_v13 = vpop.f32.mrb[90].mxu0  ;;  %v7754_v17 = vpop.f32.mrb[88].mxu1 }
 0x1c1   : > { %v6071_v40 = vpop.f32.mrb[91].mxu0  ;;  %v7757_v4 = vpop.f32.mrb[89].mxu1 }
 0x1c2   : > { %v2040_v20 = vpack.c.bf16 %v2014_v11, %v2013_v10  ;;  %v6072_v24 = vadd.f32 %v6071_v40, %v6070_v13  ;;  %v1764_v31 = vadd.f32 %v6069_v12, %v7659_v59  ;;  %v7759_v43 = vpop.f32.mrb[90].mxu1 }
 0x1c3   : > { %v7763_v33 = vpop.f32.mrb[91].mxu1 }
 0x1c4   : > { %v1925_v29 = vadd.f32 %v1924_v2, %v1764_v31  ;;  %6245 = vmatmul.mubr.msk.bf16.gmra.mrb[104].mxu1 %vm2074_vm1, %v2040_v20  ;;  %v1767_v32 = vadd.f32 %v6072_v24, %v7661_v62 }
 0x1c6   : > { %v1928_v22 = vadd.f32 %v1927_v9, %v1767_v32  ;;  %v6073_v7 = vpop.f32.mrb[92].mxu0  ;;  %v2015_v27 = vmax.f32 %v1925_v29, 0.0 }
 0x1c7   : > { %v6074_v41 = vpop.f32.mrb[93].mxu0 }
 0x1c8   : > { %v2016_v47 = vmax.f32 %v1928_v22, 0.0  ;;  %v6075_v45 = vadd.f32 %v6074_v41, %v6073_v7  ;;  %v6076_v46 = vpop.f32.mrb[94].mxu0  ;;  %v7765_v59 = vpop.f32.mrb[92].mxu1 }
 0x1c9   : > { %v6077_v48 = vpop.f32.mrb[95].mxu0  ;;  %v7768_v53 = vpop.f32.mrb[93].mxu1 }
 0x1ca   : > { %v2041_v49 = vpack.c.bf16 %v2016_v47, %v2015_v27  ;;  %v1772_v51 = vadd.f32 %v6075_v45, %v7665_v15  ;;  %v6078_v2 = vadd.f32 %v6077_v48, %v6076_v46  ;;  %v7770_v54 = vpop.f32.mrb[94].mxu1 }
 0x1cb   : > { %v7775_v36 = vpop.f32.mrb[95].mxu1 }
 0x1cc   : > { %v1933_v62 = vadd.f32 %v7725_v57, %v1772_v51  ;;  %v1775_v9 = vadd.f32 %v6078_v2, %v7667_v18  ;;  %6248 = vmatprep.mubr.msk.bf16.mxu1 %vm2074_vm1, %v2041_v49 }
 0x1ce   : > { %v1936_v26 = vadd.f32 %v7728_v0, %v1775_v9  ;;  %v6079_v39 = vpop.f32.mrb[96].mxu0  ;;  %v2017_v50 = vmax.f32 %v1933_v62, 0.0 }
 0x1cf   : > { %v6080_v6 = vpop.f32.mrb[97].mxu0 }
 0x1d0   : > { %v2018_v5 = vmax.f32 %v1936_v26, 0.0  ;;  %v6081_v15 = vadd.f32 %v6080_v6, %v6079_v39  ;;  %v6082_v10 = vpop.f32.mrb[98].mxu0 }
 0x1d1   : > { %v6083_v11 = vpop.f32.mrb[99].mxu0 }
 0x1d2   : > { %v2042_v12 = vpack.c.bf16 %v2018_v5, %v2017_v50  ;;  %v6084_v13 = vadd.f32 %v6083_v11, %v6082_v10  ;;  %v1780_v40 = vadd.f32 %v6081_v15, %v7671_v35 }
 0x1d4   : > { %v1941_v57 = vadd.f32 %v7735_v61, %v1780_v40  ;;  %6249 = vmatmul.mubr.msk.bf16.gmra.mrb[108].mxu1 %vm2074_vm1, %v2042_v12  ;;  %v1783_v18 = vadd.f32 %v6084_v13, %v7673_v38 }
 0x1d6   : > { %v1944_v20 = vadd.f32 %v7741_v34, %v1783_v18  ;;  %v6085_v0 = vpop.f32.mrb[100].mxu0  ;;  %v2019_v31 = vmax.f32 %v1941_v57, 0.0 }
 0x1d7   : > { %v6086_v24 = vpop.f32.mrb[101].mxu0 }
 0x1d8   : > { %v2020_v29 = vmax.f32 %v1944_v20, 0.0  ;;  %v6087_v32 = vadd.f32 %v6086_v24, %v6085_v0  ;;  %v6088_v22 = vpop.f32.mrb[102].mxu0 }
 0x1d9   : > { %v6089_v7 = vpop.f32.mrb[103].mxu0 }
 0x1da   : > { %v2043_v41 = vpack.c.bf16 %v2020_v29, %v2019_v31  ;;  %v1788_v27 = vadd.f32 %v6087_v32, %v7677_v56  ;;  %v6090_v47 = vadd.f32 %v6089_v7, %v6088_v22 }
 0x1dc   : > { %v1949_v35 = vadd.f32 %v7732_v28, %v1788_v27  ;;  %v1791_v61 = vadd.f32 %v6090_v47, %v7679_v60  ;;  %6252 = vmatprep.mubr.msk.bf16.mxu1 %vm2074_vm1, %v2043_v41 }
 0x1de   : > { %v1952_v38 = vadd.f32 %v7737_v8, %v1791_v61  ;;  %v6091_v34 = vpop.f32.mrb[104].mxu0  ;;  %v2021_v46 = vmax.f32 %v1949_v35, 0.0 }
 0x1df   : > { %v6092_v45 = vpop.f32.mrb[105].mxu0 }
 0x1e0   : > { %v2022_v48 = vmax.f32 %v1952_v38, 0.0  ;;  %v6093_v49 = vadd.f32 %v6092_v45, %v6091_v34  ;;  %v6094_v51 = vpop.f32.mrb[106].mxu0 }
 0x1e1   : > { %v6095_v2 = vpop.f32.mrb[107].mxu0 }
 0x1e2   : > { %v2044_v62 = vpack.c.bf16 %v2022_v48, %v2021_v46  ;;  %v6096_v9 = vadd.f32 %v6095_v2, %v6094_v51  ;;  %v1796_v56 = vadd.f32 %v6093_v49, %v7683_v14 }
 0x1e4   : > { %v1957_v26 = vadd.f32 %v7746_v58, %v1796_v56  ;;  %6253 = vmatmul.mubr.msk.bf16.gmra.mrb[112].mxu1 %vm2074_vm1, %v2044_v62  ;;  %v1799_v60 = vadd.f32 %v6096_v9, %v7685_v19 }
 0x1e6   : > { %v1960_v28 = vadd.f32 %v7752_v1, %v1799_v60  ;;  %v6097_v8 = vpop.f32.mrb[108].mxu0  ;;  %v2023_v6 = vmax.f32 %v1957_v26, 0.0 }
 0x1e7   : > { %v6098_v39 = vpop.f32.mrb[109].mxu0 }
 0x1e8   : > { %v2024_v50 = vmax.f32 %v1960_v28, 0.0  ;;  %v6099_v5 = vadd.f32 %v6098_v39, %v6097_v8  ;;  %v6100_v15 = vpop.f32.mrb[110].mxu0 }
 0x1e9   : > { %v6101_v10 = vpop.f32.mrb[111].mxu0 }
 0x1ea   : > { %v2045_v11 = vpack.c.bf16 %v2024_v50, %v2023_v6  ;;  %v1804_v12 = vadd.f32 %v6099_v5, %v7689_v37  ;;  %v6102_v13 = vadd.f32 %v6101_v10, %v6100_v15 }
 0x1ec   : > { %v1965_v14 = vadd.f32 %v7743_v23, %v1804_v12  ;;  %v1807_v58 = vadd.f32 %v6102_v13, %v7691_v42  ;;  %6256 = vmatprep.mubr.msk.bf16.mxu1 %vm2074_vm1, %v2045_v11  ;;  %v7822_v12 = vld [vmem:[%s10793_s6] ss:$0 sm:$0xff] }
 0x1ee   : > { %v1968_v19 = vadd.f32 %v7748_v44, %v1807_v58  ;;  %v6103_v1 = vpop.f32.mrb[112].mxu0  ;;  %v2025_v57 = vmax.f32 %v1965_v14, 0.0 }
 0x1ef   : > { %v6104_v40 = vpop.f32.mrb[113].mxu0 }
 0x1f0   : > { %v2026_v18 = vmax.f32 %v1968_v19, 0.0  ;;  %v6105_v20 = vadd.f32 %v6104_v40, %v6103_v1  ;;  %v6106_v0 = vpop.f32.mrb[114].mxu0 }
 0x1f1   : > { %v6107_v24 = vpop.f32.mrb[115].mxu0 }
 0x1f2   : > { %v2046_v31 = vpack.c.bf16 %v2026_v18, %v2025_v57  ;;  %v6108_v29 = vadd.f32 %v6107_v24, %v6106_v0  ;;  %v1812_v37 = vadd.f32 %v6105_v20, %v7695_v63  ;;  %v6605_v20 = vld [vmem:[%s10794_s7] sm:$0xff]  }
 0x1f3   : > { %6268 = vmatprep.subr.bf16.mxu0 %v6605_v20 }
 0x1f4   : > { %v1973_v32 = vadd.f32 %v7757_v4, %v1812_v37  ;;  %6257 = vmatmul.mubr.msk.bf16.gmra.mrb[116].mxu1 %vm2074_vm1, %v2046_v31  ;;  %v1815_v42 = vadd.f32 %v6108_v29, %v7697_v3  ;;  %6269 = vmatpush3.bf16.msra.mxu0 %v6605_v20 }
 0x1f6   : > { %v1976_v23 = vadd.f32 %v7763_v33, %v1815_v42  ;;  %v6109_v44 = vpop.f32.mrb[116].mxu0  ;;  %v2027_v7 = vmax.f32 %v1973_v32, 0.0  ;;  %v6606_v32 = vld [vmem:[%s10794_s7 + $0x8] sm:$0xff]   ;;  %v10810_v42 = vmov 0  }
 0x1f7   : > { %v6110_v22 = vpop.f32.mrb[117].mxu0  ;;  %6389 = vset.pattern.permute.xlu0 %v10810_v42  ;;  %6388 = vset.pattern.permute.xlu1 %v10810_v42 }
 0x1f8   : > { %v2028_v41 = vmax.f32 %v1976_v23, 0.0  ;;  %v6111_v27 = vadd.f32 %v6110_v22, %v6109_v44  ;;  %v6112_v47 = vpop.f32.mrb[118].mxu0  ;;  %6270 = vmatprep.subr.bf16.mxu0 %v6606_v32  ;;  %v6607_v22 = vld [vmem:[%s10794_s7 + $0x10] sm:$0xff]  }
 0x1f9   : > { %v6113_v35 = vpop.f32.mrb[119].mxu0  ;;  %6271 = vmatpush3.bf16.msra.mxu0 %v6606_v32 }
 0x1fa   : > { %v2047_v61 = vpack.c.bf16 %v2028_v41, %v2027_v7  ;;  %v1820_v38 = vadd.f32 %v6111_v27, %v7701_v25  ;;  %v6114_v34 = vadd.f32 %v6113_v35, %v6112_v47  ;;  %6272 = vmatprep.subr.bf16.mxu0 %v6607_v22 }
 0x1fc   : > { %v1981_v63 = vadd.f32 %v7754_v17, %v1820_v38  ;;  %v1823_v4 = vadd.f32 %v6114_v34, %v7703_v30  ;;  %6260 = vmatprep.mubr.msk.bf16.mxu1 %vm2074_vm1, %v2047_v61 }
 0x1fd   : > { %6273 = vmatpush3.bf16.msra.mxu0 %v6607_v22 }
 0x1fe   : > { %v1984_v3 = vadd.f32 %v7759_v43, %v1823_v4  ;;  %v6115_v33 = vpop.f32.mrb[120].mxu0  ;;  %v2029_v46 = vmax.f32 %v1981_v63, 0.0 }
 0x1ff   : > { %v6116_v45 = vpop.f32.mrb[121].mxu0 }
 0x200   : > { %v2030_v48 = vmax.f32 %v1984_v3, 0.0  ;;  %v6117_v49 = vadd.f32 %v6116_v45, %v6115_v33  ;;  %v6118_v51 = vpop.f32.mrb[122].mxu0 }
 0x201   : > { %v6119_v2 = vpop.f32.mrb[123].mxu0 }
 0x202   : > { %v2048_v62 = vpack.c.bf16 %v2030_v48, %v2029_v46  ;;  %v6120_v9 = vadd.f32 %v6119_v2, %v6118_v51  ;;  %v1828_v25 = vadd.f32 %v6117_v49, %v7707_v52 }
 0x204   : > { %v1989_v56 = vadd.f32 %v7768_v53, %v1828_v25  ;;  %6261 = vmatmul.mubr.msk.bf16.gmra.mrb[120].mxu1 %vm2074_vm1, %v2048_v62  ;;  %v1831_v30 = vadd.f32 %v6120_v9, %v7709_v55 }
 0x206   : > { %v1992_v17 = vadd.f32 %v7775_v36, %v1831_v30  ;;  %v6121_v43 = vpop.f32.mrb[124].mxu0  ;;  %v2031_v60 = vmax.f32 %v1989_v56, 0.0 }
 0x207   : > { %v6122_v26 = vpop.f32.mrb[125].mxu0 }
 0x208   : > { %v2032_v28 = vmax.f32 %v1992_v17, 0.0  ;;  %v6123_v8 = vadd.f32 %v6122_v26, %v6121_v43  ;;  %v6124_v39 = vpop.f32.mrb[126].mxu0 }
 0x209   : > { %v6125_v6 = vpop.f32.mrb[127].mxu0 }
 0x20a   : > { %v2049_v50 = vpack.c.bf16 %v2032_v28, %v2031_v60  ;;  %v1836_v5 = vadd.f32 %v6123_v8, %v7713_v16  ;;  %v6126_v15 = vadd.f32 %v6125_v6, %v6124_v39 }
 0x20c   : > { %v1997_v52 = vadd.f32 %v7765_v59, %v1836_v5  ;;  %v1839_v53 = vadd.f32 %v6126_v15, %v7715_v21  ;;  %6264 = vmatprep.mubr.msk.bf16.mxu1 %vm2074_vm1, %v2049_v50 }
 0x20e   : > { %v2000_v55 = vadd.f32 %v7770_v54, %v1839_v53  ;;  %v2033_v36 = vmax.f32 %v1997_v52, 0.0 }
 0x210   : > { %v2034_v10 = vmax.f32 %v2000_v55, 0.0 }
 0x212   : > { %v2050_v11 = vpack.c.bf16 %v2034_v10, %v2033_v36 }
 0x214   : > { %6265 = vmatmul.mubr.msk.bf16.gmra.mrb[124].mxu1 %vm2074_vm1, %v2050_v11 }
 0x277   : > { %v6238_v16 = vpop.f32.mrb[96].mxu1 }
 0x278   : > { %v7825_v59 = vadd.f32 %v6238_v16, %v7822_v12  ;;  %v2157_v21 = vpop.f32.mrb[97].mxu1 }
 0x279   : > { %v7828_v13 = vadd.f32 %v7822_v12, %v2157_v21  ;;  %v6239_v54 = vpop.f32.mrb[98].mxu1 }
 0x27a   : > { %10958 = vst [vmem:[#allocation12_spill] sm:$0xff] %v7825_v59  ;;  %v7831_v14 = vadd.f32 %v6239_v54, %v7822_v12  ;;  %v2160_v58 = vpop.f32.mrb[99].mxu1  ;;  %v2323_v19 = vsel %vm2316_vm2, %v7825_v59, -inf  ;;  %v2286_v23 = vmax.f32 %v7825_v59, 0.0 }
 0x27b   : > { %v7836_v1 = vadd.f32 %v7822_v12, %v2160_v58  ;;  %2324 = vmax.xlane.f32.xlu1 %v2323_v19  ;;  %v2317_v40 = vsel %vm2316_vm2, %v7828_v13, -inf  ;;  %v2284_v41 = vmax.f32 %v7828_v13, 0.0 }
 0x27c   : > { %10959 = vst [vmem:[#allocation13_spill] sm:$0xff] %v7831_v14  ;;  %2318 = vmax.xlane.f32.xlu0 %v2317_v40  ;;  %v2326_v57 = vsel %vm2316_vm2, %v7831_v14, -inf  ;;  %v2287_v37 = vmax.f32 %v7831_v14, 0.0 }
 0x27d   : > { %10960 = vst [vmem:[#allocation14_spill] sm:$0xff] %v7836_v1  ;;  %v2320_v18 = vsel %vm2316_vm2, %v7836_v1, -inf  ;;  %v2285_v7 = vmax.f32 %v7836_v1, 0.0 }
 0x27e   : > { %v3379_v44 = vpack.c.bf16 %v2287_v37, %v2286_v23 }
 0x27f   : > { %2327 = vmax.xlane.f32.xlu1 %v2326_v57  ;;  %v3378_v27 = vpack.c.bf16 %v2285_v7, %v2284_v41 }
 0x280   : > { %2321 = vmax.xlane.f32.xlu0 %v2320_v18 }
 0x287   : > { %v6242_v0 = vpop.f32.mrb[100].mxu1 }
 0x288   : > { %v2173_v24 = vpop.f32.mrb[101].mxu1  ;;  %v7869_v45 = vadd.f32 %v6242_v0, %v7822_v12 }
 0x289   : > { %v6243_v31 = vpop.f32.mrb[102].mxu1  ;;  %v7877_v49 = vadd.f32 %v7822_v12, %v2173_v24 }
 0x28a   : > { %v2176_v29 = vpop.f32.mrb[103].mxu1  ;;  %v7866_v33 = vadd.f32 %v6243_v31, %v7822_v12  ;;  %10961 = vst [vmem:[#allocation15_spill] sm:$0xff] %v7869_v45  ;;  %v2335_v51 = vsel %vm2316_vm2, %v7869_v45, -inf  ;;  %v2290_v8 = vmax.f32 %v7869_v45, 0.0 }
 0x28b   : > { %v7872_v46 = vadd.f32 %v7822_v12, %v2176_v29  ;;  %10962 = vst [vmem:[#allocation16_spill] sm:$0xff] %v7877_v49  ;;  %v2329_v56 = vsel %vm2316_vm2, %v7877_v49, -inf  ;;  %v2288_v52 = vmax.f32 %v7877_v49, 0.0 }
 0x28c   : > { %v2338_v48 = vsel %vm2316_vm2, %v7866_v33, -inf  ;;  %v2291_v28 = vmax.f32 %v7866_v33, 0.0 }
 0x28d   : > { %v2332_v62 = vsel %vm2316_vm2, %v7872_v46, -inf  ;;  %v2289_v50 = vmax.f32 %v7872_v46, 0.0 }
 0x28e   : > { %v3381_v6 = vpack.c.bf16 %v2291_v28, %v2290_v8 }
 0x28f   : > { %v3380_v55 = vpack.c.bf16 %v2289_v50, %v2288_v52 }
 0x290   : > { %3425 = vrot.lane.b32.xlu1 %v3379_v44, %s7067_s17 }
 0x296   : > { %3423 = vrot.lane.b32.xlu0 %v3378_v27, %s7067_s17 }
 0x297   : > { %v6246_v47 = vpop.f32.mrb[104].mxu1 }
 0x298   : > { %v2189_v35 = vpop.f32.mrb[105].mxu1  ;;  %v7884_v9 = vadd.f32 %v6246_v47, %v7822_v12 }
 0x299   : > { %v6247_v61 = vpop.f32.mrb[106].mxu1  ;;  %v7893_v43 = vadd.f32 %v7822_v12, %v2189_v35 }
 0x29a   : > { %v2192_v38 = vpop.f32.mrb[107].mxu1  ;;  %v2347_v26 = vsel %vm2316_vm2, %v7884_v9, -inf  ;;  %v7926_v0 = vadd.f32 %v6247_v61, %v7822_v12  ;;  %v2294_v35 = vmax.f32 %v7884_v9, 0.0 }
 0x29b   : > { %v2341_v60 = vsel %vm2316_vm2, %v7893_v43, -inf  ;;  %v7909_v36 = vadd.f32 %v7822_v12, %v2192_v38  ;;  %v2292_v11 = vmax.f32 %v7893_v43, 0.0 }
 0x29c   : > { %v2350_v24 = vsel %vm2316_vm2, %v7926_v0, -inf  ;;  %v2295_v41 = vmax.f32 %v7926_v0, 0.0 }
 0x29d   : > { %10963 = vst [vmem:[#allocation17_spill] sm:$0xff] %v7909_v36  ;;  %v2293_v10 = vmax.f32 %v7909_v36, 0.0  ;;  %v2344_v29 = vsel %vm2316_vm2, %v7909_v36, -inf }
 0x29e   : > { %v3383_v61 = vpack.c.bf16 %v2295_v41, %v2294_v35 }
 0x29f   : > { %v3382_v16 = vpack.c.bf16 %v2293_v10, %v2292_v11 }
 0x2a7   : > { %v6250_v34 = vpop.f32.mrb[108].mxu1 }
 0x2a8   : > { %v2205_v63 = vpop.f32.mrb[109].mxu1  ;;  %v7931_v31 = vadd.f32 %v6250_v34, %v7822_v12 }
 0x2a9   : > { %v7861_v4 = vpop.f32.mrb[110].mxu1  ;;  %v7936_v37 = vadd.f32 %v7822_v12, %v2205_v63 }
 0x2aa   : > { %v7863_v3 = vpop.f32.mrb[111].mxu1  ;;  %v2359_v32 = vsel %vm2316_vm2, %v7931_v31, -inf }
 0x2ab   : > { %v2353_v44 = vsel %vm2316_vm2, %v7936_v37, -inf }
 0x2b4   : > { %2339 = vmax.xlane.f32.xlu1 %v2338_v48 }
 0x2b5   : > { %2336 = vmax.xlane.f32.xlu0 %v2335_v51 }
 0x2b7   : > { %v6254_v2 = vpop.f32.mrb[112].mxu1 }
 0x2b8   : > { %v2221_v25 = vpop.f32.mrb[113].mxu1  ;;  %2333 = vmax.xlane.f32.xlu1 %v2332_v62  ;;  %v7941_v23 = vadd.f32 %v6254_v2, %v7822_v12 }
 0x2b9   : > { %v7888_v30 = vpop.f32.mrb[114].mxu1  ;;  %2330 = vmax.xlane.f32.xlu0 %v2329_v56  ;;  %v7946_v22 = vadd.f32 %v7822_v12, %v2221_v25 }
 0x2ba   : > { %v7890_v17 = vpop.f32.mrb[115].mxu1  ;;  %10964 = vst [vmem:[#allocation18_spill] sm:$0xff] %v7941_v23  ;;  %v2371_v7 = vsel %vm2316_vm2, %v7941_v23, -inf }
 0x2bb   : > { %v2365_v47 = vsel %vm2316_vm2, %v7946_v22, -inf }
 0x2bd   : > { %2348 = vmax.xlane.f32.xlu0 %v2347_v26 }
 0x2c1   : > { %2342 = vmax.xlane.f32.xlu0 %v2341_v60 }
 0x2c7   : > { %v6258_v39 = vpop.f32.mrb[116].mxu1 }
 0x2c8   : > { %v2237_v5 = vpop.f32.mrb[117].mxu1  ;;  %v7952_v27 = vadd.f32 %v6258_v39, %v7822_v12 }
 0x2c9   : > { %v7902_v15 = vpop.f32.mrb[118].mxu1  ;;  %3429 = vrot.lane.b32.xlu1 %v3381_v6, %s7067_s17  ;;  %v7958_v38 = vadd.f32 %v7822_v12, %v2237_v5  ;;  %v7992_v5 = vadd.f32 %v7861_v4, %v7822_v12  ;;  %v2298_v4 = vmax.f32 %v7931_v31, 0.0 }
 0x2ca   : > { %v7906_v53 = vpop.f32.mrb[119].mxu1  ;;  %10965 = vst [vmem:[#allocation19_spill] sm:$0xff] %v7952_v27  ;;  %v2383_v34 = vsel %vm2316_vm2, %v7952_v27, -inf }
 0x2cb   : > { %10966 = vst [vmem:[#allocation20_spill] sm:$0xff] %v7958_v38  ;;  %v2377_v2 = vsel %vm2316_vm2, %v7958_v38, -inf  ;;  %v2362_v10 = vsel %vm2316_vm2, %v7992_v5, -inf }
 0x2cd   : > { %3427 = vrot.lane.b32.xlu1 %v3380_v55, %s7067_s17  ;;  %v7997_v55 = vadd.f32 %v7822_v12, %v7863_v3  ;;  %v2296_v3 = vmax.f32 %v7936_v37, 0.0 }
 0x2cf   : > { %v2356_v11 = vsel %vm2316_vm2, %v7997_v55, -inf }
 0x2d7   : > { %v6262_v21 = vpop.f32.mrb[120].mxu1  ;;  %3431 = vrot.lane.b32.xlu0 %v3382_v16, %s7067_s17  ;;  %v2299_v16 = vmax.f32 %v7992_v5, 0.0 }
 0x2d8   : > { %v2253_v54 = vpop.f32.mrb[121].mxu1  ;;  %v7966_v48 = vadd.f32 %v6262_v21, %v7822_v12 }
 0x2d9   : > { %v6263_v58 = vpop.f32.mrb[122].mxu1  ;;  %v7975_v25 = vadd.f32 %v7822_v12, %v2253_v54  ;;  %v3385_v21 = vpack.c.bf16 %v2299_v16, %v2298_v4  ;;  %v2297_v54 = vmax.f32 %v7997_v55, 0.0  ;;  %v2302_v16 = vmax.f32 %v7941_v23, 0.0 }
 0x2da   : > { %v7915_v19 = vpop.f32.mrb[123].mxu1  ;;  %v2395_v26 = vsel %vm2316_vm2, %v7966_v48, -inf  ;;  %v7986_v39 = vadd.f32 %v6263_v58, %v7822_v12  ;;  %v2310_v50 = vmax.f32 %v7966_v48, 0.0 }
 0x2db   : > { %10969 = vst [vmem:[#allocation23_spill] sm:$0xff] %v7975_v25  ;;  %v2389_v28 = vsel %vm2316_vm2, %v7975_v25, -inf }
 0x2dc   : > { %10971 = vst [vmem:[#allocation25_spill] sm:$0xff] %v7986_v39  ;;  %v2311_v6 = vmax.f32 %v7986_v39, 0.0 }
 0x2de   : > { %v3391_v52 = vpack.c.bf16 %v2311_v6, %v2310_v50 }
 0x2e7   : > { %v7917_v40 = vpop.f32.mrb[124].mxu1 }
 0x2e8   : > { %v7919_v57 = vpop.f32.mrb[125].mxu1 }
 0x2e9   : > { %v7921_v18 = vpop.f32.mrb[126].mxu1 }
 0x2ea   : > { %v7923_v20 = vpop.f32.mrb[127].mxu1 }
 0x2f1   : > { %2351 = vmax.xlane.f32.xlu1 %v2350_v24  ;;  %v3384_v24 = vpack.c.bf16 %v2297_v54, %v2296_v3 }
 0x2f5   : > { %2345 = vmax.xlane.f32.xlu1 %v2344_v29  ;;  %v8012_v29 = vadd.f32 %v7917_v40, %v7822_v12 }
 0x2f6   : > { %2360 = vmax.xlane.f32.xlu0 %v2359_v32 }
 0x2f7   : > { %10972 = vst [vmem:[#allocation26_spill] sm:$0xff] %v8012_v29 }
 0x2fa   : > { %2354 = vmax.xlane.f32.xlu0 %v2353_v44 }
 0x2fe   : > { %2372 = vmax.xlane.f32.xlu0 %v2371_v7  ;;  %v8021_v7 = vadd.f32 %v7822_v12, %v7919_v57 }
 0x300   : > { %10975 = vst [vmem:[#allocation29_spill] sm:$0xff] %v8021_v7  ;;  %v2401_v40 = vsel %vm2316_vm2, %v8021_v7, -inf }
 0x302   : > { %2366 = vmax.xlane.f32.xlu0 %v2365_v47  ;;  %v2407_v47 = vsel %vm2316_vm2, %v8012_v29, -inf }
 0x306   : > { %3433 = vrot.lane.b32.xlu1 %v3383_v61, %s7067_s17  ;;  %2384 = vmax.xlane.f32.xlu0 %v2383_v34 }
 0x308   : > { %v7963_v63 = vpop.xlane.xlu1 %2324 }
 0x309   : > { %10967 = vst [vmem:[#allocation21_spill] sm:$0xff] %v7963_v63  ;;  %v7968_v51 = vpop.xlane.xlu0 %2318 }
 0x30a   : > { %2378 = vmax.xlane.f32.xlu0 %v2377_v2  ;;  %vm2413_vm4 = vcmp.eq.f32.partialorder %v7828_v13, %v7968_v51 }
 0x30b   : > { %vm2445_vm6 = vmxor %vm2413_vm4, %vm7068_vm5 }
 0x30c   : > { %v7972_v62 = vpop.xlane.xlu1 %2327 }
 0x30d   : > { %10968 = vst [vmem:[#allocation22_spill] sm:$0xff] %v7972_v62  ;;  %v7977_v56 = vpop.xlane.xlu0 %2321  ;;  %vm10816_vm7 = vcmp.eq.f32.partialorder %v7831_v14, %v7972_v62  ;;  %v2640_v54 = vsub.f32 %v7831_v14, %v7972_v62 }
 0x30e   : > { %10970 = vst [vmem:[#allocation24_spill] sm:$0xff] %v7977_v56  ;;  %2396 = vmax.xlane.f32.xlu0 %v2395_v26  ;;  %v4035_v26 = vsel %vm2413_vm4, 1, %v10810_v42 }
 0x310   : > { %v3426_v8 = vpop.permute.xlu1 %3425 }
 0x311   : > { %v3424_v60 = vpop.permute.xlu0 %3423 }
 0x312   : > { %2390 = vmax.xlane.f32.xlu0 %v2389_v28  ;;  %6274 = vmatprep.mubr.msk.bf16.mxu0 %vm3473_vm3, %v3424_v60  ;;  %v8048_v60 = vadd.f32 %v7888_v30, %v7822_v12  ;;  %v2477_v28 = vsel %vm2445_vm6, 1, %v10810_v42  ;;  %v4038_v30 = vsel %vm10816_vm7, 1, %v10810_v42 }
 0x313   : > { %6275 = vmatmul.mubr.msk.bf16.vlgmr.msra.gmra.mrb[128].mxu0 %vm3473_vm3, %v3426_v8  ;;  %v8056_v8 = vadd.f32 %v7822_v12, %v7890_v17  ;;  %v2637_v17 = vsub.f32 %v7828_v13, %v7968_v51 }
 0x314   : > { %v2374_v6 = vsel %vm2316_vm2, %v8048_v60, -inf }
 0x315   : > { %v2368_v50 = vsel %vm2316_vm2, %v8056_v8, -inf  ;;  %v2301_v4 = vmax.f32 %v8056_v8, 0.0 }
 0x328   : > { %3449 = vrot.lane.b32.xlu0 %v3391_v52, %s7067_s17  ;;  %v2639_v52 = vsub.f32 %v7825_v59, %v7963_v63 }
 0x32a   : > { %2363 = vmax.xlane.f32.xlu1 %v2362_v10  ;;  %v2673_v10 = vmul.f32 1.442695, %v2639_v52 }
 0x32c   : > { %6608 = vpow2.f32 %v2673_v10  ;;  %v8097_v10 = vadd.f32 %v7902_v15, %v7822_v12 }
 0x32e   : > { %2357 = vmax.xlane.f32.xlu1 %v2356_v11  ;;  %v2303_v11 = vmax.f32 %v8048_v60, 0.0 }
 0x330   : > { %v3387_v3 = vpack.c.bf16 %v2303_v11, %v2302_v16  ;;  %v2386_v11 = vsel %vm2316_vm2, %v8097_v10, -inf }
 0x33f   : > { %3437 = vrot.lane.b32.xlu1 %v3385_v21, %s7067_s17  ;;  %v2669_v21 = vmul.f32 1.442695, %v2637_v17  ;;  %v8103_v17 = vadd.f32 %v7822_v12, %v7906_v53 }
 0x341   : > { %v8008_v58 = vpop.xlane.xlu1 %2339  ;;  %6610 = vpow2.f32 %v2669_v21  ;;  %v2380_v15 = vsel %vm2316_vm2, %v8103_v17, -inf }
 0x342   : > { %v8014_v32 = vpop.xlane.xlu0 %2336 }
 0x343   : > { %10973 = vst [vmem:[#allocation27_spill] sm:$0xff] %v8014_v32  ;;  %3435 = vrot.lane.b32.xlu1 %v3384_v24, %s7067_s17  ;;  %v2300_v24 = vmax.f32 %v7946_v22, 0.0  ;;  %vm10815_vm8 = vcmp.eq.f32.partialorder %v7869_v45, %v8014_v32 }
 0x344   : > { %v4041_v16 = vsel %vm10815_vm8, 1, %v10810_v42  ;;  %vm2451_vm9 = vmxor %vm10815_vm8, %vm7068_vm5 }
 0x345   : > { %v8017_v44 = vpop.xlane.xlu1 %2333  ;;  %v2483_v53 = vsel %vm2451_vm9, 1, %v10810_v42 }
 0x346   : > { %10974 = vst [vmem:[#allocation28_spill] sm:$0xff] %v8017_v44  ;;  %v8023_v41 = vpop.xlane.xlu0 %2330  ;;  %vm10839_vm12 = vcmp.eq.f32.partialorder %v7872_v46, %v8017_v44 }
 0x347   : > { %10976 = vst [vmem:[#allocation30_spill] sm:$0xff] %v8023_v41  ;;  %2408 = vmax.xlane.f32.xlu0 %v2407_v47  ;;  %v2675_v47 = vmul.f32 1.442695, %v2640_v54  ;;  %vm10829_vm10 = vcmp.eq.f32.partialorder %v7877_v49, %v8023_v41  ;;  %v4040_v21 = vsel %vm10839_vm12, 1, %v10810_v42  ;;  %v2307_v54 = vmax.f32 %v8097_v10, 0.0 }
 0x348   : > { %vm2449_vm11 = vmxor %vm10829_vm10, %vm7068_vm5 }
 0x349   : > { %v3430_v35 = vpop.permute.xlu1 %3429  ;;  %6612 = vpow2.f32 %v2675_v47 }
 0x34a   : > { %v8027_v61 = vpop.xlane.xlu0 %2348 }
 0x34b   : > { %2402 = vmax.xlane.f32.xlu0 %v2401_v40  ;;  %v3386_v40 = vpack.c.bf16 %v2301_v4, %v2300_v24  ;;  %v2481_v4 = vsel %vm2449_vm11, 1, %v10810_v42  ;;  %vm2423_vm13 = vcmp.eq.f32.partialorder %v7884_v9, %v8027_v61 }
 0x34c   : > { %vm2455_vm14 = vmxor %vm2423_vm13, %vm7068_vm5 }
 0x34d   : > { %v3428_v34 = vpop.permute.xlu1 %3427 }
 0x34e   : > { %6278 = vmatprep.mubr.msk.bf16.mxu0 %vm3473_vm3, %v3428_v34  ;;  %v8032_v2 = vpop.xlane.xlu0 %2342 }
 0x34f   : > { %6279 = vmatmul.mubr.msk.bf16.gmra.mrb[132].mxu0 %vm3473_vm3, %v3430_v35  ;;  %vm2421_vm15 = vcmp.eq.f32.partialorder %v7893_v43, %v8032_v2 }
 0x350   : > { %vm2453_vm0 = vmxor %vm2421_vm15, %vm7068_vm5 }
 0x352   : > { %v3432_v57 = vpop.permute.xlu0 %3431 }
 0x353   : > { %6282 = vmatprep.mubr.msk.bf16.mxu0 %vm3473_vm3, %v3432_v57  ;;  %v8082_v57 = vpop.eup %6608 }
 0x361   : > { %4068 = vperm.xlu0 %6389, %v4035_v26  }
 0x365   : > { %2509 = vrot.lane.b32.xlu0 %v2477_v28, %s7069_s20  ;;  %v2739_v28 = vsel %vm2316_vm2, %v8082_v57, 0.0 }
 0x367   : > { %2375 = vmax.xlane.f32.xlu1 %v2374_v6  ;;  %v8087_v6 = vpop.eup %6610 }
 0x368   : > { %10979 = vst [vmem:[#allocation33_spill] sm:$0xff] %v8087_v6 }
 0x369   : > { %4077 = vperm.xlu0 %6389, %v4038_v30   ;;  %v2733_v30 = vsel %vm2316_vm2, %v8087_v6, 0.0 }
 0x36b   : > { %2369 = vmax.xlane.f32.xlu1 %v2368_v50  ;;  %v8091_v50 = vpop.eup %6612 }
 0x36c   : > { %10980 = vst [vmem:[#allocation34_spill] sm:$0xff] %v8091_v50  ;;  %v2742_v52 = vsel %vm2316_vm2, %v8091_v50, 0.0 }
 0x37c   : > { %3441 = vrot.lane.b32.xlu1 %v3387_v3, %s7067_s17  ;;  %v2306_v3 = vmax.f32 %v7952_v27, 0.0 }
 0x37e   : > { %v8077_v35 = vpop.xlane.xlu1 %2351  ;;  %v3389_v47 = vpack.c.bf16 %v2307_v54, %v2306_v3 }
 0x37f   : > { %10977 = vst [vmem:[#allocation31_spill] sm:$0xff] %v8077_v35 }
 0x380   : > { %3439 = vrot.lane.b32.xlu1 %v3386_v40, %s7067_s17  ;;  %v2305_v40 = vmax.f32 %v8103_v17, 0.0 }
 0x382   : > { %v8080_v34 = vpop.xlane.xlu1 %2345 }
 0x383   : > { %10978 = vst [vmem:[#allocation32_spill] sm:$0xff] %v8080_v34  ;;  %vm10846_vm1 = vcmp.eq.f32.partialorder %v7909_v36, %v8080_v34 }
 0x386   : > { %v3434_v26 = vpop.permute.xlu1 %3433 }
 0x387   : > { %6283 = vmatmul.mubr.msk.bf16.gmra.mrb[136].mxu0 %vm3473_vm3, %v3434_v26  ;;  %v2304_v26 = vmax.f32 %v7958_v38, 0.0 }
 0x388   : > { %2740 = vadd.xlane.f32.xlu0 %v2739_v28  ;;  %v2643_v28 = vsub.f32 %v7869_v45, %v8014_v32  ;;  %v2314_v32 = vmax.f32 %v8012_v29, 0.0  ;;  %v2312_v45 = vmax.f32 %v8021_v7, 0.0 }
 0x38c   : > { %2734 = vadd.xlane.f32.xlu0 %v2733_v30 }
 0x390   : > { %2743 = vadd.xlane.f32.xlu0 %v2742_v52  ;;  %v3388_v52 = vpack.c.bf16 %v2305_v40, %v2304_v26  ;;  %v8159_v40 = vadd.f32 %v7822_v12, %v7915_v19  ;;  %v2398_v26 = vsel %vm2316_vm2, %v7986_v39, -inf  ;;  %v4045_v19 = vsel %vm2423_vm13, 1, %v10810_v42 }
 0x3a4   : > { %2387 = vmax.xlane.f32.xlu1 %v2386_v11  ;;  %v2681_v11 = vmul.f32 1.442695, %v2643_v28  ;;  %v2392_v28 = vsel %vm2316_vm2, %v8159_v40, -inf }
 0x3a6   : > { %4086 = vperm.xlu0 %6389, %v4041_v16   ;;  %v2641_v16 = vsub.f32 %v7877_v49, %v8023_v41  ;;  %6614 = vpow2.f32 %v2681_v11 }
 0x3a8   : > { %2381 = vmax.xlane.f32.xlu1 %v2380_v15 }
 0x3aa   : > { %2521 = vrot.lane.b32.xlu0 %v2483_v53, %s7069_s20  ;;  %v2677_v53 = vmul.f32 1.442695, %v2641_v16 }
 0x3ac   : > { %6616 = vpow2.f32 %v2677_v53  ;;  %v2487_v53 = vsel %vm2455_vm14, 1, %v10810_v42  ;;  %vm10826_vm14 = vcmp.eq.f32.partialorder %v7825_v59, %v7963_v63 }
 0x3ae   : > { %2517 = vrot.lane.b32.xlu0 %v2481_v4, %s7069_s20 }
 0x3b2   : > { %4083 = vperm.xlu0 %6389, %v4040_v21   ;;  %v8149_v21 = vpop.eup %6614 }
 0x3b3   : > { %v2751_v54 = vsel %vm2316_vm2, %v8149_v21, 0.0 }
 0x3b6   : > { %v8153_v3 = vpop.eup %6616 }
 0x3b7   : > { %v8135_v24 = vpop.xlane.xlu1 %2363 }
 0x3b9   : > { %3445 = vrot.lane.b32.xlu1 %v3389_v47, %s7067_s17  ;;  %v2745_v47 = vsel %vm2316_vm2, %v8153_v3, 0.0 }
 0x3bb   : > { %v8142_v30 = vpop.xlane.xlu1 %2357 }
 0x3bc   : > { %vm10857_vm8 = vcmp.eq.f32.partialorder %v7997_v55, %v8142_v30 }
 0x3bd   : > { %3443 = vrot.lane.b32.xlu1 %v3388_v52, %s7067_s17 }
 0x3bf   : > { %v3438_v15 = vpop.permute.xlu1 %3437 }
 0x3c3   : > { %v3436_v4 = vpop.permute.xlu1 %3435 }
 0x3c4   : > { %6286 = vmatprep.mubr.msk.bf16.mxu0 %vm3473_vm3, %v3436_v4  ;;  %v2309_v4 = vmax.f32 %v8159_v40, 0.0 }
 0x3c5   : > { %6287 = vmatmul.mubr.msk.bf16.gmra.mrb[140].mxu0 %vm3473_vm3, %v3438_v15 }
 0x3d1   : > { %2752 = vadd.xlane.f32.xlu0 %v2751_v54  ;;  %v2485_v54 = vsel %vm2453_vm0, 1, %v10810_v42 }
 0x3d5   : > { %2746 = vadd.xlane.f32.xlu0 %v2745_v47  ;;  %v2308_v47 = vmax.f32 %v7975_v25, 0.0 }
 0x3e1   : > { %2399 = vmax.xlane.f32.xlu1 %v2398_v26 }
 0x3e5   : > { %2393 = vmax.xlane.f32.xlu1 %v2392_v28  ;;  %v3390_v28 = vpack.c.bf16 %v2309_v4, %v2308_v47 }
 0x3e6   : > { %v8165_v52 = vpop.f32.mrb[128].mxu0 }
 0x3e7   : > { %10981 = vst [vmem:[#allocation35_spill] sm:$0xff] %v8165_v52  ;;  %v8169_v11 = vpop.f32.mrb[129].mxu0 }
 0x3e8   : > { %10982 = vst [vmem:[#allocation36_spill] sm:$0xff] %v8169_v11  ;;  %v8171_v16 = vpop.f32.mrb[130].mxu0 }
 0x3e9   : > { %10983 = vst [vmem:[#allocation37_spill] sm:$0xff] %v8171_v16  ;;  %v8173_v15 = vpop.f32.mrb[131].mxu0  ;;  %v2647_v16 = vsub.f32 %v7884_v9, %v8027_v61 }
 0x3eb   : > { %4098 = vperm.xlu0 %6389, %v4045_v19   ;;  %v4044_v19 = vsel %vm10846_vm1, 1, %v10810_v42  ;;  %v2689_v4 = vmul.f32 1.442695, %v2647_v16 }
 0x3ed   : > { %6618 = vpow2.f32 %v2689_v4 }
 0x3ef   : > { %2529 = vrot.lane.b32.xlu0 %v2487_v53, %s7069_s20 }
 0x3f3   : > { %2525 = vrot.lane.b32.xlu0 %v2485_v54, %s7069_s20  ;;  %v2645_v54 = vsub.f32 %v7893_v43, %v8032_v2 }
 0x3f4   : > { %v8197_v26 = vpop.xlane.xlu1 %2375 }
 0x3f5   : > { %v2685_v47 = vmul.f32 1.442695, %v2645_v54 }
 0x3f6   : > { %3447 = vrot.lane.b32.xlu1 %v3390_v28, %s7067_s17 }
 0x3f7   : > { %4095 = vperm.xlu0 %6389, %v4044_v19   ;;  %6620 = vpow2.f32 %v2685_v47  ;;  %v8212_v28 = vpop.eup %6618  ;;  %v8216_v19 = vadd.f32 %v7921_v18, %v7822_v12 }
 0x3f8   : > { %v8204_v53 = vpop.xlane.xlu1 %2369  ;;  %10984 = vst [vmem:[#allocation38_spill] sm:$0xff] %v8212_v28  ;;  %v2763_v42 = vsel %vm2316_vm2, %v8212_v28, 0.0 }
 0x3f9   : > { %10985 = vst [vmem:[#allocation39_spill] sm:$0xff] %v8216_v19  ;;  %v2315_v47 = vmax.f32 %v8216_v19, 0.0 }
 0x3fc   : > { %v3442_v52 = vpop.permute.xlu1 %3441 }
 0x400   : > { %v3440_v50 = vpop.permute.xlu1 %3439 }
 0x401   : > { %6290 = vmatprep.mubr.msk.bf16.mxu0 %vm3473_vm3, %v3440_v50  ;;  %v8220_v6 = vpop.eup %6620  ;;  %v8224_v50 = vadd.f32 %v7822_v12, %v7923_v20  ;;  %v8240_v20 = vpop.xlane.xlu0 %2360 }
 0x402   : > { %6291 = vmatmul.mubr.msk.bf16.gmra.mrb[144].mxu0 %vm3473_vm3, %v3442_v52  ;;  %10986 = vst [vmem:[#allocation40_spill] sm:$0xff] %v8220_v6  ;;  %v2410_v52 = vsel %vm2316_vm2, %v8216_v19, -inf  ;;  %v2757_v16 = vsel %vm2316_vm2, %v8220_v6, 0.0  ;;  %vm2427_vm6 = vcmp.eq.f32.partialorder %v7931_v31, %v8240_v20  ;;  %v2638_v6 = vsub.f32 %v7836_v1, %v7977_v56 }
 0x403   : > { %10987 = vst [vmem:[#allocation41_spill] sm:$0xff] %v8224_v50  ;;  %v2404_v18 = vsel %vm2316_vm2, %v8224_v50, -inf  ;;  %vm2459_vm9 = vmxor %vm2427_vm6, %vm7068_vm5 }
 0x404   : > { %v2671_v14 = vmul.f32 1.442695, %v2638_v6 }
 0x416   : > { %2764 = vadd.xlane.f32.xlu0 %v2763_v42 }
 0x41a   : > { %2411 = vmax.xlane.f32.xlu1 %v2410_v52  ;;  %2758 = vadd.xlane.f32.xlu0 %v2757_v16  ;;  %v3393_v52 = vpack.c.bf16 %v2315_v47, %v2314_v32  ;;  %v2313_v16 = vmax.f32 %v8224_v50, 0.0 }
 0x41c   : > { %v3392_v47 = vpack.c.bf16 %v2313_v16, %v2312_v45 }
 0x41e   : > { %2405 = vmax.xlane.f32.xlu1 %v2404_v18  ;;  %v8247_v18 = vpop.xlane.xlu0 %2354 }
 0x41f   : > { %vm2425_vm11 = vcmp.eq.f32.partialorder %v7936_v37, %v8247_v18 }
 0x420   : > { %vm2457_vm0 = vmxor %vm2425_vm11, %vm7068_vm5 }
 0x422   : > { %v8232_v4 = vpop.f32.mrb[132].mxu0 }
 0x423   : > { %10988 = vst [vmem:[#allocation42_spill] sm:$0xff] %v8232_v4  ;;  %v8234_v54 = vpop.f32.mrb[133].mxu0  ;;  %v10992_v4 = vmov 0  }
 0x424   : > { %10989 = vst [vmem:[#allocation43_spill] sm:$0xff] %v8234_v54  ;;  %v8236_v42 = vpop.f32.mrb[134].mxu0  ;;  %v4037_v45 = vsel %vm10826_vm14, 1, %v10992_v4  ;;  %v2489_v16 = vsel %vm2457_vm0, 1, %v10992_v4  ;;  %vm2448_vm0 = vmxor %vm10816_vm7, %vm7068_vm5 }
 0x425   : > { %10990 = vst [vmem:[#allocation44_spill] sm:$0xff] %v8236_v42  ;;  %v8238_v12 = vpop.f32.mrb[135].mxu0  ;;  %v4049_v42 = vsel %vm2427_vm6, 1, %v10992_v4 }
 0x426   : > { %10991 = vst [vmem:[#allocation45_spill] sm:$0xff] %v8238_v12 }
 0x42f   : > { %3453 = vrot.lane.b32.xlu1 %v3393_v52, %s7067_s17  ;;  %v2491_v52 = vsel %vm2459_vm9, 1, %v10992_v4  ;;  %vm2447_vm9 = vmxor %vm10826_vm14, %vm7068_vm5 }
 0x430   : > { %4110 = vperm.xlu0 %6389, %v4049_v42  }
 0x431   : > { %v8261_v32 = vpop.xlane.xlu1 %2387 }
 0x432   : > { %10993 = vst [vmem:[#allocation46_spill] sm:$0xff] %v8261_v32 }
 0x433   : > { %3451 = vrot.lane.b32.xlu1 %v3392_v47, %s7067_s17 }
 0x434   : > { %2537 = vrot.lane.b32.xlu0 %v2491_v52, %s7069_s20  ;;  %v2479_v52 = vsel %vm2447_vm9, 1, %v10992_v4  ;;  %vm10825_vm9 = vcmp.eq.f32.partialorder %v7836_v1, %v7977_v56 }
 0x435   : > { %v8272_v42 = vpop.xlane.xlu1 %2381  ;;  %vm2446_vm7 = vmxor %vm10825_vm9, %vm7068_vm5 }
 0x437   : > { %4074 = vperm.xlu1 %6388, %v4037_v45   ;;  %v4048_v45 = vsel %vm10857_vm8, 1, %v10992_v4 }
 0x438   : > { %2533 = vrot.lane.b32.xlu0 %v2489_v16, %s7069_s20  ;;  %v2480_v16 = vsel %vm2448_vm0, 1, %v10992_v4 }
 0x439   : > { %v3446_v47 = vpop.permute.xlu1 %3445 }
 0x43b   : > { %2513 = vrot.lane.b32.xlu1 %v2479_v52, %s7069_s20  ;;  %v4036_v52 = vsel %vm10825_vm9, 1, %v10992_v4 }
 0x43c   : > { %4107 = vperm.xlu0 %6389, %v4048_v45   ;;  %v2478_v45 = vsel %vm2446_vm7, 1, %v10992_v4 }
 0x43d   : > { %v3444_v54 = vpop.permute.xlu1 %3443 }
 0x43e   : > { %6294 = vmatprep.mubr.msk.bf16.mxu0 %vm3473_vm3, %v3444_v54  ;;  %v2651_v54 = vsub.f32 %v7931_v31, %v8240_v20 }
 0x43f   : > { %2515 = vrot.lane.b32.xlu1 %v2480_v16, %s7069_s20  ;;  %6295 = vmatmul.mubr.msk.bf16.gmra.mrb[148].mxu0 %vm3473_vm3, %v3446_v47  ;;  %v2649_v47 = vsub.f32 %v7936_v37, %v8247_v18 }
 0x440   : > { %v2697_v16 = vmul.f32 1.442695, %v2651_v54 }
 0x441   : > { %v2693_v12 = vmul.f32 1.442695, %v2649_v47 }
 0x442   : > { %6622 = vpow2.f32 %v2697_v16 }
 0x443   : > { %4071 = vperm.xlu1 %6388, %v4036_v52   ;;  %6624 = vpow2.f32 %v2693_v12  ;;  %v8316_v52 = vpop.xlane.xlu0 %2372 }
 0x444   : > { %10994 = vst [vmem:[#allocation47_spill] sm:$0xff] %v8316_v52  ;;  %6626 = vpow2.f32 %v2671_v14  ;;  %vm10828_vm7 = vcmp.eq.f32.partialorder %v7941_v23, %v8316_v52 }
 0x445   : > { %vm2463_vm0 = vmxor %vm10828_vm7, %vm7068_vm5  ;;  %vm10873_vm7 = vcmp.eq.f32.partialorder %v8056_v8, %v8204_v53 }
 0x447   : > { %2511 = vrot.lane.b32.xlu1 %v2478_v45, %s7069_s20  ;;  %v8322_v28 = vpop.xlane.xlu0 %2366 }
 0x448   : > { %vm2429_vm9 = vcmp.eq.f32.partialorder %v7946_v22, %v8322_v28 }
 0x449   : > { %vm2461_vm14 = vmxor %vm2429_vm9, %vm7068_vm5 }
 0x44b   : > { %v8338_v56 = vpop.xlane.xlu0 %2384 }
 0x44c   : > { %v8320_v62 = vpop.eup %6622  ;;  %11001 = vst [vmem:[#allocation54_spill] sm:$0xff] %v8338_v56 }
 0x44d   : > { %10995 = vst [vmem:[#allocation48_spill] sm:$0xff] %v8320_v62  ;;  %v2775_v54 = vsel %vm2316_vm2, %v8320_v62, 0.0  ;;  %v8328_v45 = vpop.eup %6624 }
 0x44e   : > { %10997 = vst [vmem:[#allocation50_spill] sm:$0xff] %v8328_v45  ;;  %v2769_v6 = vsel %vm2316_vm2, %v8328_v45, 0.0  ;;  %v8342_v1 = vpop.eup %6626  ;;  %v2653_v45 = vsub.f32 %v7946_v22, %v8322_v28 }
 0x44f   : > { %11003 = vst [vmem:[#allocation56_spill] sm:$0xff] %v8342_v1  ;;  %v2736_v62 = vsel %vm2316_vm2, %v8342_v1, 0.0 }
 0x450   : > { %v2701_v41 = vmul.f32 1.442695, %v2653_v45 }
 0x45a   : > { %v8324_v63 = vpop.f32.mrb[136].mxu0 }
 0x45b   : > { %10996 = vst [vmem:[#allocation49_spill] sm:$0xff] %v8324_v63  ;;  %v8330_v16 = vpop.f32.mrb[137].mxu0  ;;  %2776 = vadd.xlane.f32.xlu0 %v2775_v54  ;;  %v8340_v63 = vpop.xlane.xlu0 %2378 }
 0x45c   : > { %10998 = vst [vmem:[#allocation51_spill] sm:$0xff] %v8330_v16  ;;  %v8332_v12 = vpop.f32.mrb[138].mxu0  ;;  %11002 = vst [vmem:[#allocation55_spill] sm:$0xff] %v8340_v63 }
 0x45d   : > { %10999 = vst [vmem:[#allocation52_spill] sm:$0xff] %v8332_v12  ;;  %v8334_v47 = vpop.f32.mrb[139].mxu0  ;;  %v2495_v12 = vsel %vm2463_vm0, 1, %v10992_v4  ;;  %vm10840_vm0 = vcmp.eq.f32.partialorder %v7866_v33, %v8008_v58 }
 0x45e   : > { %11000 = vst [vmem:[#allocation53_spill] sm:$0xff] %v8334_v47  ;;  %v2493_v47 = vsel %vm2461_vm14, 1, %v10992_v4  ;;  %vm2452_vm14 = vmxor %vm10840_vm0, %vm7068_vm5 }
 0x45f   : > { %2770 = vadd.xlane.f32.xlu0 %v2769_v6  ;;  %v8346_v16 = vpop.xlane.xlu0 %2396 }
 0x463   : > { %v8352_v54 = vpop.xlane.xlu0 %2390 }
 0x464   : > { %11005 = vst [vmem:[#allocation58_spill] sm:$0xff] %v8352_v54 }
 0x467   : > { %v3450_v1 = vpop.permute.xlu0 %3449 }
 0x46b   : > { %2737 = vadd.xlane.f32.xlu1 %v2736_v62 }
 0x46e   : > { %v8350_v14 = vpop.xlane.xlu1 %2399 }
 0x46f   : > { %11004 = vst [vmem:[#allocation57_spill] sm:$0xff] %v8350_v14 }
 0x472   : > { %v8360_v6 = vpop.xlane.xlu1 %2393 }
 0x475   : > { %2545 = vrot.lane.b32.xlu0 %v2495_v12, %s7069_s20  ;;  %v4039_v12 = vsel %vm10829_vm10, 1, %v10992_v4  ;;  %vm2450_vm10 = vmxor %vm10839_vm12, %vm7068_vm5  ;;  %vm10885_vm12 = vcmp.eq.f32.partialorder %v7958_v38, %v8340_v63 }
 0x476   : > { %v3448_v62 = vpop.permute.xlu1 %3447 }
 0x477   : > { %6298 = vmatprep.mubr.msk.bf16.mxu0 %vm3473_vm3, %v3448_v62  ;;  %v2484_v62 = vsel %vm2452_vm14, 1, %v10992_v4 }
 0x478   : > { %6299 = vmatmul.mubr.msk.bf16.gmra.mrb[152].mxu0 %vm3473_vm3, %v3450_v1  ;;  %v4052_v1 = vsel %vm10873_vm7, 1, %v10992_v4 }
 0x479   : > { %2541 = vrot.lane.b32.xlu0 %v2493_v47, %s7069_s20  ;;  %v4042_v47 = vsel %vm10840_vm0, 1, %v10992_v4  ;;  %vm2465_vm0 = vmxor %vm10885_vm12, %vm7068_vm5 }
 0x47c   : > { %4080 = vperm.xlu1 %6388, %v4039_v12   ;;  %v2655_v12 = vsub.f32 %v7941_v23, %v8316_v52 }
 0x47d   : > { %4119 = vperm.xlu0 %6389, %v4052_v1   ;;  %v2482_v1 = vsel %vm2450_vm10, 1, %v10992_v4  ;;  %vm10899_vm10 = vcmp.eq.f32.partialorder %v7952_v27, %v8338_v56 }
 0x47e   : > { %vm2467_vm14 = vmxor %vm10899_vm10, %vm7068_vm5 }
 0x480   : > { %4089 = vperm.xlu1 %6388, %v4042_v47   ;;  %v2705_v47 = vmul.f32 1.442695, %v2655_v12 }
 0x482   : > { %6628 = vpow2.f32 %v2705_v47 }
 0x483   : > { %6630 = vpow2.f32 %v2701_v41 }
 0x484   : > { %2523 = vrot.lane.b32.xlu1 %v2484_v62, %s7069_s20  ;;  %v2644_v62 = vsub.f32 %v7866_v33, %v8008_v58 }
 0x486   : > { %v2683_v19 = vmul.f32 1.442695, %v2644_v62 }
 0x488   : > { %2519 = vrot.lane.b32.xlu1 %v2482_v1, %s7069_s20  ;;  %v2642_v1 = vsub.f32 %v7872_v46, %v8017_v44  ;;  %6632 = vpow2.f32 %v2683_v19 }
 0x48a   : > { %v2679_v47 = vmul.f32 1.442695, %v2642_v1 }
 0x48c   : > { %v8406_v49 = vpop.eup %6628  ;;  %6634 = vpow2.f32 %v2679_v47  ;;  %v2497_v47 = vsel %vm2465_vm0, 1, %v10992_v4 }
 0x48d   : > { %11006 = vst [vmem:[#allocation59_spill] sm:$0xff] %v8406_v49  ;;  %v2787_v41 = vsel %vm2316_vm2, %v8406_v49, 0.0  ;;  %v8420_v45 = vpop.eup %6630 }
 0x48e   : > { %11011 = vst [vmem:[#allocation64_spill] sm:$0xff] %v8420_v45 }
 0x498   : > { %v8408_v59 = vpop.f32.mrb[140].mxu0 }
 0x499   : > { %11007 = vst [vmem:[#allocation60_spill] sm:$0xff] %v8408_v59  ;;  %v8410_v50 = vpop.f32.mrb[141].mxu0  ;;  %v2781_v59 = vsel %vm2316_vm2, %v8420_v45, 0.0 }
 0x49a   : > { %11008 = vst [vmem:[#allocation61_spill] sm:$0xff] %v8410_v50  ;;  %v8414_v12 = vpop.f32.mrb[142].mxu0  ;;  %v8426_v50 = vpop.eup %6632 }
 0x49b   : > { %11009 = vst [vmem:[#allocation62_spill] sm:$0xff] %v8414_v12  ;;  %v8416_v11 = vpop.f32.mrb[143].mxu0  ;;  %11013 = vst [vmem:[#allocation66_spill] sm:$0xff] %v8426_v50  ;;  %v8432_v49 = vpop.eup %6634 }
 0x49c   : > { %11010 = vst [vmem:[#allocation63_spill] sm:$0xff] %v8416_v11  ;;  %2788 = vadd.xlane.f32.xlu0 %v2787_v41  ;;  %v2754_v11 = vsel %vm2316_vm2, %v8426_v50, 0.0  ;;  %11014 = vst [vmem:[#allocation67_spill] sm:$0xff] %v8432_v49  ;;  %v10841_v41 = vmov 1  }
 0x49d   : > { %6391 = vset.pattern.permute.xlu0 %v10841_v41 }
 0x4a0   : > { %2782 = vadd.xlane.f32.xlu0 %v2781_v59  ;;  %v2748_v59 = vsel %vm2316_vm2, %v8432_v49, 0.0 }
 0x4a7   : > { %v8424_v62 = vpop.xlane.xlu1 %2411 }
 0x4a8   : > { %11012 = vst [vmem:[#allocation65_spill] sm:$0xff] %v8424_v62 }
 0x4ab   : > { %v8428_v12 = vpop.xlane.xlu1 %2405 }
 0x4ac   : > { %2755 = vadd.xlane.f32.xlu1 %v2754_v11  ;;  %v2499_v11 = vsel %vm2467_vm14, 1, %v10992_v4  ;;  %vm2454_vm14 = vmxor %vm10846_vm1, %vm7068_vm5  ;;  %vm10852_vm1 = vcmp.eq.f32.partialorder %v7975_v25, %v8352_v54 }
 0x4ad   : > { %v2486_v41 = vsel %vm2454_vm14, 1, %v10992_v4 }
 0x4af   : > { %v3454_v19 = vpop.permute.xlu1 %3453 }
 0x4b0   : > { %2749 = vadd.xlane.f32.xlu1 %v2748_v59  ;;  %v2659_v59 = vsub.f32 %v7952_v27, %v8338_v56  ;;  %v11078_v56 = vld [vmem:[#allocation14_spill] sm:$0xff]  ;;  %v11079_v27 = vld [vmem:[#allocation24_spill] sm:$0xff] }
 0x4b3   : > { %v3452_v1 = vpop.permute.xlu1 %3451 }
 0x4b4   : > { %6302 = vmatprep.mubr.msk.bf16.mxu0 %vm3473_vm3, %v3452_v1 }
 0x4b5   : > { %6303 = vmatmul.mubr.msk.bf16.gmra.mrb[156].mxu0 %vm3473_vm3, %v3454_v19  ;;  %v4043_v19 = vsel %vm2421_vm15, 1, %v10992_v4  ;;  %vm10847_vm3 = vcmp.eq.f32.partialorder %v7926_v0, %v8077_v35 }
 0x4b6   : > { %2553 = vrot.lane.b32.xlu0 %v2499_v11, %s7069_s20  ;;  %v4046_v1 = vsel %vm10847_vm3, 1, %v10992_v4  ;;  %vm2456_vm0 = vmxor %vm10847_vm3, %vm7068_vm5  ;;  %v2713_v11 = vmul.f32 1.442695, %v2659_v59 }
 0x4b7   : > { %vm2469_vm3 = vmxor %vm10852_vm1, %vm7068_vm5 }
 0x4b8   : > { %6636 = vpow2.f32 %v2713_v11  ;;  %vm2458_vm1 = vmxor %vm10857_vm8, %vm7068_vm5 }
 0x4ba   : > { %2549 = vrot.lane.b32.xlu0 %v2497_v47, %s7069_s20  ;;  %v2657_v47 = vsub.f32 %v7958_v38, %v8340_v63  ;;  %v11070_v63 = vld [vmem:[#allocation12_spill] sm:$0xff]  ;;  %v11071_v38 = vld [vmem:[#allocation21_spill] sm:$0xff] }
 0x4c1   : > { %4092 = vperm.xlu1 %6388, %v4043_v19   ;;  %v2488_v19 = vsel %vm2456_vm0, 1, %v10992_v4  ;;  %vm10859_vm0 = vcmp.eq.f32.partialorder %v7966_v48, %v8346_v16 }
 0x4c2   : > { %v8481_v59 = vpop.eup %6636  ;;  %vm2471_vm14 = vmxor %vm10859_vm0, %vm7068_vm5 }
 0x4c3   : > { %11015 = vst [vmem:[#allocation68_spill] sm:$0xff] %v8481_v59  ;;  %v2799_v44 = vsel %vm2316_vm2, %v8481_v59, 0.0 }
 0x4c5   : > { %4101 = vperm.xlu1 %6388, %v4046_v1   ;;  %v2709_v1 = vmul.f32 1.442695, %v2657_v47 }
 0x4c7   : > { %6638 = vpow2.f32 %v2709_v1 }
 0x4c9   : > { %2531 = vrot.lane.b32.xlu1 %v2488_v19, %s7069_s20 }
 0x4cd   : > { %2527 = vrot.lane.b32.xlu1 %v2486_v41, %s7069_s20  ;;  %v2648_v41 = vsub.f32 %v7926_v0, %v8077_v35 }
 0x4cf   : > { %v2691_v1 = vmul.f32 1.442695, %v2648_v41 }
 0x4d1   : > { %v8493_v11 = vpop.eup %6638  ;;  %6640 = vpow2.f32 %v2691_v1  ;;  %v8525_v1 = vpop.xlane.xlu0 %2408 }
 0x4d2   : > { %11020 = vst [vmem:[#allocation73_spill] sm:$0xff] %v8493_v11  ;;  %v2793_v47 = vsel %vm2316_vm2, %v8493_v11, 0.0  ;;  %11023 = vst [vmem:[#allocation76_spill] sm:$0xff] %v8525_v1  ;;  %v2667_v13 = vsub.f32 %v8012_v29, %v8525_v1 }
 0x4d5   : > { %v8483_v49 = vpop.f32.mrb[144].mxu0 }
 0x4d6   : > { %11016 = vst [vmem:[#allocation69_spill] sm:$0xff] %v8483_v49  ;;  %v8485_v50 = vpop.f32.mrb[145].mxu0  ;;  %v2646_v49 = vsub.f32 %v7909_v36, %v8080_v34 }
 0x4d7   : > { %11017 = vst [vmem:[#allocation70_spill] sm:$0xff] %v8485_v50  ;;  %v8487_v45 = vpop.f32.mrb[146].mxu0 }
 0x4d8   : > { %11018 = vst [vmem:[#allocation71_spill] sm:$0xff] %v8487_v45  ;;  %v8489_v19 = vpop.f32.mrb[147].mxu0  ;;  %v2687_v45 = vmul.f32 1.442695, %v2646_v49  ;;  %v2503_v49 = vsel %vm2471_vm14, 1, %v10992_v4 }
 0x4d9   : > { %11019 = vst [vmem:[#allocation72_spill] sm:$0xff] %v8489_v19  ;;  %2800 = vadd.xlane.f32.xlu0 %v2799_v44  ;;  %v2661_v19 = vsub.f32 %v7975_v25, %v8352_v54 }
 0x4da   : > { %6642 = vpow2.f32 %v2687_v45 }
 0x4db   : > { %v8503_v50 = vpop.eup %6640 }
 0x4dc   : > { %11021 = vst [vmem:[#allocation74_spill] sm:$0xff] %v8503_v50  ;;  %v2766_v44 = vsel %vm2316_vm2, %v8503_v50, 0.0  ;;  %v8529_v50 = vpop.xlane.xlu0 %2402 }
 0x4dd   : > { %2794 = vadd.xlane.f32.xlu0 %v2793_v47  ;;  %v2501_v47 = vsel %vm2469_vm3, 1, %v10992_v4  ;;  %11024 = vst [vmem:[#allocation77_spill] sm:$0xff] %v8529_v50  ;;  %vm10858_vm3 = vcmp.eq.f32.partialorder %v7992_v5, %v8135_v24  ;;  %vm2441_vm8 = vcmp.eq.f32.partialorder %v8021_v7, %v8529_v50 }
 0x4de   : > { %vm2460_vm14 = vmxor %vm10858_vm3, %vm7068_vm5 }
 0x4df   : > { %v2492_v59 = vsel %vm2460_vm14, 1, %v10992_v4 }
 0x4e4   : > { %v8513_v41 = vpop.eup %6642 }
 0x4e5   : > { %11022 = vst [vmem:[#allocation75_spill] sm:$0xff] %v8513_v41  ;;  %v2760_v45 = vsel %vm2316_vm2, %v8513_v41, 0.0  ;;  %v2717_v41 = vmul.f32 1.442695, %v2661_v19  ;;  %v2490_v19 = vsel %vm2458_vm1, 1, %v10992_v4  ;;  %vm10860_vm1 = vcmp.eq.f32.partialorder %v8012_v29, %v8525_v1 }
 0x4e6   : > { %vm2475_vm14 = vmxor %vm10860_vm1, %vm7068_vm5 }
 0x4f1   : > { %2767 = vadd.xlane.f32.xlu1 %v2766_v44  ;;  %v2663_v44 = vsub.f32 %v7966_v48, %v8346_v16 }
 0x4f3   : > { %2561 = vrot.lane.b32.xlu0 %v2503_v49, %s7069_s20  ;;  %v2721_v49 = vmul.f32 1.442695, %v2663_v44  ;;  %v4050_v44 = vsel %vm10858_vm3, 1, %v10992_v4  ;;  %vm2473_vm3 = vmxor %vm2441_vm8, %vm7068_vm5 }
 0x4f5   : > { %2761 = vadd.xlane.f32.xlu1 %v2760_v45  ;;  %v4047_v45 = vsel %vm2425_vm11, 1, %v10992_v4  ;;  %6644 = vpow2.f32 %v2721_v49 }
 0x4f6   : > { %6646 = vpow2.f32 %v2717_v41 }
 0x4f7   : > { %2557 = vrot.lane.b32.xlu0 %v2501_v47, %s7069_s20  ;;  %v8539_v47 = vpop.permute.xlu0 %4068 }
 0x4f8   : > { %11025 = vst [vmem:[#allocation78_spill] sm:$0xff] %v8539_v47 }
 0x4fb   : > { %v2510_v11 = vpop.permute.xlu0 %2509 }
 0x4fc   : > { %vm2573_vm0 = vcmp.ne.s32.totalorder %v2510_v11, 0 }
 0x4fd   : > { %vm2605_vm1 = vmand %vm2413_vm4, %vm2573_vm0  ;;  %vm10874_vm4 = vcmp.eq.f32.partialorder %v8048_v60, %v8197_v26 }
 0x4fe   : > { %v3715_v11 = vsel %vm2605_vm1, 1, %v10992_v4  ;;  %vm2464_vm0 = vmxor %vm10874_vm4, %vm7068_vm5 }
 0x4ff   : > { %v8556_v49 = vpop.eup %6644 }
 0x500   : > { %11026 = vst [vmem:[#allocation79_spill] sm:$0xff] %v8556_v49  ;;  %v2811_v34 = vsel %vm2316_vm2, %v8556_v49, 0.0  ;;  %v8571_v36 = vpop.eup %6646 }
 0x501   : > { %11032 = vst [vmem:[#allocation85_spill] sm:$0xff] %v8571_v36 }
 0x506   : > { %4104 = vperm.xlu1 %6388, %v4047_v45  }
 0x50a   : > { %4113 = vperm.xlu1 %6388, %v4050_v44   ;;  %v8561_v44 = vpop.permute.xlu0 %4077 }
 0x50b   : > { %11028 = vst [vmem:[#allocation81_spill] sm:$0xff] %v8561_v44  ;;  %v2652_v44 = vsub.f32 %v7992_v5, %v8135_v24 }
 0x50e   : > { %2539 = vrot.lane.b32.xlu1 %v2492_v59, %s7069_s20  ;;  %v8573_v35 = vpop.xlane.xlu0 %2740 }
 0x512   : > { %v8558_v45 = vpop.f32.mrb[148].mxu0  ;;  %2535 = vrot.lane.b32.xlu1 %v2490_v19, %s7069_s20  ;;  %v8577_v19 = vpop.xlane.xlu0 %2734 }
 0x513   : > { %11027 = vst [vmem:[#allocation80_spill] sm:$0xff] %v8558_v45  ;;  %v8563_v41 = vpop.f32.mrb[149].mxu0  ;;  %v2805_v45 = vsel %vm2316_vm2, %v8571_v36, 0.0  ;;  %11033 = vst [vmem:[#allocation86_spill] sm:$0xff] %v8577_v19 }
 0x514   : > { %11029 = vst [vmem:[#allocation82_spill] sm:$0xff] %v8563_v41  ;;  %v8565_v47 = vpop.f32.mrb[150].mxu0  ;;  %v2699_v41 = vmul.f32 1.442695, %v2652_v44  ;;  %v2507_v44 = vsel %vm2475_vm14, 1, %v10992_v4 }
 0x515   : > { %11030 = vst [vmem:[#allocation83_spill] sm:$0xff] %v8565_v47  ;;  %v8567_v59 = vpop.f32.mrb[151].mxu0 }
 0x516   : > { %11031 = vst [vmem:[#allocation84_spill] sm:$0xff] %v8567_v59  ;;  %2812 = vadd.xlane.f32.xlu0 %v2811_v34  ;;  %v8581_v47 = vpop.xlane.xlu0 %2743  ;;  %v2650_v59 = vsub.f32 %v7997_v55, %v8142_v30  ;;  %6648 = vpow2.f32 %v2699_v41 }
 0x517   : > { %11034 = vst [vmem:[#allocation87_spill] sm:$0xff] %v8581_v47 }
 0x518   : > { %v2695_v34 = vmul.f32 1.442695, %v2650_v59 }
 0x51a   : > { %2806 = vadd.xlane.f32.xlu0 %v2805_v45  ;;  %v8585_v49 = vpop.permute.xlu0 %4086  ;;  %6650 = vpow2.f32 %v2695_v34  ;;  %v2505_v34 = vsel %vm2473_vm3, 1, %v10992_v4  ;;  %vm2462_vm3 = vmxor %vm10873_vm7, %vm7068_vm5 }
 0x51b   : > { %11035 = vst [vmem:[#allocation88_spill] sm:$0xff] %v8585_v49 }
 0x51e   : > { %v8595_v45 = vpop.permute.xlu0 %2521 }
 0x520   : > { %v8603_v41 = vpop.eup %6648 }
 0x521   : > { %11036 = vst [vmem:[#allocation89_spill] sm:$0xff] %v8603_v41 }
 0x522   : > { %v8605_v59 = vpop.permute.xlu0 %2517 }
 0x524   : > { %v8614_v49 = vpop.eup %6650 }
 0x525   : > { %11037 = vst [vmem:[#allocation90_spill] sm:$0xff] %v8614_v49  ;;  %v2772_v47 = vsel %vm2316_vm2, %v8614_v49, 0.0  ;;  %v2656_v49 = vsub.f32 %v8048_v60, %v8197_v26 }
 0x526   : > { %v8617_v36 = vpop.permute.xlu0 %4083 }
 0x527   : > { %11038 = vst [vmem:[#allocation91_spill] sm:$0xff] %v8617_v36 }
 0x52a   : > { %v8621_v19 = vpop.xlane.xlu0 %2752 }
 0x52e   : > { %v8625_v51 = vpop.xlane.xlu0 %2746 }
 0x530   : > { %2569 = vrot.lane.b32.xlu0 %v2507_v44, %s7069_s20  ;;  %v2778_v44 = vsel %vm2316_vm2, %v8603_v41, 0.0 }
 0x532   : > { %v8629_v41 = vpop.permute.xlu0 %4098 }
 0x533   : > { %11039 = vst [vmem:[#allocation92_spill] sm:$0xff] %v8629_v41 }
 0x534   : > { %2565 = vrot.lane.b32.xlu0 %v2505_v34, %s7069_s20  ;;  %v2729_v34 = vmul.f32 1.442695, %v2667_v13 }
 0x536   : > { %2779 = vadd.xlane.f32.xlu1 %v2778_v44  ;;  %v2665_v44 = vsub.f32 %v8021_v7, %v8529_v50  ;;  %6652 = vpow2.f32 %v2729_v34  ;;  %v2530_v41 = vpop.permute.xlu0 %2529 }
 0x537   : > { %vm2583_vm1 = vcmp.ne.s32.totalorder %v2530_v41, 0 }
 0x538   : > { %3748 = vperm.xlu0 %6391, %v3715_v11   ;;  %v2725_v11 = vmul.f32 1.442695, %v2665_v44  ;;  %v2496_v44 = vsel %vm2464_vm0, 1, %v10992_v4  ;;  %vm2615_vm14 = vmand %vm2423_vm13, %vm2583_vm1 }
 0x53a   : > { %2773 = vadd.xlane.f32.xlu1 %v2772_v47  ;;  %v4051_v47 = vsel %vm2429_vm9, 1, %v10992_v4  ;;  %6654 = vpow2.f32 %v2725_v11  ;;  %v2526_v11 = vpop.permute.xlu0 %2525 }
 0x53b   : > { %vm2581_vm0 = vcmp.ne.s32.totalorder %v2526_v11, 0 }
 0x540   : > { %v8657_v29 = vpop.eup %6652 }
 0x541   : > { %11045 = vst [vmem:[#allocation97_spill] sm:$0xff] %v8657_v29 }
 0x54b   : > { %4116 = vperm.xlu1 %6388, %v4051_v47   ;;  %v8637_v36 = vpop.f32.mrb[152].mxu0  ;;  %v11044_v47 = vmov 1  }
 0x54c   : > { %11040 = vst [vmem:[#allocation93_spill] sm:$0xff] %v8637_v36  ;;  %v8643_v13 = vpop.f32.mrb[153].mxu0  ;;  %v2494_v36 = vsel %vm2462_vm3, 1, %v10992_v4  ;;  %vm2613_vm3 = vmand %vm2421_vm15, %vm2581_vm0 }
 0x54d   : > { %11041 = vst [vmem:[#allocation94_spill] sm:$0xff] %v8643_v13  ;;  %v8645_v1 = vpop.f32.mrb[154].mxu0  ;;  %v8662_v13 = vpop.eup %6654 }
 0x54e   : > { %11042 = vst [vmem:[#allocation95_spill] sm:$0xff] %v8645_v1  ;;  %v8647_v34 = vpop.f32.mrb[155].mxu0  ;;  %v2823_v1 = vsel %vm2316_vm2, %v8657_v29, 0.0  ;;  %v2654_v29 = vsub.f32 %v8056_v8, %v8204_v53 }
 0x54f   : > { %11043 = vst [vmem:[#allocation96_spill] sm:$0xff] %v8647_v34  ;;  %2547 = vrot.lane.b32.xlu1 %v2496_v44, %s7069_s20  ;;  %v8664_v44 = vpop.permute.xlu0 %4095  ;;  %v2817_v34 = vsel %vm2316_vm2, %v8662_v13, 0.0 }
 0x550   : > { %6390 = vset.pattern.permute.xlu1 %v11044_v47  ;;  %11046 = vst [vmem:[#allocation98_spill] sm:$0xff] %v8664_v44  ;;  %v3725_v44 = vsel %vm2615_vm14, 1, %v10992_v4  ;;  %vm11053_vm14 = vcmp.eq.f32.partialorder %v7941_v23, %v8316_v52 }
 0x553   : > { %2543 = vrot.lane.b32.xlu1 %v2494_v36, %s7069_s20  ;;  %v8668_v47 = vpop.xlane.xlu0 %2764  ;;  %v2707_v36 = vmul.f32 1.442695, %v2656_v49 }
 0x555   : > { %6656 = vpow2.f32 %v2707_v36 }
 0x557   : > { %2824 = vadd.xlane.f32.xlu0 %v2823_v1  ;;  %v8672_v50 = vpop.xlane.xlu0 %2758  ;;  %v2703_v1 = vmul.f32 1.442695, %v2654_v29  ;;  %v3723_v29 = vsel %vm2613_vm3, 1, %v10992_v4 }
 0x559   : > { %6658 = vpow2.f32 %v2703_v1 }
 0x55a   : > { %6660 = vrcp.f32 %v8573_v35 }
 0x55b   : > { %2818 = vadd.xlane.f32.xlu0 %v2817_v34  ;;  %v8676_v7 = vpop.permute.xlu0 %4110 }
 0x55c   : > { %11047 = vst [vmem:[#allocation99_spill] sm:$0xff] %v8676_v7 }
 0x55f   : > { %v2538_v34 = vpop.permute.xlu0 %2537  ;;  %v8685_v49 = vpop.eup %6656 }
 0x560   : > { %vm2587_vm7 = vcmp.ne.s32.totalorder %v2538_v34, 0  ;;  %11048 = vst [vmem:[#allocation100_spill] sm:$0xff] %v8685_v49  ;;  %v2790_v9 = vsel %vm2316_vm2, %v8685_v49, 0.0  ;;  %v8731_v34 = vld [vmem:[%s10796_s9] ss:$0 sm:$0xff] }
 0x561   : > { %vm2619_vm4 = vmand %vm2427_vm6, %vm2587_vm7  ;;  %vm2436_vm6 = vcmp.eq.f32.partialorder %v8097_v10, %v8261_v32  ;;  %vm2434_vm7 = vcmp.eq.f32.partialorder %v8103_v17, %v8272_v42 }
 0x562   : > { %v3729_v43 = vsel %vm2619_vm4, 1, %v10992_v4  ;;  %vm2466_vm4 = vmxor %vm2434_vm7, %vm7068_vm5 }
 0x563   : > { %v2534_v36 = vpop.permute.xlu0 %2533  ;;  %v8693_v61 = vpop.eup %6658  ;;  %v2498_v35 = vsel %vm2466_vm4, 1, %v10992_v4 }
 0x564   : > { %vm2585_vm13 = vcmp.ne.s32.totalorder %v2534_v36, 0  ;;  %11049 = vst [vmem:[#allocation101_spill] sm:$0xff] %v8693_v61  ;;  %v2784_v2 = vsel %vm2316_vm2, %v8693_v61, 0.0 }
 0x565   : > { %vm2617_vm15 = vmand %vm2425_vm11, %vm2585_vm13 }
 0x566   : > { %v3727_v31 = vsel %vm2617_vm15, 1, %v10992_v4  ;;  %vm2468_vm11 = vmxor %vm2436_vm6, %vm7068_vm5 }
 0x567   : > { %v2500_v11 = vsel %vm2468_vm11, 1, %v10992_v4  ;;  %v8733_v36 = vpop.permute.xlu0 %4107  ;;  %vm2438_vm11 = vcmp.eq.f32.partialorder %v8159_v40, %v8360_v6 }
 0x568   : > { %11052 = vst [vmem:[#allocation104_spill] sm:$0xff] %v8733_v36  ;;  %vm2470_vm4 = vmxor %vm2438_vm11, %vm7068_vm5 }
 0x571   : > { %3778 = vperm.xlu0 %6391, %v3725_v44   ;;  %v6661_v44 = vpop.eup %6660 }
 0x572   : > { %v2863_v1 = vmul.f32 %v6661_v44, %v8082_v57 }
 0x575   : > { %3772 = vperm.xlu0 %6391, %v3723_v29   ;;  %v2902_v29 = vmul.f32 %v8731_v34, %v2863_v1 }
 0x577   : > { %2791 = vadd.xlane.f32.xlu1 %v2790_v9  ;;  %v8736_v9 = vpop.xlane.xlu0 %2776 }
 0x579   : > { %3790 = vperm.xlu0 %6391, %v3729_v43   ;;  %v2938_v43 = vsel %vm2316_vm2, %v2902_v29, 0.0 }
 0x57b   : > { %2785 = vadd.xlane.f32.xlu1 %v2784_v2  ;;  %v2660_v2 = vsub.f32 %v8097_v10, %v8261_v32  ;;  %v11220_v10 = vld [vmem:[#allocation23_spill] sm:$0xff] }
 0x57d   : > { %3784 = vperm.xlu0 %6391, %v3727_v31   ;;  %v8741_v31 = vpop.xlane.xlu0 %2770  ;;  %v2715_v57 = vmul.f32 1.442695, %v2660_v2 }
 0x57f   : > { %6662 = vpow2.f32 %v2715_v57 }
 0x581   : > { %v2546_v44 = vpop.permute.xlu0 %2545 }
 0x582   : > { %vm2591_vm1 = vcmp.ne.s32.totalorder %v2546_v44, 0  ;;  %v8761_v44 = vpop.permute.xlu1 %4074 }
 0x583   : > { %vm2623_vm0 = vmand %vm11053_vm14, %vm2591_vm1  ;;  %11056 = vst [vmem:[#allocation107_spill] sm:$0xff] %v8761_v44 }
 0x585   : > { %v2542_v1 = vpop.permute.xlu0 %2541 }
 0x586   : > { %vm2589_vm3 = vcmp.ne.s32.totalorder %v2542_v1, 0  ;;  %v8764_v22 = vpop.permute.xlu1 %2513 }
 0x587   : > { %vm2621_vm13 = vmand %vm2429_vm9, %vm2589_vm3  ;;  %vm2440_vm9 = vcmp.eq.f32.partialorder %v7986_v39, %v8350_v14 }
 0x588   : > { %v8705_v20 = vpop.f32.mrb[156].mxu0  ;;  %vm2472_vm15 = vmxor %vm2440_vm9, %vm7068_vm5 }
 0x589   : > { %v8713_v37 = vpop.f32.mrb[157].mxu0  ;;  %v8748_v29 = vpop.eup %6662  ;;  %v2504_v1 = vsel %vm2472_vm15, 1, %v10992_v4 }
 0x58a   : > { %11050 = vst [vmem:[#allocation102_spill] sm:$0xff] %v8713_v37  ;;  %v8715_v18 = vpop.f32.mrb[158].mxu0  ;;  %11054 = vst [vmem:[#allocation105_spill] sm:$0xff] %v8748_v29  ;;  %v2802_v2 = vsel %vm2316_vm2, %v8748_v29, 0.0  ;;  %v8775_v28 = vpop.permute.xlu1 %2515 }
 0x58b   : > { %v8717_v41 = vpop.f32.mrb[159].mxu0 }
 0x58c   : > { %11051 = vst [vmem:[#allocation103_spill] sm:$0xff] %v8717_v41  ;;  %2555 = vrot.lane.b32.xlu1 %v2500_v11, %s7069_s20  ;;  %v2658_v11 = vsub.f32 %v8103_v17, %v8272_v42 }
 0x590   : > { %2551 = vrot.lane.b32.xlu1 %v2498_v35, %s7069_s20  ;;  %v2711_v35 = vmul.f32 1.442695, %v2658_v11  ;;  %v3731_v11 = vsel %vm2621_vm13, 1, %v10992_v4 }
 0x592   : > { %6664 = vpow2.f32 %v2711_v35 }
 0x593   : > { %6666 = vrcp.f32 %v8621_v19 }
 0x594   : > { %6668 = vrcp.f32 %v8625_v51  ;;  %v8783_v51 = vpop.permute.xlu1 %4071 }
 0x595   : > { %11057 = vst [vmem:[#allocation108_spill] sm:$0xff] %v8783_v51  ;;  %v8796_v51 = vpop.permute.xlu0 %4119 }
 0x596   : > { %11058 = vst [vmem:[#allocation109_spill] sm:$0xff] %v8796_v51  ;;  %v11061_v51 = vld [vmem:[#allocation36_spill] sm:$0xff] }
 0x598   : > { %v8790_v7 = vpop.permute.xlu1 %2511 }
 0x59c   : > { %2939 = vadd.xlane.f32.xlu0 %v2938_v43  ;;  %v3733_v43 = vsel %vm2623_vm0, 1, %v10992_v4  ;;  %v8756_v57 = vpop.eup %6664  ;;  %v8794_v37 = vpop.xlane.xlu1 %2737 }
 0x59d   : > { %11055 = vst [vmem:[#allocation106_spill] sm:$0xff] %v8756_v57  ;;  %v2796_v35 = vsel %vm2316_vm2, %v8756_v57, 0.0  ;;  %v6667_v19 = vpop.eup %6666 }
 0x5b2   : > { %3802 = vperm.xlu0 %6391, %v3733_v43   ;;  %v2502_v43 = vsel %vm2470_vm4, 1, %v10992_v4 }
 0x5b4   : > { %2803 = vadd.xlane.f32.xlu1 %v2802_v2  ;;  %v2867_v2 = vmul.f32 %v6667_v19, %v8149_v21  ;;  %v2664_v19 = vsub.f32 %v7986_v39, %v8350_v14  ;;  %v11150_v14 = vld [vmem:[#allocation97_spill] sm:$0xff] }
 0x5b6   : > { %3796 = vperm.xlu0 %6391, %v3731_v11   ;;  %v6669_v11 = vpop.eup %6668 }
 0x5b7   : > { %v2865_v36 = vmul.f32 %v6669_v11, %v8153_v3  ;;  %v8803_v3 = vpop.permute.xlu1 %4080  ;;  %v2662_v11 = vsub.f32 %v8159_v40, %v8360_v6 }
 0x5b8   : > { %2797 = vadd.xlane.f32.xlu1 %v2796_v35  ;;  %v2906_v35 = vmul.f32 %v8731_v34, %v2867_v2  ;;  %11059 = vst [vmem:[#allocation110_spill] sm:$0xff] %v8803_v3  ;;  %v2723_v2 = vmul.f32 1.442695, %v2664_v19 }
 0x5b9   : > { %v2904_v44 = vmul.f32 %v8731_v34, %v2865_v36 }
 0x5ba   : > { %6670 = vpow2.f32 %v2723_v2 }
 0x5bb   : > { %v2944_v21 = vsel %vm2316_vm2, %v2904_v44, 0.0  ;;  %v8814_v44 = vld [vmem:[%s10795_s8] ss:$0 sm:$0xff] }
 0x5bc   : > { %v3557_v19 = vadd.f32 %v8814_v44, %v11061_v51 }
 0x5c4   : > { %v8826_v2 = vpop.eup %6670 }
 0x5c5   : > { %11064 = vst [vmem:[#allocation113_spill] sm:$0xff] %v8826_v2 }
 0x5c9   : > { %2563 = vrot.lane.b32.xlu1 %v2504_v1, %s7069_s20  ;;  %v2950_v1 = vsel %vm2316_vm2, %v2906_v35, 0.0  ;;  %v8809_v35 = vpop.permute.xlu1 %4089 }
 0x5ca   : > { %11060 = vst [vmem:[#allocation111_spill] sm:$0xff] %v8809_v35  ;;  %v8824_v35 = vmax.f32 %v3557_v19, 0.0 }
 0x5cc   : > { %11063 = vst [vmem:[#allocation112_spill] sm:$0xff] %v8824_v35 }
 0x5cd   : > { %2559 = vrot.lane.b32.xlu1 %v2502_v43, %s7069_s20  ;;  %v8801_v43 = vpop.xlane.xlu0 %2788  ;;  %v8820_v41 = vpop.permute.xlu1 %2523 }
 0x5d1   : > { %v8807_v36 = vpop.xlane.xlu0 %2782  ;;  %v8830_v61 = vpop.permute.xlu1 %2519 }
 0x5d5   : > { %2951 = vadd.xlane.f32.xlu0 %v2950_v1  ;;  %v2719_v1 = vmul.f32 1.442695, %v2662_v11  ;;  %v2554_v3 = vpop.permute.xlu0 %2553 }
 0x5d6   : > { %vm2595_vm1 = vcmp.ne.s32.totalorder %v2554_v3, 0  ;;  %v8840_v3 = vpop.xlane.xlu1 %2755 }
 0x5d7   : > { %6672 = vpow2.f32 %v2719_v1  ;;  %vm2627_vm14 = vmand %vm10899_vm10, %vm2595_vm1 }
 0x5d8   : > { %v3737_v1 = vsel %vm2627_vm14, 1, %v10992_v4  ;;  %6674 = vrcp.f32 %v8668_v47  ;;  %vm2575_vm14 = vcmp.ne.s32.totalorder %v8764_v22, 0  ;;  %v11075_v22 = vld [vmem:[#allocation22_spill] sm:$0xff] }
 0x5d9   : > { %2945 = vadd.xlane.f32.xlu0 %v2944_v21  ;;  %v3560_v21 = vadd.f32 %v8814_v44, %v8173_v15  ;;  %v2550_v29 = vpop.permute.xlu0 %2549  ;;  %v2814_v15 = vsel %vm2316_vm2, %v8826_v2, 0.0  ;;  %6676 = vrcp.f32 %v8672_v50  ;;  %v11077_v2 = vld [vmem:[#allocation40_spill] sm:$0xff] }
 0x5da   : > { %vm2593_vm0 = vcmp.ne.s32.totalorder %v2550_v29, 0  ;;  %v8849_v19 = vpop.xlane.xlu1 %2749 }
 0x5db   : > { %v8822_v57 = vmax.f32 %v3560_v21, 0.0  ;;  %vm2625_vm3 = vmand %vm10885_vm12, %vm2593_vm0  ;;  %vm11072_vm0 = vcmp.eq.f32.partialorder %v11070_v63, %v11071_v38  ;;  %vm2574_vm12 = vcmp.ne.s32.totalorder %v8790_v7, 0 }
 0x5dc   : > { %v3735_v29 = vsel %vm2625_vm3, 1, %v10992_v4  ;;  %vm2607_vm3 = vmand %vm11072_vm0, %vm2575_vm14  ;;  %vm11080_vm14 = vcmp.eq.f32.partialorder %v11078_v56, %v11079_v27 }
 0x5dd   : > { %11062 = vst [vmem:[#allocation36_spill] sm:$0xff] %v8822_v57  ;;  %v6397_v11 = vpack.i.bf16 %v8822_v57, %v8824_v35  ;;  %vm2606_vm0 = vmand %vm11080_vm14, %vm2574_vm12 }
 0x5e1   : > { %v8838_v51 = vpop.eup %6672 }
 0x5e2   : > { %11065 = vst [vmem:[#allocation114_spill] sm:$0xff] %v8838_v51  ;;  %v2808_v21 = vsel %vm2316_vm2, %v8838_v51, 0.0  ;;  %v11074_v51 = vld [vmem:[#allocation13_spill] sm:$0xff] }
 0x5ef   : > { %6398 = vrot.lane.b32.xlu0 %v6397_v11, %s7071_s30  ;;  %v8851_v11 = vpop.permute.xlu1 %4092 }
 0x5f0   : > { %11066 = vst [vmem:[#allocation115_spill] sm:$0xff] %v8851_v11  ;;  %v6675_v11 = vpop.eup %6674 }
 0x5f1   : > { %2815 = vadd.xlane.f32.xlu1 %v2814_v15  ;;  %v11067_v15 = vld [vmem:[#allocation39_spill] sm:$0xff]  ;;  %v6677_v57 = vpop.eup %6676 }
 0x5f2   : > { %vm2444_vm13 = vcmp.eq.f32.partialorder %v11067_v15, %v8424_v62 }
 0x5f3   : > { %3814 = vperm.xlu0 %6391, %v3737_v1   ;;  %vm2476_vm15 = vmxor %vm2444_vm13, %vm7068_vm5  ;;  %v11068_v1 = vld [vmem:[#allocation41_spill] sm:$0xff] }
 0x5f4   : > { %vm2442_vm4 = vcmp.eq.f32.partialorder %v11068_v1, %v8428_v12 }
 0x5f5   : > { %2809 = vadd.xlane.f32.xlu1 %v2808_v21  ;;  %v8863_v21 = vpop.permute.xlu1 %4101  ;;  %vm2474_vm1 = vmxor %vm2442_vm4, %vm7068_vm5  ;;  %vm11076_vm5 = vcmp.eq.f32.partialorder %v11074_v51, %v11075_v22  ;;  %v3716_v51 = vsel %vm2606_vm0, 1, %v10992_v4  ;;  %v11082_v22 = vld [vmem:[#allocation45_spill] sm:$0xff]  ;;  %vm2579_vm0 = vcmp.ne.s32.totalorder %v8595_v45, 0 }
 0x5f6   : > { %11069 = vst [vmem:[#allocation41_spill] sm:$0xff] %v8863_v21  ;;  %v2506_v47 = vsel %vm2474_vm1, 1, %v10992_v4  ;;  %v11073_v21 = vld [vmem:[#allocation38_spill] sm:$0xff] }
 0x5f7   : > { %3808 = vperm.xlu0 %6391, %v3735_v29   ;;  %v2508_v29 = vsel %vm2476_vm15, 1, %v10992_v4  ;;  %vm2576_vm15 = vcmp.ne.s32.totalorder %v8775_v28, 0  ;;  %v2871_v35 = vmul.f32 %v6675_v11, %v11073_v21  ;;  %v2869_v28 = vmul.f32 %v6677_v57, %v11077_v2  ;;  %v8902_v57 = vpop.xlane.xlu0 %2800 }
 0x5f8   : > { %vm2608_vm1 = vmand %vm11076_vm5, %vm2576_vm15  ;;  %v2668_v2 = vsub.f32 %v11067_v15, %v8424_v62  ;;  %v11149_v62 = vld [vmem:[#allocation89_spill] sm:$0xff] }
 0x5f9   : > { %v8876_v50 = vpop.permute.xlu1 %2531  ;;  %v3718_v63 = vsel %vm2608_vm1, 1, %v10992_v4  ;;  %v2908_v7 = vmul.f32 %v8731_v34, %v2869_v28  ;;  %v11084_v28 = vld [vmem:[#allocation43_spill] sm:$0xff]  ;;  %vm11088_vm1 = vcmp.eq.f32.partialorder %v7975_v25, %v8352_v54 }
 0x5fa   : > { %v11091_v54 = vld [vmem:[#allocation15_spill] sm:$0xff] }
 0x5fb   : > { %v8906_v56 = vpop.xlane.xlu0 %2794  ;;  %v11092_v25 = vld [vmem:[#allocation27_spill] sm:$0xff] }
 0x5fd   : > { %v8886_v38 = vpop.permute.xlu1 %2527 }
 0x601   : > { %v8894_v11 = vpop.xlane.xlu1 %2767 }
 0x606   : > { %2571 = vrot.lane.b32.xlu1 %v2508_v29, %s7069_s20  ;;  %v3717_v29 = vsel %vm2607_vm3, 1, %v10992_v4  ;;  %vm11087_vm3 = vcmp.eq.f32.partialorder %v7966_v48, %v8346_v16 }
 0x60a   : > { %2567 = vrot.lane.b32.xlu1 %v2506_v47, %s7069_s20  ;;  %v2910_v47 = vmul.f32 %v8731_v34, %v2871_v35  ;;  %v8900_v35 = vpop.xlane.xlu1 %2761 }
 0x60c   : > { %v2962_v21 = vsel %vm2316_vm2, %v2910_v47, 0.0 }
 0x60e   : > { %3754 = vperm.xlu1 %6390, %v3717_v29   ;;  %v2956_v29 = vsel %vm2316_vm2, %v2908_v7, 0.0  ;;  %v8904_v27 = vpop.permute.xlu1 %4104  ;;  %v2666_v7 = vsub.f32 %v11068_v1, %v8428_v12 }
 0x60f   : > { %11081 = vst [vmem:[#allocation12_spill] sm:$0xff] %v8904_v27 }
 0x610   : > { %v2727_v52 = vmul.f32 1.442695, %v2666_v7 }
 0x612   : > { %3757 = vperm.xlu1 %6390, %v3718_v63   ;;  %v3576_v63 = vadd.f32 %v8814_v44, %v11082_v22  ;;  %v8912_v47 = vpop.permute.xlu1 %4113 }
 0x613   : > { %11083 = vst [vmem:[#allocation21_spill] sm:$0xff] %v8912_v47 }
 0x614   : > { %v8918_v49 = vmax.f32 %v3576_v63, 0.0 }
 0x616   : > { %3751 = vperm.xlu1 %6390, %v3716_v51   ;;  %2963 = vadd.xlane.f32.xlu0 %v2962_v21  ;;  %v3573_v51 = vadd.f32 %v8814_v44, %v11084_v28  ;;  %v2731_v21 = vmul.f32 1.442695, %v2668_v2  ;;  %11085 = vst [vmem:[#allocation38_spill] sm:$0xff] %v8918_v49  ;;  %v8922_v23 = vpop.permute.xlu1 %2539 }
 0x618   : > { %v8920_v27 = vmax.f32 %v3573_v51, 0.0  ;;  %6678 = vpow2.f32 %v2731_v21 }
 0x619   : > { %6680 = vpow2.f32 %v2727_v52 }
 0x61a   : > { %2957 = vadd.xlane.f32.xlu0 %v2956_v29  ;;  %v2562_v29 = vpop.permute.xlu0 %2561  ;;  %11086 = vst [vmem:[#allocation13_spill] sm:$0xff] %v8920_v27  ;;  %v6407_v22 = vpack.i.bf16 %v8918_v49, %v8920_v27  ;;  %v8930_v2 = vpop.permute.xlu1 %2535  ;;  %6682 = vrcp.f32 %v8736_v9  ;;  %v11094_v9 = vld [vmem:[#allocation48_spill] sm:$0xff] }
 0x61b   : > { %vm2599_vm12 = vcmp.ne.s32.totalorder %v2562_v29, 0  ;;  %6684 = vrcp.f32 %v8741_v31  ;;  %v11095_v49 = vld [vmem:[#allocation16_spill] sm:$0xff]  ;;  %v11096_v31 = vld [vmem:[#allocation30_spill] sm:$0xff]  ;;  %vm2586_vm10 = vcmp.ne.s32.totalorder %v8930_v2, 0 }
 0x61c   : > { %vm2631_vm15 = vmand %vm11087_vm3, %vm2599_vm12  ;;  %vm11093_vm12 = vcmp.eq.f32.partialorder %v11091_v54, %v11092_v25 }
 0x61d   : > { %v3741_v63 = vsel %vm2631_vm15, 1, %v10992_v4  ;;  %vm2611_vm3 = vmand %vm11093_vm12, %vm2579_vm0  ;;  %vm2577_vm15 = vcmp.ne.s32.totalorder %v8605_v59, 0  ;;  %v11098_v59 = vld [vmem:[#allocation50_spill] sm:$0xff]  ;;  %vm11099_vm0 = vcmp.eq.f32.partialorder %v7866_v33, %v8008_v58 }
 0x61e   : > { %v2558_v47 = vpop.permute.xlu0 %2557  ;;  %v8938_v51 = vpop.xlane.xlu1 %2779 }
 0x61f   : > { %vm2597_vm5 = vcmp.ne.s32.totalorder %v2558_v47, 0 }
 0x620   : > { %vm2629_vm14 = vmand %vm11088_vm1, %vm2597_vm5  ;;  %vm11097_vm5 = vcmp.eq.f32.partialorder %v11095_v49, %v11096_v31 }
 0x621   : > { %v3739_v52 = vsel %vm2629_vm14, 1, %v10992_v4  ;;  %vm2609_vm1 = vmand %vm11097_vm5, %vm2577_vm15  ;;  %vm2580_vm14 = vcmp.ne.s32.totalorder %v8820_v41, 0 }
 0x622   : > { %v8936_v28 = vpop.eup %6678  ;;  %v8945_v7 = vpop.xlane.xlu1 %2773  ;;  %v3719_v25 = vsel %vm2609_vm1, 1, %v10992_v4  ;;  %vm2612_vm12 = vmand %vm11099_vm0, %vm2580_vm14  ;;  %vm2584_vm1 = vcmp.ne.s32.totalorder %v8876_v50, 0 }
 0x623   : > { %v2826_v21 = vsel %vm2316_vm2, %v8936_v28, 0.0  ;;  %v8943_v47 = vpop.eup %6680  ;;  %v3722_v49 = vsel %vm2612_vm12, 1, %v10992_v4  ;;  %v8986_v33 = vpop.xlane.xlu0 %2812  ;;  %vm2582_vm12 = vcmp.ne.s32.totalorder %v8886_v38, 0 }
 0x624   : > { %11089 = vst [vmem:[#allocation22_spill] sm:$0xff] %v8943_v47  ;;  %v2820_v29 = vsel %vm2316_vm2, %v8943_v47, 0.0 }
 0x627   : > { %v9000_v31 = vpop.xlane.xlu0 %2806 }
 0x630   : > { %6408 = vrot.lane.b32.xlu0 %v6407_v22, %s7071_s30  ;;  %v8950_v22 = vpop.permute.xlu1 %4116 }
 0x631   : > { %11090 = vst [vmem:[#allocation40_spill] sm:$0xff] %v8950_v22 }
 0x634   : > { %3826 = vperm.xlu0 %6391, %v3741_v63   ;;  %v8954_v63 = vpop.permute.xlu1 %2547 }
 0x638   : > { %3820 = vperm.xlu0 %6391, %v3739_v52   ;;  %v6683_v52 = vpop.eup %6682 }
 0x639   : > { %v2875_v27 = vmul.f32 %v6683_v52, %v11094_v9  ;;  %v6685_v22 = vpop.eup %6684  ;;  %v11105_v9 = vld [vmem:[#allocation32_spill] sm:$0xff] }
 0x63a   : > { %2827 = vadd.xlane.f32.xlu1 %v2826_v21  ;;  %v8960_v21 = vpop.permute.xlu1 %2543  ;;  %v2873_v47 = vmul.f32 %v6685_v22, %v11098_v59  ;;  %v11102_v22 = vld [vmem:[#allocation31_spill] sm:$0xff]  ;;  %v11108_v59 = vld [vmem:[#allocation53_spill] sm:$0xff] }
 0x63b   : > { %v2914_v54 = vmul.f32 %v8731_v34, %v2875_v27  ;;  %vm11103_vm14 = vcmp.eq.f32.partialorder %v7926_v0, %v11102_v22 }
 0x63c   : > { %v2912_v41 = vmul.f32 %v8731_v34, %v2873_v47  ;;  %vm2616_vm0 = vmand %vm11103_vm14, %vm2584_vm1  ;;  %v11104_v47 = vld [vmem:[#allocation17_spill] sm:$0xff]  ;;  %vm11107_vm1 = vcmp.eq.f32.partialorder %v7992_v5, %v8135_v24  ;;  %v11110_v5 = vld [vmem:[#allocation51_spill] sm:$0xff] }
 0x63d   : > { %v2974_v52 = vsel %vm2316_vm2, %v2914_v54, 0.0  ;;  %v3726_v50 = vsel %vm2616_vm0, 1, %v10992_v4  ;;  %vm11109_vm0 = vcmp.eq.f32.partialorder %v7997_v55, %v8142_v30  ;;  %v3589_v24 = vadd.f32 %v8814_v44, %v11110_v5 }
 0x63e   : > { %2821 = vadd.xlane.f32.xlu1 %v2820_v29  ;;  %v3721_v29 = vsel %vm2611_vm3, 1, %v10992_v4  ;;  %v8968_v45 = vpop.xlane.xlu1 %2791  ;;  %vm2578_vm3 = vcmp.ne.s32.totalorder %v8830_v61, 0  ;;  %v2968_v61 = vsel %vm2316_vm2, %v2912_v41, 0.0 }
 0x642   : > { %v8984_v27 = vpop.xlane.xlu1 %2785 }
 0x64f   : > { %3766 = vperm.xlu1 %6390, %v3721_v29   ;;  %v11100_v29 = vld [vmem:[#allocation28_spill] sm:$0xff] }
 0x650   : > { %vm11101_vm15 = vcmp.eq.f32.partialorder %v7872_v46, %v11100_v29  ;;  %v8994_v46 = vpop.permute.xlu1 %2555  ;;  %v9025_v29 = vmax.f32 %v3589_v24, 0.0  ;;  %v11116_v24 = vld [vmem:[#allocation33_spill] sm:$0xff] }
 0x651   : > { %vm2610_vm5 = vmand %vm11101_vm15, %vm2578_vm3  ;;  %vm11106_vm3 = vcmp.eq.f32.partialorder %v11104_v47, %v11105_v9  ;;  %v11114_v47 = vld [vmem:[#allocation86_spill] sm:$0xff] }
 0x652   : > { %v3720_v58 = vsel %vm2610_vm5, 1, %v10992_v4  ;;  %vm2614_vm15 = vmand %vm11106_vm3, %vm2582_vm12  ;;  %vm2588_vm5 = vcmp.ne.s32.totalorder %v8922_v23, 0  ;;  %11111 = vst [vmem:[#allocation14_spill] sm:$0xff] %v9025_v29  ;;  %6686 = vrcp.f32 %v11114_v47  ;;  %v11117_v47 = vld [vmem:[#allocation34_spill] sm:$0xff] }
 0x653   : > { %3760 = vperm.xlu1 %6390, %v3719_v25   ;;  %v3724_v0 = vsel %vm2614_vm15, 1, %v10992_v4  ;;  %vm2620_vm14 = vmand %vm11107_vm1, %vm2588_vm5  ;;  %v9010_v25 = vpop.permute.xlu0 %2569  ;;  %vm2592_vm1 = vcmp.ne.s32.totalorder %v8954_v63, 0 }
 0x654   : > { %v9008_v38 = vpop.permute.xlu1 %2551  ;;  %v3730_v54 = vsel %vm2620_vm14, 1, %v10992_v4  ;;  %vm2618_vm12 = vmand %vm11109_vm0, %vm2586_vm10  ;;  %vm11120_vm14 = vcmp.eq.f32.partialorder %v8048_v60, %v8197_v26 }
 0x655   : > { %v3728_v2 = vsel %vm2618_vm12, 1, %v10992_v4  ;;  %vm2624_vm0 = vmand %vm11120_vm14, %vm2592_vm1  ;;  %vm2590_vm12 = vcmp.ne.s32.totalorder %v8960_v21, 0  ;;  %vm2594_vm1 = vcmp.ne.s32.totalorder %v9008_v38, 0 }
 0x656   : > { %vm2626_vm14 = vmand %vm2434_vm7, %vm2594_vm1 }
 0x657   : > { %3769 = vperm.xlu1 %6390, %v3722_v49   ;;  %2975 = vadd.xlane.f32.xlu0 %v2974_v52  ;;  %v3592_v49 = vadd.f32 %v8814_v44, %v11108_v59  ;;  %v2566_v41 = vpop.permute.xlu0 %2565 }
 0x658   : > { %v9018_v23 = vpop.xlane.xlu1 %2803  ;;  %vm2601_vm3 = vcmp.ne.s32.totalorder %v2566_v41, 0 }
 0x659   : > { %v9023_v52 = vmax.f32 %v3592_v49, 0.0  ;;  %vm2633_vm10 = vmand %vm2441_vm8, %vm2601_vm3  ;;  %vm11122_vm3 = vcmp.eq.f32.partialorder %v8056_v8, %v8204_v53 }
 0x65b   : > { %3763 = vperm.xlu1 %6390, %v3720_v58   ;;  %2969 = vadd.xlane.f32.xlu0 %v2968_v61  ;;  %v6417_v55 = vpack.i.bf16 %v9023_v52, %v9025_v29  ;;  %v11118_v29 = vld [vmem:[#allocation56_spill] sm:$0xff] }
 0x65c   : > { %v9027_v58 = vpop.xlane.xlu1 %2797  ;;  %v6687_v49 = vpop.eup %6686 }
 0x65f   : > { %3781 = vperm.xlu1 %6390, %v3726_v50   ;;  %v3743_v50 = vsel %vm2633_vm10, 1, %v10992_v4  ;;  %vm2622_vm10 = vmand %vm11122_vm3, %vm2590_vm12 }
 0x660   : > { %v9035_v22 = vpop.permute.xlu1 %2563 }
 0x663   : > { %3775 = vperm.xlu1 %6390, %v3724_v0   ;;  %v11115_v0 = vld [vmem:[#allocation87_spill] sm:$0xff] }
 0x664   : > { %v9039_v9 = vpop.permute.xlu1 %2559  ;;  %6688 = vrcp.f32 %v11115_v0 }
 0x665   : > { %6690 = vrcp.f32 %v8794_v37  ;;  %vm2598_vm3 = vcmp.ne.s32.totalorder %v9039_v9, 0 }
 0x666   : > { %6692 = vrcp.f32 %v8801_v43 }
 0x667   : > { %3793 = vperm.xlu1 %6390, %v3730_v54   ;;  %6694 = vrcp.f32 %v8807_v36 }
 0x668   : > { %6696 = vrcp.f32 %v8840_v3 }
 0x669   : > { %6698 = vrcp.f32 %v8849_v19 }
 0x66a   : > { %6700 = vrcp.f32 %v8902_v57 }
 0x66b   : > { %3787 = vperm.xlu1 %6390, %v3728_v2   ;;  %v2861_v2 = vmul.f32 %v6687_v49, %v11116_v24  ;;  %6702 = vrcp.f32 %v8906_v56 }
 0x66c   : > { %6704 = vrcp.f32 %v8894_v11 }
 0x66d   : > { %6706 = vrcp.f32 %v8900_v35 }
 0x66e   : > { %v6689_v41 = vpop.eup %6688  ;;  %6708 = vrcp.f32 %v8986_v33 }
 0x66f   : > { %v2864_v0 = vmul.f32 %v6689_v41, %v11117_v47  ;;  %v6691_v37 = vpop.eup %6690  ;;  %6710 = vrcp.f32 %v9000_v31 }
 0x670   : > { %v2862_v49 = vmul.f32 %v6691_v37, %v11118_v29  ;;  %v6693_v41 = vpop.eup %6692  ;;  %6712 = vrcp.f32 %v8938_v51 }
 0x671   : > { %6418 = vrot.lane.b32.xlu0 %v6417_v55, %s7071_s30  ;;  %v2903_v30 = vmul.f32 %v8731_v34, %v2864_v0  ;;  %v6695_v47 = vpop.eup %6694  ;;  %v3732_v0 = vsel %vm2622_vm10, 1, %v10992_v4  ;;  %vm2630_vm10 = vmand %vm2438_vm11, %vm2598_vm3 }
 0x672   : > { %v2901_v24 = vmul.f32 %v8731_v34, %v2862_v49  ;;  %v11123_v49 = vld [vmem:[#allocation63_spill] sm:$0xff] }
 0x673   : > { %v3608_v21 = vadd.f32 %v8814_v44, %v11123_v49  ;;  %v11128_v49 = vld [vmem:[#allocation37_spill] sm:$0xff] }
 0x675   : > { %3832 = vperm.xlu0 %6391, %v3743_v50   ;;  %v2900_v50 = vmul.f32 %v8731_v34, %v2861_v2  ;;  %v2935_v2 = vsel %vm2316_vm2, %v2901_v24, 0.0  ;;  %v9084_v53 = vmax.f32 %v3608_v21, 0.0  ;;  %v3568_v21 = vadd.f32 %v11128_v49, %v8814_v44 }
 0x677   : > { %v2932_v61 = vsel %vm2316_vm2, %v2900_v50, 0.0 }
 0x67e   : > { %v9042_v54 = vpop.xlane.xlu1 %2815 }
 0x682   : > { %v9045_v59 = vpop.xlane.xlu1 %2809 }
 0x686   : > { %v2572_v5 = vpop.permute.xlu1 %2571 }
 0x687   : > { %vm2604_vm15 = vcmp.ne.s32.totalorder %v2572_v5, 0  ;;  %v2941_v5 = vsel %vm2316_vm2, %v2903_v30, 0.0  ;;  %v11121_v30 = vld [vmem:[#allocation64_spill] sm:$0xff] }
 0x688   : > { %vm2636_vm5 = vmand %vm2444_vm13, %vm2604_vm15  ;;  %v2877_v43 = vmul.f32 %v6695_v47, %v11121_v30  ;;  %vm2596_vm15 = vcmp.ne.s32.totalorder %v8994_v46, 0  ;;  %v3736_v46 = vsel %vm2626_vm14, 1, %v10992_v4 }
 0x689   : > { %v3746_v55 = vsel %vm2636_vm5, 1, %v10992_v4  ;;  %vm2628_vm5 = vmand %vm2436_vm6, %vm2596_vm15  ;;  %vm2603_vm15 = vcmp.ne.s32.totalorder %v9010_v25, 0 }
 0x68a   : > { %3841 = vperm.xlu0 %6391, %v3746_v55   ;;  %v11119_v55 = vld [vmem:[#allocation59_spill] sm:$0xff]  ;;  %v2916_v63 = vmul.f32 %v8731_v34, %v2877_v43  ;;  %v9133_v38 = vpop.permute.xlu1 %2567 }
 0x68b   : > { %v2879_v50 = vmul.f32 %v6693_v41, %v11119_v55  ;;  %v6697_v41 = vpop.eup %6696  ;;  %v11125_v55 = vld [vmem:[#allocation66_spill] sm:$0xff]  ;;  %vm2602_vm14 = vcmp.ne.s32.totalorder %v9133_v38, 0  ;;  %v3677_v38 = vadd.f32 %v8705_v20, %v8814_v44 }
 0x68c   : > { %v2980_v37 = vsel %vm2316_vm2, %v2916_v63, 0.0  ;;  %v6699_v47 = vpop.eup %6698  ;;  %v11127_v63 = vld [vmem:[#allocation68_spill] sm:$0xff] }
 0x68d   : > { %v2918_v29 = vmul.f32 %v8731_v34, %v2879_v50  ;;  %v2868_v50 = vmul.f32 %v6697_v41, %v11125_v55  ;;  %v9107_v55 = vmax.f32 %v3568_v21, 0.0 }
 0x68e   : > { %6462 = vset.pattern.permute.xlu0 %v10992_v4  ;;  %v9140_v49 = vpop.permute.xlu1 %3754 }
 0x68f   : > { %2933 = vadd.xlane.f32.xlu1 %v2932_v61  ;;  %v3734_v61 = vsel %vm2624_vm0, 1, %v10992_v4  ;;  %v2986_v36 = vsel %vm2316_vm2, %v2918_v29, 0.0  ;;  %v2907_v3 = vmul.f32 %v8731_v34, %v2868_v50  ;;  %v11126_v29 = vld [vmem:[#allocation67_spill] sm:$0xff]  ;;  %vm2600_vm0 = vcmp.ne.s32.totalorder %v9035_v22, 0 }
 0x690   : > { %v2866_v30 = vmul.f32 %v6699_v47, %v11126_v29  ;;  %vm2632_vm12 = vmand %vm2440_vm9, %vm2600_vm0  ;;  %vm3845_vm3 = vcmp.eq.s32.totalorder %v9140_v49, 1 }
 0x691   : > { %v2953_v43 = vsel %vm2316_vm2, %v2907_v3, 0.0  ;;  %vm2634_vm0 = vmand %vm2442_vm4, %vm2602_vm14 }
 0x692   : > { %v2905_v19 = vmul.f32 %v8731_v34, %v2866_v30  ;;  %v3738_v30 = vsel %vm2628_vm5, 1, %v10992_v4  ;;  %v9144_v21 = vpop.permute.xlu1 %3757 }
 0x693   : > { %2942 = vadd.xlane.f32.xlu1 %v2941_v5  ;;  %v11124_v5 = vld [vmem:[#allocation61_spill] sm:$0xff] }
 0x694   : > { %v3605_v8 = vadd.f32 %v8814_v44, %v11124_v5  ;;  %v11129_v5 = vld [vmem:[#allocation35_spill] sm:$0xff] }
 0x695   : > { %v3565_v57 = vadd.f32 %v11129_v5, %v8814_v44 }
 0x696   : > { %v9087_v24 = vmax.f32 %v3605_v8, 0.0 }
 0x697   : > { %2936 = vadd.xlane.f32.xlu1 %v2935_v2  ;;  %v9109_v56 = vmax.f32 %v3565_v57, 0.0  ;;  %v9147_v57 = vpop.permute.xlu1 %3751 }
 0x698   : > { %v6427_v2 = vpack.i.bf16 %v9084_v53, %v9087_v24 }
 0x699   : > { %11131 = vst [vmem:[#allocation24_spill] sm:$0xff] %v9109_v56  ;;  %v6392_v3 = vpack.i.bf16 %v9107_v55, %v9109_v56 }
 0x6a8   : > { %3805 = vperm.xlu1 %6390, %v3734_v61   ;;  %v2947_v61 = vsel %vm2316_vm2, %v2905_v19, 0.0 }
 0x6a9   : > { %2987 = vadd.xlane.f32.xlu0 %v2986_v36  ;;  %v6701_v36 = vpop.eup %6700 }
 0x6ac   : > { %3799 = vperm.xlu1 %6390, %v3732_v0   ;;  %v2883_v0 = vmul.f32 %v6701_v36, %v11127_v63 }
 0x6ad   : > { %2981 = vadd.xlane.f32.xlu0 %v2980_v37  ;;  %v6703_v37 = vpop.eup %6702 }
 0x6ae   : > { %v2922_v8 = vmul.f32 %v8731_v34, %v2883_v0  ;;  %v6705_v5 = vpop.eup %6704 }
 0x6b0   : > { %v2998_v50 = vsel %vm2316_vm2, %v2922_v8, 0.0  ;;  %v11136_v8 = vld [vmem:[#allocation74_spill] sm:$0xff] }
 0x6c3   : > { %6428 = vrot.lane.b32.xlu0 %v6427_v2, %s7071_s30  ;;  %v11130_v2 = vld [vmem:[#allocation73_spill] sm:$0xff] }
 0x6c4   : > { %v2881_v41 = vmul.f32 %v6703_v37, %v11130_v2  ;;  %v2872_v2 = vmul.f32 %v6705_v5, %v11136_v8 }
 0x6c6   : > { %v2920_v47 = vmul.f32 %v8731_v34, %v2881_v41  ;;  %v6707_v41 = vpop.eup %6706  ;;  %v2911_v11 = vmul.f32 %v8731_v34, %v2872_v2 }
 0x6c8   : > { %v2992_v29 = vsel %vm2316_vm2, %v2920_v47, 0.0  ;;  %v11137_v47 = vld [vmem:[#allocation75_spill] sm:$0xff]  ;;  %v2965_v35 = vsel %vm2316_vm2, %v2911_v11, 0.0 }
 0x6d0   : > { %2954 = vadd.xlane.f32.xlu1 %v2953_v43  ;;  %v11132_v43 = vld [vmem:[#allocation72_spill] sm:$0xff] }
 0x6d1   : > { %v3624_v19 = vadd.f32 %v8814_v44, %v11132_v43 }
 0x6d3   : > { %v9131_v63 = vmax.f32 %v3624_v19, 0.0 }
 0x6d4   : > { %2948 = vadd.xlane.f32.xlu1 %v2947_v61  ;;  %v11133_v61 = vld [vmem:[#allocation70_spill] sm:$0xff] }
 0x6d5   : > { %v3621_v36 = vadd.f32 %v8814_v44, %v11133_v61  ;;  %11134 = vst [vmem:[#allocation45_spill] sm:$0xff] %v9131_v63 }
 0x6d7   : > { %v9135_v0 = vmax.f32 %v3621_v36, 0.0  ;;  %v11139_v36 = vld [vmem:[#allocation85_spill] sm:$0xff] }
 0x6d9   : > { %11135 = vst [vmem:[#allocation43_spill] sm:$0xff] %v9135_v0  ;;  %v6437_v37 = vpack.i.bf16 %v9131_v63, %v9135_v0 }
 0x6e2   : > { %2999 = vadd.xlane.f32.xlu0 %v2998_v50  ;;  %v9151_v50 = vpop.xlane.xlu1 %2827 }
 0x6e5   : > { %6393 = vrot.lane.b32.xlu1 %v6392_v3, %s7071_s30  ;;  %v2870_v3 = vmul.f32 %v6707_v41, %v11137_v47  ;;  %v11140_v41 = vld [vmem:[#allocation44_spill] sm:$0xff]  ;;  %v11141_v47 = vld [vmem:[#allocation42_spill] sm:$0xff] }
 0x6e6   : > { %2993 = vadd.xlane.f32.xlu0 %v2992_v29  ;;  %v6709_v29 = vpop.eup %6708  ;;  %v9157_v33 = vpop.xlane.xlu1 %2821  ;;  %v3584_v11 = vadd.f32 %v11140_v41, %v8814_v44 }
 0x6e7   : > { %v6711_v19 = vpop.eup %6710 }
 0x6e9   : > { %3817 = vperm.xlu1 %6390, %v3738_v30   ;;  %v2909_v30 = vmul.f32 %v8731_v34, %v2870_v3  ;;  %v3581_v3 = vadd.f32 %v11141_v47, %v8814_v44 }
 0x6ea   : > { %v9163_v5 = vpop.permute.xlu1 %3766 }
 0x6eb   : > { %v2959_v61 = vsel %vm2316_vm2, %v2909_v30, 0.0  ;;  %v9174_v30 = vmax.f32 %v3584_v11, 0.0 }
 0x6ed   : > { %3811 = vperm.xlu1 %6390, %v3736_v46   ;;  %v11138_v46 = vld [vmem:[#allocation79_spill] sm:$0xff]  ;;  %11142 = vst [vmem:[#allocation15_spill] sm:$0xff] %v9174_v30 }
 0x6ee   : > { %v2887_v43 = vmul.f32 %v6709_v29, %v11138_v46  ;;  %v9171_v29 = vpop.permute.xlu1 %3760  ;;  %v9176_v46 = vmax.f32 %v3581_v3, 0.0  ;;  %v9207_v3 = vpop.permute.xlu0 %3748 }
 0x6f0   : > { %v2926_v31 = vmul.f32 %v8731_v34, %v2887_v43  ;;  %11143 = vst [vmem:[#allocation27_spill] sm:$0xff] %v9176_v46  ;;  %v6402_v43 = vpack.i.bf16 %v9174_v30, %v9176_v46 }
 0x6f2   : > { %v3010_v8 = vsel %vm2316_vm2, %v2926_v31, 0.0  ;;  %v11144_v31 = vld [vmem:[#allocation84_spill] sm:$0xff] }
 0x6fc   : > { %6438 = vrot.lane.b32.xlu0 %v6437_v37, %s7071_s30  ;;  %v2885_v37 = vmul.f32 %v6711_v19, %v11139_v36  ;;  %v9181_v19 = vpop.permute.xlu1 %3769  ;;  %v3640_v36 = vadd.f32 %v8814_v44, %v11144_v31 }
 0x6fe   : > { %v2924_v2 = vmul.f32 %v8731_v34, %v2885_v37  ;;  %v11145_v37 = vld [vmem:[#allocation82_spill] sm:$0xff]  ;;  %v9199_v41 = vmax.f32 %v3640_v36, 0.0 }
 0x700   : > { %v9192_v22 = vpop.permute.xlu1 %3763  ;;  %11146 = vst [vmem:[#allocation48_spill] sm:$0xff] %v9199_v41 }
 0x704   : > { %v9201_v9 = vpop.permute.xlu1 %3781 }
 0x711   : > { %2966 = vadd.xlane.f32.xlu1 %v2965_v35  ;;  %v3004_v35 = vsel %vm2316_vm2, %v2924_v2, 0.0  ;;  %v3740_v2 = vsel %vm2630_vm10, 1, %v10992_v4  ;;  %vm3846_vm10 = vcmp.eq.s32.totalorder %v9144_v21, 1  ;;  %v11169_v21 = vld [vmem:[#allocation101_spill] sm:$0xff] }
 0x715   : > { %2960 = vadd.xlane.f32.xlu1 %v2959_v61  ;;  %v3742_v61 = vsel %vm2632_vm12, 1, %v10992_v4 }
 0x71b   : > { %3011 = vadd.xlane.f32.xlu0 %v3010_v8  ;;  %v3637_v8 = vadd.f32 %v8814_v44, %v11145_v37  ;;  %v6713_v37 = vpop.eup %6712 }
 0x71d   : > { %v9203_v11 = vmax.f32 %v3637_v8, 0.0 }
 0x71f   : > { %3005 = vadd.xlane.f32.xlu0 %v3004_v35  ;;  %11147 = vst [vmem:[#allocation16_spill] sm:$0xff] %v9203_v11  ;;  %v6447_v47 = vpack.i.bf16 %v9199_v41, %v9203_v11  ;;  %v9210_v35 = vpop.permute.xlu1 %3775  ;;  %v11152_v41 = vld [vmem:[#allocation90_spill] sm:$0xff] }
 0x726   : > { %6403 = vrot.lane.b32.xlu1 %v6402_v43, %s7071_s30  ;;  %v2825_v43 = vpop.xlane.xlu0 %2824 }
 0x727   : > { %6714 = vrcp.f32 %v2825_v43 }
 0x728   : > { %6716 = vrcp.f32 %v8945_v7 }
 0x72a   : > { %3829 = vperm.xlu1 %6390, %v3742_v61   ;;  %v9213_v61 = vpop.permute.xlu1 %3793  ;;  %v2819_v31 = vpop.xlane.xlu0 %2818 }
 0x72b   : > { %6718 = vrcp.f32 %v2819_v31 }
 0x72c   : > { %6720 = vrcp.f32 %v8968_v45 }
 0x72d   : > { %6722 = vrcp.f32 %v8984_v27  ;;  %v11170_v27 = vld [vmem:[#allocation62_spill] sm:$0xff] }
 0x72e   : > { %3823 = vperm.xlu1 %6390, %v3740_v2   ;;  %v9216_v36 = vpop.permute.xlu1 %3787  ;;  %6724 = vrcp.f32 %v9018_v23 }
 0x72f   : > { %6726 = vrcp.f32 %v9027_v58  ;;  %v11179_v58 = vld [vmem:[#allocation71_spill] sm:$0xff] }
 0x730   : > { %6728 = vrcp.f32 %v9042_v54 }
 0x731   : > { %v6715_v2 = vpop.eup %6714  ;;  %6730 = vrcp.f32 %v9045_v59 }
 0x732   : > { %v9218_v8 = vpop.xlane.xlu1 %2933  ;;  %v6717_v15 = vpop.eup %6716  ;;  %v2891_v39 = vmul.f32 %v6715_v2, %v11150_v14  ;;  %6732 = vrcp.f32 %v9151_v50  ;;  %v4060_v50 = vsel %vm2438_vm11, 1, %v10992_v4  ;;  %vm3843_vm11 = vcmp.eq.s32.totalorder %v9207_v3, 1 }
 0x733   : > { %11148 = vst [vmem:[#allocation30_spill] sm:$0xff] %v9218_v8  ;;  %v2874_v0 = vmul.f32 %v6717_v15, %v11152_v41  ;;  %6734 = vrcp.f32 %v9157_v33 }
 0x734   : > { %v2930_v7 = vmul.f32 %v8731_v34, %v2891_v39 }
 0x735   : > { %6448 = vrot.lane.b32.xlu0 %v6447_v47, %s7071_s30  ;;  %v2876_v47 = vmul.f32 %v6713_v37, %v11149_v62  ;;  %v6719_v11 = vpop.eup %6718  ;;  %v2913_v8 = vmul.f32 %v8731_v34, %v2874_v0 }
 0x736   : > { %v9222_v51 = vpop.xlane.xlu1 %2942  ;;  %v2889_v31 = vmul.f32 %v6719_v11, %v8662_v13  ;;  %v3022_v14 = vsel %vm2316_vm2, %v2930_v7, 0.0  ;;  %v11154_v13 = vld [vmem:[#allocation52_spill] sm:$0xff] }
 0x737   : > { %11151 = vst [vmem:[#allocation50_spill] sm:$0xff] %v9222_v51  ;;  %v2915_v43 = vmul.f32 %v8731_v34, %v2876_v47  ;;  %v2971_v37 = vsel %vm2316_vm2, %v2913_v8, 0.0  ;;  %v3600_v41 = vadd.f32 %v11154_v13, %v8814_v44  ;;  %v11159_v8 = vld [vmem:[#allocation96_spill] sm:$0xff]  ;;  %v9286_v51 = vmax.f32 %v3677_v38, 0.0 }
 0x738   : > { %v2928_v62 = vmul.f32 %v8731_v34, %v2889_v31  ;;  %v3656_v7 = vadd.f32 %v8814_v44, %v11159_v8  ;;  %v3680_v8 = vadd.f32 %v8715_v18, %v8814_v44 }
 0x739   : > { %v2977_v63 = vsel %vm2316_vm2, %v2915_v43, 0.0  ;;  %v9244_v2 = vmax.f32 %v3600_v41, 0.0 }
 0x73a   : > { %v9230_v32 = vpop.xlane.xlu1 %2936  ;;  %v3016_v15 = vsel %vm2316_vm2, %v2928_v62, 0.0  ;;  %v9261_v13 = vmax.f32 %v3656_v7, 0.0 }
 0x73b   : > { %11153 = vst [vmem:[#allocation28_spill] sm:$0xff] %v9230_v32  ;;  %11156 = vst [vmem:[#allocation31_spill] sm:$0xff] %v9244_v2 }
 0x73e   : > { %v9236_v39 = vpop.permute.xlu1 %3805 }
 0x742   : > { %v9240_v0 = vpop.permute.xlu1 %3799 }
 0x752   : > { %2978 = vadd.xlane.f32.xlu1 %v2977_v63  ;;  %v11155_v63 = vld [vmem:[#allocation49_spill] sm:$0xff] }
 0x753   : > { %v3597_v11 = vadd.f32 %v11155_v63, %v8814_v44 }
 0x754   : > { %3023 = vadd.xlane.f32.xlu0 %v3022_v14  ;;  %v11160_v14 = vld [vmem:[#allocation94_spill] sm:$0xff] }
 0x755   : > { %v9248_v43 = vmax.f32 %v3597_v11, 0.0  ;;  %v3653_v62 = vadd.f32 %v8814_v44, %v11160_v14  ;;  %v9280_v14 = vmax.f32 %v3680_v8, 0.0  ;;  %v11168_v8 = vld [vmem:[#allocation100_spill] sm:$0xff] }
 0x756   : > { %2972 = vadd.xlane.f32.xlu1 %v2971_v37  ;;  %v11161_v37 = vld [vmem:[#allocation26_spill] sm:$0xff] }
 0x757   : > { %11158 = vst [vmem:[#allocation32_spill] sm:$0xff] %v9248_v43  ;;  %v6412_v31 = vpack.i.bf16 %v9244_v2, %v9248_v43  ;;  %v9266_v63 = vmax.f32 %v3653_v62, 0.0  ;;  %v6463_v20 = vpack.i.bf16 %v9280_v14, %v9286_v51 }
 0x758   : > { %3017 = vadd.xlane.f32.xlu0 %v3016_v15  ;;  %v11162_v15 = vld [vmem:[#allocation76_spill] sm:$0xff] }
 0x759   : > { %vm11163_vm5 = vcmp.eq.f32.partialorder %v11161_v37, %v11162_v15  ;;  %v6457_v11 = vpack.i.bf16 %v9261_v13, %v9266_v63 }
 0x75a   : > { %vm2635_vm1 = vmand %vm11163_vm5, %vm2603_vm15  ;;  %vm3849_vm15 = vcmp.eq.s32.totalorder %v9163_v5, 1  ;;  %vm3850_vm5 = vcmp.eq.s32.totalorder %v9181_v19, 1  ;;  %v11175_v5 = vld [vmem:[#allocation54_spill] sm:$0xff] }
 0x75b   : > { %v3745_v25 = vsel %vm2635_vm1, 1, %v10992_v4 }
 0x75d   : > { %v9246_v47 = vpop.xlane.xlu1 %2954 }
 0x75e   : > { %11157 = vst [vmem:[#allocation17_spill] sm:$0xff] %v9246_v47  ;;  %v11166_v47 = vld [vmem:[#allocation47_spill] sm:$0xff] }
 0x761   : > { %v9264_v41 = vpop.xlane.xlu1 %2948 }
 0x762   : > { %11164 = vst [vmem:[#allocation53_spill] sm:$0xff] %v9264_v41 }
 0x765   : > { %v6394_v7 = vpop.permute.xlu1 %6393 }
 0x766   : > { %v6396_v62 = vunpack.i.h.bf16 %v6394_v7  ;;  %v6395_v41 = vunpack.i.l.bf16 %v6394_v7 }
 0x767   : > { %6413 = vrot.lane.b32.xlu1 %v6412_v31, %s7071_s30  ;;  %v3744_v31 = vsel %vm2634_vm0, 1, %v10992_v4 }
 0x768   : > { %v4006_v18 = vsel %vm3846_vm10, %v9107_v55, %v6396_v62  ;;  %vm3848_vm10 = vcmp.eq.s32.totalorder %v9192_v22, 1  ;;  %v4371_v22 = vld [vmem:[%s10799_s13] sm:$0xf] }
 0x76b   : > { %3838 = vperm.xlu1 %6390, %v3745_v25   ;;  %v11165_v25 = vld [vmem:[#allocation18_spill] sm:$0xff] }
 0x76c   : > { %vm11167_vm12 = vcmp.eq.f32.partialorder %v11165_v25, %v11166_v47  ;;  %v9304_v25 = vpop.permute.xlu1 %3817 }
 0x76d   : > { %v4053_v32 = vsel %vm11167_vm12, 1, %v10992_v4  ;;  %vm3858_vm12 = vcmp.eq.s32.totalorder %v9213_v61, 1 }
 0x76e   : > { %6458 = vrot.lane.b32.xlu0 %v6457_v11, %s7071_s30  ;;  %v4005_v11 = vsel %vm3845_vm3, %v9109_v56, %v6395_v41  ;;  %vm11196_vm3 = vcmp.eq.f32.partialorder %v7966_v48, %v8346_v16 }
 0x76f   : > { %3835 = vperm.xlu1 %6390, %v3744_v31   ;;  %v6473_v47 = vpack.i.bf16 %v4006_v18, %v4005_v11  ;;  %v3616_v18 = vadd.f32 %v11170_v27, %v8814_v44  ;;  %v4061_v61 = vsel %vm11196_vm3, 1, %v10992_v4 }
 0x770   : > { %v9307_v45 = vpop.permute.xlu1 %3811 }
 0x772   : > { %4122 = vperm.xlu0 %6462, %v4053_v32   ;;  %v6721_v32 = vpop.eup %6720 }
 0x773   : > { %6483 = vset.pattern.permute.xlu1 %v10992_v4  ;;  %v2880_v38 = vmul.f32 %v6721_v32, %v11168_v8  ;;  %v6723_v7 = vpop.eup %6722  ;;  %v9315_v8 = vmax.f32 %v3616_v18, 0.0  ;;  %v4056_v18 = vsel %vm2434_vm7, 1, %v10992_v4  ;;  %vm3854_vm7 = vcmp.eq.s32.totalorder %v9201_v9, 1 }
 0x774   : > { %v2878_v31 = vmul.f32 %v6723_v7, %v11169_v21 }
 0x775   : > { %v2919_v49 = vmul.f32 %v8731_v34, %v2880_v38 }
 0x776   : > { %6464 = vrot.lane.b32.xlu0 %v6463_v20, %s7071_s30  ;;  %v2917_v41 = vmul.f32 %v8731_v34, %v2878_v31 }
 0x777   : > { %v2989_v62 = vsel %vm2316_vm2, %v2919_v49, 0.0 }
 0x778   : > { %v2983_v20 = vsel %vm2316_vm2, %v2917_v41, 0.0 }
 0x77a   : > { %6474 = vrot.lane.b32.xlu0 %v6473_v47, %s7071_s30  ;;  %v11172_v47 = vld [vmem:[#allocation60_spill] sm:$0xff] }
 0x77b   : > { %v3613_v32 = vadd.f32 %v11172_v47, %v8814_v44  ;;  %v11174_v47 = vld [vmem:[#allocation19_spill] sm:$0xff] }
 0x77c   : > { %vm11176_vm1 = vcmp.eq.f32.partialorder %v11174_v47, %v11175_v5  ;;  %v3632_v47 = vadd.f32 %v11179_v58, %v8814_v44  ;;  %v11180_v5 = vld [vmem:[#allocation69_spill] sm:$0xff] }
 0x77d   : > { %v9319_v7 = vmax.f32 %v3613_v32, 0.0  ;;  %v4057_v19 = vsel %vm11176_vm1, 1, %v10992_v4  ;;  %v6725_v32 = vpop.eup %6724  ;;  %vm4428_vm1 = vcmask 1043456  }
 0x77e   : > { %6340 = vmatprep.subr.msk.bf16.mxu1 %vm4428_vm1, %v4371_v22 }
 0x77f   : > { %v6422_v49 = vpack.i.bf16 %v9315_v8, %v9319_v7 }
 0x793   : > { %2990 = vadd.xlane.f32.xlu1 %v2989_v62 }
 0x797   : > { %2984 = vadd.xlane.f32.xlu1 %v2983_v20 }
 0x79e   : > { %v9311_v11 = vpop.xlane.xlu1 %2966 }
 0x79f   : > { %11171 = vst [vmem:[#allocation51_spill] sm:$0xff] %v9311_v11 }
 0x7a2   : > { %v9317_v38 = vpop.xlane.xlu1 %2960 }
 0x7a3   : > { %11173 = vst [vmem:[#allocation86_spill] sm:$0xff] %v9317_v38 }
 0x7a6   : > { %v6404_v21 = vpop.permute.xlu1 %6403 }
 0x7a7   : > { %v6406_v31 = vunpack.i.h.bf16 %v6404_v21  ;;  %v6405_v62 = vunpack.i.l.bf16 %v6404_v21 }
 0x7a8   : > { %6423 = vrot.lane.b32.xlu1 %v6422_v49, %s7071_s30  ;;  %v11177_v49 = vld [vmem:[#allocation105_spill] sm:$0xff] }
 0x7a9   : > { %v4010_v41 = vsel %vm3850_vm5, %v9174_v30, %v6406_v31  ;;  %v4009_v20 = vsel %vm3849_vm15, %v9176_v46, %v6405_v62  ;;  %v2884_v21 = vmul.f32 %v6725_v32, %v11177_v49  ;;  %v6727_v31 = vpop.eup %6726  ;;  %v9353_v49 = vmax.f32 %v3632_v47, 0.0 }
 0x7aa   : > { %v6484_v27 = vpack.i.bf16 %v4010_v41, %v4009_v20  ;;  %v11178_v41 = vld [vmem:[#allocation106_spill] sm:$0xff]  ;;  %v9345_v23 = vpop.permute.xlu1 %3829  ;;  %v6729_v9 = vpop.eup %6728  ;;  %vm3847_vm15 = vcmp.eq.s32.totalorder %v9171_v29, 1  ;;  %vm11211_vm5 = vcmp.eq.f32.partialorder %v8048_v60, %v8197_v26  ;;  %v4430_v29 = vsel %vm4428_vm1, %v4371_v22, 0 }
 0x7ab   : > { %v2923_v62 = vmul.f32 %v8731_v34, %v2884_v21  ;;  %v2882_v17 = vmul.f32 %v6727_v31, %v11178_v41  ;;  %v6731_v38 = vpop.eup %6730  ;;  %6307 = vmatpush3.bf16.msra.mxu1 %v4430_v29  ;;  %vm3864_vm1 = vcmp.eq.s32.totalorder %v9307_v45, 1 }
 0x7ac   : > { %6485 = vrot.lane.b32.xlu0 %v6484_v27, %s7071_s30 }
 0x7ad   : > { %v3001_v42 = vsel %vm2316_vm2, %v2923_v62, 0.0  ;;  %v2921_v20 = vmul.f32 %v8731_v34, %v2882_v17 }
 0x7ae   : > { %v9355_v21 = vpop.permute.xlu1 %3823 }
 0x7af   : > { %v2995_v27 = vsel %vm2316_vm2, %v2921_v20, 0.0 }
 0x7b0   : > { %4131 = vperm.xlu0 %6462, %v4056_v18   ;;  %v3779_v18 = vpop.permute.xlu0 %3778 }
 0x7b1   : > { %vm3853_vm14 = vcmp.eq.s32.totalorder %v3779_v18, 1 }
 0x7b4   : > { %4134 = vperm.xlu0 %6462, %v4057_v19   ;;  %v3629_v19 = vadd.f32 %v11180_v5, %v8814_v44  ;;  %v9351_v32 = vpop.permute.xlu0 %3772 }
 0x7b6   : > { %v9357_v34 = vmax.f32 %v3629_v19, 0.0 }
 0x7b8   : > { %v6432_v31 = vpack.i.bf16 %v9353_v49, %v9357_v34  ;;  %v3791_v62 = vpop.permute.xlu0 %3790 }
 0x7b9   : > { %vm3857_vm0 = vcmp.eq.s32.totalorder %v3791_v62, 1  ;;  %v6733_v62 = vpop.eup %6732 }
 0x7ba   : > { %v6735_v33 = vpop.eup %6734 }
 0x7cc   : > { %3002 = vadd.xlane.f32.xlu1 %v3001_v42  ;;  %v9366_v42 = vpop.permute.xlu0 %3784 }
 0x7d0   : > { %2996 = vadd.xlane.f32.xlu1 %v2995_v27  ;;  %v9368_v58 = vpop.xlane.xlu0 %2939 }
 0x7d1   : > { %11183 = vst [vmem:[#allocation34_spill] sm:$0xff] %v9368_v58 }
 0x7df   : > { %v9361_v41 = vpop.xlane.xlu1 %2978 }
 0x7e0   : > { %11181 = vst [vmem:[#allocation87_spill] sm:$0xff] %v9361_v41  ;;  %v9373_v41 = vpop.permute.xlu0 %3802 }
 0x7e1   : > { %6433 = vrot.lane.b32.xlu1 %v6432_v31, %s7071_s30 }
 0x7e3   : > { %v9364_v17 = vpop.xlane.xlu1 %2972 }
 0x7e4   : > { %11182 = vst [vmem:[#allocation33_spill] sm:$0xff] %v9364_v17  ;;  %v9377_v31 = vpop.permute.xlu0 %3796 }
 0x7e7   : > { %v6414_v20 = vpop.permute.xlu1 %6413 }
 0x7e8   : > { %v6416_v27 = vunpack.i.h.bf16 %v6414_v20  ;;  %v6415_v47 = vunpack.i.l.bf16 %v6414_v20  ;;  %v9380_v17 = vpop.xlane.xlu0 %2951  ;;  %v11185_v20 = vld [vmem:[#allocation113_spill] sm:$0xff] }
 0x7e9   : > { %11184 = vst [vmem:[#allocation56_spill] sm:$0xff] %v9380_v17  ;;  %v2888_v18 = vmul.f32 %v6729_v9, %v11185_v20 }
 0x7ea   : > { %v4014_v5 = vsel %vm3854_vm7, %v9244_v2, %v6416_v27  ;;  %v4013_v19 = vsel %vm3853_vm14, %v9248_v43, %v6415_v47  ;;  %v7000_v47 = vld [vmem:[%s10796_s9] ss:$0 sm:$0xff]  ;;  %vm3861_vm7 = vcmp.eq.s32.totalorder %v9373_v41, 1  ;;  %vm3862_vm14 = vcmp.eq.s32.totalorder %v9236_v39, 1  ;;  %v11214_v41 = vld [vmem:[#allocation20_spill] sm:$0xff] }
 0x7eb   : > { %v6494_v11 = vpack.i.bf16 %v4014_v5, %v4013_v19  ;;  %v2927_v5 = vmul.f32 %v7000_v47, %v2888_v18  ;;  %v11215_v39 = vld [vmem:[#allocation55_spill] sm:$0xff] }
 0x7ec   : > { %v9383_v27 = vpop.xlane.xlu0 %2945  ;;  %vm11216_vm3 = vcmp.eq.f32.partialorder %v11214_v41, %v11215_v39  ;;  %v11221_v39 = vld [vmem:[#allocation58_spill] sm:$0xff] }
 0x7ed   : > { %6495 = vrot.lane.b32.xlu0 %v6494_v11, %s7071_s30  ;;  %11186 = vst [vmem:[#allocation59_spill] sm:$0xff] %v9383_v27  ;;  %v11187_v11 = vld [vmem:[#allocation114_spill] sm:$0xff]  ;;  %v3013_v58 = vsel %vm2316_vm2, %v2927_v5, 0.0  ;;  %v11188_v27 = vld [vmem:[#allocation83_spill] sm:$0xff]  ;;  %v4055_v29 = vsel %vm11216_vm3, 1, %v10992_v4 }
 0x7ee   : > { %v2886_v19 = vmul.f32 %v6731_v38, %v11187_v11  ;;  %v3648_v43 = vadd.f32 %v11188_v27, %v8814_v44  ;;  %v11190_v38 = vld [vmem:[#allocation80_spill] sm:$0xff] }
 0x7ef   : > { %v3645_v18 = vadd.f32 %v11190_v38, %v8814_v44 }
 0x7f0   : > { %v9389_v54 = vpop.permute.xlu0 %6398  ;;  %v2925_v59 = vmul.f32 %v7000_v47, %v2886_v19  ;;  %v9403_v11 = vmax.f32 %v3648_v43, 0.0 }
 0x7f1   : > { %v9405_v5 = vmax.f32 %v3645_v18, 0.0 }
 0x7f2   : > { %v3007_v9 = vsel %vm2316_vm2, %v2925_v59, 0.0 }
 0x7f3   : > { %v6442_v59 = vpack.i.bf16 %v9403_v11, %v9405_v5 }
 0x7f4   : > { %v9392_v17 = vpop.permute.xlu0 %3814 }
 0x7f8   : > { %v9395_v20 = vpop.permute.xlu0 %3808 }
 0x7fc   : > { %v9399_v2 = vpop.xlane.xlu0 %2963 }
 0x7fd   : > { %11189 = vst [vmem:[#allocation64_spill] sm:$0xff] %v9399_v2 }
 0x800   : > { %v9409_v19 = vpop.xlane.xlu0 %2957 }
 0x801   : > { %11191 = vst [vmem:[#allocation63_spill] sm:$0xff] %v9409_v19 }
 0x804   : > { %v9416_v27 = vpop.permute.xlu0 %6408 }
 0x805   : > { %3014 = vadd.xlane.f32.xlu1 %v3013_v58  ;;  %v9407_v58 = vpop.permute.xlu1 %3838  ;;  %v6410_v3 = vunpack.i.l.bf16 %v9416_v27 }
 0x806   : > { %vm3873_vm3 = vcmp.eq.s32.totalorder %v9407_v58, 1 }
 0x808   : > { %v9420_v44 = vpop.permute.xlu0 %3826 }
 0x809   : > { %3008 = vadd.xlane.f32.xlu1 %v3007_v9  ;;  %v9414_v9 = vpop.permute.xlu1 %3835 }
 0x80c   : > { %v9424_v38 = vpop.permute.xlu0 %3820 }
 0x81a   : > { %6443 = vrot.lane.b32.xlu1 %v6442_v59, %s7071_s30  ;;  %v9428_v59 = vpop.xlane.xlu0 %2975 }
 0x81b   : > { %11194 = vst [vmem:[#allocation67_spill] sm:$0xff] %v9428_v59 }
 0x820   : > { %v9418_v2 = vpop.xlane.xlu1 %2990 }
 0x821   : > { %11192 = vst [vmem:[#allocation61_spill] sm:$0xff] %v9418_v2 }
 0x824   : > { %v9422_v43 = vpop.xlane.xlu1 %2984 }
 0x825   : > { %11193 = vst [vmem:[#allocation66_spill] sm:$0xff] %v9422_v43  ;;  %v9434_v43 = vpop.xlane.xlu0 %2969 }
 0x826   : > { %11195 = vst [vmem:[#allocation68_spill] sm:$0xff] %v9434_v43 }
 0x828   : > { %v6424_v18 = vpop.permute.xlu1 %6423 }
 0x829   : > { %v6426_v19 = vunpack.i.h.bf16 %v6424_v18  ;;  %v6425_v46 = vunpack.i.l.bf16 %v6424_v18 }
 0x82b   : > { %v4018_v30 = vsel %vm3858_vm12, %v9315_v8, %v6426_v19  ;;  %v4017_v2 = vsel %vm3857_vm0, %v9319_v7, %v6425_v46  ;;  %v2892_v46 = vmul.f32 %v6733_v62, %v8936_v28  ;;  %v7001_v28 = vld [vmem:[%s10795_s8] ss:$0 sm:$0xff]  ;;  %vm3851_vm0 = vcmp.eq.s32.totalorder %v9351_v32, 1 }
 0x82c   : > { %v6504_v56 = vpack.i.bf16 %v4018_v30, %v4017_v2  ;;  %v9445_v30 = vpop.permute.xlu0 %6418  ;;  %v11197_v2 = vld [vmem:[#allocation22_spill] sm:$0xff]  ;;  %v11199_v62 = vld [vmem:[#allocation95_spill] sm:$0xff]  ;;  %vm3852_vm12 = vcmp.eq.s32.totalorder %v9210_v35, 1 }
 0x82d   : > { %v2890_v19 = vmul.f32 %v6735_v33, %v11197_v2  ;;  %v11201_v33 = vld [vmem:[#allocation93_spill] sm:$0xff] }
 0x82e   : > { %6505 = vrot.lane.b32.xlu0 %v6504_v56, %s7071_s30  ;;  %v2931_v56 = vmul.f32 %v7000_v47, %v2892_v46  ;;  %v3661_v2 = vadd.f32 %v7001_v28, %v11201_v33 }
 0x82f   : > { %v2929_v6 = vmul.f32 %v7000_v47, %v2890_v19  ;;  %v11202_v47 = vld [vmem:[#allocation103_spill] sm:$0xff] }
 0x830   : > { %v9448_v18 = vpop.permute.xlu0 %3832  ;;  %v3025_v40 = vsel %vm2316_vm2, %v2931_v56, 0.0  ;;  %v3672_v19 = vadd.f32 %v7001_v28, %v11202_v47  ;;  %v11205_v47 = vld [vmem:[#allocation36_spill] sm:$0xff] }
 0x831   : > { %v3019_v48 = vsel %vm2316_vm2, %v2929_v6, 0.0  ;;  %v11203_v6 = vld [vmem:[#allocation102_spill] sm:$0xff]  ;;  %vm3844_vm2 = vcmp.eq.s32.totalorder %v9147_v57, 1 }
 0x832   : > { %4143 = vperm.xlu0 %6462, %v4060_v50  }
 0x834   : > { %v9451_v50 = vpop.permute.xlu0 %3841 }
 0x836   : > { %4146 = vperm.xlu0 %6462, %v4061_v61   ;;  %v3664_v61 = vadd.f32 %v7001_v28, %v11199_v62 }
 0x838   : > { %v9454_v16 = vpop.xlane.xlu0 %2987  ;;  %v9463_v56 = vmax.f32 %v3664_v61, 0.0  ;;  %v6401_v61 = vunpack.i.h.bf16 %v9389_v54 }
 0x839   : > { %11198 = vst [vmem:[#allocation37_spill] sm:$0xff] %v9454_v16  ;;  %v9473_v16 = vmax.f32 %v3672_v19, 0.0  ;;  %v11206_v19 = vld [vmem:[#allocation112_spill] sm:$0xff] }
 0x83c   : > { %v9460_v46 = vpop.xlane.xlu0 %2981 }
 0x83d   : > { %11200 = vst [vmem:[#allocation35_spill] sm:$0xff] %v9460_v46 }
 0x83e   : > { %3026 = vadd.xlane.f32.xlu1 %v3025_v40  ;;  %v9466_v40 = vmax.f32 %v3661_v2, 0.0  ;;  %v6400_v2 = vunpack.i.l.bf16 %v9389_v54  ;;  %v6411_v54 = vunpack.i.h.bf16 %v9416_v27 }
 0x840   : > { %v9469_v59 = vpop.permute.xlu0 %6428  ;;  %v6452_v43 = vpack.i.bf16 %v9463_v56, %v9466_v40 }
 0x841   : > { %v6431_v32 = vunpack.i.h.bf16 %v9469_v59  ;;  %v6430_v35 = vunpack.i.l.bf16 %v9469_v59 }
 0x842   : > { %3020 = vadd.xlane.f32.xlu1 %v3019_v48  ;;  %v3669_v48 = vadd.f32 %v7001_v28, %v11203_v6  ;;  %v4004_v6 = vsel %vm3844_vm2, %v11205_v47, %v6401_v61  ;;  %v11210_v61 = vld [vmem:[#allocation38_spill] sm:$0xff]  ;;  %vm3855_vm2 = vcmp.eq.s32.totalorder %v9366_v42, 1 }
 0x844   : > { %v9475_v62 = vmax.f32 %v3669_v48, 0.0  ;;  %v9478_v33 = vpop.xlane.xlu0 %2999  ;;  %v4003_v48 = vsel %vm3843_vm11, %v11206_v19, %v6400_v2  ;;  %v4054_v2 = vsel %vm11211_vm5, 1, %v10992_v4  ;;  %vm3856_vm11 = vcmp.eq.s32.totalorder %v9216_v36, 1  ;;  %v11218_v36 = vld [vmem:[#allocation45_spill] sm:$0xff] }
 0x845   : > { %11204 = vst [vmem:[#allocation73_spill] sm:$0xff] %v9478_v33  ;;  %v6478_v57 = vpack.i.bf16 %v4004_v6, %v4003_v48  ;;  %v11212_v48 = vld [vmem:[#allocation13_spill] sm:$0xff]  ;;  %vm3863_vm5 = vcmp.eq.s32.totalorder %v9395_v20, 1 }
 0x846   : > { %v6468_v28 = vpack.i.bf16 %v9473_v16, %v9475_v62 }
 0x848   : > { %v9489_v46 = vpop.xlane.xlu0 %2993 }
 0x849   : > { %11207 = vst [vmem:[#allocation72_spill] sm:$0xff] %v9489_v46 }
 0x84c   : > { %v6439_v6 = vpop.permute.xlu0 %6438 }
 0x84d   : > { %v6440_v59 = vunpack.i.l.bf16 %v6439_v6 }
 0x850   : > { %v9513_v46 = vpop.xlane.xlu0 %3011 }
 0x853   : > { %6453 = vrot.lane.b32.xlu1 %v6452_v43, %s7071_s30 }
 0x857   : > { %6469 = vrot.lane.b32.xlu1 %v6468_v28, %s7071_s30  ;;  %v4008_v28 = vsel %vm3848_vm10, %v11210_v61, %v6411_v54  ;;  %v6421_v54 = vunpack.i.h.bf16 %v9445_v30  ;;  %vm3859_vm10 = vcmp.eq.s32.totalorder %v9377_v31, 1 }
 0x859   : > { %v9491_v33 = vpop.xlane.xlu1 %3002 }
 0x85a   : > { %11208 = vst [vmem:[#allocation70_spill] sm:$0xff] %v9491_v33 }
 0x85b   : > { %6479 = vrot.lane.b32.xlu1 %v6478_v57, %s7071_s30  ;;  %v4007_v57 = vsel %vm3847_vm15, %v11212_v48, %v6410_v3  ;;  %vm3860_vm15 = vcmp.eq.s32.totalorder %v9240_v0, 1  ;;  %v11223_v0 = vld [vmem:[#allocation48_spill] sm:$0xff] }
 0x85c   : > { %v6489_v27 = vpack.i.bf16 %v4008_v28, %v4007_v57  ;;  %v9527_v57 = vpop.xlane.xlu0 %3005 }
 0x85d   : > { %v9497_v43 = vpop.xlane.xlu1 %2996 }
 0x85e   : > { %11209 = vst [vmem:[#allocation74_spill] sm:$0xff] %v9497_v43  ;;  %v6420_v43 = vunpack.i.l.bf16 %v9445_v30  ;;  %v4012_v30 = vsel %vm3852_vm12, %v9023_v52, %v6421_v54  ;;  %v4015_v54 = vsel %vm3855_vm2, %v9087_v24, %v6430_v35  ;;  %vm3874_vm12 = vcmp.eq.s32.totalorder %v9451_v50, 1 }
 0x85f   : > { %4125 = vperm.xlu1 %6483, %v4054_v2   ;;  %vm3871_vm2 = vcmp.eq.s32.totalorder %v9448_v18, 1 }
 0x861   : > { %v6434_v33 = vpop.permute.xlu1 %6433 }
 0x862   : > { %v6436_v60 = vunpack.i.h.bf16 %v6434_v33  ;;  %v6435_v26 = vunpack.i.l.bf16 %v6434_v33  ;;  %v11213_v33 = vld [vmem:[#allocation14_spill] sm:$0xff] }
 0x863   : > { %6490 = vrot.lane.b32.xlu1 %v6489_v27, %s7071_s30  ;;  %v4011_v22 = vsel %vm3851_vm0, %v11213_v33, %v6420_v43  ;;  %v4016_v43 = vsel %vm3856_vm11, %v9084_v53, %v6431_v32  ;;  %vm3870_vm0 = vcmp.eq.s32.totalorder %v9345_v23, 1  ;;  %vm3872_vm11 = vcmp.eq.s32.totalorder %v9414_v9, 1 }
 0x864   : > { %v4022_v2 = vsel %vm3862_vm14, %v9353_v49, %v6436_v60  ;;  %v4021_v3 = vsel %vm3861_vm7, %v9357_v34, %v6435_v26  ;;  %v6499_v27 = vpack.i.bf16 %v4012_v30, %v4011_v22  ;;  %v4058_v26 = vsel %vm2436_vm6, 1, %v10992_v4  ;;  %v11219_v22 = vld [vmem:[#allocation43_spill] sm:$0xff] }
 0x865   : > { %v6514_v28 = vpack.i.bf16 %v4022_v2, %v4021_v3  ;;  %v6449_v2 = vpop.permute.xlu0 %6448  ;;  %v6509_v3 = vpack.i.bf16 %v4016_v43, %v4015_v54  ;;  %v4019_v41 = vsel %vm3859_vm10, %v11219_v22, %v6440_v59  ;;  %vm11222_vm6 = vcmp.eq.f32.partialorder %v11220_v10, %v11221_v39  ;;  %v11224_v43 = vld [vmem:[#allocation16_spill] sm:$0xff] }
 0x866   : > { %v6451_v32 = vunpack.i.h.bf16 %v6449_v2  ;;  %v6450_v35 = vunpack.i.l.bf16 %v6449_v2  ;;  %vm3867_vm7 = vcmp.eq.s32.totalorder %v9424_v38, 1  ;;  %vm3868_vm14 = vcmp.eq.s32.totalorder %v9355_v21, 1 }
 0x867   : > { %6515 = vrot.lane.b32.xlu0 %v6514_v28, %s7071_s30  ;;  %4128 = vperm.xlu1 %6483, %v4055_v29   ;;  %v6441_v28 = vunpack.i.h.bf16 %v6439_v6  ;;  %v4059_v29 = vsel %vm11222_vm6, 1, %v10992_v4  ;;  %v4063_v39 = vsel %vm2441_vm8, 1, %v10992_v4  ;;  %v4066_v38 = vsel %vm2444_vm13, 1, %v10992_v4 }
 0x868   : > { %v4024_v31 = vsel %vm3864_vm1, %v11223_v0, %v6451_v32  ;;  %v4023_v54 = vsel %vm3863_vm5, %v11224_v43, %v6450_v35  ;;  %vm3866_vm8 = vcmp.eq.s32.totalorder %v9304_v25, 1  ;;  %vm11231_vm13 = vcmp.eq.f32.partialorder %v11161_v37, %v11162_v15 }
 0x869   : > { %v9540_v30 = vpop.xlane.xlu0 %3023  ;;  %v4020_v42 = vsel %vm3860_vm15, %v11218_v36, %v6441_v28  ;;  %v6529_v59 = vpack.i.bf16 %v4024_v31, %v4023_v54  ;;  %vm4379_vm1 = vcmask 64512  }
 0x86a   : > { %v6519_v6 = vpack.i.bf16 %v4020_v42, %v4019_v41 }
 0x86b   : > { %6500 = vrot.lane.b32.xlu1 %v6499_v27, %s7071_s30 }
 0x86d   : > { %v9551_v27 = vpop.xlane.xlu0 %3017 }
 0x86f   : > { %4137 = vperm.xlu1 %6483, %v4058_v26  }
 0x871   : > { %v6459_v28 = vpop.permute.xlu0 %6458 }
 0x872   : > { %v6461_v42 = vunpack.i.h.bf16 %v6459_v28  ;;  %v6460_v2 = vunpack.i.l.bf16 %v6459_v28 }
 0x873   : > { %6510 = vrot.lane.b32.xlu1 %v6509_v3, %s7071_s30  ;;  %v4062_v3 = vsel %vm2440_vm9, 1, %v10992_v4  ;;  %vm3865_vm9 = vcmp.eq.s32.totalorder %v9392_v17, 1  ;;  %v4065_v17 = vsel %vm11231_vm13, 1, %v10992_v4 }
 0x874   : > { %v4028_v45 = vsel %vm3868_vm14, %v9261_v13, %v6461_v42  ;;  %v4027_v20 = vsel %vm3867_vm7, %v9266_v63, %v6460_v2 }
 0x875   : > { %v9593_v25 = vpop.permute.xlu0 %4122 }
 0x877   : > { %4140 = vperm.xlu1 %6483, %v4059_v29   ;;  %v6534_v29 = vpack.i.bf16 %v4028_v45, %v4027_v20 }
 0x879   : > { %v6465_v2 = vpop.permute.xlu0 %6464 }
 0x87a   : > { %v6467_v41 = vunpack.i.h.bf16 %v6465_v2  ;;  %v6466_v10 = vunpack.i.l.bf16 %v6465_v2  ;;  %v11235_v2 = vld [vmem:[#allocation108_spill] sm:$0xff] }
 0x87b   : > { %6520 = vrot.lane.b32.xlu1 %v6519_v6, %s7071_s30  ;;  %vm4164_vm5 = vcmp.eq.s32.totalorder %v11235_v2, 1  ;;  %v5061_v2 = vld [vmem:[%s9618_s12 + $0x88] sm:$0xff] }
 0x87c   : > { %v4034_v6 = vsel %vm3874_vm12, %v9280_v14, %v6467_v41  ;;  %v4033_v32 = vsel %vm3873_vm3, %v9286_v51, %v6466_v10  ;;  %v11236_v10 = vld [vmem:[#allocation24_spill] sm:$0xff] }
 0x87d   : > { %v6475_v37 = vpop.permute.xlu0 %6474 }
 0x87e   : > { %v6477_v50 = vunpack.i.h.bf16 %v6475_v37 }
 0x87f   : > { %4149 = vperm.xlu1 %6483, %v4062_v3  }
 0x881   : > { %v6486_v23 = vpop.permute.xlu0 %6485 }
 0x883   : > { %6530 = vrot.lane.b32.xlu1 %v6529_v59, %s7071_s30  ;;  %v4064_v59 = vsel %vm2442_vm4, 1, %v10992_v4  ;;  %vm3869_vm4 = vcmp.eq.s32.totalorder %v9420_v44, 1 }
 0x887   : > { %4152 = vperm.xlu1 %6483, %v4063_v39  }
 0x88b   : > { %6535 = vrot.lane.b32.xlu1 %v6534_v29, %s7071_s30 }
 0x88f   : > { %4161 = vperm.xlu1 %6483, %v4066_v38  }
 0x892   : > { %v9576_v21 = vpop.xlane.xlu1 %3014 }
 0x896   : > { %v9578_v35 = vpop.xlane.xlu1 %3008 }
 0x89a   : > { %v6444_v31 = vpop.permute.xlu1 %6443 }
 0x89b   : > { %v6446_v54 = vunpack.i.h.bf16 %v6444_v31  ;;  %v6445_v60 = vunpack.i.l.bf16 %v6444_v31  ;;  %v6476_v31 = vunpack.i.l.bf16 %v6475_v37 }
 0x89d   : > { %v4026_v26 = vsel %vm3866_vm8, %v9403_v11, %v6446_v54  ;;  %v4025_v3 = vsel %vm3865_vm9, %v9405_v5, %v6445_v60 }
 0x89e   : > { %v6524_v28 = vpack.i.bf16 %v4026_v26, %v4025_v3  ;;  %v6549_v26 = vpack.i.bf16 %v4034_v6, %v4033_v32  ;;  %v6488_v32 = vunpack.i.h.bf16 %v6486_v23 }
 0x8a0   : > { %6525 = vrot.lane.b32.xlu0 %v6524_v28, %s7071_s30  ;;  %v11232_v28 = vld [vmem:[#allocation78_spill] sm:$0xff] }
 0x8a1   : > { %vm4163_vm10 = vcmp.eq.s32.totalorder %v11232_v28, 1 }
 0x8a4   : > { %4155 = vperm.xlu0 %6462, %v4064_v59   ;;  %v11233_v59 = vld [vmem:[#allocation81_spill] sm:$0xff] }
 0x8a5   : > { %vm4166_vm15 = vcmp.eq.s32.totalorder %v11233_v59, 1 }
 0x8a6   : > { %v4326_v41 = vsel %vm4166_vm15, %v9107_v55, %v6477_v50  ;;  %v5046_v55 = vld [vmem:[%s9618_s12 + $0x10] sm:$0xff] }
 0x8a8   : > { %4158 = vperm.xlu0 %6462, %v4065_v17   ;;  %v11234_v17 = vld [vmem:[#allocation107_spill] sm:$0xff] }
 0x8a9   : > { %vm4165_vm6 = vcmp.eq.s32.totalorder %v11234_v17, 1  ;;  %v5047_v17 = vld [vmem:[%s9618_s12 + $0x18] sm:$0xff] }
 0x8cb   : > { %v9595_v42 = vpop.xlane.xlu1 %3026 }
 0x8cf   : > { %v9597_v45 = vpop.xlane.xlu1 %3020 }
 0x8d3   : > { %v6454_v20 = vpop.permute.xlu1 %6453 }
 0x8d4   : > { %v6456_v12 = vunpack.i.h.bf16 %v6454_v20  ;;  %v6455_v1 = vunpack.i.l.bf16 %v6454_v20  ;;  %v9624_v20 = vpop.permute.xlu0 %4131 }
 0x8d6   : > { %v4030_v4 = vsel %vm3870_vm0, %v9463_v56, %v6456_v12  ;;  %v4029_v15 = vsel %vm3869_vm4, %v9466_v40, %v6455_v1  ;;  %v4325_v12 = vsel %vm4165_vm6, %v11236_v10, %v6476_v31 }
 0x8d7   : > { %v6470_v39 = vpop.permute.xlu1 %6469  ;;  %v6539_v29 = vpack.i.bf16 %v4030_v4, %v4029_v15  ;;  %v5045_v4 = vld [vmem:[%s9618_s12 + $0x8] sm:$0xff]  ;;  %v5044_v15 = vld [vmem:[%s9618_s12] sm:$0xff]  ;;  %v4356_v6 = vpack.c.bf16 %v4326_v41, %v4325_v12 }
 0x8d8   : > { %v6472_v38 = vunpack.i.h.bf16 %v6470_v39  ;;  %v6471_v44 = vunpack.i.l.bf16 %v6470_v39  ;;  %v9639_v50 = vpop.permute.xlu0 %4134 }
 0x8d9   : > { %6540 = vrot.lane.b32.xlu0 %v6539_v29, %s7071_s30 }
 0x8da   : > { %v4032_v58 = vsel %vm3872_vm11, %v9473_v16, %v6472_v38  ;;  %v4031_v54 = vsel %vm3871_vm2, %v9475_v62, %v6471_v44  ;;  %v6487_v38 = vunpack.i.l.bf16 %v6486_v23  ;;  %v5060_v44 = vld [vmem:[%s9618_s12 + $0x80] sm:$0xff] }
 0x8db   : > { %v6480_v60 = vpop.permute.xlu1 %6479  ;;  %v6544_v3 = vpack.i.bf16 %v4032_v58, %v4031_v54  ;;  %v11237_v58 = vld [vmem:[#allocation88_spill] sm:$0xff]  ;;  %v11238_v54 = vld [vmem:[#allocation91_spill] sm:$0xff] }
 0x8dc   : > { %v6482_v9 = vunpack.i.h.bf16 %v6480_v60  ;;  %v6481_v18 = vunpack.i.l.bf16 %v6480_v60  ;;  %vm4169_vm7 = vcmp.eq.s32.totalorder %v11237_v58, 1  ;;  %vm4168_vm14 = vcmp.eq.s32.totalorder %v11238_v54, 1  ;;  %v11239_v60 = vld [vmem:[#allocation110_spill] sm:$0xff]  ;;  %v11240_v23 = vld [vmem:[#allocation111_spill] sm:$0xff]  ;;  %v6496_v41 = vpop.permute.xlu0 %6495  ;;  %v11248_v58 = vld [vmem:[#allocation32_spill] sm:$0xff] }
 0x8dd   : > { %6550 = vrot.lane.b32.xlu0 %v6549_v26, %s7071_s30  ;;  %6545 = vrot.lane.b32.xlu1 %v6544_v3, %s7071_s30  ;;  %vm4167_vm9 = vcmp.eq.s32.totalorder %v11239_v60, 1  ;;  %vm4170_vm8 = vcmp.eq.s32.totalorder %v11240_v23, 1  ;;  %v11241_v26 = vld [vmem:[#allocation15_spill] sm:$0xff] }
 0x8de   : > { %v4324_v1 = vsel %vm4164_vm5, %v11205_v47, %v6482_v9  ;;  %v4323_v37 = vsel %vm4163_vm10, %v11206_v19, %v6481_v18  ;;  %v4330_v3 = vsel %vm4170_vm8, %v11241_v26, %v6488_v32  ;;  %v11242_v9 = vld [vmem:[#allocation27_spill] sm:$0xff]  ;;  %v5049_v26 = vld [vmem:[%s9618_s12 + $0x28] sm:$0xff] }
 0x8df   : > { %v9634_v39 = vpop.permute.xlu1 %4125  ;;  %v4355_v29 = vpack.c.bf16 %v4324_v1, %v4323_v37  ;;  %v4329_v18 = vsel %vm4169_vm7, %v11242_v9, %v6487_v38  ;;  %v6498_v37 = vunpack.i.h.bf16 %v6496_v41  ;;  %v11243_v38 = vld [vmem:[#allocation92_spill] sm:$0xff]  ;;  %vm4181_vm7 = vcmp.eq.s32.totalorder %v9593_v25, 1 }
 0x8e0   : > { %v4358_v1 = vpack.c.bf16 %v4330_v3, %v4329_v18  ;;  %vm4173_vm13 = vcmp.eq.s32.totalorder %v11243_v38, 1  ;;  %v5063_v3 = vld [vmem:[%s9618_s12 + $0x98] sm:$0xff]  ;;  %vm4182_vm15 = vcmp.eq.s32.totalorder %v9634_v39, 1 }
 0x8e1   : > { %5080 = vperm.xlu0 %6462, %v5045_v4   ;;  %5077 = vperm.xlu1 %6483, %v5044_v15   ;;  %v6497_v4 = vunpack.i.l.bf16 %v6496_v41  ;;  %v5048_v15 = vld [vmem:[%s9618_s12 + $0x20] sm:$0xff]  ;;  %v5050_v41 = vld [vmem:[%s9618_s12 + $0x30] sm:$0xff] }
 0x8e2   : > { %6308 = vmatprep.mubr.msk.bf16.mxu1 %vm4379_vm1, %v4355_v29  ;;  %v5062_v29 = vld [vmem:[%s9618_s12 + $0x90] sm:$0xff] }
 0x8e3   : > { %6309 = vmatmul.mubr.msk.bf16.vlgmr.msra.gmra.mrb[128].mxu1 %vm4379_vm1, %v4356_v6  ;;  %v6491_v47 = vpop.permute.xlu1 %6490  ;;  %v6506_v6 = vpop.permute.xlu0 %6505  ;;  %v4333_v54 = vsel %vm4173_vm13, %v11248_v58, %v6497_v4  ;;  %v11250_v4 = vld [vmem:[#allocation104_spill] sm:$0xff]  ;;  %vm4185_vm13 = vcmp.eq.s32.totalorder %v9639_v50, 1 }
 0x8e4   : > { %v6493_v19 = vunpack.i.h.bf16 %v6491_v47  ;;  %v6492_v31 = vunpack.i.l.bf16 %v6491_v47  ;;  %v11246_v47 = vld [vmem:[#allocation41_spill] sm:$0xff]  ;;  %vm4176_vm2 = vcmp.eq.s32.totalorder %v11250_v4, 1  ;;  %v5055_v4 = vld [vmem:[%s9618_s12 + $0x58] sm:$0xff] }
 0x8e5   : > { %5083 = vperm.xlu0 %6462, %v5046_v55   ;;  %5125 = vperm.xlu1 %6483, %v5060_v44   ;;  %v11244_v55 = vld [vmem:[#allocation98_spill] sm:$0xff]  ;;  %v11245_v44 = vld [vmem:[#allocation115_spill] sm:$0xff]  ;;  %vm4174_vm12 = vcmp.eq.s32.totalorder %v11246_v47, 1 }
 0x8e6   : > { %v4328_v28 = vsel %vm4168_vm14, %v11210_v61, %v6493_v19  ;;  %v4327_v59 = vsel %vm4167_vm9, %v11212_v48, %v6492_v31  ;;  %vm4172_vm4 = vcmp.eq.s32.totalorder %v11244_v55, 1  ;;  %vm4171_vm0 = vcmp.eq.s32.totalorder %v11245_v44, 1  ;;  %v11247_v19 = vld [vmem:[#allocation31_spill] sm:$0xff]  ;;  %v5065_v44 = vld [vmem:[%s9618_s12 + $0xa8] sm:$0xff] }
 0x8e7   : > { %v9652_v10 = vpop.permute.xlu1 %4128  ;;  %v4357_v12 = vpack.c.bf16 %v4328_v28, %v4327_v59  ;;  %v4334_v31 = vsel %vm4174_vm12, %v11247_v19, %v6498_v37  ;;  %v9668_v9 = vpop.permute.xlu0 %4143  ;;  %v11249_v37 = vld [vmem:[#allocation99_spill] sm:$0xff]  ;;  %vm4184_vm14 = vcmp.eq.s32.totalorder %v9624_v20, 1 }
 0x8e8   : > { %v4360_v59 = vpack.c.bf16 %v4334_v31, %v4333_v54  ;;  %vm4177_vm3 = vcmp.eq.s32.totalorder %v11249_v37, 1  ;;  %v5051_v55 = vld [vmem:[%s9618_s12 + $0x38] sm:$0xff]  ;;  %v5052_v54 = vld [vmem:[%s9618_s12 + $0x40] sm:$0xff]  ;;  %vm4183_vm9 = vcmp.eq.s32.totalorder %v9652_v10, 1  ;;  %v5070_v10 = vld [vmem:[%s9618_s12 + $0xd0] sm:$0xff]  ;;  %vm4188_vm8 = vcmp.eq.s32.totalorder %v9668_v9, 1 }
 0x8e9   : > { %5086 = vperm.xlu0 %6462, %v5047_v17   ;;  %5128 = vperm.xlu1 %6483, %v5061_v2   ;;  %v6508_v17 = vunpack.i.h.bf16 %v6506_v6  ;;  %v6507_v2 = vunpack.i.l.bf16 %v6506_v6  ;;  %v5056_v20 = vld [vmem:[%s9618_s12 + $0x60] sm:$0xff] }
 0x8ea   : > { %6312 = vmatprep.mubr.msk.bf16.mxu1 %vm4379_vm1, %v4357_v12  ;;  %v5064_v12 = vld [vmem:[%s9618_s12 + $0xa0] sm:$0xff] }
 0x8eb   : > { %6313 = vmatmul.mubr.msk.bf16.gmra.mrb[132].mxu1 %vm4379_vm1, %v4358_v1  ;;  %v6501_v61 = vpop.permute.xlu1 %6500  ;;  %v9680_v6 = vpop.permute.xlu0 %4146 }
 0x8ec   : > { %v6503_v48 = vunpack.i.h.bf16 %v6501_v61  ;;  %v6502_v32 = vunpack.i.l.bf16 %v6501_v61  ;;  %vm4189_vm12 = vcmp.eq.s32.totalorder %v9680_v6, 1 }
 0x8ed   : > { %5089 = vperm.xlu0 %6462, %v5048_v15   ;;  %5131 = vperm.xlu1 %6483, %v5062_v29   ;;  %v11251_v15 = vld [vmem:[#allocation12_spill] sm:$0xff]  ;;  %v11252_v29 = vld [vmem:[#allocation21_spill] sm:$0xff] }
 0x8ee   : > { %v4332_v60 = vsel %vm4172_vm4, %v9023_v52, %v6503_v48  ;;  %v4331_v23 = vsel %vm4171_vm0, %v11213_v33, %v6502_v32  ;;  %vm4175_vm11 = vcmp.eq.s32.totalorder %v11251_v15, 1  ;;  %vm4178_vm10 = vcmp.eq.s32.totalorder %v11252_v29, 1  ;;  %v5069_v15 = vld [vmem:[%s9618_s12 + $0xc8] sm:$0xff] }
 0x8ef   : > { %v9670_v18 = vpop.permute.xlu1 %4137  ;;  %v4359_v28 = vpack.c.bf16 %v4332_v60, %v4331_v23  ;;  %v4338_v61 = vsel %vm4178_vm10, %v9315_v8, %v6508_v17  ;;  %v4337_v48 = vsel %vm4177_vm3, %v9319_v7, %v6507_v2  ;;  %v6516_v31 = vpop.permute.xlu0 %6515  ;;  %v5066_v8 = vld [vmem:[%s9618_s12 + $0xb0] sm:$0xff]  ;;  %v5053_v17 = vld [vmem:[%s9618_s12 + $0x48] sm:$0xff]  ;;  %v5067_v2 = vld [vmem:[%s9618_s12 + $0xb8] sm:$0xff] }
 0x8f0   : > { %v4362_v58 = vpack.c.bf16 %v4338_v61, %v4337_v48  ;;  %v6517_v7 = vunpack.i.l.bf16 %v6516_v31  ;;  %vm4186_vm4 = vcmp.eq.s32.totalorder %v9670_v18, 1  ;;  %v5075_v18 = vld [vmem:[%s9618_s12 + $0xf8] sm:$0xff] }
 0x8f1   : > { %5092 = vperm.xlu0 %6462, %v5049_v26   ;;  %5134 = vperm.xlu1 %6483, %v5063_v3   ;;  %v11253_v26 = vld [vmem:[#allocation109_spill] sm:$0xff]  ;;  %v11254_v3 = vld [vmem:[#allocation40_spill] sm:$0xff] }
 0x8f2   : > { %6316 = vmatprep.mubr.msk.bf16.mxu1 %vm4379_vm1, %v4359_v28  ;;  %vm4180_vm6 = vcmp.eq.s32.totalorder %v11253_v26, 1  ;;  %vm4179_vm5 = vcmp.eq.s32.totalorder %v11254_v3, 1 }
 0x8f3   : > { %6317 = vmatmul.mubr.msk.bf16.gmra.mrb[136].mxu1 %vm4379_vm1, %v4360_v59  ;;  %v6511_v52 = vpop.permute.xlu1 %6510 }
 0x8f4   : > { %v6513_v33 = vunpack.i.h.bf16 %v6511_v52  ;;  %v6512_v1 = vunpack.i.l.bf16 %v6511_v52  ;;  %v4341_v52 = vsel %vm4181_vm7, %v9357_v34, %v6517_v7  ;;  %v5059_v7 = vld [vmem:[%s9618_s12 + $0x78] sm:$0xff] }
 0x8f5   : > { %5095 = vperm.xlu0 %6462, %v5050_v41   ;;  %5137 = vperm.xlu1 %6483, %v5064_v12  }
 0x8f6   : > { %v4336_v32 = vsel %vm4176_vm2, %v9084_v53, %v6513_v33  ;;  %v4335_v38 = vsel %vm4175_vm11, %v9087_v24, %v6512_v1  ;;  %v6518_v24 = vunpack.i.h.bf16 %v6516_v31 }
 0x8f7   : > { %v9688_v47 = vpop.permute.xlu1 %4140  ;;  %v4361_v19 = vpack.c.bf16 %v4336_v32, %v4335_v38  ;;  %v5057_v32 = vld [vmem:[%s9618_s12 + $0x68] sm:$0xff] }
 0x8f8   : > { %v4342_v28 = vsel %vm4182_vm15, %v9353_v49, %v6518_v24  ;;  %v5054_v49 = vld [vmem:[%s9618_s12 + $0x50] sm:$0xff]  ;;  %vm4187_vm0 = vcmp.eq.s32.totalorder %v9688_v47, 1 }
 0x8f9   : > { %5098 = vperm.xlu0 %6462, %v5051_v55   ;;  %5140 = vperm.xlu1 %6483, %v5065_v44   ;;  %v4364_v33 = vpack.c.bf16 %v4342_v28, %v4341_v52  ;;  %v5058_v44 = vld [vmem:[%s9618_s12 + $0x70] sm:$0xff] }
 0x8fa   : > { %6320 = vmatprep.mubr.msk.bf16.mxu1 %vm4379_vm1, %v4361_v19  ;;  %v5072_v19 = vld [vmem:[%s9618_s12 + $0xe0] sm:$0xff] }
 0x8fb   : > { %6321 = vmatmul.mubr.msk.bf16.gmra.mrb[140].mxu1 %vm4379_vm1, %v4362_v58  ;;  %v6521_v53 = vpop.permute.xlu1 %6520 }
 0x8fc   : > { %v6523_v60 = vunpack.i.h.bf16 %v6521_v53  ;;  %v6522_v23 = vunpack.i.l.bf16 %v6521_v53 }
 0x8fd   : > { %5101 = vperm.xlu0 %6462, %v5052_v54   ;;  %5143 = vperm.xlu1 %6483, %v5066_v8  }
 0x8fe   : > { %v4340_v59 = vsel %vm4180_vm6, %v11218_v36, %v6523_v60  ;;  %v4339_v39 = vsel %vm4179_vm5, %v11219_v22, %v6522_v23  ;;  %v5068_v36 = vld [vmem:[%s9618_s12 + $0xc0] sm:$0xff]  ;;  %v5073_v60 = vld [vmem:[%s9618_s12 + $0xe8] sm:$0xff] }
 0x8ff   : > { %v9703_v41 = vpop.permute.xlu1 %4149  ;;  %v4363_v12 = vpack.c.bf16 %v4340_v59, %v4339_v39 }
 0x900   : > { %vm4190_vm3 = vcmp.eq.s32.totalorder %v9703_v41, 1 }
 0x901   : > { %5104 = vperm.xlu0 %6462, %v5053_v17   ;;  %5146 = vperm.xlu1 %6483, %v5067_v2  }
 0x902   : > { %6324 = vmatprep.mubr.msk.bf16.mxu1 %vm4379_vm1, %v4363_v12 }
 0x903   : > { %6325 = vmatmul.mubr.msk.bf16.gmra.mrb[144].mxu1 %vm4379_vm1, %v4364_v33  ;;  %v6531_v22 = vpop.permute.xlu1 %6530 }
 0x904   : > { %v6533_v1 = vunpack.i.h.bf16 %v6531_v22  ;;  %v6532_v25 = vunpack.i.l.bf16 %v6531_v22 }
 0x905   : > { %5107 = vperm.xlu0 %6462, %v5054_v49   ;;  %5149 = vperm.xlu1 %6483, %v5068_v36  }
 0x906   : > { %v4344_v34 = vsel %vm4184_vm14, %v11223_v0, %v6533_v1  ;;  %v4343_v37 = vsel %vm4183_vm9, %v11224_v43, %v6532_v25  ;;  %v5071_v0 = vld [vmem:[%s9618_s12 + $0xd8] sm:$0xff] }
 0x907   : > { %v9716_v29 = vpop.permute.xlu1 %4152  ;;  %v4365_v61 = vpack.c.bf16 %v4344_v34, %v4343_v37 }
 0x908   : > { %vm4191_vm2 = vcmp.eq.s32.totalorder %v9716_v29, 1 }
 0x909   : > { %5110 = vperm.xlu0 %6462, %v5055_v4   ;;  %5152 = vperm.xlu1 %6483, %v5069_v15   ;;  %v10920_v15 = vmov 0.0  }
 0x90a   : > { %6328 = vmatprep.mubr.msk.bf16.mxu1 %vm4379_vm1, %v4365_v61 }
 0x90b   : > { %v6536_v48 = vpop.permute.xlu1 %6535 }
 0x90c   : > { %v6538_v38 = vunpack.i.h.bf16 %v6536_v48  ;;  %v6537_v43 = vunpack.i.l.bf16 %v6536_v48 }
 0x90d   : > { %5113 = vperm.xlu0 %6462, %v5056_v20   ;;  %5155 = vperm.xlu1 %6483, %v5070_v10  }
 0x90e   : > { %v4348_v54 = vsel %vm4188_vm8, %v9261_v13, %v6538_v38  ;;  %v4347_v8 = vsel %vm4187_vm0, %v9266_v63, %v6537_v43  ;;  %v5074_v13 = vld [vmem:[%s9618_s12 + $0xf0] sm:$0xff] }
 0x90f   : > { %v4367_v50 = vpack.c.bf16 %v4348_v54, %v4347_v8  ;;  %v4162_v47 = vpop.permute.xlu1 %4161 }
 0x910   : > { %vm4194_vm10 = vcmp.eq.s32.totalorder %v4162_v47, 1 }
 0x911   : > { %5116 = vperm.xlu0 %6462, %v5057_v32   ;;  %5158 = vperm.xlu1 %6483, %v5071_v0  }
 0x912   : > { %v6526_v55 = vpop.permute.xlu0 %6525 }
 0x913   : > { %v6528_v31 = vunpack.i.h.bf16 %v6526_v55  ;;  %v6527_v58 = vunpack.i.l.bf16 %v6526_v55 }
 0x915   : > { %v4345_v53 = vsel %vm4185_vm13, %v9405_v5, %v6527_v58  ;;  %v4346_v24 = vsel %vm4186_vm4, %v9403_v11, %v6528_v31  ;;  %5119 = vperm.xlu0 %6462, %v5058_v44   ;;  %5161 = vperm.xlu1 %6483, %v5072_v19  }
 0x916   : > { %v4366_v9 = vpack.c.bf16 %v4346_v24, %v4345_v53 }
 0x918   : > { %6329 = vmatmul.mubr.msk.bf16.gmra.mrb[148].mxu1 %vm4379_vm1, %v4366_v9 }
 0x919   : > { %5122 = vperm.xlu0 %6462, %v5059_v7   ;;  %5164 = vperm.xlu1 %6483, %v5073_v60  }
 0x91a   : > { %6332 = vmatprep.mubr.msk.bf16.mxu1 %vm4379_vm1, %v4367_v50 }
 0x91d   : > { %5167 = vperm.xlu1 %6483, %v5074_v13  }
 0x921   : > { %5170 = vperm.xlu1 %6483, %v5075_v18  }
 0x923   : > { %v4156_v63 = vpop.permute.xlu0 %4155 }
 0x924   : > { %vm4192_vm11 = vcmp.eq.s32.totalorder %v4156_v63, 1 }
 0x927   : > { %v4159_v5 = vpop.permute.xlu0 %4158 }
 0x928   : > { %vm4193_vm15 = vcmp.eq.s32.totalorder %v4159_v5, 1 }
 0x94b   : > { %v6541_v11 = vpop.permute.xlu0 %6540 }
 0x94c   : > { %v6543_v23 = vunpack.i.h.bf16 %v6541_v11  ;;  %v6542_v26 = vunpack.i.l.bf16 %v6541_v11 }
 0x94e   : > { %v4349_v3 = vsel %vm4189_vm12, %v9466_v40, %v6542_v26  ;;  %v4350_v28 = vsel %vm4190_vm3, %v9463_v56, %v6543_v23 }
 0x94f   : > { %v6551_v59 = vpop.permute.xlu0 %6550  ;;  %v6546_v39 = vpop.permute.xlu1 %6545  ;;  %v4368_v17 = vpack.c.bf16 %v4350_v28, %v4349_v3 }
 0x950   : > { %v6553_v2 = vunpack.i.h.bf16 %v6551_v59  ;;  %v6552_v12 = vunpack.i.l.bf16 %v6551_v59  ;;  %v6548_v52 = vunpack.i.h.bf16 %v6546_v39  ;;  %v6547_v33 = vunpack.i.l.bf16 %v6546_v39 }
 0x951   : > { %6333 = vmatmul.mubr.msk.bf16.gmra.mrb[152].mxu1 %vm4379_vm1, %v4368_v17 }
 0x952   : > { %v4352_v6 = vsel %vm4192_vm11, %v9473_v16, %v6548_v52  ;;  %v4351_v41 = vsel %vm4191_vm2, %v9475_v62, %v6547_v33  ;;  %v4353_v56 = vsel %vm4193_vm15, %v9286_v51, %v6552_v12  ;;  %v4354_v49 = vsel %vm4194_vm10, %v9280_v14, %v6553_v2 }
 0x953   : > { %v4369_v40 = vpack.c.bf16 %v4352_v6, %v4351_v41  ;;  %v4370_v36 = vpack.c.bf16 %v4354_v49, %v4353_v56  ;;  %v5042_v62 = vlaneseq }
 0x955   : > { %6336 = vmatprep.mubr.msk.bf16.mxu1 %vm4379_vm1, %v4369_v40  ;;  %v9763_v51 = vand.u32 127, %v5042_v62 }
 0x959   : > { %6337 = vmatmul.mubr.msk.bf16.gmra.mrb[156].mxu1 %vm4379_vm1, %v4370_v36 }
 0x960   : > { %v9751_v22 = vpop.permute.xlu0 %5080  ;;  %v9753_v1 = vpop.permute.xlu1 %5077 }
 0x964   : > { %v9755_v25 = vpop.permute.xlu0 %5083  ;;  %v9757_v16 = vpop.permute.xlu1 %5125 }
 0x968   : > { %v9759_v34 = vpop.permute.xlu0 %5086  ;;  %v9761_v37 = vpop.permute.xlu1 %5128 }
 0x96c   : > { %v5090_v14 = vpop.permute.xlu0 %5089  ;;  %v9765_v4 = vpop.permute.xlu1 %5131 }
 0x96d   : > { %vm5176_vm1 = vcmp.eq.s32.totalorder %v9763_v51, %v5090_v14 }
 0x96e   : > { %v9769_v29 = vsel %vm5176_vm1, 1.0, %v10920_v15 }
 0x970   : > { %v5093_v61 = vpop.permute.xlu0 %5092  ;;  %v9771_v20 = vpop.permute.xlu1 %5134 }
 0x971   : > { %vm5177_vm6 = vcmp.eq.s32.totalorder %v9763_v51, %v5093_v61 }
 0x972   : > { %v9775_v10 = vsel %vm5177_vm6, 1.0, %v10920_v15 }
 0x974   : > { %v5096_v48 = vpop.permute.xlu0 %5095  ;;  %v5138_v32 = vpop.permute.xlu1 %5137 }
 0x975   : > { %vm5178_vm5 = vcmp.eq.s32.totalorder %v9763_v51, %v5096_v48  ;;  %vm5192_vm7 = vcmp.eq.s32.totalorder %v9763_v51, %v5138_v32  ;;  %v9868_v48 = vld [vmem:[%s10800_s14] ss:$0 sm:$0xff] }
 0x976   : > { %v9780_v0 = vsel %vm5178_vm5, 1.0, %v10920_v15  ;;  %v9783_v38 = vsel %vm5192_vm7, 1.0, %v10920_v15 }
 0x978   : > { %v5099_v43 = vpop.permute.xlu0 %5098  ;;  %v5141_v55 = vpop.permute.xlu1 %5140 }
 0x979   : > { %vm5179_vm14 = vcmp.eq.s32.totalorder %v9763_v51, %v5099_v43  ;;  %vm5193_vm9 = vcmp.eq.s32.totalorder %v9763_v51, %v5141_v55 }
 0x97a   : > { %v9788_v44 = vsel %vm5179_vm14, 1.0, %v10920_v15  ;;  %v9791_v19 = vsel %vm5193_vm9, 1.0, %v10920_v15 }
 0x97c   : > { %v5102_v31 = vpop.permute.xlu0 %5101  ;;  %v5144_v58 = vpop.permute.xlu1 %5143 }
 0x97d   : > { %vm5180_vm8 = vcmp.eq.s32.totalorder %v9763_v51, %v5102_v31  ;;  %vm5194_vm13 = vcmp.eq.s32.totalorder %v9763_v51, %v5144_v58 }
 0x97e   : > { %v9796_v54 = vsel %vm5180_vm8, 1.0, %v10920_v15  ;;  %v9799_v8 = vsel %vm5194_vm13, 1.0, %v10920_v15 }
 0x980   : > { %v5105_v53 = vpop.permute.xlu0 %5104  ;;  %v5147_v24 = vpop.permute.xlu1 %5146 }
 0x981   : > { %vm5181_vm4 = vcmp.eq.s32.totalorder %v9763_v51, %v5105_v53  ;;  %vm5195_vm0 = vcmp.eq.s32.totalorder %v9763_v51, %v5147_v24 }
 0x982   : > { %v9804_v9 = vsel %vm5181_vm4, 1.0, %v10920_v15  ;;  %v9807_v7 = vsel %vm5195_vm0, 1.0, %v10920_v15  ;;  %vm4625_vm4 = vcmask 80896   ;;  %vm5172_vm0 = vcmp.eq.s32.totalorder %v9763_v51, %v9753_v1 }
 0x984   : > { %v5108_v60 = vpop.permute.xlu0 %5107  ;;  %v5150_v50 = vpop.permute.xlu1 %5149 }
 0x985   : > { %vm5182_vm12 = vcmp.eq.s32.totalorder %v9763_v51, %v5108_v60  ;;  %vm5196_vm3 = vcmp.eq.s32.totalorder %v9763_v51, %v5150_v50 }
 0x986   : > { %v9812_v13 = vsel %vm5182_vm12, 1.0, %v10920_v15  ;;  %v9815_v18 = vsel %vm5196_vm3, 1.0, %v10920_v15  ;;  %vm5174_vm12 = vcmp.eq.s32.totalorder %v9763_v51, %v9755_v25  ;;  %vm5175_vm3 = vcmp.eq.s32.totalorder %v9763_v51, %v9759_v34 }
 0x987   : > { %11255 = vst [vmem:[#allocation75_spill] sm:$0xff] %v9812_v13 }
 0x988   : > { %v5111_v63 = vpop.permute.xlu0 %5110  ;;  %v5153_v5 = vpop.permute.xlu1 %5152 }
 0x989   : > { %vm5183_vm2 = vcmp.eq.s32.totalorder %v9763_v51, %v5111_v63  ;;  %vm5197_vm11 = vcmp.eq.s32.totalorder %v9763_v51, %v5153_v5 }
 0x98a   : > { %v9820_v47 = vsel %vm5183_vm2, 1.0, %v10920_v15  ;;  %v9823_v11 = vsel %vm5197_vm11, 1.0, %v10920_v15  ;;  %vm5173_vm2 = vcmp.eq.s32.totalorder %v9763_v51, %v9751_v22  ;;  %vm5190_vm11 = vcmp.eq.s32.totalorder %v9763_v51, %v9765_v4 }
 0x98b   : > { %11256 = vst [vmem:[#allocation79_spill] sm:$0xff] %v9820_v47  ;;  %v5754_v22 = vsel %vm5173_vm2, 1.0, %v10920_v15 }
 0x98c   : > { %v5114_v23 = vpop.permute.xlu0 %5113  ;;  %v5156_v26 = vpop.permute.xlu1 %5155 }
 0x98d   : > { %vm5184_vm10 = vcmp.eq.s32.totalorder %v9763_v51, %v5114_v23  ;;  %vm5198_vm15 = vcmp.eq.s32.totalorder %v9763_v51, %v5156_v26 }
 0x98e   : > { %v9828_v3 = vsel %vm5184_vm10, 1.0, %v10920_v15  ;;  %v9831_v28 = vsel %vm5198_vm15, 1.0, %v10920_v15  ;;  %vm5188_vm10 = vcmp.eq.s32.totalorder %v9763_v51, %v9757_v16  ;;  %vm5191_vm15 = vcmp.eq.s32.totalorder %v9763_v51, %v9771_v20 }
 0x98f   : > { %11257 = vst [vmem:[#allocation85_spill] sm:$0xff] %v9828_v3  ;;  %11258 = vst [vmem:[#allocation44_spill] sm:$0xff] %v9831_v28  ;;  %v11273_v3 = vld [vmem:[#allocation59_spill] sm:$0xff] }
 0x990   : > { %v5117_v59 = vpop.permute.xlu0 %5116  ;;  %v5159_v39 = vpop.permute.xlu1 %5158 }
 0x991   : > { %vm5185_vm1 = vcmp.eq.s32.totalorder %v9763_v51, %v5117_v59  ;;  %vm5199_vm6 = vcmp.eq.s32.totalorder %v9763_v51, %v5159_v39  ;;  %v5753_v59 = vsel %vm5172_vm0, 1.0, %v10920_v15 }
 0x992   : > { %v9836_v17 = vsel %vm5185_vm1, 1.0, %v10920_v15  ;;  %v9839_v2 = vsel %vm5199_vm6, 1.0, %v10920_v15  ;;  %vm5189_vm1 = vcmp.eq.s32.totalorder %v9763_v51, %v9761_v37  ;;  %vm3275_vm6 = vcmask 7168  }
 0x993   : > { %11259 = vst [vmem:[#allocation42_spill] sm:$0xff] %v9836_v17  ;;  %11260 = vst [vmem:[#allocation84_spill] sm:$0xff] %v9839_v2 }
 0x994   : > { %v5120_v12 = vpop.permute.xlu0 %5119  ;;  %v5162_v52 = vpop.permute.xlu1 %5161 }
 0x995   : > { %vm5186_vm5 = vcmp.eq.s32.totalorder %v9763_v51, %v5120_v12  ;;  %vm5200_vm7 = vcmp.eq.s32.totalorder %v9763_v51, %v5162_v52  ;;  %v5755_v12 = vsel %vm5174_vm12, 1.0, %v10920_v15 }
 0x996   : > { %v9844_v33 = vsel %vm5186_vm5, 1.0, %v10920_v15  ;;  %v9847_v6 = vsel %vm5200_vm7, 1.0, %v10920_v15  ;;  %vm5474_vm5 = vcmask 1041409   ;;  %vm5485_vm7 = vcmask 9216  }
 0x997   : > { %11261 = vst [vmem:[#allocation82_spill] sm:$0xff] %v9844_v33  ;;  %11262 = vst [vmem:[#allocation89_spill] sm:$0xff] %v9847_v6 }
 0x998   : > { %v5123_v41 = vpop.permute.xlu0 %5122  ;;  %v5165_v40 = vpop.permute.xlu1 %5164 }
 0x999   : > { %vm5187_vm14 = vcmp.eq.s32.totalorder %v9763_v51, %v5123_v41  ;;  %vm5201_vm9 = vcmp.eq.s32.totalorder %v9763_v51, %v5165_v40 }
 0x99a   : > { %v9852_v56 = vsel %vm5187_vm14, 1.0, %v10920_v15  ;;  %v9855_v49 = vsel %vm5201_vm9, 1.0, %v10920_v15 }
 0x99b   : > { %11263 = vst [vmem:[#allocation97_spill] sm:$0xff] %v9852_v56  ;;  %11264 = vst [vmem:[#allocation90_spill] sm:$0xff] %v9855_v49 }
 0x99c   : > { %v5168_v36 = vpop.permute.xlu1 %5167 }
 0x99d   : > { %vm5202_vm8 = vcmp.eq.s32.totalorder %v9763_v51, %v5168_v36 }
 0x99e   : > { %v9859_v62 = vsel %vm5202_vm8, 1.0, %v10920_v15 }
 0x99f   : > { %11265 = vst [vmem:[#allocation52_spill] sm:$0xff] %v9859_v62 }
 0x9a0   : > { %v5171_v14 = vpop.permute.xlu1 %5170 }
 0x9a1   : > { %vm5203_vm13 = vcmp.eq.s32.totalorder %v9763_v51, %v5171_v14 }
 0x9a2   : > { %v9863_v61 = vsel %vm5203_vm13, 1.0, %v10920_v15 }
 0x9a3   : > { %11266 = vst [vmem:[#allocation49_spill] sm:$0xff] %v9863_v61 }
 0x9b6   : > { %v6310_v32 = vpop.f32.mrb[128].mxu1 }
 0x9b7   : > { %v4475_v43 = vadd.f32 %v6310_v32, %v9868_v48  ;;  %v4466_v55 = vpop.f32.mrb[129].mxu1 }
 0x9b8   : > { %v4467_v31 = vadd.f32 %v9868_v48, %v4466_v55  ;;  %v6311_v58 = vpop.f32.mrb[130].mxu1 }
 0x9b9   : > { %v9879_v53 = vmax.f32 %v4475_v43, 0.0  ;;  %v4478_v24 = vadd.f32 %v6311_v58, %v9868_v48  ;;  %v4469_v60 = vpop.f32.mrb[131].mxu1 }
 0x9ba   : > { %v9882_v50 = vmax.f32 %v4467_v31, 0.0  ;;  %v4470_v63 = vadd.f32 %v9868_v48, %v4469_v60  ;;  %v5756_v60 = vsel %vm5175_vm3, 1.0, %v10920_v15 }
 0x9bb   : > { %4628 = vst.msk [vmem:[%s9876_s0 + $0x10] sm:$0xff] %vm4625_vm4, %v9879_v53  ;;  %v9890_v5 = vmax.f32 %v4478_v24, 0.0  ;;  %v4664_v23 = vsel %vm4625_vm4, %v9879_v53, -inf  ;;  %v5270_v43 = vmul.f32 %v5755_v12, %v9879_v53 }
 0x9bc   : > { %4626 = vst.msk [vmem:[%s9876_s0] sm:$0xff] %vm4625_vm4, %v9882_v50  ;;  %v9899_v26 = vmax.f32 %v4470_v63, 0.0  ;;  %4665 = vmax.xlane.f32.xlu0 %v4664_v23  ;;  %v4658_v1 = vsel %vm4625_vm4, %v9882_v50, -inf  ;;  %v5268_v40 = vmul.f32 %v5753_v59, %v9882_v50 }
 0x9bd   : > { %4629 = vst.msk [vmem:[%s9876_s0 + $0x18] sm:$0xff] %vm4625_vm4, %v9890_v5  ;;  %4659 = vmax.xlane.f32.xlu1 %v4658_v1  ;;  %v4667_v32 = vsel %vm4625_vm4, %v9890_v5, -inf  ;;  %v5306_v59 = vsel %vm4625_vm4, %v5270_v43, 0.0 }
 0x9be   : > { %4627 = vst.msk [vmem:[%s9876_s0 + $0x8] sm:$0xff] %vm4625_vm4, %v9899_v26  ;;  %v6314_v39 = vpop.f32.mrb[132].mxu1  ;;  %v4661_v25 = vsel %vm4625_vm4, %v9899_v26, -inf  ;;  %v5300_v23 = vsel %vm4625_vm4, %v5268_v40, 0.0 }
 0x9bf   : > { %v4491_v52 = vadd.f32 %v6314_v39, %v9868_v48  ;;  %v4482_v41 = vpop.f32.mrb[133].mxu1  ;;  %v5271_v39 = vmul.f32 %v5756_v60, %v9890_v5 }
 0x9c0   : > { %v4483_v36 = vadd.f32 %v9868_v48, %v4482_v41  ;;  %v6315_v14 = vpop.f32.mrb[134].mxu1  ;;  %4662 = vmax.xlane.f32.xlu0 %v4661_v25 }
 0x9c1   : > { %v9921_v55 = vmax.f32 %v4491_v52, 0.0  ;;  %v4494_v31 = vadd.f32 %v6315_v14, %v9868_v48  ;;  %v4485_v58 = vpop.f32.mrb[135].mxu1  ;;  %4668 = vmax.xlane.f32.xlu1 %v4667_v32  ;;  %v5309_v14 = vsel %vm4625_vm4, %v5271_v39, 0.0  ;;  %v5269_v32 = vmul.f32 %v5754_v22, %v9899_v26 }
 0x9c2   : > { %v9924_v24 = vmax.f32 %v4483_v36, 0.0  ;;  %v4486_v34 = vadd.f32 %v9868_v48, %v4485_v58 }
 0x9c3   : > { %4632 = vst.msk [vmem:[%s9876_s0 + $0x30] sm:$0xff] %vm4625_vm4, %v9921_v55  ;;  %v9931_v63 = vmax.f32 %v4494_v31, 0.0  ;;  %v4676_v41 = vsel %vm4625_vm4, %v9921_v55, -inf }
 0x9c4   : > { %4630 = vst.msk [vmem:[%s9876_s0 + $0x20] sm:$0xff] %vm4625_vm4, %v9924_v24  ;;  %v9939_v1 = vmax.f32 %v4486_v34, 0.0  ;;  %5301 = vadd.xlane.f32.xlu0 %v5300_v23 }
 0x9c5   : > { %4633 = vst.msk [vmem:[%s9876_s0 + $0x38] sm:$0xff] %vm4625_vm4, %v9931_v63  ;;  %5307 = vadd.xlane.f32.xlu1 %v5306_v59  ;;  %v4670_v59 = vsel %vm4625_vm4, %v9924_v24, -inf }
 0x9c6   : > { %4631 = vst.msk [vmem:[%s9876_s0 + $0x28] sm:$0xff] %vm4625_vm4, %v9939_v1  ;;  %v6318_v25 = vpop.f32.mrb[136].mxu1 }
 0x9c7   : > { %v4507_v12 = vadd.f32 %v6318_v25, %v9868_v48  ;;  %v4498_v52 = vpop.f32.mrb[137].mxu1  ;;  %v5303_v25 = vsel %vm4625_vm4, %v5269_v32, 0.0 }
 0x9c8   : > { %v4499_v40 = vadd.f32 %v9868_v48, %v4498_v52  ;;  %v6319_v36 = vpop.f32.mrb[138].mxu1  ;;  %4677 = vmax.xlane.f32.xlu0 %v4676_v41 }
 0x9c9   : > { %v9956_v43 = vmax.f32 %v4507_v12, 0.0  ;;  %v4510_v31 = vadd.f32 %v6319_v36, %v9868_v48  ;;  %v4501_v58 = vpop.f32.mrb[139].mxu1  ;;  %5310 = vadd.xlane.f32.xlu1 %v5309_v14  ;;  %v4679_v14 = vsel %vm4625_vm4, %v9931_v63, -inf }
 0x9ca   : > { %v9959_v34 = vmax.f32 %v4499_v40, 0.0  ;;  %v4502_v60 = vadd.f32 %v9868_v48, %v4501_v58 }
 0x9cb   : > { %4636 = vst.msk [vmem:[%s9876_s0 + $0x50] sm:$0xff] %vm4625_vm4, %v9956_v43  ;;  %v9965_v23 = vmax.f32 %v4510_v31, 0.0  ;;  %v4688_v41 = vsel %vm4625_vm4, %v9956_v43, -inf }
 0x9cc   : > { %4634 = vst.msk [vmem:[%s9876_s0 + $0x40] sm:$0xff] %vm4625_vm4, %v9959_v34  ;;  %v9972_v39 = vmax.f32 %v4502_v60, 0.0  ;;  %4671 = vmax.xlane.f32.xlu0 %v4670_v59 }
 0x9cd   : > { %4637 = vst.msk [vmem:[%s9876_s0 + $0x58] sm:$0xff] %vm4625_vm4, %v9965_v23  ;;  %5304 = vadd.xlane.f32.xlu1 %v5303_v25 }
 0x9ce   : > { %4635 = vst.msk [vmem:[%s9876_s0 + $0x48] sm:$0xff] %vm4625_vm4, %v9972_v39  ;;  %v6322_v22 = vpop.f32.mrb[140].mxu1 }
 0x9cf   : > { %v4523_v12 = vadd.f32 %v6322_v22, %v9868_v48  ;;  %v4514_v52 = vpop.f32.mrb[141].mxu1  ;;  %v4682_v22 = vsel %vm4625_vm4, %v9959_v34, -inf }
 0x9d0   : > { %v4515_v40 = vadd.f32 %v9868_v48, %v4514_v52  ;;  %v6323_v36 = vpop.f32.mrb[142].mxu1  ;;  %4689 = vmax.xlane.f32.xlu0 %v4688_v41  ;;  %v4673_v52 = vsel %vm4625_vm4, %v9939_v1, -inf }
 0x9d1   : > { %v9987_v32 = vmax.f32 %v4523_v12, 0.0  ;;  %v4526_v31 = vadd.f32 %v6323_v36, %v9868_v48  ;;  %v4517_v58 = vpop.f32.mrb[143].mxu1  ;;  %4680 = vmax.xlane.f32.xlu1 %v4679_v14 }
 0x9d2   : > { %v9990_v60 = vmax.f32 %v4515_v40, 0.0  ;;  %v4518_v59 = vadd.f32 %v9868_v48, %v4517_v58 }
 0x9d3   : > { %4640 = vst.msk [vmem:[%s9876_s0 + $0x70] sm:$0xff] %vm4625_vm4, %v9987_v32  ;;  %v9996_v25 = vmax.f32 %v4526_v31, 0.0  ;;  %v4700_v14 = vsel %vm4625_vm4, %v9987_v32, -inf }
 0x9d4   : > { %4638 = vst.msk [vmem:[%s9876_s0 + $0x60] sm:$0xff] %vm4625_vm4, %v9990_v60  ;;  %v10003_v12 = vmax.f32 %v4518_v59, 0.0  ;;  %4683 = vmax.xlane.f32.xlu0 %v4682_v22  ;;  %v4691_v59 = vsel %vm4625_vm4, %v9965_v23, -inf }
 0x9d5   : > { %4641 = vst.msk [vmem:[%s9876_s0 + $0x78] sm:$0xff] %vm4625_vm4, %v9996_v25  ;;  %4674 = vmax.xlane.f32.xlu1 %v4673_v52 }
 0x9d6   : > { %4639 = vst.msk [vmem:[%s9876_s0 + $0x68] sm:$0xff] %vm4625_vm4, %v10003_v12  ;;  %v6326_v41 = vpop.f32.mrb[144].mxu1  ;;  %v4697_v4 = vsel %vm4625_vm4, %v10003_v12, -inf }
 0x9d7   : > { %v4539_v40 = vadd.f32 %v6326_v41, %v9868_v48  ;;  %v4530_v36 = vpop.f32.mrb[145].mxu1 }
 0x9d8   : > { %v4531_v31 = vadd.f32 %v9868_v48, %v4530_v36  ;;  %v6327_v58 = vpop.f32.mrb[146].mxu1  ;;  %4701 = vmax.xlane.f32.xlu0 %v4700_v14  ;;  %v4694_v14 = vsel %vm4625_vm4, %v9990_v60, -inf }
 0x9d9   : > { %v10019_v22 = vmax.f32 %v4539_v40, 0.0  ;;  %v4542_v52 = vadd.f32 %v6327_v58, %v9868_v48  ;;  %v4533_v15 = vpop.f32.mrb[147].mxu1  ;;  %4692 = vmax.xlane.f32.xlu1 %v4691_v59  ;;  %v11267_v58 = vmov 0.0  }
 0x9da   : > { %v10022_v41 = vmax.f32 %v4531_v31, 0.0  ;;  %v4534_v61 = vadd.f32 %v9868_v48, %v4533_v15  ;;  %v4685_v31 = vsel %vm4625_vm4, %v9972_v39, -inf  ;;  %v5771_v59 = vsel %vm5190_vm11, 1.0, %v11267_v58 }
 0x9db   : > { %4644 = vst.msk [vmem:[%s9876_s0 + $0x90] sm:$0xff] %vm4625_vm4, %v10019_v22  ;;  %v10028_v36 = vmax.f32 %v4542_v52, 0.0  ;;  %v4712_v15 = vsel %vm4625_vm4, %v10019_v22, -inf  ;;  %v5770_v37 = vsel %vm5189_vm1, 1.0, %v11267_v58 }
 0x9dc   : > { %4642 = vst.msk [vmem:[%s9876_s0 + $0x80] sm:$0xff] %vm4625_vm4, %v10022_v41  ;;  %v10035_v40 = vmax.f32 %v4534_v61, 0.0  ;;  %4695 = vmax.xlane.f32.xlu0 %v4694_v14  ;;  %v4703_v61 = vsel %vm4625_vm4, %v9996_v25, -inf  ;;  %v4706_v52 = vsel %vm4625_vm4, %v10022_v41, -inf  ;;  %v5286_v14 = vmul.f32 %v5771_v59, %v10019_v22 }
 0x9dd   : > { %4645 = vst.msk [vmem:[%s9876_s0 + $0x98] sm:$0xff] %vm4625_vm4, %v10028_v36  ;;  %4686 = vmax.xlane.f32.xlu1 %v4685_v31  ;;  %v5769_v31 = vsel %vm5188_vm10, 1.0, %v11267_v58  ;;  %v4715_v16 = vsel %vm4625_vm4, %v10028_v36, -inf  ;;  %v5772_v59 = vsel %vm5191_vm15, 1.0, %v11267_v58 }
 0x9de   : > { %4643 = vst.msk [vmem:[%s9876_s0 + $0x88] sm:$0xff] %vm4625_vm4, %v10035_v40  ;;  %v5287_v56 = vmul.f32 %v5772_v59, %v10028_v36  ;;  %v5285_v33 = vmul.f32 %v5770_v37, %v10035_v40 }
 0x9e0   : > { %4713 = vmax.xlane.f32.xlu0 %v4712_v15  ;;  %v5354_v15 = vsel %vm4625_vm4, %v5286_v14, 0.0  ;;  %v5357_v62 = vsel %vm4625_vm4, %v5287_v56, 0.0  ;;  %v5351_v56 = vsel %vm4625_vm4, %v5285_v33, 0.0 }
 0x9e1   : > { %4704 = vmax.xlane.f32.xlu1 %v4703_v61  ;;  %v5284_v61 = vmul.f32 %v5769_v31, %v10022_v41  ;;  %v4709_v31 = vsel %vm4625_vm4, %v10035_v40, -inf }
 0x9e4   : > { %4707 = vmax.xlane.f32.xlu0 %v4706_v52 }
 0x9e5   : > { %4698 = vmax.xlane.f32.xlu1 %v4697_v4  ;;  %v5348_v4 = vsel %vm4625_vm4, %v5284_v61, 0.0 }
 0x9e8   : > { %5355 = vadd.xlane.f32.xlu0 %v5354_v15 }
 0x9e9   : > { %4716 = vmax.xlane.f32.xlu1 %v4715_v16 }
 0x9eb   : > { %v6330_v52 = vpop.f32.mrb[148].mxu1 }
 0x9ec   : > { %v4555_v20 = vadd.f32 %v6330_v52, %v9868_v48  ;;  %5349 = vadd.xlane.f32.xlu0 %v5348_v4  ;;  %v4546_v14 = vpop.f32.mrb[149].mxu1 }
 0x9ed   : > { %v4547_v15 = vadd.f32 %v9868_v48, %v4546_v14  ;;  %4710 = vmax.xlane.f32.xlu1 %v4709_v31  ;;  %v6331_v16 = vpop.f32.mrb[150].mxu1 }
 0x9ee   : > { %v10076_v51 = vmax.f32 %v4555_v20, 0.0  ;;  %v4558_v61 = vadd.f32 %v6331_v16, %v9868_v48  ;;  %v4549_v59 = vpop.f32.mrb[151].mxu1  ;;  %v10109_v16 = vld [vmem:[#allocation2] ss:$0 sm:$0xff] }
 0x9ef   : > { %v10079_v52 = vmax.f32 %v4547_v15, 0.0  ;;  %v4550_v4 = vadd.f32 %v9868_v48, %v4549_v59  ;;  %v3039_v2 = vadd.f32 %v10109_v16, %v11273_v3 }
 0x9f0   : > { %4648 = vst.msk [vmem:[%s9876_s0 + $0xb0] sm:$0xff] %vm4625_vm4, %v10076_v51  ;;  %v10087_v14 = vmax.f32 %v4558_v61, 0.0  ;;  %5358 = vadd.xlane.f32.xlu0 %v5357_v62  ;;  %v4724_v31 = vsel %vm4625_vm4, %v10076_v51, -inf  ;;  %v11270_v61 = vld [vmem:[#allocation34_spill] sm:$0xff] }
 0x9f1   : > { %11268 = vst [vmem:[#allocation96_spill] sm:$0xff] %v10079_v52  ;;  %4646 = vst.msk [vmem:[%s9876_s0 + $0xa0] sm:$0xff] %vm4625_vm4, %v10079_v52  ;;  %v10092_v58 = vmax.f32 %v4550_v4, 0.0  ;;  %v4718_v15 = vsel %vm4625_vm4, %v10079_v52, -inf  ;;  %v3037_v33 = vadd.f32 %v10109_v16, %v11270_v61 }
 0x9f2   : > { %4649 = vst.msk [vmem:[%s9876_s0 + $0xb8] sm:$0xff] %vm4625_vm4, %v10087_v14  ;;  %v4727_v20 = vsel %vm4625_vm4, %v10087_v14, -inf }
 0x9f3   : > { %11269 = vst [vmem:[#allocation94_spill] sm:$0xff] %v10092_v58  ;;  %4647 = vst.msk [vmem:[%s9876_s0 + $0xa8] sm:$0xff] %vm4625_vm4, %v10092_v58  ;;  %4728 = vmax.xlane.f32.xlu1 %v4727_v20  ;;  %v4721_v62 = vsel %vm4625_vm4, %v10092_v58, -inf  ;;  %v11271_v20 = vld [vmem:[#allocation56_spill] sm:$0xff] }
 0x9f4   : > { %5352 = vadd.xlane.f32.xlu0 %v5351_v56  ;;  %v3041_v56 = vadd.f32 %v10109_v16, %v11271_v20 }
 0x9f6   : > { %v3073_v20 = vsub.f32 0.0, %v3041_v56 }
 0x9f7   : > { %4722 = vmax.xlane.f32.xlu1 %v4721_v62 }
 0x9f8   : > { %4725 = vmax.xlane.f32.xlu0 %v4724_v31 }
 0x9fc   : > { %4719 = vmax.xlane.f32.xlu0 %v4718_v15 }
 0xa24   : > { %v6334_v37 = vpop.f32.mrb[152].mxu1 }
 0xa25   : > { %v4571_v59 = vadd.f32 %v6334_v37, %v9868_v48  ;;  %v4562_v4 = vpop.f32.mrb[153].mxu1  ;;  %v3069_v37 = vsub.f32 0.0, %v3037_v33 }
 0xa26   : > { %v4563_v62 = vadd.f32 %v9868_v48, %v4562_v4  ;;  %v6335_v31 = vpop.f32.mrb[154].mxu1 }
 0xa27   : > { %v10117_v49 = vmax.f32 %v4571_v59, 0.0  ;;  %v4574_v15 = vadd.f32 %v6335_v31, %v9868_v48  ;;  %v4565_v17 = vpop.f32.mrb[155].mxu1  ;;  %v3103_v33 = vmul.f32 1.442695, %v3069_v37  ;;  %v3071_v31 = vsub.f32 0.0, %v3039_v2 }
 0xa28   : > { %v10120_v6 = vmax.f32 %v4563_v62, 0.0  ;;  %v4566_v61 = vadd.f32 %v9868_v48, %v4565_v17 }
 0xa29   : > { %11272 = vst [vmem:[#allocation26_spill] sm:$0xff] %v10117_v49  ;;  %4652 = vst.msk [vmem:[%s9876_s0 + $0xd0] sm:$0xff] %vm4625_vm4, %v10117_v49  ;;  %v10128_v4 = vmax.f32 %v4574_v15, 0.0  ;;  %v4736_v59 = vsel %vm4625_vm4, %v10117_v49, -inf  ;;  %6736 = vpow2.f32 %v3103_v33 }
 0xa2a   : > { %4650 = vst.msk [vmem:[%s9876_s0 + $0xc0] sm:$0xff] %vm4625_vm4, %v10120_v6  ;;  %v10135_v62 = vmax.f32 %v4566_v61, 0.0  ;;  %4737 = vmax.xlane.f32.xlu0 %v4736_v59  ;;  %v4730_v61 = vsel %vm4625_vm4, %v10120_v6, -inf  ;;  %v3111_v59 = vmul.f32 1.442695, %v3073_v20 }
 0xa2b   : > { %11274 = vst [vmem:[#allocation76_spill] sm:$0xff] %v10128_v4  ;;  %4653 = vst.msk [vmem:[%s9876_s0 + $0xd8] sm:$0xff] %vm4625_vm4, %v10128_v4  ;;  %v4739_v3 = vsel %vm4625_vm4, %v10128_v4, -inf }
 0xa2c   : > { %4651 = vst.msk [vmem:[%s9876_s0 + $0xc8] sm:$0xff] %vm4625_vm4, %v10135_v62  ;;  %v6338_v17 = vpop.f32.mrb[156].mxu1  ;;  %4740 = vmax.xlane.f32.xlu1 %v4739_v3  ;;  %v4733_v2 = vsel %vm4625_vm4, %v10135_v62, -inf  ;;  %v5288_v3 = vmul.f32 %v9783_v38, %v10079_v52  ;;  %6738 = vpow2.f32 %v3111_v59 }
 0xa2d   : > { %v4587_v56 = vadd.f32 %v6338_v17, %v9868_v48  ;;  %v4578_v15 = vpop.f32.mrb[157].mxu1 }
 0xa2e   : > { %v4579_v47 = vadd.f32 %v9868_v48, %v4578_v15  ;;  %v6339_v13 = vpop.f32.mrb[158].mxu1  ;;  %4731 = vmax.xlane.f32.xlu0 %v4730_v61  ;;  %v3107_v15 = vmul.f32 1.442695, %v3071_v31  ;;  %v5272_v31 = vmul.f32 %v9769_v29, %v9924_v24 }
 0xa2f   : > { %v10149_v28 = vmax.f32 %v4587_v56, 0.0  ;;  %v4590_v4 = vadd.f32 %v6339_v13, %v9868_v48  ;;  %v4581_v37 = vpop.f32.mrb[159].mxu1 }
 0xa30   : > { %v10156_v17 = vmax.f32 %v4579_v47, 0.0  ;;  %v4582_v20 = vadd.f32 %v9868_v48, %v4581_v37  ;;  %4734 = vmax.xlane.f32.xlu1 %v4733_v2  ;;  %v5360_v47 = vsel %vm4625_vm4, %v5288_v3, 0.0  ;;  %v11279_v48 = vld [vmem:[#allocation63_spill] sm:$0xff]  ;;  %6740 = vpow2.f32 %v3107_v15  ;;  %v11280_v37 = vld [vmem:[#allocation30_spill] sm:$0xff] }
 0xa31   : > { %11275 = vst [vmem:[#allocation18_spill] sm:$0xff] %v10149_v28  ;;  %4656 = vst.msk [vmem:[%s9876_s0 + $0xf0] sm:$0xff] %vm4625_vm4, %v10149_v28  ;;  %v10162_v13 = vmax.f32 %v4590_v4, 0.0  ;;  %v4748_v56 = vsel %vm4625_vm4, %v10149_v28, -inf  ;;  %v3043_v33 = vadd.f32 %v10109_v16, %v11279_v48  ;;  %v3035_v2 = vadd.f32 %v10109_v16, %v11280_v37 }
 0xa32   : > { %11276 = vst [vmem:[#allocation47_spill] sm:$0xff] %v10156_v17  ;;  %4654 = vst.msk [vmem:[%s9876_s0 + $0xe0] sm:$0xff] %vm4625_vm4, %v10156_v17  ;;  %v10169_v38 = vmax.f32 %v4582_v20, 0.0  ;;  %4749 = vmax.xlane.f32.xlu0 %v4748_v56  ;;  %v4742_v4 = vsel %vm4625_vm4, %v10156_v17, -inf  ;;  %v5312_v3 = vsel %vm4625_vm4, %v5272_v31, 0.0  ;;  %v5289_v20 = vmul.f32 %v9791_v19, %v10092_v58  ;;  %v11281_v56 = vld [vmem:[#allocation50_spill] sm:$0xff] }
 0xa33   : > { %11277 = vst [vmem:[#allocation100_spill] sm:$0xff] %v10162_v13  ;;  %4657 = vst.msk [vmem:[%s9876_s0 + $0xf8] sm:$0xff] %vm4625_vm4, %v10162_v13  ;;  %v4751_v61 = vsel %vm4625_vm4, %v10162_v13, -inf  ;;  %v3075_v59 = vsub.f32 0.0, %v3043_v33  ;;  %v6737_v15 = vpop.eup %6736  ;;  %v5273_v48 = vmul.f32 %v9775_v10, %v9939_v1  ;;  %v11283_v31 = vld [vmem:[#allocation28_spill] sm:$0xff]  ;;  %v3067_v19 = vsub.f32 0.0, %v3035_v2 }
 0xa34   : > { %11278 = vst [vmem:[#allocation101_spill] sm:$0xff] %v10169_v38  ;;  %4655 = vst.msk [vmem:[%s9876_s0 + $0xe8] sm:$0xff] %vm4625_vm4, %v10169_v38  ;;  %5361 = vadd.xlane.f32.xlu1 %v5360_v47  ;;  %v3038_v47 = vadd.f32 %v10109_v16, %v11281_v56  ;;  %v4745_v29 = vsel %vm4625_vm4, %v10169_v38, -inf  ;;  %v3036_v13 = vadd.f32 %v10109_v16, %v11283_v31  ;;  %v3165_v17 = vadd.f32 1.0, %v6737_v15  ;;  %v11284_v38 = vld [vmem:[#allocation37_spill] sm:$0xff]  ;;  %s5625_s0 = sshll.u32 %s7278_s22, 1 }
 0xa35   : > { %v3115_v37 = vmul.f32 1.442695, %v3075_v59  ;;  %v5274_v56 = vmul.f32 %v9780_v0, %v9921_v55  ;;  %v3053_v28 = vadd.f32 %v10109_v16, %v11284_v38  ;;  %v5315_v59 = vsel %vm4625_vm4, %v5273_v48, 0.0  ;;  %v11286_v15 = vld [vmem:[#allocation17_spill] sm:$0xff]  ;;  %s568_s23 = scalar_lea.vmem %s10789_s2, %s5625_s0  ;;  %s552_s22 = sand.u32 1, %s7056_s26  }
 0xa36   : > { %4743 = vmax.xlane.f32.xlu0 %v4742_v4  ;;  %v6739_v33 = vpop.eup %6738  ;;  %v11282_v4 = vld [vmem:[#allocation64_spill] sm:$0xff]  ;;  %v3070_v52 = vsub.f32 0.0, %v3038_v47  ;;  %v3068_v2 = vsub.f32 0.0, %v3036_v13  ;;  %v3099_v0 = vmul.f32 1.442695, %v3067_v19  ;;  %v3042_v38 = vadd.f32 %v10109_v16, %v11286_v15  ;;  %v11287_v58 = vld [vmem:[#allocation53_spill] sm:$0xff] }
 0xa37   : > { %v3169_v49 = vadd.f32 1.0, %v6739_v33  ;;  %6742 = vpow2.f32 %v3115_v37  ;;  %v5291_v47 = vmul.f32 %v9807_v7, %v10087_v14  ;;  %v3085_v33 = vsub.f32 0.0, %v3053_v28  ;;  %s5493_s10 = scalar_lea.sflag [#allocation5], %s552_s22  ;;  %s7073_s0 = smov [#allocation4]  }
 0xa38   : > { %4752 = vmax.xlane.f32.xlu1 %v4751_v61  ;;  %v3045_v61 = vadd.f32 %v10109_v16, %v11282_v4  ;;  %v5290_v4 = vmul.f32 %v9799_v8, %v10076_v51  ;;  %v3040_v8 = vadd.f32 %v10109_v16, %v11287_v58  ;;  %6744 = vrcp.f32 %v3165_v17  ;;  %v11288_v17 = vld [vmem:[#allocation68_spill] sm:$0xff]  ;;  %s7006_s27 = sshll.u32 %s7073_s0, 4  ;;  %s7007_s27 = int_to_ptr.vmem [resolvable:$false] %s7006_s27 }
 0xa39   : > { %v3105_v13 = vmul.f32 1.442695, %v3070_v52  ;;  %v5275_v37 = vmul.f32 %v9788_v44, %v9931_v63  ;;  %6746 = vrcp.f32 %v3169_v49  ;;  %v3074_v7 = vsub.f32 0.0, %v3042_v38  ;;  %s7008_s17 = scalar_lea.vmem %s7007_s27, 64 }
 0xa3a   : > { %5313 = vadd.xlane.f32.xlu0 %v5312_v3  ;;  %v5363_v3 = vsel %vm4625_vm4, %v5289_v20, 0.0  ;;  %v6741_v10 = vpop.eup %6740  ;;  %v11285_v20 = vld [vmem:[#allocation35_spill] sm:$0xff]  ;;  %6748 = vpow2.f32 %v3099_v0  ;;  %v5369_v28 = vsel %vm4625_vm4, %v5291_v47, 0.0  ;;  %v5276_v58 = vmul.f32 %v9796_v54, %v9959_v34 }
 0xa3b   : > { %v3051_v31 = vadd.f32 %v10109_v16, %v11285_v20  ;;  %v3167_v48 = vadd.f32 1.0, %v6741_v10  ;;  %v3047_v52 = vadd.f32 %v10109_v16, %v11288_v17  ;;  %v3135_v10 = vmul.f32 1.442695, %v3085_v33  ;;  %v11291_v33 = vld [vmem:[#allocation66_spill] sm:$0xff] }
 0xa3c   : > { %4746 = vmax.xlane.f32.xlu1 %v4745_v29  ;;  %v3077_v29 = vsub.f32 0.0, %v3045_v61  ;;  %v5366_v61 = vsel %vm4625_vm4, %v5290_v4, 0.0  ;;  %v3072_v4 = vsub.f32 0.0, %v3040_v8  ;;  %v5321_v44 = vsel %vm4625_vm4, %v5275_v37, 0.0 }
 0xa3d   : > { %6750 = vrcp.f32 %v3167_v48  ;;  %v5292_v49 = vmul.f32 %v9815_v18, %v10120_v6  ;;  %v3113_v54 = vmul.f32 1.442695, %v3074_v7  ;;  %v5324_v0 = vsel %vm4625_vm4, %v5276_v58, 0.0 }
 0xa3e   : > { %5364 = vadd.xlane.f32.xlu0 %v5363_v3  ;;  %v5318_v3 = vsel %vm4625_vm4, %v5274_v56, 0.0  ;;  %v3119_v19 = vmul.f32 1.442695, %v3077_v29  ;;  %v3083_v56 = vsub.f32 0.0, %v3051_v31  ;;  %6752 = vpow2.f32 %v3105_v13 }
 0xa3f   : > { %v5277_v15 = vmul.f32 %v9804_v9, %v9972_v39  ;;  %v3109_v47 = vmul.f32 1.442695, %v3072_v4  ;;  %v3052_v8 = vadd.f32 %v10109_v16, %v11291_v33  ;;  %v5293_v9 = vmul.f32 %v9823_v11, %v10135_v62 }
 0xa40   : > { %5316 = vadd.xlane.f32.xlu1 %v5315_v59  ;;  %v3101_v59 = vmul.f32 1.442695, %v3068_v2  ;;  %v3131_v29 = vmul.f32 1.442695, %v3083_v56  ;;  %v11289_v2 = vld [vmem:[#allocation72_spill] sm:$0xff] }
 0xa41   : > { %v3055_v20 = vadd.f32 %v10109_v16, %v11289_v2  ;;  %v6743_v38 = vpop.eup %6742  ;;  %v11293_v2 = vld [vmem:[#allocation61_spill] sm:$0xff] }
 0xa42   : > { %5319 = vadd.xlane.f32.xlu0 %v5318_v3  ;;  %6754 = vpow2.f32 %v3101_v59  ;;  %v3079_v3 = vsub.f32 0.0, %v3047_v52  ;;  %v10247_v59 = vpop.eup %6744 }
 0xa43   : > { %6756 = vpow2.f32 %v3119_v19  ;;  %v3087_v37 = vsub.f32 0.0, %v3055_v20  ;;  %v10252_v58 = vpop.eup %6746  ;;  %v3054_v20 = vadd.f32 %v10109_v16, %v11293_v2 }
 0xa44   : > { %5367 = vadd.xlane.f32.xlu1 %v5366_v61  ;;  %6758 = vpow2.f32 %v3135_v10  ;;  %v5372_v61 = vsel %vm4625_vm4, %v5292_v49, 0.0  ;;  %v6749_v52 = vpop.eup %6748  ;;  %v3084_v10 = vsub.f32 0.0, %v3052_v8 }
 0xa45   : > { %6760 = vpow2.f32 %v3131_v29  ;;  %v3139_v29 = vmul.f32 1.442695, %v3087_v37 }
 0xa46   : > { %5370 = vadd.xlane.f32.xlu0 %v5369_v28  ;;  %6762 = vpow2.f32 %v3113_v54  ;;  %v5327_v28 = vsel %vm4625_vm4, %v5277_v15, 0.0 }
 0xa47   : > { %v10261_v49 = vpop.eup %6750 }
 0xa48   : > { %5322 = vadd.xlane.f32.xlu1 %v5321_v44  ;;  %v5375_v44 = vsel %vm4625_vm4, %v5293_v9, 0.0  ;;  %v11296_v9 = vld [vmem:[#allocation73_spill] sm:$0xff] }
 0xa49   : > { %v10231_v31 = vpop.xlane.xlu0 %4665  ;;  %v3057_v37 = vadd.f32 %v10109_v16, %v11296_v9 }
 0xa4a   : > { %11290 = vst [vmem:[#allocation62_spill] sm:$0xff] %v10231_v31  ;;  %v4756_v18 = vsub.f32 %v9879_v53, %v10231_v31  ;;  %v10238_v48 = vpop.xlane.xlu1 %4659  ;;  %5325 = vadd.xlane.f32.xlu0 %v5324_v0  ;;  %v3171_v53 = vadd.f32 1.0, %v6743_v38 }
 0xa4b   : > { %v4754_v13 = vsub.f32 %v9882_v50, %v10238_v48  ;;  %v3123_v50 = vmul.f32 1.442695, %v3079_v3  ;;  %v3163_v3 = vadd.f32 1.0, %v6749_v52 }
 0xa4c   : > { %v4790_v19 = vmul.f32 1.442695, %v4756_v18  ;;  %5373 = vadd.xlane.f32.xlu1 %v5372_v61  ;;  %v3133_v18 = vmul.f32 1.442695, %v3084_v10 }
 0xa4d   : > { %v4786_v56 = vmul.f32 1.442695, %v4754_v13  ;;  %v10249_v7 = vpop.xlane.xlu0 %4662  ;;  %v3086_v13 = vsub.f32 0.0, %v3054_v20 }
 0xa4e   : > { %6764 = vpow2.f32 %v4790_v19  ;;  %v4755_v11 = vsub.f32 %v9899_v26, %v10249_v7  ;;  %v10256_v17 = vpop.xlane.xlu1 %4668  ;;  %5328 = vadd.xlane.f32.xlu0 %v5327_v28  ;;  %v6753_v26 = vpop.eup %6752 }
 0xa4f   : > { %11292 = vst [vmem:[#allocation60_spill] sm:$0xff] %v10256_v17  ;;  %6766 = vpow2.f32 %v3109_v47  ;;  %v4757_v4 = vsub.f32 %v9890_v5, %v10256_v17  ;;  %v6755_v38 = vpop.eup %6754  ;;  %v3166_v8 = vadd.f32 1.0, %v6753_v26  ;;  %v3137_v10 = vmul.f32 1.442695, %v3086_v13  ;;  %v10295_v13 = vld [vmem:[%s10798_s11 + $0x10] sm:$0xff] }
 0xa50   : > { %6768 = vpow2.f32 %v4786_v56  ;;  %5376 = vadd.xlane.f32.xlu1 %v5375_v44  ;;  %v4788_v54 = vmul.f32 1.442695, %v4755_v11  ;;  %v10269_v47 = vpop.eup %6756  ;;  %v3164_v61 = vadd.f32 1.0, %v6755_v38  ;;  %v3089_v26 = vsub.f32 0.0, %v3057_v37 }
 0xa51   : > { %6770 = vrcp.f32 %v3171_v53  ;;  %v4792_v0 = vmul.f32 1.442695, %v4757_v4  ;;  %v10265_v15 = vpop.xlane.xlu0 %5301  ;;  %v6759_v33 = vpop.eup %6758  ;;  %v11299_v4 = vld [vmem:[#allocation74_spill] sm:$0xff] }
 0xa52   : > { %11294 = vst [vmem:[#allocation19_spill] sm:$0xff] %v10265_v15  ;;  %6772 = vpow2.f32 %v3123_v50  ;;  %v10267_v5 = vpop.xlane.xlu1 %5307  ;;  %v6761_v53 = vpop.eup %6760  ;;  %v3181_v11 = vadd.f32 1.0, %v6759_v33  ;;  %v3056_v44 = vadd.f32 %v10109_v16, %v11299_v4 }
 0xa53   : > { %11295 = vst [vmem:[#allocation54_spill] sm:$0xff] %v10267_v5  ;;  %6774 = vpow2.f32 %v4792_v0  ;;  %v6763_v50 = vpop.eup %6762  ;;  %v3179_v20 = vadd.f32 1.0, %v6761_v53 }
 0xa54   : > { %6776 = vpow2.f32 %v3139_v29  ;;  %v3170_v33 = vadd.f32 1.0, %v6763_v50  ;;  %v3088_v9 = vsub.f32 0.0, %v3056_v44  ;;  %v3245_v44 = vmul.f32 %v10247_v59, %v10295_v13 }
 0xa55   : > { %6778 = vpow2.f32 %v4788_v54  ;;  %v10273_v19 = vpop.xlane.xlu0 %4677 }
 0xa56   : > { %11297 = vst [vmem:[#allocation105_spill] sm:$0xff] %v10273_v19  ;;  %6780 = vrcp.f32 %v3163_v3  ;;  %v4760_v56 = vsub.f32 %v9921_v55, %v10273_v19  ;;  %v10277_v28 = vpop.xlane.xlu1 %5310 }
 0xa57   : > { %11298 = vst [vmem:[#allocation106_spill] sm:$0xff] %v10277_v28  ;;  %6782 = vpow2.f32 %v3133_v18 }
 0xa58   : > { %v6765_v52 = vpop.eup %6764  ;;  %6784 = vrcp.f32 %v3166_v8  ;;  %v4798_v29 = vmul.f32 1.442695, %v4760_v56 }
 0xa59   : > { %v6767_v2 = vpop.eup %6766  ;;  %6786 = vrcp.f32 %v3164_v61  ;;  %v10281_v54 = vpop.xlane.xlu0 %4671  ;;  %v4856_v55 = vsel %vm4625_vm4, %v6765_v52, 0.0 }
 0xa5a   : > { %11300 = vst [vmem:[#allocation71_spill] sm:$0xff] %v10281_v54  ;;  %v6769_v0 = vpop.eup %6768  ;;  %6788 = vpow2.f32 %v4798_v29  ;;  %v4758_v38 = vsub.f32 %v9924_v24, %v10281_v54  ;;  %4857 = vadd.xlane.f32.xlu0 %v4856_v55  ;;  %v10286_v3 = vpop.xlane.xlu1 %5304  ;;  %v3168_v61 = vadd.f32 1.0, %v6767_v2  ;;  %v3143_v24 = vmul.f32 1.442695, %v3089_v26 }
 0xa5b   : > { %11301 = vst [vmem:[#allocation69_spill] sm:$0xff] %v10286_v3  ;;  %v10288_v18 = vpop.eup %6770  ;;  %6790 = vrcp.f32 %v3181_v11  ;;  %v4850_v52 = vsel %vm4625_vm4, %v6769_v0, 0.0  ;;  %v3059_v2 = vadd.f32 %v10109_v16, %v9527_v57  ;;  %v3141_v55 = vmul.f32 1.442695, %v3088_v9 }
 0xa5c   : > { %v10290_v8 = vpop.eup %6772  ;;  %6792 = vpow2.f32 %v3137_v10  ;;  %v4794_v37 = vmul.f32 1.442695, %v4758_v38 }
 0xa5d   : > { %v6775_v53 = vpop.eup %6774  ;;  %6794 = vrcp.f32 %v3179_v20  ;;  %v10297_v56 = vpop.xlane.xlu0 %4689 }
 0xa5e   : > { %11302 = vst [vmem:[#allocation113_spill] sm:$0xff] %v10297_v56  ;;  %v6777_v11 = vpop.eup %6776  ;;  %6796 = vpow2.f32 %v4794_v37  ;;  %v4764_v50 = vsub.f32 %v9956_v43, %v10297_v56  ;;  %4851 = vadd.xlane.f32.xlu0 %v4850_v52  ;;  %v10302_v4 = vpop.xlane.xlu1 %4680  ;;  %v4859_v29 = vsel %vm4625_vm4, %v6775_v53, 0.0 }
 0xa5f   : > { %11303 = vst [vmem:[#allocation114_spill] sm:$0xff] %v10302_v4  ;;  %v6779_v10 = vpop.eup %6778  ;;  %6798 = vrcp.f32 %v3170_v33  ;;  %v4761_v20 = vsub.f32 %v9931_v63, %v10302_v4  ;;  %4860 = vadd.xlane.f32.xlu1 %v4859_v29  ;;  %v3183_v37 = vadd.f32 1.0, %v6777_v11  ;;  %v11305_v33 = vld [vmem:[#allocation67_spill] sm:$0xff] }
 0xa60   : > { %v6781_v26 = vpop.eup %6780  ;;  %6800 = vrcp.f32 %v3168_v61  ;;  %v4806_v0 = vmul.f32 1.442695, %v4764_v50  ;;  %v3049_v57 = vadd.f32 %v10109_v16, %v11305_v33  ;;  %v4853_v61 = vsel %vm4625_vm4, %v6779_v10, 0.0  ;;  %v10328_v11 = vld [vmem:[%s10798_s11] sm:$0xff] }
 0xa61   : > { %v6783_v38 = vpop.eup %6782  ;;  %6802 = vpow2.f32 %v3143_v24  ;;  %v4800_v53 = vmul.f32 1.442695, %v4761_v20  ;;  %v10311_v52 = vpop.xlane.xlu0 %4683  ;;  %v10323_v24 = vsel %vm3275_vm6, %v3245_v44, 0.0  ;;  %v3091_v50 = vsub.f32 0.0, %v3059_v2  ;;  %v10335_v10 = vld [vmem:[%s10798_s11 + $0x20] sm:$0xff]  ;;  %v11307_v44 = vld [vmem:[#allocation70_spill] sm:$0xff] }
 0xa62   : > { %11304 = vst [vmem:[#allocation83_spill] sm:$0xff] %v10311_v52  ;;  %v10313_v59 = vpop.eup %6784  ;;  %6804 = vpow2.f32 %v4806_v0  ;;  %v4762_v63 = vsub.f32 %v9959_v34, %v10311_v52  ;;  %v10319_v29 = vpop.xlane.xlu1 %4674  ;;  %v3180_v0 = vadd.f32 1.0, %v6783_v38  ;;  %v3058_v33 = vadd.f32 %v10109_v16, %v11307_v44 }
 0xa63   : > { %11306 = vst [vmem:[#allocation80_spill] sm:$0xff] %v10319_v29  ;;  %v6787_v9 = vpop.eup %6786  ;;  %6806 = vpow2.f32 %v4800_v53  ;;  %v4759_v20 = vsub.f32 %v9939_v1, %v10319_v29  ;;  %4854 = vadd.xlane.f32.xlu1 %v4853_v61  ;;  %v3060_v2 = vadd.f32 %v10109_v16, %v9578_v35  ;;  %v3081_v29 = vsub.f32 0.0, %v3049_v57  ;;  %v10364_v57 = vld [vmem:[%s10798_s11 + $0x8] sm:$0xff] }
 0xa64   : > { %v6789_v34 = vpop.eup %6788  ;;  %6808 = vpow2.f32 %v3141_v55  ;;  %v4802_v56 = vmul.f32 1.442695, %v4762_v63  ;;  %v3243_v38 = vmul.f32 %v6781_v26, %v10328_v11  ;;  %v10355_v35 = vmul.f32 %v10261_v49, %v10335_v10 }
 0xa65   : > { %v10339_v52 = vpop.eup %6790  ;;  %6810 = vrcp.f32 %v3183_v37  ;;  %v4796_v1 = vmul.f32 1.442695, %v4759_v20  ;;  %v10343_v53 = vpop.xlane.xlu0 %4701  ;;  %v4868_v61 = vsel %vm4625_vm4, %v6789_v34, 0.0  ;;  %v11310_v20 = vld [vmem:[#allocation86_spill] sm:$0xff]  ;;  %v3147_v44 = vmul.f32 1.442695, %v3091_v50 }
 0xa66   : > { %11308 = vst [vmem:[#allocation22_spill] sm:$0xff] %v10343_v53  ;;  %v6793_v4 = vpop.eup %6792  ;;  %6812 = vpow2.f32 %v4802_v56  ;;  %v4768_v55 = vsub.f32 %v9987_v32, %v10343_v53  ;;  %4869 = vadd.xlane.f32.xlu0 %v4868_v61  ;;  %v10349_v63 = vpop.xlane.xlu1 %4692  ;;  %v3044_v34 = vadd.f32 %v10109_v16, %v11310_v20  ;;  %v3090_v61 = vsub.f32 0.0, %v3058_v33  ;;  %v10385_v33 = vld [vmem:[%s10798_s11 + $0x18] sm:$0xff] }
 0xa67   : > { %11309 = vst [vmem:[#allocation95_spill] sm:$0xff] %v10349_v63  ;;  %v10351_v37 = vpop.eup %6794  ;;  %6814 = vpow2.f32 %v4796_v1  ;;  %v4765_v26 = vsub.f32 %v9965_v23, %v10349_v63  ;;  %v3182_v49 = vadd.f32 1.0, %v6793_v4  ;;  %v3092_v28 = vsub.f32 0.0, %v3060_v2 }
 0xa68   : > { %v6797_v56 = vpop.eup %6796  ;;  %6816 = vrcp.f32 %v3180_v0  ;;  %v4814_v53 = vmul.f32 1.442695, %v4768_v55  ;;  %v10373_v17 = vmul.f32 1.442695, %v3081_v29  ;;  %v10376_v5 = vsel %vm3275_vm6, %v3243_v38, 0.0 }
 0xa69   : > { %v10366_v19 = vpop.eup %6798  ;;  %v4808_v54 = vmul.f32 1.442695, %v4765_v26  ;;  %v10368_v20 = vpop.xlane.xlu0 %4695  ;;  %v4862_v1 = vsel %vm4625_vm4, %v6797_v56, 0.0  ;;  %v3244_v2 = vmul.f32 %v6787_v9, %v10364_v57  ;;  %v3076_v29 = vsub.f32 0.0, %v3044_v34 }
 0xa6a   : > { %11311 = vst [vmem:[#allocation93_spill] sm:$0xff] %v10368_v20  ;;  %v10371_v63 = vpop.eup %6800  ;;  %6818 = vpow2.f32 %v4814_v53  ;;  %v4766_v50 = vsub.f32 %v9990_v60, %v10368_v20  ;;  %4863 = vadd.xlane.f32.xlu0 %v4862_v1  ;;  %v10380_v0 = vpop.xlane.xlu1 %4686  ;;  %v3061_v55 = vadd.f32 %v10109_v16, %v9513_v46  ;;  %v3145_v26 = vmul.f32 1.442695, %v3090_v61 }
 0xa6b   : > { %11312 = vst [vmem:[#allocation103_spill] sm:$0xff] %v10380_v0  ;;  %v6803_v4 = vpop.eup %6802  ;;  %6820 = vpow2.f32 %v4808_v54  ;;  %v4763_v38 = vsub.f32 %v9972_v39, %v10380_v0  ;;  %v3149_v20 = vmul.f32 1.442695, %v3092_v28  ;;  %v3246_v54 = vmul.f32 %v10313_v59, %v10385_v33 }
 0xa6c   : > { %v6805_v53 = vpop.eup %6804  ;;  %6822 = vpow2.f32 %v3147_v44  ;;  %v4810_v56 = vmul.f32 1.442695, %v4766_v50  ;;  %v3277_v28 = vsel %vm3275_vm6, %v3244_v2, 0.0 }
 0xa6d   : > { %v6807_v1 = vpop.eup %6806  ;;  %6824 = vrcp.f32 %v3182_v49  ;;  %v4804_v15 = vmul.f32 1.442695, %v4763_v38  ;;  %v10392_v31 = vpop.xlane.xlu0 %4713  ;;  %v4880_v9 = vsel %vm4625_vm4, %v6805_v53, 0.0  ;;  %v11314_v49 = vld [vmem:[#allocation51_spill] sm:$0xff]  ;;  %v3117_v53 = vmul.f32 1.442695, %v3076_v29 }
 0xa6e   : > { %11313 = vst [vmem:[#allocation102_spill] sm:$0xff] %v10392_v31  ;;  %v6809_v34 = vpop.eup %6808  ;;  %6826 = vpow2.f32 %v4810_v56  ;;  %v4772_v39 = vsub.f32 %v10019_v22, %v10392_v31  ;;  %4881 = vadd.xlane.f32.xlu0 %v4880_v9  ;;  %v10399_v46 = vpop.xlane.xlu1 %4704  ;;  %v4871_v44 = vsel %vm4625_vm4, %v6807_v1, 0.0  ;;  %v3046_v50 = vadd.f32 %v10109_v16, %v11314_v49 }
 0xa6f   : > { %v10402_v61 = vpop.eup %6810  ;;  %6828 = vpow2.f32 %v4804_v15  ;;  %v4769_v59 = vsub.f32 %v9996_v25, %v10399_v46  ;;  %4872 = vadd.xlane.f32.xlu1 %v4871_v44  ;;  %v3093_v22 = vsub.f32 0.0, %v3061_v55  ;;  %v3184_v31 = vadd.f32 1.0, %v6809_v34 }
 0xa70   : > { %v6813_v38 = vpop.eup %6812  ;;  %6830 = vpow2.f32 %v3145_v26  ;;  %v4822_v56 = vmul.f32 1.442695, %v4772_v39  ;;  %v3062_v15 = vadd.f32 %v10109_v16, %v9576_v21  ;;  %v3185_v26 = vadd.f32 1.0, %v6803_v4 }
 0xa71   : > { %v6815_v9 = vpop.eup %6814  ;;  %6832 = vpow2.f32 %v3149_v20  ;;  %v4816_v1 = vmul.f32 1.442695, %v4769_v59  ;;  %v10409_v0 = vpop.xlane.xlu0 %4707  ;;  %v4874_v2 = vsel %vm4625_vm4, %v6813_v38, 0.0  ;;  %v3078_v20 = vsub.f32 0.0, %v3046_v50 }
 0xa72   : > { %v6817_v3 = vpop.eup %6816  ;;  %6834 = vpow2.f32 %v4822_v56  ;;  %v4770_v44 = vsub.f32 %v10022_v41, %v10409_v0  ;;  %4875 = vadd.xlane.f32.xlu0 %v4874_v2  ;;  %v10416_v29 = vpop.xlane.xlu1 %4698  ;;  %v4865_v55 = vsel %vm4625_vm4, %v6815_v9, 0.0  ;;  %v3151_v49 = vmul.f32 1.442695, %v3093_v22 }
 0xa73   : > { %6836 = vpow2.f32 %v4816_v1  ;;  %v4767_v34 = vsub.f32 %v10003_v12, %v10416_v29  ;;  %4866 = vadd.xlane.f32.xlu1 %v4865_v55  ;;  %v3063_v21 = vadd.f32 %v10109_v16, %v9551_v27  ;;  %v3260_v38 = vmul.f32 %v6817_v3, %v10364_v57 }
 0xa74   : > { %v6819_v39 = vpop.eup %6818  ;;  %6838 = vpow2.f32 %v3117_v53  ;;  %v4818_v59 = vmul.f32 1.442695, %v4770_v44  ;;  %v3094_v1 = vsub.f32 0.0, %v3062_v15  ;;  %v3064_v2 = vadd.f32 %v10109_v16, %v9597_v45 }
 0xa75   : > { %v6821_v41 = vpop.eup %6820  ;;  %6840 = vrcp.f32 %v3184_v31  ;;  %v4812_v56 = vmul.f32 1.442695, %v4767_v34  ;;  %v10424_v9 = vpop.xlane.xlu0 %5355  ;;  %v4892_v4 = vsel %vm4625_vm4, %v6819_v39, 0.0  ;;  %v10433_v3 = vsel %vm3275_vm6, %v3246_v54, 0.0 }
 0xa76   : > { %v6823_v50 = vpop.eup %6822  ;;  %6842 = vpow2.f32 %v4818_v59  ;;  %4893 = vadd.xlane.f32.xlu0 %v4892_v4  ;;  %v10429_v53 = vpop.xlane.xlu1 %4716  ;;  %v4883_v27 = vsel %vm4625_vm4, %v6821_v41, 0.0  ;;  %v3278_v31 = vadd.f32 %v3277_v28, %v10376_v5  ;;  %v3259_v45 = vmul.f32 %v10351_v37, %v10328_v11 }
 0xa77   : > { %v6825_v22 = vpop.eup %6824  ;;  %6844 = vpow2.f32 %v4812_v56  ;;  %v4773_v57 = vsub.f32 %v10028_v36, %v10429_v53  ;;  %4884 = vadd.xlane.f32.xlu1 %v4883_v27  ;;  %v3121_v44 = vmul.f32 1.442695, %v3078_v20  ;;  %v3095_v55 = vsub.f32 0.0, %v3063_v21 }
 0xa78   : > { %v6827_v15 = vpop.eup %6826  ;;  %6846 = vrcp.f32 %v3185_v26  ;;  %v3261_v39 = vmul.f32 %v10339_v52, %v10295_v13  ;;  %v3314_v36 = vsel %vm3275_vm6, %v3260_v38, 0.0  ;;  %v3153_v41 = vmul.f32 1.442695, %v3094_v1  ;;  %v11315_v52 = vld [vmem:[#allocation33_spill] sm:$0xff] }
 0xa79   : > { %v6829_v34 = vpop.eup %6828  ;;  %6848 = vpow2.f32 %v3151_v49  ;;  %v4824_v54 = vmul.f32 1.442695, %v4773_v57  ;;  %v10442_v59 = vpop.xlane.xlu0 %5349  ;;  %v4886_v5 = vsel %vm4625_vm4, %v6827_v15, 0.0  ;;  %v3096_v56 = vsub.f32 0.0, %v3064_v2 }
 0xa7a   : > { %v6831_v28 = vpop.eup %6830  ;;  %4887 = vadd.xlane.f32.xlu0 %v4886_v5  ;;  %v10446_v11 = vpop.xlane.xlu1 %4710  ;;  %v4877_v37 = vsel %vm4625_vm4, %v6829_v34, 0.0  ;;  %v3065_v13 = vadd.f32 %v10109_v16, %v9540_v30  ;;  %v3048_v20 = vadd.f32 %v10109_v16, %v11315_v52  ;;  %v3280_v38 = vadd.f32 %v10323_v24, %v3278_v31 }
 0xa7b   : > { %v6833_v26 = vpop.eup %6832  ;;  %6850 = vpow2.f32 %v4824_v54  ;;  %v4771_v49 = vsub.f32 %v10035_v40, %v10446_v11  ;;  %4878 = vadd.xlane.f32.xlu1 %v4877_v37  ;;  %v3313_v4 = vsel %vm3275_vm6, %v3259_v45, 0.0  ;;  %v3155_v1 = vmul.f32 1.442695, %v3095_v55 }
 0xa7c   : > { %v6835_v21 = vpop.eup %6834  ;;  %6852 = vpow2.f32 %v3121_v44  ;;  %v3315_v27 = vadd.f32 %v3314_v36, %v3313_v4  ;;  %v3186_v57 = vadd.f32 1.0, %v6831_v28  ;;  %v3316_v5 = vsel %vm3275_vm6, %v3261_v39, 0.0 }
 0xa7d   : > { %v6837_v2 = vpop.eup %6836  ;;  %v4820_v15 = vmul.f32 1.442695, %v4771_v49  ;;  %v10457_v30 = vpop.xlane.xlu0 %5358  ;;  %v4904_v34 = vsel %vm4625_vm4, %v6835_v21, 0.0  ;;  %6854 = vpow2.f32 %v3153_v41  ;;  %v3157_v40 = vmul.f32 1.442695, %v3096_v56 }
 0xa7e   : > { %v6839_v54 = vpop.eup %6838  ;;  %4905 = vadd.xlane.f32.xlu0 %v4904_v34  ;;  %v4895_v24 = vsel %vm4625_vm4, %v6837_v2, 0.0  ;;  %v3187_v45 = vadd.f32 1.0, %v6823_v50  ;;  %v3097_v44 = vsub.f32 0.0, %v3065_v13  ;;  %v3080_v55 = vsub.f32 0.0, %v3048_v20 }
 0xa7f   : > { %v6841_v31 = vpop.eup %6840  ;;  %6856 = vpow2.f32 %v4820_v15  ;;  %4896 = vadd.xlane.f32.xlu1 %v4895_v24  ;;  %v3262_v36 = vmul.f32 %v6825_v22, %v10385_v33  ;;  %v3188_v37 = vadd.f32 1.0, %v6833_v26  ;;  %v3066_v52 = vadd.f32 %v10109_v16, %v9595_v42  ;;  %v3232_v33 = vld [vmem:[%s10798_s11 + $0x28] sm:$0xff] }
 0xa80   : > { %v6843_v28 = vpop.eup %6842  ;;  %6858 = vpow2.f32 %v3155_v1  ;;  %v10465_v39 = vpop.xlane.xlu1 %4728  ;;  %v3317_v56 = vadd.f32 %v3316_v5, %v3315_v27  ;;  %v3263_v42 = vmul.f32 %v10402_v61, %v10335_v10  ;;  %v3172_v22 = vadd.f32 1.0, %v6839_v54  ;;  %v11316_v10 = vld [vmem:[#allocation87_spill] sm:$0xff] }
 0xa81   : > { %v6845_v41 = vpop.eup %6844  ;;  %6860 = vrcp.f32 %v3186_v57  ;;  %v10467_v49 = vpop.xlane.xlu0 %5352  ;;  %v4777_v50 = vsub.f32 %v10087_v14, %v10465_v39  ;;  %v4898_v13 = vsel %vm4625_vm4, %v6843_v28, 0.0  ;;  %v3159_v4 = vmul.f32 1.442695, %v3097_v44 }
 0xa82   : > { %v6847_v20 = vpop.eup %6846  ;;  %6862 = vpow2.f32 %v3157_v40  ;;  %4899 = vadd.xlane.f32.xlu0 %v4898_v13  ;;  %v4889_v26 = vsel %vm4625_vm4, %v6845_v41, 0.0  ;;  %v3125_v1 = vmul.f32 1.442695, %v3080_v55  ;;  %v3318_v2 = vsel %vm3275_vm6, %v3262_v36, 0.0  ;;  %v11317_v40 = vld [vmem:[#allocation94_spill] sm:$0xff] }
 0xa83   : > { %v6849_v21 = vpop.eup %6848  ;;  %6864 = vrcp.f32 %v3187_v45  ;;  %v4832_v14 = vmul.f32 1.442695, %v4777_v50  ;;  %4890 = vadd.xlane.f32.xlu1 %v4889_v26  ;;  %v3264_v27 = vmul.f32 %v6841_v31, %v3232_v33  ;;  %v3098_v57 = vsub.f32 0.0, %v3066_v52  ;;  %v3233_v52 = vld [vmem:[%s10798_s11 + $0x30] sm:$0xff] }
 0xa84   : > { %6866 = vrcp.f32 %v3188_v37  ;;  %v10479_v15 = vpop.xlane.xlu1 %4722  ;;  %v3050_v61 = vadd.f32 %v10109_v16, %v11316_v10  ;;  %v3319_v54 = vadd.f32 %v3318_v2, %v3317_v56  ;;  %v3282_v44 = vadd.f32 %v10433_v3, %v3280_v38 }
 0xa85   : > { %v6851_v34 = vpop.eup %6850  ;;  %6868 = vpow2.f32 %v4832_v14  ;;  %v10483_v5 = vpop.xlane.xlu0 %4725  ;;  %v4775_v24 = vsub.f32 %v11317_v40, %v10479_v15  ;;  %v3320_v28 = vsel %vm3275_vm6, %v3263_v42, 0.0  ;;  %v3189_v36 = vadd.f32 1.0, %v6849_v21  ;;  %v11318_v21 = vld [vmem:[#allocation96_spill] sm:$0xff] }
 0xa86   : > { %v6853_v45 = vpop.eup %6852  ;;  %6870 = vrcp.f32 %v3172_v22  ;;  %v4776_v31 = vsub.f32 %v10076_v51, %v10483_v5  ;;  %v4907_v55 = vsel %vm4625_vm4, %v6851_v34, 0.0  ;;  %v3322_v3 = vsel %vm3275_vm6, %v3264_v27, 0.0 }
 0xa87   : > { %6872 = vpow2.f32 %v3159_v4  ;;  %v4828_v16 = vmul.f32 1.442695, %v4775_v24  ;;  %4908 = vadd.xlane.f32.xlu1 %v4907_v55  ;;  %v6855_v37 = vpop.eup %6854  ;;  %v3161_v38 = vmul.f32 1.442695, %v3098_v57  ;;  %v3248_v51 = vmul.f32 %v10371_v63, %v3232_v33 }
 0xa88   : > { %6874 = vpow2.f32 %v3125_v1  ;;  %v4830_v41 = vmul.f32 1.442695, %v4776_v31  ;;  %v3082_v50 = vsub.f32 0.0, %v3050_v61  ;;  %v3321_v13 = vadd.f32 %v3320_v28, %v3319_v54  ;;  %v3234_v61 = vld [vmem:[%s10798_s11 + $0x38] sm:$0xff] }
 0xa89   : > { %v6857_v56 = vpop.eup %6856  ;;  %6876 = vpow2.f32 %v4828_v16  ;;  %v10497_v42 = vpop.xlane.xlu0 %4719  ;;  %v3265_v26 = vmul.f32 %v6847_v20, %v3233_v52  ;;  %v3249_v2 = vmul.f32 %v10252_v58, %v3233_v52  ;;  %v3190_v57 = vadd.f32 1.0, %v6855_v37 }
 0xa8a   : > { %v6859_v22 = vpop.eup %6858  ;;  %6878 = vpow2.f32 %v4830_v41  ;;  %v4774_v4 = vsub.f32 %v11318_v21, %v10497_v42  ;;  %v4901_v1 = vsel %vm4625_vm4, %v6857_v56, 0.0  ;;  %v3323_v27 = vadd.f32 %v3322_v3, %v3321_v13  ;;  %v3235_v3 = vld [vmem:[%s10798_s11 + $0x40] sm:$0xff]  ;;  %v3236_v41 = vld [vmem:[%s10798_s11 + $0x48] sm:$0xff] }
 0xa8b   : > { %v6861_v14 = vpop.eup %6860  ;;  %6880 = vrcp.f32 %v3189_v36  ;;  %4902 = vadd.xlane.f32.xlu1 %v4901_v1  ;;  %v3283_v33 = vsel %vm3275_vm6, %v10355_v35, 0.0  ;;  %v3173_v34 = vadd.f32 1.0, %v10269_v47  ;;  %v3285_v54 = vsel %vm3275_vm6, %v3248_v51, 0.0 }
 0xa8c   : > { %v6863_v63 = vpop.eup %6862  ;;  %6882 = vpow2.f32 %v3161_v38  ;;  %v4826_v20 = vmul.f32 1.442695, %v4774_v4  ;;  %v3284_v58 = vadd.f32 %v3283_v33, %v3282_v44  ;;  %v3129_v40 = vmul.f32 1.442695, %v3082_v50 }
 0xa8d   : > { %v6865_v10 = vpop.eup %6864  ;;  %6884 = vpow2.f32 %v10373_v17  ;;  %v3324_v31 = vsel %vm3275_vm6, %v3265_v26, 0.0  ;;  %v3191_v55 = vadd.f32 1.0, %v6859_v22  ;;  %v3266_v35 = vmul.f32 %v6861_v14, %v3234_v61 }
 0xa8e   : > { %v6867_v24 = vpop.eup %6866  ;;  %6886 = vpow2.f32 %v4826_v20  ;;  %v3325_v28 = vadd.f32 %v3324_v31, %v3323_v27  ;;  %v3192_v36 = vadd.f32 1.0, %v6863_v63  ;;  %v3286_v17 = vadd.f32 %v3285_v54, %v3284_v58  ;;  %v3237_v20 = vld [vmem:[%s10798_s11 + $0x50] sm:$0xff] }
 0xa8f   : > { %v6869_v47 = vpop.eup %6868  ;;  %6888 = vrcp.f32 %v3190_v57  ;;  %v3287_v44 = vsel %vm3275_vm6, %v3249_v2, 0.0  ;;  %v3174_v38 = vadd.f32 1.0, %v6853_v45  ;;  %v3267_v51 = vmul.f32 %v6865_v10, %v3235_v3 }
 0xa90   : > { %v6871_v16 = vpop.eup %6870  ;;  %6890 = vrcp.f32 %v3173_v34  ;;  %v4919_v37 = vsel %vm4625_vm4, %v6869_v47, 0.0  ;;  %v3326_v50 = vsel %vm3275_vm6, %v3266_v35, 0.0  ;;  %v3268_v13 = vmul.f32 %v6867_v24, %v3236_v41 }
 0xa91   : > { %v6873_v52 = vpop.eup %6872  ;;  %6892 = vpow2.f32 %v3129_v40  ;;  %4920 = vadd.xlane.f32.xlu1 %v4919_v37  ;;  %v3175_v26 = vadd.f32 1.0, %v10290_v8  ;;  %v3250_v21 = vmul.f32 %v10366_v19, %v3234_v61  ;;  %v3327_v4 = vadd.f32 %v3326_v50, %v3325_v28 }
 0xa92   : > { %v6875_v56 = vpop.eup %6874  ;;  %6894 = vrcp.f32 %v3191_v55  ;;  %v3288_v1 = vadd.f32 %v3287_v44, %v3286_v17  ;;  %v3193_v14 = vadd.f32 1.0, %v6873_v52  ;;  %v3328_v34 = vsel %vm3275_vm6, %v3267_v51, 0.0 }
 0xa93   : > { %v6877_v22 = vpop.eup %6876  ;;  %6896 = vrcp.f32 %v3192_v36  ;;  %v3176_v57 = vadd.f32 1.0, %v6875_v56  ;;  %v3330_v8 = vsel %vm3275_vm6, %v3268_v13, 0.0  ;;  %v3251_v10 = vmul.f32 %v10288_v18, %v3235_v3  ;;  %v3238_v18 = vld [vmem:[%s10798_s11 + $0x58] sm:$0xff] }
 0xa94   : > { %v6879_v45 = vpop.eup %6878  ;;  %v4913_v2 = vsel %vm4625_vm4, %v6877_v22, 0.0  ;;  %6898 = vrcp.f32 %v3174_v38  ;;  %v3289_v61 = vsel %vm3275_vm6, %v3250_v21, 0.0  ;;  %v3329_v58 = vadd.f32 %v3328_v34, %v3327_v4  ;;  %v3239_v22 = vld [vmem:[%s10798_s11 + $0x60] sm:$0xff]  ;;  %v3240_v4 = vld [vmem:[%s10798_s11 + $0x68] sm:$0xff] }
 0xa95   : > { %v6881_v27 = vpop.eup %6880  ;;  %v4916_v63 = vsel %vm4625_vm4, %v6879_v45, 0.0  ;;  %4914 = vadd.xlane.f32.xlu1 %v4913_v2  ;;  %6900 = vrcp.f32 %v3175_v26  ;;  %v3252_v40 = vmul.f32 %v6871_v16, %v3236_v41  ;;  %v3290_v24 = vadd.f32 %v3289_v61, %v3288_v1 }
 0xa96   : > { %v6883_v33 = vpop.eup %6882  ;;  %4917 = vadd.xlane.f32.xlu0 %v4916_v63  ;;  %v3269_v31 = vmul.f32 %v6881_v27, %v3237_v20  ;;  %6902 = vrcp.f32 %v3193_v14  ;;  %v3331_v35 = vadd.f32 %v3330_v8, %v3329_v58  ;;  %v3291_v16 = vsel %vm3275_vm6, %v3251_v10, 0.0  ;;  %v3241_v10 = vld [vmem:[%s10798_s11 + $0x70] sm:$0xff] }
 0xa97   : > { %v6885_v19 = vpop.eup %6884  ;;  %6904 = vrcp.f32 %v3176_v57  ;;  %v3194_v47 = vadd.f32 1.0, %v6883_v33  ;;  %v3293_v44 = vsel %vm3275_vm6, %v3252_v40, 0.0  ;;  %v3292_v56 = vadd.f32 %v3291_v16, %v3290_v24 }
 0xa98   : > { %v6887_v54 = vpop.eup %6886  ;;  %v3177_v37 = vadd.f32 1.0, %v6885_v19  ;;  %v3332_v3 = vsel %vm3275_vm6, %v3269_v31, 0.0 }
 0xa99   : > { %v6889_v55 = vpop.eup %6888  ;;  %v4910_v28 = vsel %vm4625_vm4, %v6887_v54, 0.0  ;;  %v3333_v51 = vadd.f32 %v3332_v3, %v3331_v35  ;;  %6906 = vrcp.f32 %v3194_v47  ;;  %v3294_v26 = vadd.f32 %v3293_v44, %v3292_v56 }
 0xa9a   : > { %v6891_v36 = vpop.eup %6890  ;;  %4911 = vadd.xlane.f32.xlu0 %v4910_v28  ;;  %v3270_v38 = vmul.f32 %v6889_v55, %v3238_v18  ;;  %6908 = vrcp.f32 %v3177_v37  ;;  %v3242_v28 = vld [vmem:[%s10798_s11 + $0x78] sm:$0xff] }
 0xa9b   : > { %v6893_v17 = vpop.eup %6892  ;;  %v3253_v50 = vmul.f32 %v6891_v36, %v3237_v20 }
 0xa9c   : > { %v6895_v52 = vpop.eup %6894  ;;  %v3178_v21 = vadd.f32 1.0, %v6893_v17  ;;  %v3334_v1 = vsel %vm3275_vm6, %v3270_v38, 0.0 }
 0xa9d   : > { %v6897_v41 = vpop.eup %6896  ;;  %v3271_v45 = vmul.f32 %v6895_v52, %v3239_v22  ;;  %v3335_v27 = vadd.f32 %v3334_v1, %v3333_v51  ;;  %v3295_v63 = vsel %vm3275_vm6, %v3253_v50, 0.0  ;;  %v11319_v1 = vld [vmem:[#allocation26_spill] sm:$0xff] }
 0xa9e   : > { %v6899_v13 = vpop.eup %6898  ;;  %v3272_v14 = vmul.f32 %v6897_v41, %v3240_v4  ;;  %v3296_v8 = vadd.f32 %v3295_v63, %v3294_v26  ;;  %6910 = vrcp.f32 %v3178_v21  ;;  %v11320_v63 = vld [vmem:[#allocation76_spill] sm:$0xff] }
 0xa9f   : > { %v6901_v2 = vpop.eup %6900  ;;  %v3254_v33 = vmul.f32 %v6899_v13, %v3238_v18  ;;  %v3336_v19 = vsel %vm3275_vm6, %v3271_v45, 0.0 }
 0xaa0   : > { %v6903_v57 = vpop.eup %6902  ;;  %v3338_v20 = vsel %vm3275_vm6, %v3272_v14, 0.0  ;;  %v3337_v61 = vadd.f32 %v3336_v19, %v3335_v27  ;;  %v3255_v58 = vmul.f32 %v6901_v2, %v3239_v22 }
 0xaa1   : > { %v6905_v34 = vpop.eup %6904  ;;  %v3297_v54 = vsel %vm3275_vm6, %v3254_v33, 0.0  ;;  %v3273_v40 = vmul.f32 %v6903_v57, %v3241_v10 }
 0xaa2   : > { %v3256_v24 = vmul.f32 %v6905_v34, %v3240_v4  ;;  %v3298_v55 = vadd.f32 %v3297_v54, %v3296_v8  ;;  %v3339_v35 = vadd.f32 %v3338_v20, %v3337_v61  ;;  %v3299_v36 = vsel %vm3275_vm6, %v3255_v58, 0.0 }
 0xaa3   : > { %v6907_v31 = vpop.eup %6906  ;;  %v3340_v17 = vsel %vm3275_vm6, %v3273_v40, 0.0 }
 0xaa4   : > { %v6909_v47 = vpop.eup %6908  ;;  %v3301_v37 = vsel %vm3275_vm6, %v3256_v24, 0.0  ;;  %v3274_v18 = vmul.f32 %v6907_v31, %v3242_v28  ;;  %v3300_v52 = vadd.f32 %v3299_v36, %v3298_v55  ;;  %v3341_v16 = vadd.f32 %v3340_v17, %v3339_v35  ;;  %v11321_v55 = vld [vmem:[#allocation18_spill] sm:$0xff] }
 0xaa5   : > { %v3257_v44 = vmul.f32 %v6909_v47, %v3241_v10 }
 0xaa6   : > { %v3302_v38 = vadd.f32 %v3301_v37, %v3300_v52  ;;  %v3342_v41 = vsel %vm3275_vm6, %v3274_v18, 0.0  ;;  %v11322_v37 = vld [vmem:[#allocation47_spill] sm:$0xff] }
 0xaa7   : > { %v3343_v56 = vadd.f32 %v3342_v41, %v3341_v16  ;;  %v3303_v51 = vsel %vm3275_vm6, %v3257_v44, 0.0 }
 0xaa8   : > { %v6911_v3 = vpop.eup %6910  ;;  %v3304_v13 = vadd.f32 %v3303_v51, %v3302_v38 }
 0xaa9   : > { %v3258_v50 = vmul.f32 %v6911_v3, %v3242_v28  ;;  %v3344_v22 = vrot.slane %v3343_v56, 4  ;;  %v11323_v3 = vld [vmem:[#allocation100_spill] sm:$0xff] }
 0xaab   : > { %v3305_v26 = vsel %vm3275_vm6, %v3258_v50, 0.0  ;;  %v3345_v4 = vadd.f32 %v3344_v22, %v3343_v56 }
 0xaac   : > { %v3306_v21 = vadd.f32 %v3305_v26, %v3304_v13 }
 0xaad   : > { %v3346_v34 = vrot.slane %v3345_v4, 2 }
 0xaae   : > { %v3307_v2 = vrot.slane %v3306_v21, 4 }
 0xaaf   : > { %v3347_v40 = vadd.f32 %v3346_v34, %v3345_v4 }
 0xab0   : > { %v3308_v10 = vadd.f32 %v3307_v2, %v3306_v21 }
 0xab1   : > { %v3348_v17 = vrot.slane %v3347_v40, 1 }
 0xab2   : > { %v3309_v47 = vrot.slane %v3308_v10, 2 }
 0xab3   : > { %v3349_v51 = vadd.f32 %v3348_v17, %v3347_v40 }
 0xab4   : > { %v3310_v52 = vadd.f32 %v3309_v47, %v3308_v10 }
 0xab6   : > { %v3311_v21 = vrot.slane %v3310_v52, 1 }
 0xab7   : > { %v10562_v45 = vpop.xlane.xlu0 %4737 }
 0xab8   : > { %v4780_v14 = vsub.f32 %v11319_v1, %v10562_v45 }
 0xab9   : > { %v10566_v27 = vpop.xlane.xlu1 %4740 }
 0xaba   : > { %v4838_v57 = vmul.f32 1.442695, %v4780_v14  ;;  %v4781_v33 = vsub.f32 %v11320_v63, %v10566_v27  ;;  %v11324_v14 = vld [vmem:[#allocation101_spill] sm:$0xff] }
 0xabb   : > { %v10570_v8 = vpop.xlane.xlu0 %4731 }
 0xabc   : > { %6912 = vpow2.f32 %v4838_v57  ;;  %v4840_v19 = vmul.f32 1.442695, %v4781_v33  ;;  %v4778_v20 = vsub.f32 %v10120_v6, %v10570_v8  ;;  %v5715_v57 = vld [vmem:[#allocation3] ss:$0 sm:$0xff] }
 0xabd   : > { %v10574_v61 = vpop.xlane.xlu1 %4734 }
 0xabe   : > { %6914 = vpow2.f32 %v4840_v19  ;;  %v4834_v58 = vmul.f32 1.442695, %v4778_v20  ;;  %v4779_v54 = vsub.f32 %v10135_v62, %v10574_v61  ;;  %v3358_v19 = vadd.f32 %v5715_v57, %v3349_v51 }
 0xabf   : > { %v10578_v24 = vpop.xlane.xlu0 %4749 }
 0xac0   : > { %6916 = vpow2.f32 %v4834_v58  ;;  %v4836_v31 = vmul.f32 1.442695, %v4779_v54  ;;  %v4784_v35 = vsub.f32 %v11321_v55, %v10578_v24  ;;  %v11325_v54 = vld [vmem:[#allocation44_spill] sm:$0xff] }
 0xac1   : > { %v10582_v28 = vpop.xlane.xlu1 %5361  ;;  %v5294_v40 = vmul.f32 %v11325_v54, %v11319_v1  ;;  %v11326_v1 = vld [vmem:[#allocation75_spill] sm:$0xff] }
 0xac2   : > { %6918 = vpow2.f32 %v4836_v31  ;;  %v4846_v6 = vmul.f32 1.442695, %v4784_v35  ;;  %v3312_v31 = vadd.f32 %v3311_v21, %v3310_v52  ;;  %v5278_v52 = vmul.f32 %v11326_v1, %v9956_v43  ;;  %v11332_v1 = vld [vmem:[#allocation90_spill] sm:$0xff] }
 0xac3   : > { %v10584_v36 = vpop.xlane.xlu0 %4743 }
 0xac4   : > { %6920 = vpow2.f32 %v4846_v6  ;;  %v4782_v62 = vsub.f32 %v11322_v37, %v10584_v36  ;;  %v3360_v6 = vsub.f32 0.0, %v3358_v19 }
 0xac5   : > { %v10588_v18 = vpop.xlane.xlu1 %4752 }
 0xac6   : > { %v6913_v16 = vpop.eup %6912  ;;  %v4842_v44 = vmul.f32 1.442695, %v4782_v62  ;;  %v4785_v38 = vsub.f32 %v11323_v3, %v10588_v18  ;;  %v3363_v51 = vmul.f32 1.442695, %v3360_v6  ;;  %v11330_v6 = vld [vmem:[#allocation89_spill] sm:$0xff] }
 0xac7   : > { %v10592_v41 = vpop.xlane.xlu0 %5313  ;;  %v4928_v56 = vsel %vm4625_vm4, %v6913_v16, 0.0  ;;  %v5378_v16 = vsel %vm4625_vm4, %v5294_v40, 0.0  ;;  %v11329_v40 = vld [vmem:[#allocation85_spill] sm:$0xff] }
 0xac8   : > { %v6915_v50 = vpop.eup %6914  ;;  %6922 = vpow2.f32 %v4842_v44  ;;  %v4848_v13 = vmul.f32 1.442695, %v4785_v38  ;;  %4929 = vadd.xlane.f32.xlu0 %v4928_v56  ;;  %v3357_v44 = vadd.f32 %v5715_v57, %v3312_v31  ;;  %v11327_v57 = vld [vmem:[#allocation79_spill] sm:$0xff]  ;;  %v5280_v31 = vmul.f32 %v11329_v40, %v9990_v60 }
 0xac9   : > { %v10595_v22 = vpop.xlane.xlu1 %4746  ;;  %v4931_v26 = vsel %vm4625_vm4, %v6915_v50, 0.0 }
 0xaca   : > { %v6917_v4 = vpop.eup %6916  ;;  %6924 = vpow2.f32 %v4848_v13  ;;  %v4783_v2 = vsub.f32 %v11324_v14, %v10595_v22  ;;  %4932 = vadd.xlane.f32.xlu1 %v4931_v26  ;;  %v3359_v26 = vsub.f32 0.0, %v3357_v44  ;;  %v11331_v44 = vld [vmem:[#allocation42_spill] sm:$0xff] }
 0xacb   : > { %v10600_v33 = vpop.xlane.xlu0 %5364  ;;  %v4922_v34 = vsel %vm4625_vm4, %v6917_v4, 0.0 }
 0xacc   : > { %v6919_v20 = vpop.eup %6918  ;;  %v4844_v10 = vmul.f32 1.442695, %v4783_v2  ;;  %4923 = vadd.xlane.f32.xlu0 %v4922_v34  ;;  %v5330_v2 = vsel %vm4625_vm4, %v5278_v52, 0.0  ;;  %v5279_v34 = vmul.f32 %v11327_v57, %v9965_v23  ;;  %v5297_v52 = vmul.f32 %v11332_v1, %v11324_v14  ;;  %v11334_v57 = vld [vmem:[#allocation52_spill] sm:$0xff] }
 0xacd   : > { %v4925_v58 = vsel %vm4625_vm4, %v6919_v20, 0.0  ;;  %v10607_v17 = vpop.xlane.xlu1 %5316  ;;  %v11328_v20 = vld [vmem:[#allocation84_spill] sm:$0xff] }
 0xace   : > { %v6921_v35 = vpop.eup %6920  ;;  %6926 = vpow2.f32 %v4844_v10  ;;  %4926 = vadd.xlane.f32.xlu1 %v4925_v58  ;;  %v5295_v10 = vmul.f32 %v11328_v20, %v11320_v63  ;;  %v3361_v58 = vmul.f32 1.442695, %v3359_v26  ;;  %v5333_v54 = vsel %vm4625_vm4, %v5279_v34, 0.0  ;;  %v11335_v20 = vld [vmem:[#allocation97_spill] sm:$0xff] }
 0xacf   : > { %v4940_v47 = vsel %vm4625_vm4, %v6921_v35, 0.0  ;;  %v10609_v62 = vpop.xlane.xlu0 %5319  ;;  %6928 = vpow2.f32 %v3363_v51  ;;  %v5336_v63 = vsel %vm4625_vm4, %v5280_v31, 0.0  ;;  %v5298_v34 = vmul.f32 %v11334_v57, %v11321_v55 }
 0xad0   : > { %4941 = vadd.xlane.f32.xlu0 %v4940_v47  ;;  %v5381_v23 = vsel %vm4625_vm4, %v5295_v10, 0.0  ;;  %6930 = vpow2.f32 %v3361_v58  ;;  %v5283_v10 = vmul.f32 %v11335_v20, %v9996_v25 }
 0xad1   : > { %v10616_v21 = vpop.xlane.xlu1 %5367 }
 0xad2   : > { %v6923_v38 = vpop.eup %6922  ;;  %5379 = vadd.xlane.f32.xlu1 %v5378_v16  ;;  %v5296_v16 = vmul.f32 %v11330_v6, %v11322_v37 }
 0xad3   : > { %v4934_v56 = vsel %vm4625_vm4, %v6923_v38, 0.0  ;;  %v10618_v4 = vpop.xlane.xlu0 %5370  ;;  %v5281_v38 = vmul.f32 %v11331_v44, %v10003_v12 }
 0xad4   : > { %v6925_v50 = vpop.eup %6924  ;;  %4935 = vadd.xlane.f32.xlu0 %v4934_v56  ;;  %v5384_v60 = vsel %vm4625_vm4, %v5296_v16, 0.0 }
 0xad5   : > { %v4943_v13 = vsel %vm4625_vm4, %v6925_v50, 0.0  ;;  %v10629_v35 = vpop.xlane.xlu1 %5322  ;;  %v5339_v37 = vsel %vm4625_vm4, %v5281_v38, 0.0 }
 0xad6   : > { %4944 = vadd.xlane.f32.xlu1 %v4943_v13  ;;  %v11333_v13 = vld [vmem:[#allocation82_spill] sm:$0xff] }
 0xad7   : > { %v10631_v47 = vpop.xlane.xlu0 %5325  ;;  %v5282_v26 = vmul.f32 %v11333_v13, %v9987_v32  ;;  %v5390_v32 = vsel %vm4625_vm4, %v5298_v34, 0.0 }
 0xad8   : > { %v6927_v19 = vpop.eup %6926  ;;  %5331 = vadd.xlane.f32.xlu0 %v5330_v2  ;;  %v5387_v2 = vsel %vm4625_vm4, %v5297_v52, 0.0 }
 0xad9   : > { %v4937_v43 = vsel %vm4625_vm4, %v6927_v19, 0.0  ;;  %v6929_v56 = vpop.eup %6928  ;;  %v10642_v51 = vpop.xlane.xlu1 %5373 }
 0xada   : > { %4938 = vadd.xlane.f32.xlu1 %v4937_v43  ;;  %v3366_v12 = vadd.f32 1.0, %v6929_v56  ;;  %v6931_v14 = vpop.eup %6930  ;;  %v5342_v43 = vsel %vm4625_vm4, %v5282_v26, 0.0 }
 0xadb   : > { %v10644_v50 = vpop.xlane.xlu0 %5328  ;;  %v3365_v55 = vadd.f32 1.0, %v6931_v14 }
 0xadc   : > { %5334 = vadd.xlane.f32.xlu0 %v5333_v54  ;;  %6932 = vrcp.f32 %v3366_v12  ;;  %v11336_v54 = vld [vmem:[#allocation49_spill] sm:$0xff] }
 0xadd   : > { %v10655_v58 = vpop.xlane.xlu1 %5376  ;;  %v5299_v40 = vmul.f32 %v11336_v54, %v11323_v3  ;;  %v3369_v3 = vld [vmem:[%s568_s23] sm:$0x3] }
 0xade   : > { %5382 = vadd.xlane.f32.xlu1 %v5381_v23  ;;  %v5345_v23 = vsel %vm4625_vm4, %v5283_v10, 0.0 }
 0xadf   : > { %v5393_v25 = vsel %vm4625_vm4, %v5299_v40, 0.0 }
 0xae0   : > { %5337 = vadd.xlane.f32.xlu0 %v5336_v63  ;;  %v3371_v63 = vrot.slane %v3369_v3, 1 }
 0xae2   : > { %5385 = vadd.xlane.f32.xlu1 %v5384_v60 }
 0xae4   : > { %5340 = vadd.xlane.f32.xlu0 %v5339_v37 }
 0xae6   : > { %5388 = vadd.xlane.f32.xlu1 %v5387_v2  ;;  %v6933_v44 = vpop.eup %6932 }
 0xae7   : > { %v4858_v19 = vpop.xlane.xlu0 %4857  ;;  %v3375_v56 = vsub.f32 %v6933_v44, %v3371_v63  ;;  %v11339_v63 = vld [vmem:[#allocation19_spill] sm:$0xff] }
 0xae8   : > { %5343 = vadd.xlane.f32.xlu0 %v5342_v43 }
 0xae9   : > { %v3377_v37 = vmul.f32 %v3375_v56, %v3375_v56 }
 0xaea   : > { %5391 = vadd.xlane.f32.xlu1 %v5390_v32 }
 0xaeb   : > { %v4852_v31 = vpop.xlane.xlu0 %4851 }
 0xaec   : > { %v4861_v6 = vpop.xlane.xlu1 %4860  ;;  %5346 = vadd.xlane.f32.xlu0 %v5345_v23  ;;  %6934 = vlog2.f32 %v4852_v31 }
 0xaed   : > { %6936 = vrcp.f32 %v3365_v55  ;;  %v11337_v55 = vld [vmem:[#allocation69_spill] sm:$0xff] }
 0xaee   : > { %5394 = vadd.xlane.f32.xlu1 %v5393_v25  ;;  %6938 = vlog2.f32 %v4858_v19  ;;  %v5479_v19 = vrot.slane %v3377_v37, 7 }
 0xaf0   : > { %v4855_v16 = vpop.xlane.xlu1 %4854 }
 0xaf1   : > { %6940 = vlog2.f32 %v4855_v16  ;;  %v11338_v16 = vld [vmem:[#allocation62_spill] sm:$0xff] }
 0xaf2   : > { %6942 = vlog2.f32 %v4861_v6 }
 0xaf3   : > { %v4870_v38 = vpop.xlane.xlu0 %4869 }
 0xaf6   : > { %v6935_v60 = vpop.eup %6934 }
 0xaf7   : > { %v4864_v1 = vpop.xlane.xlu0 %4863  ;;  %v6937_v52 = vpop.eup %6936  ;;  %v4947_v26 = vmul.f32 0.6931472, %v6935_v60  ;;  %v11340_v60 = vld [vmem:[#allocation54_spill] sm:$0xff] }
 0xaf8   : > { %6944 = vlog2.f32 %v4864_v1  ;;  %v6939_v13 = vpop.eup %6938  ;;  %v3374_v57 = vsub.f32 %v6937_v52, %v3369_v3  ;;  %v11341_v52 = vld [vmem:[#allocation60_spill] sm:$0xff] }
 0xaf9   : > { %6946 = vlog2.f32 %v4870_v38  ;;  %v4951_v43 = vmul.f32 0.6931472, %v6939_v13  ;;  %v5010_v20 = vadd.f32 %v4947_v26, %v10238_v48 }
 0xafa   : > { %v3376_v40 = vmul.f32 %v3374_v57, %v3374_v57 }
 0xafb   : > { %v6941_v12 = vpop.eup %6940  ;;  %v10666_v2 = vpop.xlane.xlu0 %4881  ;;  %v5012_v3 = vadd.f32 %v4951_v43, %v11338_v16  ;;  %v5396_v44 = vsub.f32 %v5010_v20, %v11339_v63  ;;  %v11343_v43 = vld [vmem:[#allocation106_spill] sm:$0xff]  ;;  %v11345_v16 = vld [vmem:[#allocation80_spill] sm:$0xff] }
 0xafc   : > { %v4949_v34 = vmul.f32 0.6931472, %v6941_v12  ;;  %v4873_v14 = vpop.xlane.xlu1 %4872  ;;  %v6943_v32 = vpop.eup %6942  ;;  %v5480_v6 = vsel %vm5474_vm5, %v5479_v19, %v3376_v40  ;;  %v11342_v12 = vld [vmem:[#allocation71_spill] sm:$0xff] }
 0xafd   : > { %6948 = vlog2.f32 %v4873_v14  ;;  %v4953_v48 = vmul.f32 0.6931472, %v6943_v32  ;;  %v5398_v1 = vsub.f32 %v5012_v3, %v11340_v60  ;;  %v11347_v60 = vld [vmem:[#allocation83_spill] sm:$0xff] }
 0xafe   : > { %v5011_v10 = vadd.f32 %v4949_v34, %v10249_v7 }
 0xaff   : > { %v4876_v54 = vpop.xlane.xlu0 %4875  ;;  %v5013_v37 = vadd.f32 %v4953_v48, %v11341_v52 }
 0xb00   : > { %v5397_v31 = vsub.f32 %v5011_v10, %v11337_v55  ;;  %6950 = vlog2.f32 %v4876_v54  ;;  %v4867_v23 = vpop.xlane.xlu1 %4866 }
 0xb01   : > { %6952 = vlog2.f32 %v4867_v23  ;;  %v5399_v20 = vsub.f32 %v5013_v37, %v11343_v43  ;;  %v11344_v23 = vld [vmem:[#allocation105_spill] sm:$0xff] }
 0xb02   : > { %v6945_v25 = vpop.eup %6944  ;;  %5481 = vrot.lane.b32.xlu0 %v5480_v6, %s7069_s20  ;;  %v5428_v7 = vadd.f32 %v5397_v31, %v5396_v44  ;;  %v11346_v44 = vld [vmem:[#allocation114_spill] sm:$0xff]  ;;  %s5621_s20 = sshll.u32 %s552_s22, 1 }
 0xb03   : > { %v4955_v38 = vmul.f32 0.6931472, %v6945_v25  ;;  %v6947_v13 = vpop.eup %6946  ;;  %s554_s29 = scalar_lea.vmem [#allocation4], %s5621_s20 }
 0xb04   : > { %v10675_v56 = vpop.xlane.xlu1 %4884  ;;  %v5429_v26 = vadd.f32 %v5428_v7, %v5398_v1  ;;  %v4959_v10 = vmul.f32 0.6931472, %v6947_v13  ;;  %s5509_s12 = sshll.u32 %s554_s29, 4  ;;  %s10746_s12 = int_to_ptr.vmem [resolvable:$true] %s5509_s12 }
 0xb05   : > { %v5014_v57 = vadd.f32 %v4955_v38, %v11342_v12  ;;  %s7002_s21 = scalar_lea.vmem %s10746_s12, 32  ;;  %p7009_p0 = scmp.lt.s32.totalorder %s10746_s12, %s7007_s27 }
 0xb06   : > { %v5430_v40 = vadd.f32 %v5429_v26, %v5399_v20  ;;  %v5016_v6 = vadd.f32 %v4959_v10, %v11344_v23  ;;  %p7003_p11 = scmp.ne.s32.totalorder %s10746_s12, %s7002_s21  ;;  %p7010_p1 = scmp.lt.s32.totalorder %s7008_s17, %s7002_s21 }
 0xb07   : > { %v6949_v14 = vpop.eup %6948  ;;  %v5400_v54 = vsub.f32 %v5014_v57, %v10592_v41  ;;  %v11348_v57 = vld [vmem:[#allocation103_spill] sm:$0xff] }
 0xb08   : > { %v4879_v34 = vpop.xlane.xlu1 %4878  ;;  %v4961_v55 = vmul.f32 0.6931472, %v6949_v14  ;;  %v5402_v38 = vsub.f32 %v5016_v6, %v10609_v62  ;;  %p7004_p12 = pnand %p7003_p11, %p7203_p5  ;;  %p7011_p2 = por %p7010_p1, %p7009_p0 }
 0xb09   : > { %6954 = vlog2.f32 %v4879_v34  ;;  %v5431_v63 = vadd.f32 %v5430_v40, %v5400_v54 }
 0xb0a   : > { %v6951_v19 = vpop.eup %6950  ;;  %v5017_v48 = vadd.f32 %v4961_v55, %v11346_v44  ;;  %p7005_p13 = pneg %p7004_p12 }
 0xb0b   : > { %v6953_v32 = vpop.eup %6952  ;;  %v4963_v25 = vmul.f32 0.6931472, %v6951_v19 }
 0xb0c   : > { %v4957_v31 = vmul.f32 0.6931472, %v6953_v32  ;;  %v5403_v41 = vsub.f32 %v5017_v48, %v10629_v35  ;;  %v10696_v62 = vpop.xlane.xlu1 %4896  ;;  %p7012_p3 = pnand %p7011_p2, %p7005_p13 }
 0xb0d   : > { %v5018_v1 = vadd.f32 %v4963_v25, %v11347_v60 }
 0xb0e   : > { %v5015_v3 = vadd.f32 %v4957_v31, %v11345_v16 }
 0xb0f   : > { %v5404_v12 = vsub.f32 %v5018_v1, %v10631_v47 }
 0xb10   : > { %v5401_v7 = vsub.f32 %v5015_v3, %v10607_v17  ;;  %v10694_v17 = vpop.xlane.xlu0 %4893  ;;  %v10698_v32 = vpop.xlane.xlu1 %4890 }
 0xb12   : > { %v5432_v52 = vadd.f32 %v5431_v63, %v5401_v7 }
 0xb13   : > { %v6955_v37 = vpop.eup %6954 }
 0xb14   : > { %v4965_v13 = vmul.f32 0.6931472, %v6955_v37  ;;  %v5433_v26 = vadd.f32 %v5432_v52, %v5402_v38  ;;  %v4888_v10 = vpop.xlane.xlu0 %4887  ;;  %v4909_v54 = vpop.xlane.xlu1 %4908  ;;  %v11349_v52 = vld [vmem:[#allocation102_spill] sm:$0xff] }
 0xb16   : > { %v5019_v34 = vadd.f32 %v4965_v13, %v11348_v57  ;;  %v5434_v14 = vadd.f32 %v5433_v26, %v5403_v41 }
 0xb18   : > { %v5405_v19 = vsub.f32 %v5019_v34, %v10644_v50  ;;  %v5435_v43 = vadd.f32 %v5434_v14, %v5404_v12  ;;  %v4906_v35 = vpop.xlane.xlu0 %4905  ;;  %v4903_v55 = vpop.xlane.xlu1 %4902 }
 0xb19   : > { %6956 = vlog2.f32 %v4903_v55 }
 0xb1a   : > { %v10692_v20 = vadd.f32 %v5435_v43, %v5405_v19 }
 0xb1c   : > { %v4900_v40 = vpop.xlane.xlu0 %4899 }
 0xb1d   : > { %6958 = vlog2.f32 %v4900_v40 }
 0xb1e   : > { %6960 = vlog2.f32 %v4906_v35  ;;  %v4921_v31 = vpop.xlane.xlu1 %4920 }
 0xb1f   : > { %6962 = vlog2.f32 %v4909_v54 }
 0xb22   : > { %v4915_v16 = vpop.xlane.xlu1 %4914 }
 0xb23   : > { %v4918_v47 = vpop.xlane.xlu0 %4917  ;;  %v6957_v23 = vpop.eup %6956 }
 0xb24   : > { %v4981_v25 = vmul.f32 0.6931472, %v6957_v23 }
 0xb26   : > { %v5027_v44 = vadd.f32 %v4981_v25, %v10446_v11 }
 0xb27   : > { %v4912_v50 = vpop.xlane.xlu0 %4911  ;;  %v6959_v6 = vpop.eup %6958 }
 0xb28   : > { %6964 = vlog2.f32 %v4912_v50  ;;  %v4979_v3 = vmul.f32 0.6931472, %v6959_v6  ;;  %v6961_v63 = vpop.eup %6960  ;;  %v5413_v1 = vsub.f32 %v5027_v44, %v10467_v49 }
 0xb29   : > { %6966 = vlog2.f32 %v4915_v16  ;;  %v6963_v48 = vpop.eup %6962  ;;  %v4983_v7 = vmul.f32 0.6931472, %v6961_v63 }
 0xb2a   : > { %v5026_v38 = vadd.f32 %v4979_v3, %v10409_v0  ;;  %6968 = vlog2.f32 %v4918_v47  ;;  %v4985_v13 = vmul.f32 0.6931472, %v6963_v48 }
 0xb2b   : > { %v5028_v37 = vadd.f32 %v4983_v7, %v11349_v52  ;;  %6970 = vlog2.f32 %v4921_v31 }
 0xb2c   : > { %v5412_v41 = vsub.f32 %v5026_v38, %v10442_v59  ;;  %v5029_v11 = vadd.f32 %v4985_v13, %v10429_v53 }
 0xb2d   : > { %v5414_v34 = vsub.f32 %v5028_v37, %v10424_v9 }
 0xb2e   : > { %v5449_v12 = vadd.f32 %v5413_v1, %v5412_v41  ;;  %v5415_v54 = vsub.f32 %v5029_v11, %v10457_v30 }
 0xb30   : > { %v5450_v19 = vadd.f32 %v5449_v12, %v5414_v34 }
 0xb32   : > { %v6965_v60 = vpop.eup %6964  ;;  %v5451_v31 = vadd.f32 %v5450_v19, %v5415_v54  ;;  %v11350_v19 = vld [vmem:[#allocation113_spill] sm:$0xff] }
 0xb33   : > { %v4987_v26 = vmul.f32 0.6931472, %v6965_v60  ;;  %v6967_v57 = vpop.eup %6966 }
 0xb34   : > { %v4989_v43 = vmul.f32 0.6931472, %v6967_v57  ;;  %v6969_v35 = vpop.eup %6968 }
 0xb35   : > { %v5030_v14 = vadd.f32 %v4987_v26, %v10497_v42  ;;  %v4991_v55 = vmul.f32 0.6931472, %v6969_v35  ;;  %v6971_v9 = vpop.eup %6970 }
 0xb36   : > { %v5031_v47 = vadd.f32 %v4989_v43, %v10479_v15  ;;  %v4993_v23 = vmul.f32 0.6931472, %v6971_v9 }
 0xb37   : > { %v5416_v59 = vsub.f32 %v5030_v14, %v10582_v28  ;;  %v5032_v30 = vadd.f32 %v4991_v55, %v10483_v5 }
 0xb38   : > { %v5417_v28 = vsub.f32 %v5031_v47, %v10600_v33 }
 0xb39   : > { %v5452_v42 = vadd.f32 %v5451_v31, %v5416_v59  ;;  %v5418_v3 = vsub.f32 %v5032_v30, %v10616_v21 }
 0xb3b   : > { %v5453_v15 = vadd.f32 %v5452_v42, %v5417_v28 }
 0xb3d   : > { %v5454_v5 = vadd.f32 %v5453_v15, %v5418_v3 }
 0xb55   : > { %v4930_v0 = vpop.xlane.xlu0 %4929 }
 0xb56   : > { %6972 = vlog2.f32 %v4930_v0 }
 0xb57   : > { %v4933_v49 = vpop.xlane.xlu1 %4932 }
 0xb59   : > { %v4924_v40 = vpop.xlane.xlu0 %4923 }
 0xb5a   : > { %6974 = vlog2.f32 %v4924_v40  ;;  %v11351_v40 = vld [vmem:[#allocation95_spill] sm:$0xff] }
 0xb5b   : > { %6976 = vlog2.f32 %v10666_v2  ;;  %v4927_v53 = vpop.xlane.xlu1 %4926  ;;  %v5033_v2 = vadd.f32 %v4993_v23, %v10465_v39  ;;  %v11352_v23 = vld [vmem:[#allocation93_spill] sm:$0xff] }
 0xb5c   : > { %6978 = vlog2.f32 %v4927_v53 }
 0xb5d   : > { %6980 = vlog2.f32 %v10675_v56  ;;  %v4942_v50 = vpop.xlane.xlu0 %4941 }
 0xb5e   : > { %6982 = vlog2.f32 %v4933_v49 }
 0xb5f   : > { %6984 = vlog2.f32 %v4888_v10  ;;  %v5380_v6 = vpop.xlane.xlu1 %5379 }
 0xb60   : > { %6986 = vlog2.f32 %v10698_v32  ;;  %v6973_v16 = vpop.eup %6972  ;;  %v5419_v32 = vsub.f32 %v5033_v2, %v10618_v4 }
 0xb61   : > { %v4936_v25 = vpop.xlane.xlu0 %4935  ;;  %v4999_v33 = vmul.f32 0.6931472, %v6973_v16 }
 0xb62   : > { %6988 = vlog2.f32 %v4936_v25  ;;  %v5455_v52 = vadd.f32 %v5454_v5, %v5419_v32 }
 0xb63   : > { %6990 = vlog2.f32 %v10694_v17  ;;  %v4945_v56 = vpop.xlane.xlu1 %4944  ;;  %v5036_v26 = vadd.f32 %v4999_v33, %v10562_v45 }
 0xb64   : > { %v6975_v63 = vpop.eup %6974  ;;  %6992 = vlog2.f32 %v4942_v50 }
 0xb65   : > { %v6977_v44 = vpop.eup %6976  ;;  %v4995_v48 = vmul.f32 0.6931472, %v6975_v63  ;;  %v5332_v10 = vpop.xlane.xlu0 %5331  ;;  %6994 = vlog2.f32 %v10696_v62 }
 0xb66   : > { %v6979_v7 = vpop.eup %6978  ;;  %v4967_v17 = vmul.f32 0.6931472, %v6977_v44 }
 0xb67   : > { %v6981_v38 = vpop.eup %6980  ;;  %v5034_v39 = vadd.f32 %v4995_v48, %v10570_v8  ;;  %v4997_v21 = vmul.f32 0.6931472, %v6979_v7  ;;  %v4939_v60 = vpop.xlane.xlu1 %4938  ;;  %v11353_v7 = vld [vmem:[#allocation22_spill] sm:$0xff] }
 0xb68   : > { %v6983_v1 = vpop.eup %6982  ;;  %6996 = vlog2.f32 %v4939_v60  ;;  %v4969_v12 = vmul.f32 0.6931472, %v6981_v38  ;;  %v5020_v43 = vadd.f32 %v4967_v17, %v11350_v19 }
 0xb69   : > { %v6985_v37 = vpop.eup %6984  ;;  %v5420_v41 = vsub.f32 %v5034_v39, %v10642_v51  ;;  %v5035_v13 = vadd.f32 %v4997_v21, %v10574_v61  ;;  %6998 = vlog2.f32 %v4945_v56  ;;  %v5335_v4 = vpop.xlane.xlu0 %5334  ;;  %v5001_v62 = vmul.f32 0.6931472, %v6983_v1 }
 0xb6a   : > { %v6987_v57 = vpop.eup %6986  ;;  %v4971_v0 = vmul.f32 0.6931472, %v6985_v37  ;;  %v5422_v51 = vsub.f32 %v5036_v26, %v5380_v6  ;;  %v5406_v45 = vsub.f32 %v5020_v43, %v5332_v10  ;;  %v5021_v55 = vadd.f32 %v4969_v12, %v11351_v40 }
 0xb6b   : > { %v5421_v8 = vsub.f32 %v5035_v13, %v10655_v58  ;;  %v5456_v34 = vadd.f32 %v5455_v52, %v5420_v41  ;;  %v5383_v11 = vpop.xlane.xlu1 %5382  ;;  %v4973_v59 = vmul.f32 0.6931472, %v6987_v57  ;;  %v5037_v9 = vadd.f32 %v5001_v62, %v10566_v27 }
 0xb6c   : > { %v6989_v14 = vpop.eup %6988  ;;  %v5407_v50 = vsub.f32 %v5021_v55, %v5335_v4  ;;  %v5022_v30 = vadd.f32 %v4971_v0, %v11352_v23  ;;  %v5437_v2 = vadd.f32 %v10692_v20, %v5406_v45 }
 0xb6d   : > { %v6991_v35 = vpop.eup %6990  ;;  %v5457_v49 = vadd.f32 %v5456_v34, %v5421_v8  ;;  %v5003_v54 = vmul.f32 0.6931472, %v6989_v14  ;;  %v5338_v61 = vpop.xlane.xlu0 %5337  ;;  %v5423_v15 = vsub.f32 %v5037_v9, %v5383_v11  ;;  %v5023_v56 = vadd.f32 %v4973_v59, %v10416_v29 }
 0xb6e   : > { %v6993_v47 = vpop.eup %6992  ;;  %v4975_v42 = vmul.f32 0.6931472, %v6991_v35  ;;  %v5408_v3 = vsub.f32 %v5022_v30, %v5338_v61  ;;  %v5438_v48 = vadd.f32 %v5437_v2, %v5407_v50 }
 0xb6f   : > { %v5458_v31 = vadd.f32 %v5457_v49, %v5422_v51  ;;  %v5038_v58 = vadd.f32 %v5003_v54, %v10584_v36  ;;  %v5386_v53 = vpop.xlane.xlu1 %5385  ;;  %v6995_v28 = vpop.eup %6994  ;;  %v5007_v16 = vmul.f32 0.6931472, %v6993_v47 }
 0xb70   : > { %v4977_v33 = vmul.f32 0.6931472, %v6995_v28  ;;  %v5024_v32 = vadd.f32 %v4975_v42, %v11353_v7  ;;  %v5439_v60 = vadd.f32 %v5438_v48, %v5408_v3 }
 0xb71   : > { %v5341_v6 = vpop.xlane.xlu0 %5340  ;;  %v5459_v27 = vadd.f32 %v5458_v31, %v5423_v15  ;;  %v5424_v44 = vsub.f32 %v5038_v58, %v5386_v53  ;;  %v5040_v20 = vadd.f32 %v5007_v16, %v10578_v24 }
 0xb72   : > { %v6997_v25 = vpop.eup %6996  ;;  %v5409_v10 = vsub.f32 %v5023_v56, %v5341_v6  ;;  %v5025_v13 = vadd.f32 %v4977_v33, %v10399_v46 }
 0xb73   : > { %v6999_v63 = vpop.eup %6998  ;;  %v5005_v5 = vmul.f32 0.6931472, %v6997_v25  ;;  %v5389_v36 = vpop.xlane.xlu1 %5388  ;;  %v5460_v17 = vadd.f32 %v5459_v27, %v5424_v44 }
 0xb74   : > { %v5009_v21 = vmul.f32 0.6931472, %v6999_v63  ;;  %v5440_v37 = vadd.f32 %v5439_v60, %v5409_v10 }
 0xb75   : > { %v5039_v38 = vadd.f32 %v5005_v5, %v10595_v22  ;;  %v5344_v39 = vpop.xlane.xlu0 %5343 }
 0xb76   : > { %v5410_v1 = vsub.f32 %v5024_v32, %v5344_v39  ;;  %v5041_v22 = vadd.f32 %v5009_v21, %v10588_v18 }
 0xb77   : > { %v5425_v29 = vsub.f32 %v5039_v38, %v5389_v36  ;;  %v5392_v52 = vpop.xlane.xlu1 %5391 }
 0xb78   : > { %v5426_v41 = vsub.f32 %v5040_v20, %v5392_v52  ;;  %v5441_v12 = vadd.f32 %v5440_v37, %v5410_v1 }
 0xb79   : > { %v5461_v26 = vadd.f32 %v5460_v17, %v5425_v29  ;;  %v5347_v4 = vpop.xlane.xlu0 %5346 }
 0xb7a   : > { %v5411_v57 = vsub.f32 %v5025_v13, %v5347_v4 }
 0xb7b   : > { %v5462_v62 = vadd.f32 %v5461_v26, %v5426_v41  ;;  %v5395_v8 = vpop.xlane.xlu1 %5394 }
 0xb7c   : > { %v5442_v34 = vadd.f32 %v5441_v12, %v5411_v57  ;;  %v5427_v11 = vsub.f32 %v5041_v22, %v5395_v8 }
 0xb7d   : > { %v5482_v55 = vpop.permute.xlu0 %5481 }
 0xb7e   : > { %v5443_v24 = vrot.slane %v5442_v34, 4  ;;  %v5463_v14 = vadd.f32 %v5462_v62, %v5427_v11 }
 0xb80   : > { %v5444_v0 = vadd.f32 %v5443_v24, %v5442_v34  ;;  %v5464_v19 = vrot.slane %v5463_v14, 4 }
 0xb82   : > { %v5445_v43 = vrot.slane %v5444_v0, 2  ;;  %v5465_v35 = vadd.f32 %v5464_v19, %v5463_v14 }
 0xb84   : > { %v5446_v46 = vadd.f32 %v5445_v43, %v5444_v0  ;;  %v5466_v49 = vrot.slane %v5465_v35, 2 }
 0xb86   : > { %v5447_v51 = vrot.slane %v5446_v46, 1  ;;  %v5467_v54 = vadd.f32 %v5466_v49, %v5465_v35 }
 0xb88   : > { %v5448_v61 = vadd.f32 %v5447_v51, %v5446_v46  ;;  %v5468_v59 = vrot.slane %v5467_v54, 1 }
 0xb8a   : > { %v5469_v18 = vadd.f32 %v5468_v59, %v5467_v54  ;;  %v5470_v45 = vmul.f32 0.0078125, %v5448_v61 }
 0xb8c   : > { %v5471_v40 = vmul.f32 0.0078125, %v5469_v18 }
 0xb8e   : > { %v5475_v47 = vsel %vm5474_vm5, %v5471_v40, %v5470_v45 }
 0xb8f   : > { %v5484_v31 = vsel %vm3275_vm6, %v5475_v47, %v5482_v55 }
 0xb90   : > { %5486 = vst.msk [vmem:[%s554_s29] sm:$0x3] %vm5485_vm7, %v5484_v31 }
 0xb91   : > { %7015 = shalt.err (!%p7012_p3)
}
 0xb92   : > { %s7016_s23 = scalar_lea.hbm %s10744_s19, 32  ;;  %s7020_s24 = scalar_lea.hbm %s10802_s16, 64 }
 0xb93   : > { %p7017_p4 = scmp.ne.s32.totalorder %s10744_s19, %s7016_s23  ;;  %p7021_p9 = scmp.lt.u32.totalorder %s10744_s19, %s10802_s16 }
 0xb94   : > { %p7022_p10 = scmp.lt.u32.totalorder %s7020_s24, %s7016_s23  ;;  %p7024_p12 = scmp.lt.u32.totalorder %s7016_s23, %s10744_s19 }
 0xb95   : > { %p7018_p7 = pnand %p7017_p4, %p7203_p5 }
 0xb96   : > { %p7023_p11 = por %p7022_p10, %p7021_p9 }
 0xb97   : > { %p7019_p8 = pneg %p7018_p7 }
 0xb98   : > { %p7025_p13 = por %p7024_p12, %p7023_p11 }
 0xb9a   : > { %p7026_p0 = pnand %p7025_p13, %p7019_p8 }
 0xb9c   : > { %7029 = shalt.err (!%p7026_p0)
}
 0xb9d   : > { %6342 = dma.vmem_to_hbm [thread:$0]  (%p7203_p5), %s10746_s12, 32, %s10744_s19, %s5493_s10  }
 0xb9e PF: > { %s11354_s25 = sld [smem:[#allocation7_spill]]  ;;  %p6348_p1 = scmp.ge.s32.totalorder %s7064_s28, 2 }
 0xba0   : > { %p6345_p2 = pnand %p6348_p1, %p7207_p6 }
 0xba4   : > { %s5529_s0 = sand.u32 1, %s11354_s25  }
 0xba5   : > { %s5530_s27 = scalar_lea.sflag [#allocation5], %s5529_s0 }
 0xba6   : > { %7047 = dma.done.wait (!%p6345_p2), %s5530_s27, 32  }
 0xba7   : > { %7049 = vsyncadd (!%p6345_p2), %s5530_s27, 4294967264  ;;  %s11356_s28 = sld [smem:[#allocation9_spill]]  ;;  %s11357_s17 = sld [smem:[#allocation8_spill]] }
 0xba8   : > { %s11358_s27 = sld [smem:[#allocation10_spill]]  ;;  %s11359_s25 = smov %s7056_s26 }
 0xbad   : > { %p31_p3 = scmp.ge.s32.totalorder %s11356_s28, 4   ;;  %s11360_s26 = smov %s11357_s17 }
 0xbaf   :  { %33 = sbr.rel (!%p31_p3) target bundleno = 6 (0x6), region = 133 }
 0xbb6   :  { %5535 = vsyncpa [#allocation5], 1 }
 0xbb7   :  { %5537 = vsyncpa [#allocation5 + $0x1], 1 }

</bundles_post_ra>
